<compile_context>
chip_gen: v6e
topology: v6e:2x2x1
jax: 0.10.0
libtpu: 0.0.40
codegen_flags: <defaults>
</compile_context>

<pallas_src>
import functools
import math

import jax
import jax.numpy as jnp
from jax.experimental import pallas as pl
from jax.experimental.pallas import tpu as pltpu


# ------------------------------ Pallas kernel ---------------------------------

def _scam_kernel(xl_ref, xr_ref,
                 lnl_w_ref, lnl_b_ref, lnr_w_ref, lnr_b_ref,
                 wq_l_ref, bq_l_ref, wq_r_ref, bq_r_ref,
                 wv_l_ref, bv_l_ref, wv_r_ref, bv_r_ref,
                 beta_ref, gamma_ref,
                 out_l_ref, out_r_ref,
                 *, scale, eps):
    """One grid step: `hb` image rows of one batch element, fully fused."""
    hb = xl_ref.shape[1]
    f32 = jnp.float32
    bf16 = jnp.bfloat16

    # Small parameters: loaded once per grid step (constant index_map blocks).
    ln_l_w = lnl_w_ref[...]          # (W, 1) f32  -- per-W LayerNorm affine
    ln_l_b = lnl_b_ref[...]
    ln_r_w = lnr_w_ref[...]
    ln_r_b = lnr_b_ref[...]
    wq_l = wq_l_ref[...]             # (C, C) bf16, pre-transposed for x @ W
    wq_r = wq_r_ref[...]
    wv_l = wv_l_ref[...]
    wv_r = wv_r_ref[...]
    bq_l = bq_l_ref[...]             # (1, C) f32
    bq_r = bq_r_ref[...]
    bv_l = bv_l_ref[...]
    bv_r = bv_r_ref[...]
    beta = beta_ref[...]             # (1, C) f32
    gamma = gamma_ref[...]

    def layer_norm_over_w(x):
        # nn.LayerNorm(c) on NCHW normalizes the last (W) dim; in the channels-
        # last (W, C) tile that is axis 0.  One-pass E[x^2] - E[x]^2 variance.
        mean = jnp.mean(x, axis=0, keepdims=True)                       # (1, C)
        var = jnp.mean(jnp.square(x), axis=0, keepdims=True) - jnp.square(mean)
        return (x - mean) * jax.lax.rsqrt(var + eps)

    def softmax_last(a):
        # f32 softmax; denominator reciprocal on the (otherwise idle) EUP slot.
        m = jnp.max(a, axis=-1, keepdims=True)
        e = jnp.exp(a - m)
        return e * pl.reciprocal(jnp.sum(e, axis=-1, keepdims=True), approx=True)

    def matmul(a, b):
        # bf16 operands on the MXU, f32 accumulation.
        return jnp.dot(a.astype(bf16), b.astype(bf16), preferred_element_type=f32)

    for h in range(hb):                       # statically unrolled over rows
        xl = xl_ref[0, h]                     # (W, C) f32
        xr = xr_ref[0, h]

        nl = layer_norm_over_w(xl) * ln_l_w + ln_l_b
        nr = layer_norm_over_w(xr) * ln_r_w + ln_r_b

        # 1x1-conv projections; attention scale folded into Q_l.
        q_l = (matmul(nl, wq_l) + bq_l) * scale
        q_r = matmul(nr, wq_r) + bq_r
        v_l = matmul(xl, wv_l) + bv_l
        v_r = matmul(xr, wv_r) + bv_r

        # Forward scores (one MXU pass); reverse direction reuses the exact
        # transpose instead of a second QK^T matmul.
        attn = jax.lax.dot_general(
            q_l.astype(bf16), q_r.astype(bf16),
            (((1,), (1,)), ((), ())), preferred_element_type=f32)       # (W, W)

        f_r2l = matmul(softmax_last(attn), v_r)        # attends over right positions
        f_l2r = matmul(softmax_last(attn.T), v_l)      # attends over left positions

        out_l_ref[0, h] = xl + f_r2l * beta
        out_r_ref[0, h] = xr + f_l2r * gamma


# ------------------------------ host wrapper ----------------------------------

def _pick_row_block(H, W, C, budget_bytes=1 << 20):
    """Largest divisor of H whose (hb, W, C) f32 block fits the byte budget."""
    hb = 1
    for cand in range(1, H + 1):
        if H % cand == 0 and cand * W * C * 4 <= budget_bytes:
            hb = cand
    return hb


def scam_forward(params, x_l, x_r, *, eps=1e-5):
    """SCAM forward.  x_l, x_r: (N, C, H, W) float32 (PyTorch NCHW layout)."""
    N, C, H, W = x_l.shape
    if W != C:
        raise ValueError(
            "SCAM applies nn.LayerNorm(c) to an NCHW tensor, which requires the "
            f"last dimension W ({W}) to equal c ({C}).")
    scale = float(C) ** -0.5
    hb = _pick_row_block(H, W, C)

    to_nhwc = lambda t: jnp.transpose(t, (0, 2, 3, 1))
    xl = to_nhwc(x_l).astype(jnp.float32)
    xr = to_nhwc(x_r).astype(jnp.float32)

    # Parameter packing: per-W LayerNorm affine as a (W, 1) column, per-channel
    # vectors as (1, C) rows, projection weights transposed (x @ W^T layout) and
    # pre-cast to bf16 so the MXU operands come straight from HBM at half width.
    col = lambda p: jnp.asarray(p, jnp.float32).reshape(W, 1)
    row = lambda p: jnp.asarray(p, jnp.float32).reshape(1, C)
    wmat = lambda p: jnp.asarray(p, jnp.float32).T.astype(jnp.bfloat16)

    x_spec = pl.BlockSpec((1, hb, W, C), lambda n, h: (n, h, 0, 0))
    w_spec = pl.BlockSpec((C, C), lambda n, h: (0, 0))
    r_spec = pl.BlockSpec((1, C), lambda n, h: (0, 0))
    c_spec = pl.BlockSpec((W, 1), lambda n, h: (0, 0))

    out_shape = jax.ShapeDtypeStruct((N, H, W, C), jnp.float32)
    kernel = functools.partial(_scam_kernel, scale=scale, eps=eps)

    out_l, out_r = pl.pallas_call(
        kernel,
        out_shape=(out_shape, out_shape),
        grid_spec=pltpu.PrefetchScalarGridSpec(
            num_scalar_prefetch=0,
            grid=(N, H // hb),
            in_specs=[x_spec, x_spec,
                      c_spec, c_spec, c_spec, c_spec,
                      w_spec, r_spec, w_spec, r_spec,
                      w_spec, r_spec, w_spec, r_spec,
                      r_spec, r_spec],
            out_specs=(x_spec, x_spec),
        ),
        compiler_params=pltpu.CompilerParams(
            dimension_semantics=("parallel", "parallel")),
    )(xl, xr,
      col(params['ln_l_w']), col(params['ln_l_b']),
      col(params['ln_r_w']), col(params['ln_r_b']),
      wmat(params['w_lp1']), row(params['b_lp1']),
      wmat(params['w_rp1']), row(params['b_rp1']),
      wmat(params['w_lp2']), row(params['b_lp2']),
      wmat(params['w_rp2']), row(params['b_rp2']),
      row(params['beta']), row(params['gamma']))

    to_nchw = lambda t: jnp.transpose(t, (0, 3, 1, 2))
    return to_nchw(out_l), to_nchw(out_r)


# --------------------------- pure-JAX f32 reference ----------------------------

def scam_reference(params, x_l, x_r, eps=1e-5):
    """Straight port of the PyTorch module (all-f32), for verification."""
    C = x_l.shape[1]
    scale = float(C) ** -0.5

    def layer_norm_last(x, w, b):       # nn.LayerNorm(c): last (W) dim
        mean = jnp.mean(x, axis=-1, keepdims=True)
        var = jnp.mean(jnp.square(x - mean), axis=-1, keepdims=True)
        return (x - mean) / jnp.sqrt(var + eps) * w + b

    def conv1x1(x, w, b):               # NCHW 1x1 convolution
        return jnp.einsum('nchw,dc->ndhw', x, w) + b[None, :, None, None]

    q_l = conv1x1(layer_norm_last(x_l, params['ln_l_w'], params['ln_l_b']),
                  params['w_lp1'], params['b_lp1'])
    q_r = conv1x1(layer_norm_last(x_r, params['ln_r_w'], params['ln_r_b']),
                  params['w_rp1'], params['b_rp1'])
    v_l = conv1x1(x_l, params['w_lp2'], params['b_lp2'])
    v_r = conv1x1(x_r, params['w_rp2'], params['b_rp2'])

    Q_l = jnp.transpose(q_l, (0, 2, 3, 1))       # (N, H, W, C)
    Q_r_T = jnp.transpose(q_r, (0, 2, 1, 3))     # (N, H, C, W)
    V_l = jnp.transpose(v_l, (0, 2, 3, 1))
    V_r = jnp.transpose(v_r, (0, 2, 3, 1))

    attn = jnp.matmul(Q_l, Q_r_T) * scale                          # (N, H, W, W)
    F_r2l = jnp.matmul(jax.nn.softmax(attn, axis=-1), V_r)
    F_l2r = jnp.matmul(jax.nn.softmax(jnp.swapaxes(attn, -1, -2), axis=-1), V_l)
    F_r2l = jnp.transpose(F_r2l, (0, 3, 1, 2)) * params['beta'][None, :, None, None]
    F_l2r = jnp.transpose(F_l2r, (0, 3, 1, 2)) * params['gamma'][None, :, None, None]
    return x_l + F_r2l, x_r + F_l2r


# ------------------------------- parameters ------------------------------------

def init_params(key, c):
    ks = jax.random.split(key, 12)
    bound = 1.0 / math.sqrt(c)
    wmat = lambda k: jax.random.uniform(k, (c, c), jnp.float32, -bound, bound)
    wvec = lambda k: jax.random.uniform(k, (c,), jnp.float32, -bound, bound)
    return {
        # LayerNorm affine (PyTorch default is weight=1/bias=0; perturbed so the
        # test exercises the affine path).
        'ln_l_w': 1.0 + 0.1 * jax.random.normal(ks[0], (c,), jnp.float32),
        'ln_l_b': 0.1 * jax.random.normal(ks[1], (c,), jnp.float32),
        'ln_r_w': 1.0 + 0.1 * jax.random.normal(ks[2], (c,), jnp.float32),
        'ln_r_b': 0.1 * jax.random.normal(ks[3], (c,), jnp.float32),
        # 1x1 conv weights in PyTorch (out, in) orientation, plus biases.
        'w_lp1': wmat(ks[4]), 'b_lp1': wvec(ks[5]),
        'w_rp1': wmat(ks[6]), 'b_rp1': wvec(ks[7]),
        'w_lp2': wmat(ks[8]), 'b_lp2': wvec(ks[9]),
        'w_rp2': wmat(ks[10]), 'b_rp2': wvec(ks[11]),
        # PyTorch initializes beta/gamma to zero; use non-zero values so the
        # attention path actually contributes to the tested output.
        'beta': jnp.full((c,), 0.5, jnp.float32),
        'gamma': jnp.full((c,), 0.5, jnp.float32),
    }


# ---------------------------------- demo ---------------------------------------

if __name__ == "__main__":
    N, C, H = 2, 128, 4
    W = C  # nn.LayerNorm(c) on an NCHW input forces the last dim (W) == c.
    root = jax.random.PRNGKey(0)
    kp, kl, kr = jax.random.split(root, 3)
    params = init_params(kp, C)
    x_l = jax.random.normal(kl, (N, C, H, W), jnp.float32)
    x_r = jax.random.normal(kr, (N, C, H, W), jnp.float32)

    fwd = jax.jit(scam_forward)
    out_l, out_r = fwd(params, x_l, x_r)
    jax.block_until_ready((out_l, out_r))

    assert out_l.shape == (N, C, H, W) and out_r.shape == (N, C, H, W)
    assert bool(jnp.all(jnp.isfinite(out_l))) and bool(jnp.all(jnp.isfinite(out_r)))

    ref_l, ref_r = jax.jit(scam_reference)(params, x_l, x_r)
    err = max(float(jnp.max(jnp.abs(out_l - ref_l))),
              float(jnp.max(jnp.abs(out_r - ref_r))))
    assert err < 2e-2, f"mismatch vs f32 reference: max abs err = {err}"
    print("KERNEL_OK")
</pallas_src>

<mosaic_0001>
module attributes {stable_mosaic.version = 11 : i64} {
  func.func @_scam_kernel(%arg0: i32, %arg1: i32, %arg2: memref<1x4x128x128xf32, #tpu.memory_space<vmem>>, %arg3: memref<1x4x128x128xf32, #tpu.memory_space<vmem>>, %arg4: memref<128x1xf32, #tpu.memory_space<vmem>>, %arg5: memref<128x1xf32, #tpu.memory_space<vmem>>, %arg6: memref<128x1xf32, #tpu.memory_space<vmem>>, %arg7: memref<128x1xf32, #tpu.memory_space<vmem>>, %arg8: memref<128x128xbf16, #tpu.memory_space<vmem>>, %arg9: memref<1x128xf32, #tpu.memory_space<vmem>>, %arg10: memref<128x128xbf16, #tpu.memory_space<vmem>>, %arg11: memref<1x128xf32, #tpu.memory_space<vmem>>, %arg12: memref<128x128xbf16, #tpu.memory_space<vmem>>, %arg13: memref<1x128xf32, #tpu.memory_space<vmem>>, %arg14: memref<128x128xbf16, #tpu.memory_space<vmem>>, %arg15: memref<1x128xf32, #tpu.memory_space<vmem>>, %arg16: memref<1x128xf32, #tpu.memory_space<vmem>>, %arg17: memref<1x128xf32, #tpu.memory_space<vmem>>, %arg18: memref<1x4x128x128xf32, #tpu.memory_space<vmem>>, %arg19: memref<1x4x128x128xf32, #tpu.memory_space<vmem>>) attributes {dimension_semantics = [#tpu.dimension_semantics<parallel>, #tpu.dimension_semantics<parallel>], iteration_bounds = array<i64: 2, 1>, scalar_prefetch = 0 : i64, scratch_operands = 0 : i64, tpu.core_type = #tpu.core_type<tc>, window_params = [{transform_indices = @transform_0, window_bounds = array<i64: 1, 4, 128, 128>}, {transform_indices = @transform_1, window_bounds = array<i64: 1, 4, 128, 128>}, {pipeline_mode = #tpu.pipeline_mode<synchronous>, transform_indices = @transform_2, window_bounds = array<i64: 128, 1>}, {pipeline_mode = #tpu.pipeline_mode<synchronous>, transform_indices = @transform_3, window_bounds = array<i64: 128, 1>}, {pipeline_mode = #tpu.pipeline_mode<synchronous>, transform_indices = @transform_4, window_bounds = array<i64: 128, 1>}, {pipeline_mode = #tpu.pipeline_mode<synchronous>, transform_indices = @transform_5, window_bounds = array<i64: 128, 1>}, {pipeline_mode = #tpu.pipeline_mode<synchronous>, transform_indices = @transform_6, window_bounds = array<i64: 128, 128>}, {pipeline_mode = #tpu.pipeline_mode<synchronous>, transform_indices = @transform_7, window_bounds = array<i64: 1, 128>}, {pipeline_mode = #tpu.pipeline_mode<synchronous>, transform_indices = @transform_8, window_bounds = array<i64: 128, 128>}, {pipeline_mode = #tpu.pipeline_mode<synchronous>, transform_indices = @transform_9, window_bounds = array<i64: 1, 128>}, {pipeline_mode = #tpu.pipeline_mode<synchronous>, transform_indices = @transform_10, window_bounds = array<i64: 128, 128>}, {pipeline_mode = #tpu.pipeline_mode<synchronous>, transform_indices = @transform_11, window_bounds = array<i64: 1, 128>}, {pipeline_mode = #tpu.pipeline_mode<synchronous>, transform_indices = @transform_12, window_bounds = array<i64: 128, 128>}, {pipeline_mode = #tpu.pipeline_mode<synchronous>, transform_indices = @transform_13, window_bounds = array<i64: 1, 128>}, {pipeline_mode = #tpu.pipeline_mode<synchronous>, transform_indices = @transform_14, window_bounds = array<i64: 1, 128>}, {pipeline_mode = #tpu.pipeline_mode<synchronous>, transform_indices = @transform_15, window_bounds = array<i64: 1, 128>}, {transform_indices = @transform_16, window_bounds = array<i64: 1, 4, 128, 128>}, {transform_indices = @transform_17, window_bounds = array<i64: 1, 4, 128, 128>}]} {
    %c0 = arith.constant 0 : index
    %c0_0 = arith.constant 0 : index
    %0 = vector.load %arg4[%c0, %c0_0] : memref<128x1xf32, #tpu.memory_space<vmem>>, vector<128x1xf32>
    %c0_1 = arith.constant 0 : index
    %c0_2 = arith.constant 0 : index
    %1 = vector.load %arg5[%c0_1, %c0_2] : memref<128x1xf32, #tpu.memory_space<vmem>>, vector<128x1xf32>
    %c0_3 = arith.constant 0 : index
    %c0_4 = arith.constant 0 : index
    %2 = vector.load %arg6[%c0_3, %c0_4] : memref<128x1xf32, #tpu.memory_space<vmem>>, vector<128x1xf32>
    %c0_5 = arith.constant 0 : index
    %c0_6 = arith.constant 0 : index
    %3 = vector.load %arg7[%c0_5, %c0_6] : memref<128x1xf32, #tpu.memory_space<vmem>>, vector<128x1xf32>
    %c0_7 = arith.constant 0 : index
    %c0_8 = arith.constant 0 : index
    %4 = vector.load %arg8[%c0_7, %c0_8] : memref<128x128xbf16, #tpu.memory_space<vmem>>, vector<128x128xbf16>
    %c0_9 = arith.constant 0 : index
    %c0_10 = arith.constant 0 : index
    %5 = vector.load %arg10[%c0_9, %c0_10] : memref<128x128xbf16, #tpu.memory_space<vmem>>, vector<128x128xbf16>
    %c0_11 = arith.constant 0 : index
    %c0_12 = arith.constant 0 : index
    %6 = vector.load %arg12[%c0_11, %c0_12] : memref<128x128xbf16, #tpu.memory_space<vmem>>, vector<128x128xbf16>
    %c0_13 = arith.constant 0 : index
    %c0_14 = arith.constant 0 : index
    %7 = vector.load %arg14[%c0_13, %c0_14] : memref<128x128xbf16, #tpu.memory_space<vmem>>, vector<128x128xbf16>
    %c0_15 = arith.constant 0 : index
    %c0_16 = arith.constant 0 : index
    %8 = vector.load %arg9[%c0_15, %c0_16] : memref<1x128xf32, #tpu.memory_space<vmem>>, vector<1x128xf32>
    %c0_17 = arith.constant 0 : index
    %c0_18 = arith.constant 0 : index
    %9 = vector.load %arg11[%c0_17, %c0_18] : memref<1x128xf32, #tpu.memory_space<vmem>>, vector<1x128xf32>
    %c0_19 = arith.constant 0 : index
    %c0_20 = arith.constant 0 : index
    %10 = vector.load %arg13[%c0_19, %c0_20] : memref<1x128xf32, #tpu.memory_space<vmem>>, vector<1x128xf32>
    %c0_21 = arith.constant 0 : index
    %c0_22 = arith.constant 0 : index
    %11 = vector.load %arg15[%c0_21, %c0_22] : memref<1x128xf32, #tpu.memory_space<vmem>>, vector<1x128xf32>
    %c0_23 = arith.constant 0 : index
    %c0_24 = arith.constant 0 : index
    %12 = vector.load %arg16[%c0_23, %c0_24] : memref<1x128xf32, #tpu.memory_space<vmem>>, vector<1x128xf32>
    %c0_25 = arith.constant 0 : index
    %c0_26 = arith.constant 0 : index
    %13 = vector.load %arg17[%c0_25, %c0_26] : memref<1x128xf32, #tpu.memory_space<vmem>>, vector<1x128xf32>
    %c0_27 = arith.constant 0 : index
    %c0_28 = arith.constant 0 : index
    %c0_29 = arith.constant 0 : index
    %c0_30 = arith.constant 0 : index
    %14 = vector.load %arg2[%c0_27, %c0_28, %c0_29, %c0_30] : memref<1x4x128x128xf32, #tpu.memory_space<vmem>>, vector<1x1x128x128xf32>
    %15 = vector.shape_cast %14 : vector<1x1x128x128xf32> to vector<128x128xf32>
    %c0_31 = arith.constant 0 : index
    %c0_32 = arith.constant 0 : index
    %c0_33 = arith.constant 0 : index
    %c0_34 = arith.constant 0 : index
    %16 = vector.load %arg3[%c0_31, %c0_32, %c0_33, %c0_34] : memref<1x4x128x128xf32, #tpu.memory_space<vmem>>, vector<1x1x128x128xf32>
    %17 = vector.shape_cast %16 : vector<1x1x128x128xf32> to vector<128x128xf32>
    %cst = arith.constant dense<0.000000e+00> : vector<128xf32>
    %18 = vector.multi_reduction <add>, %15, %cst [0] : vector<128x128xf32> to vector<128xf32>
    %19 = vector.shape_cast %18 : vector<128xf32> to vector<1x128xf32>
    %cst_35 = arith.constant 1.280000e+02 : f32
    %20 = vector.broadcast %cst_35 : f32 to vector<1x128xf32>
    %21 = arith.divf %19, %20 : vector<1x128xf32>
    %22 = arith.mulf %15, %15 : vector<128x128xf32>
    %cst_36 = arith.constant dense<0.000000e+00> : vector<128xf32>
    %23 = vector.multi_reduction <add>, %22, %cst_36 [0] : vector<128x128xf32> to vector<128xf32>
    %24 = vector.shape_cast %23 : vector<128xf32> to vector<1x128xf32>
    %cst_37 = arith.constant 1.280000e+02 : f32
    %25 = vector.broadcast %cst_37 : f32 to vector<1x128xf32>
    %26 = arith.divf %24, %25 : vector<1x128xf32>
    %27 = arith.mulf %21, %21 : vector<1x128xf32>
    %28 = arith.subf %26, %27 : vector<1x128xf32>
    %29 = vector.broadcast %21 : vector<1x128xf32> to vector<128x128xf32>
    %30 = arith.subf %15, %29 : vector<128x128xf32>
    %cst_38 = arith.constant 9.99999974E-6 : f32
    %31 = vector.broadcast %cst_38 : f32 to vector<1x128xf32>
    %32 = arith.addf %28, %31 : vector<1x128xf32>
    %33 = math.rsqrt %32 : vector<1x128xf32>
    %34 = vector.broadcast %33 : vector<1x128xf32> to vector<128x128xf32>
    %35 = arith.mulf %30, %34 : vector<128x128xf32>
    %36 = vector.broadcast %0 : vector<128x1xf32> to vector<128x128xf32>
    %37 = arith.mulf %35, %36 : vector<128x128xf32>
    %38 = vector.broadcast %1 : vector<128x1xf32> to vector<128x128xf32>
    %39 = arith.addf %37, %38 : vector<128x128xf32>
    %cst_39 = arith.constant dense<0.000000e+00> : vector<128xf32>
    %40 = vector.multi_reduction <add>, %17, %cst_39 [0] : vector<128x128xf32> to vector<128xf32>
    %41 = vector.shape_cast %40 : vector<128xf32> to vector<1x128xf32>
    %cst_40 = arith.constant 1.280000e+02 : f32
    %42 = vector.broadcast %cst_40 : f32 to vector<1x128xf32>
    %43 = arith.divf %41, %42 : vector<1x128xf32>
    %44 = arith.mulf %17, %17 : vector<128x128xf32>
    %cst_41 = arith.constant dense<0.000000e+00> : vector<128xf32>
    %45 = vector.multi_reduction <add>, %44, %cst_41 [0] : vector<128x128xf32> to vector<128xf32>
    %46 = vector.shape_cast %45 : vector<128xf32> to vector<1x128xf32>
    %cst_42 = arith.constant 1.280000e+02 : f32
    %47 = vector.broadcast %cst_42 : f32 to vector<1x128xf32>
    %48 = arith.divf %46, %47 : vector<1x128xf32>
    %49 = arith.mulf %43, %43 : vector<1x128xf32>
    %50 = arith.subf %48, %49 : vector<1x128xf32>
    %51 = vector.broadcast %43 : vector<1x128xf32> to vector<128x128xf32>
    %52 = arith.subf %17, %51 : vector<128x128xf32>
    %cst_43 = arith.constant 9.99999974E-6 : f32
    %53 = vector.broadcast %cst_43 : f32 to vector<1x128xf32>
    %54 = arith.addf %50, %53 : vector<1x128xf32>
    %55 = math.rsqrt %54 : vector<1x128xf32>
    %56 = vector.broadcast %55 : vector<1x128xf32> to vector<128x128xf32>
    %57 = arith.mulf %52, %56 : vector<128x128xf32>
    %58 = vector.broadcast %2 : vector<128x1xf32> to vector<128x128xf32>
    %59 = arith.mulf %57, %58 : vector<128x128xf32>
    %60 = vector.broadcast %3 : vector<128x1xf32> to vector<128x128xf32>
    %61 = arith.addf %59, %60 : vector<128x128xf32>
    %62 = arith.truncf %39 : vector<128x128xf32> to vector<128x128xbf16>
    %cst_44 = arith.constant dense<0.000000e+00> : vector<128x128xf32>
    %63 = tpu.matmul %62, %4, %cst_44 {dimension_numbers = #tpu.dot_dimension_numbers<[1], [0], [0], [1], [0, 0, 1, 1], [], []>} : vector<128x128xbf16>, vector<128x128xbf16>, vector<128x128xf32> -> vector<128x128xf32>
    %64 = vector.broadcast %8 : vector<1x128xf32> to vector<128x128xf32>
    %65 = arith.addf %63, %64 : vector<128x128xf32>
    %cst_45 = arith.constant 0.0883883461 : f32
    %66 = vector.broadcast %cst_45 : f32 to vector<128x128xf32>
    %67 = arith.mulf %65, %66 : vector<128x128xf32>
    %68 = arith.truncf %61 : vector<128x128xf32> to vector<128x128xbf16>
    %cst_46 = arith.constant dense<0.000000e+00> : vector<128x128xf32>
    %69 = tpu.matmul %68, %5, %cst_46 {dimension_numbers = #tpu.dot_dimension_numbers<[1], [0], [0], [1], [0, 0, 1, 1], [], []>} : vector<128x128xbf16>, vector<128x128xbf16>, vector<128x128xf32> -> vector<128x128xf32>
    %70 = vector.broadcast %9 : vector<1x128xf32> to vector<128x128xf32>
    %71 = arith.addf %69, %70 : vector<128x128xf32>
    %72 = arith.truncf %15 : vector<128x128xf32> to vector<128x128xbf16>
    %cst_47 = arith.constant dense<0.000000e+00> : vector<128x128xf32>
    %73 = tpu.matmul %72, %6, %cst_47 {dimension_numbers = #tpu.dot_dimension_numbers<[1], [0], [0], [1], [0, 0, 1, 1], [], []>} : vector<128x128xbf16>, vector<128x128xbf16>, vector<128x128xf32> -> vector<128x128xf32>
    %74 = vector.broadcast %10 : vector<1x128xf32> to vector<128x128xf32>
    %75 = arith.addf %73, %74 : vector<128x128xf32>
    %76 = arith.truncf %17 : vector<128x128xf32> to vector<128x128xbf16>
    %cst_48 = arith.constant dense<0.000000e+00> : vector<128x128xf32>
    %77 = tpu.matmul %76, %7, %cst_48 {dimension_numbers = #tpu.dot_dimension_numbers<[1], [0], [0], [1], [0, 0, 1, 1], [], []>} : vector<128x128xbf16>, vector<128x128xbf16>, vector<128x128xf32> -> vector<128x128xf32>
    %78 = vector.broadcast %11 : vector<1x128xf32> to vector<128x128xf32>
    %79 = arith.addf %77, %78 : vector<128x128xf32>
    %80 = arith.truncf %67 : vector<128x128xf32> to vector<128x128xbf16>
    %81 = arith.truncf %71 : vector<128x128xf32> to vector<128x128xbf16>
    %cst_49 = arith.constant dense<0.000000e+00> : vector<128x128xf32>
    %82 = tpu.matmul %80, %81, %cst_49 {dimension_numbers = #tpu.dot_dimension_numbers<[1], [1], [0], [0], [0, 0, 1, 0], [], []>} : vector<128x128xbf16>, vector<128x128xbf16>, vector<128x128xf32> -> vector<128x128xf32>
    %cst_50 = arith.constant dense<0xFF800000> : vector<128xf32>
    %83 = vector.multi_reduction <maximumf>, %82, %cst_50 [1] : vector<128x128xf32> to vector<128xf32>
    %84 = vector.shape_cast %83 : vector<128xf32> to vector<128x1xf32>
    %85 = vector.broadcast %84 : vector<128x1xf32> to vector<128x128xf32>
    %86 = arith.subf %82, %85 : vector<128x128xf32>
    %87 = math.exp %86 : vector<128x128xf32>
    %cst_51 = arith.constant dense<0.000000e+00> : vector<128xf32>
    %88 = vector.multi_reduction <add>, %87, %cst_51 [1] : vector<128x128xf32> to vector<128xf32>
    %89 = vector.shape_cast %88 : vector<128xf32> to vector<128x1xf32>
    %90 = tpu.reciprocal %89 {approx = true} : vector<128x1xf32> -> vector<128x1xf32>
    %91 = vector.broadcast %90 : vector<128x1xf32> to vector<128x128xf32>
    %92 = arith.mulf %87, %91 : vector<128x128xf32>
    %93 = arith.truncf %92 : vector<128x128xf32> to vector<128x128xbf16>
    %94 = arith.truncf %79 : vector<128x128xf32> to vector<128x128xbf16>
    %cst_52 = arith.constant dense<0.000000e+00> : vector<128x128xf32>
    %95 = tpu.matmul %93, %94, %cst_52 {dimension_numbers = #tpu.dot_dimension_numbers<[1], [0], [0], [1], [0, 0, 1, 1], [], []>} : vector<128x128xbf16>, vector<128x128xbf16>, vector<128x128xf32> -> vector<128x128xf32>
    %96 = tpu.transpose %82, [1, 0] : vector<128x128xf32> -> vector<128x128xf32>
    %cst_53 = arith.constant dense<0xFF800000> : vector<128xf32>
    %97 = vector.multi_reduction <maximumf>, %96, %cst_53 [1] : vector<128x128xf32> to vector<128xf32>
    %98 = vector.shape_cast %97 : vector<128xf32> to vector<128x1xf32>
    %99 = vector.broadcast %98 : vector<128x1xf32> to vector<128x128xf32>
    %100 = arith.subf %96, %99 : vector<128x128xf32>
    %101 = math.exp %100 : vector<128x128xf32>
    %cst_54 = arith.constant dense<0.000000e+00> : vector<128xf32>
    %102 = vector.multi_reduction <add>, %101, %cst_54 [1] : vector<128x128xf32> to vector<128xf32>
    %103 = vector.shape_cast %102 : vector<128xf32> to vector<128x1xf32>
    %104 = tpu.reciprocal %103 {approx = true} : vector<128x1xf32> -> vector<128x1xf32>
    %105 = vector.broadcast %104 : vector<128x1xf32> to vector<128x128xf32>
    %106 = arith.mulf %101, %105 : vector<128x128xf32>
    %107 = arith.truncf %106 : vector<128x128xf32> to vector<128x128xbf16>
    %108 = arith.truncf %75 : vector<128x128xf32> to vector<128x128xbf16>
    %cst_55 = arith.constant dense<0.000000e+00> : vector<128x128xf32>
    %109 = tpu.matmul %107, %108, %cst_55 {dimension_numbers = #tpu.dot_dimension_numbers<[1], [0], [0], [1], [0, 0, 1, 1], [], []>} : vector<128x128xbf16>, vector<128x128xbf16>, vector<128x128xf32> -> vector<128x128xf32>
    %110 = vector.broadcast %12 : vector<1x128xf32> to vector<128x128xf32>
    %111 = arith.mulf %95, %110 : vector<128x128xf32>
    %112 = arith.addf %15, %111 : vector<128x128xf32>
    %c0_56 = arith.constant 0 : index
    %c0_57 = arith.constant 0 : index
    %c0_58 = arith.constant 0 : index
    %c0_59 = arith.constant 0 : index
    %113 = vector.load %arg18[%c0_56, %c0_57, %c0_58, %c0_59] : memref<1x4x128x128xf32, #tpu.memory_space<vmem>>, vector<1x1x128x128xf32>
    %114 = vector.shape_cast %113 : vector<1x1x128x128xf32> to vector<128x128xf32>
    %115 = vector.shape_cast %112 : vector<128x128xf32> to vector<1x1x128x128xf32>
    tpu.vector_store %arg18[%c0_56, %c0_57, %c0_58, %c0_59], %115 {strides = array<i32>} : memref<1x4x128x128xf32, #tpu.memory_space<vmem>>, vector<1x1x128x128xf32>,
    %116 = vector.broadcast %13 : vector<1x128xf32> to vector<128x128xf32>
    %117 = arith.mulf %109, %116 : vector<128x128xf32>
    %118 = arith.addf %17, %117 : vector<128x128xf32>
    %c0_60 = arith.constant 0 : index
    %c0_61 = arith.constant 0 : index
    %c0_62 = arith.constant 0 : index
    %c0_63 = arith.constant 0 : index
    %119 = vector.load %arg19[%c0_60, %c0_61, %c0_62, %c0_63] : memref<1x4x128x128xf32, #tpu.memory_space<vmem>>, vector<1x1x128x128xf32>
    %120 = vector.shape_cast %119 : vector<1x1x128x128xf32> to vector<128x128xf32>
    %121 = vector.shape_cast %118 : vector<128x128xf32> to vector<1x1x128x128xf32>
    tpu.vector_store %arg19[%c0_60, %c0_61, %c0_62, %c0_63], %121 {strides = array<i32>} : memref<1x4x128x128xf32, #tpu.memory_space<vmem>>, vector<1x1x128x128xf32>,
    %c0_64 = arith.constant 0 : index
    %c1 = arith.constant 1 : index
    %c0_65 = arith.constant 0 : index
    %c0_66 = arith.constant 0 : index
    %122 = vector.load %arg2[%c0_64, %c1, %c0_65, %c0_66] : memref<1x4x128x128xf32, #tpu.memory_space<vmem>>, vector<1x1x128x128xf32>
    %123 = vector.shape_cast %122 : vector<1x1x128x128xf32> to vector<128x128xf32>
    %c0_67 = arith.constant 0 : index
    %c1_68 = arith.constant 1 : index
    %c0_69 = arith.constant 0 : index
    %c0_70 = arith.constant 0 : index
    %124 = vector.load %arg3[%c0_67, %c1_68, %c0_69, %c0_70] : memref<1x4x128x128xf32, #tpu.memory_space<vmem>>, vector<1x1x128x128xf32>
    %125 = vector.shape_cast %124 : vector<1x1x128x128xf32> to vector<128x128xf32>
    %cst_71 = arith.constant dense<0.000000e+00> : vector<128xf32>
    %126 = vector.multi_reduction <add>, %123, %cst_71 [0] : vector<128x128xf32> to vector<128xf32>
    %127 = vector.shape_cast %126 : vector<128xf32> to vector<1x128xf32>
    %cst_72 = arith.constant 1.280000e+02 : f32
    %128 = vector.broadcast %cst_72 : f32 to vector<1x128xf32>
    %129 = arith.divf %127, %128 : vector<1x128xf32>
    %130 = arith.mulf %123, %123 : vector<128x128xf32>
    %cst_73 = arith.constant dense<0.000000e+00> : vector<128xf32>
    %131 = vector.multi_reduction <add>, %130, %cst_73 [0] : vector<128x128xf32> to vector<128xf32>
    %132 = vector.shape_cast %131 : vector<128xf32> to vector<1x128xf32>
    %cst_74 = arith.constant 1.280000e+02 : f32
    %133 = vector.broadcast %cst_74 : f32 to vector<1x128xf32>
    %134 = arith.divf %132, %133 : vector<1x128xf32>
    %135 = arith.mulf %129, %129 : vector<1x128xf32>
    %136 = arith.subf %134, %135 : vector<1x128xf32>
    %137 = vector.broadcast %129 : vector<1x128xf32> to vector<128x128xf32>
    %138 = arith.subf %123, %137 : vector<128x128xf32>
    %cst_75 = arith.constant 9.99999974E-6 : f32
    %139 = vector.broadcast %cst_75 : f32 to vector<1x128xf32>
    %140 = arith.addf %136, %139 : vector<1x128xf32>
    %141 = math.rsqrt %140 : vector<1x128xf32>
    %142 = vector.broadcast %141 : vector<1x128xf32> to vector<128x128xf32>
    %143 = arith.mulf %138, %142 : vector<128x128xf32>
    %144 = vector.broadcast %0 : vector<128x1xf32> to vector<128x128xf32>
    %145 = arith.mulf %143, %144 : vector<128x128xf32>
    %146 = vector.broadcast %1 : vector<128x1xf32> to vector<128x128xf32>
    %147 = arith.addf %145, %146 : vector<128x128xf32>
    %cst_76 = arith.constant dense<0.000000e+00> : vector<128xf32>
    %148 = vector.multi_reduction <add>, %125, %cst_76 [0] : vector<128x128xf32> to vector<128xf32>
    %149 = vector.shape_cast %148 : vector<128xf32> to vector<1x128xf32>
    %cst_77 = arith.constant 1.280000e+02 : f32
    %150 = vector.broadcast %cst_77 : f32 to vector<1x128xf32>
    %151 = arith.divf %149, %150 : vector<1x128xf32>
    %152 = arith.mulf %125, %125 : vector<128x128xf32>
    %cst_78 = arith.constant dense<0.000000e+00> : vector<128xf32>
    %153 = vector.multi_reduction <add>, %152, %cst_78 [0] : vector<128x128xf32> to vector<128xf32>
    %154 = vector.shape_cast %153 : vector<128xf32> to vector<1x128xf32>
    %cst_79 = arith.constant 1.280000e+02 : f32
    %155 = vector.broadcast %cst_79 : f32 to vector<1x128xf32>
    %156 = arith.divf %154, %155 : vector<1x128xf32>
    %157 = arith.mulf %151, %151 : vector<1x128xf32>
    %158 = arith.subf %156, %157 : vector<1x128xf32>
    %159 = vector.broadcast %151 : vector<1x128xf32> to vector<128x128xf32>
    %160 = arith.subf %125, %159 : vector<128x128xf32>
    %cst_80 = arith.constant 9.99999974E-6 : f32
    %161 = vector.broadcast %cst_80 : f32 to vector<1x128xf32>
    %162 = arith.addf %158, %161 : vector<1x128xf32>
    %163 = math.rsqrt %162 : vector<1x128xf32>
    %164 = vector.broadcast %163 : vector<1x128xf32> to vector<128x128xf32>
    %165 = arith.mulf %160, %164 : vector<128x128xf32>
    %166 = vector.broadcast %2 : vector<128x1xf32> to vector<128x128xf32>
    %167 = arith.mulf %165, %166 : vector<128x128xf32>
    %168 = vector.broadcast %3 : vector<128x1xf32> to vector<128x128xf32>
    %169 = arith.addf %167, %168 : vector<128x128xf32>
    %170 = arith.truncf %147 : vector<128x128xf32> to vector<128x128xbf16>
    %cst_81 = arith.constant dense<0.000000e+00> : vector<128x128xf32>
    %171 = tpu.matmul %170, %4, %cst_81 {dimension_numbers = #tpu.dot_dimension_numbers<[1], [0], [0], [1], [0, 0, 1, 1], [], []>} : vector<128x128xbf16>, vector<128x128xbf16>, vector<128x128xf32> -> vector<128x128xf32>
    %172 = vector.broadcast %8 : vector<1x128xf32> to vector<128x128xf32>
    %173 = arith.addf %171, %172 : vector<128x128xf32>
    %cst_82 = arith.constant 0.0883883461 : f32
    %174 = vector.broadcast %cst_82 : f32 to vector<128x128xf32>
    %175 = arith.mulf %173, %174 : vector<128x128xf32>
    %176 = arith.truncf %169 : vector<128x128xf32> to vector<128x128xbf16>
    %cst_83 = arith.constant dense<0.000000e+00> : vector<128x128xf32>
    %177 = tpu.matmul %176, %5, %cst_83 {dimension_numbers = #tpu.dot_dimension_numbers<[1], [0], [0], [1], [0, 0, 1, 1], [], []>} : vector<128x128xbf16>, vector<128x128xbf16>, vector<128x128xf32> -> vector<128x128xf32>
    %178 = vector.broadcast %9 : vector<1x128xf32> to vector<128x128xf32>
    %179 = arith.addf %177, %178 : vector<128x128xf32>
    %180 = arith.truncf %123 : vector<128x128xf32> to vector<128x128xbf16>
    %cst_84 = arith.constant dense<0.000000e+00> : vector<128x128xf32>
    %181 = tpu.matmul %180, %6, %cst_84 {dimension_numbers = #tpu.dot_dimension_numbers<[1], [0], [0], [1], [0, 0, 1, 1], [], []>} : vector<128x128xbf16>, vector<128x128xbf16>, vector<128x128xf32> -> vector<128x128xf32>
    %182 = vector.broadcast %10 : vector<1x128xf32> to vector<128x128xf32>
    %183 = arith.addf %181, %182 : vector<128x128xf32>
    %184 = arith.truncf %125 : vector<128x128xf32> to vector<128x128xbf16>
    %cst_85 = arith.constant dense<0.000000e+00> : vector<128x128xf32>
    %185 = tpu.matmul %184, %7, %cst_85 {dimension_numbers = #tpu.dot_dimension_numbers<[1], [0], [0], [1], [0, 0, 1, 1], [], []>} : vector<128x128xbf16>, vector<128x128xbf16>, vector<128x128xf32> -> vector<128x128xf32>
    %186 = vector.broadcast %11 : vector<1x128xf32> to vector<128x128xf32>
    %187 = arith.addf %185, %186 : vector<128x128xf32>
    %188 = arith.truncf %175 : vector<128x128xf32> to vector<128x128xbf16>
    %189 = arith.truncf %179 : vector<128x128xf32> to vector<128x128xbf16>
    %cst_86 = arith.constant dense<0.000000e+00> : vector<128x128xf32>
    %190 = tpu.matmul %188, %189, %cst_86 {dimension_numbers = #tpu.dot_dimension_numbers<[1], [1], [0], [0], [0, 0, 1, 0], [], []>} : vector<128x128xbf16>, vector<128x128xbf16>, vector<128x128xf32> -> vector<128x128xf32>
    %cst_87 = arith.constant dense<0xFF800000> : vector<128xf32>
    %191 = vector.multi_reduction <maximumf>, %190, %cst_87 [1] : vector<128x128xf32> to vector<128xf32>
    %192 = vector.shape_cast %191 : vector<128xf32> to vector<128x1xf32>
    %193 = vector.broadcast %192 : vector<128x1xf32> to vector<128x128xf32>
    %194 = arith.subf %190, %193 : vector<128x128xf32>
    %195 = math.exp %194 : vector<128x128xf32>
    %cst_88 = arith.constant dense<0.000000e+00> : vector<128xf32>
    %196 = vector.multi_reduction <add>, %195, %cst_88 [1] : vector<128x128xf32> to vector<128xf32>
    %197 = vector.shape_cast %196 : vector<128xf32> to vector<128x1xf32>
    %198 = tpu.reciprocal %197 {approx = true} : vector<128x1xf32> -> vector<128x1xf32>
    %199 = vector.broadcast %198 : vector<128x1xf32> to vector<128x128xf32>
    %200 = arith.mulf %195, %199 : vector<128x128xf32>
    %201 = arith.truncf %200 : vector<128x128xf32> to vector<128x128xbf16>
    %202 = arith.truncf %187 : vector<128x128xf32> to vector<128x128xbf16>
    %cst_89 = arith.constant dense<0.000000e+00> : vector<128x128xf32>
    %203 = tpu.matmul %201, %202, %cst_89 {dimension_numbers = #tpu.dot_dimension_numbers<[1], [0], [0], [1], [0, 0, 1, 1], [], []>} : vector<128x128xbf16>, vector<128x128xbf16>, vector<128x128xf32> -> vector<128x128xf32>
    %204 = tpu.transpose %190, [1, 0] : vector<128x128xf32> -> vector<128x128xf32>
    %cst_90 = arith.constant dense<0xFF800000> : vector<128xf32>
    %205 = vector.multi_reduction <maximumf>, %204, %cst_90 [1] : vector<128x128xf32> to vector<128xf32>
    %206 = vector.shape_cast %205 : vector<128xf32> to vector<128x1xf32>
    %207 = vector.broadcast %206 : vector<128x1xf32> to vector<128x128xf32>
    %208 = arith.subf %204, %207 : vector<128x128xf32>
    %209 = math.exp %208 : vector<128x128xf32>
    %cst_91 = arith.constant dense<0.000000e+00> : vector<128xf32>
    %210 = vector.multi_reduction <add>, %209, %cst_91 [1] : vector<128x128xf32> to vector<128xf32>
    %211 = vector.shape_cast %210 : vector<128xf32> to vector<128x1xf32>
    %212 = tpu.reciprocal %211 {approx = true} : vector<128x1xf32> -> vector<128x1xf32>
    %213 = vector.broadcast %212 : vector<128x1xf32> to vector<128x128xf32>
    %214 = arith.mulf %209, %213 : vector<128x128xf32>
    %215 = arith.truncf %214 : vector<128x128xf32> to vector<128x128xbf16>
    %216 = arith.truncf %183 : vector<128x128xf32> to vector<128x128xbf16>
    %cst_92 = arith.constant dense<0.000000e+00> : vector<128x128xf32>
    %217 = tpu.matmul %215, %216, %cst_92 {dimension_numbers = #tpu.dot_dimension_numbers<[1], [0], [0], [1], [0, 0, 1, 1], [], []>} : vector<128x128xbf16>, vector<128x128xbf16>, vector<128x128xf32> -> vector<128x128xf32>
    %218 = vector.broadcast %12 : vector<1x128xf32> to vector<128x128xf32>
    %219 = arith.mulf %203, %218 : vector<128x128xf32>
    %220 = arith.addf %123, %219 : vector<128x128xf32>
    %c0_93 = arith.constant 0 : index
    %c1_94 = arith.constant 1 : index
    %c0_95 = arith.constant 0 : index
    %c0_96 = arith.constant 0 : index
    %221 = vector.load %arg18[%c0_93, %c1_94, %c0_95, %c0_96] : memref<1x4x128x128xf32, #tpu.memory_space<vmem>>, vector<1x1x128x128xf32>
    %222 = vector.shape_cast %221 : vector<1x1x128x128xf32> to vector<128x128xf32>
    %223 = vector.shape_cast %220 : vector<128x128xf32> to vector<1x1x128x128xf32>
    tpu.vector_store %arg18[%c0_93, %c1_94, %c0_95, %c0_96], %223 {strides = array<i32>} : memref<1x4x128x128xf32, #tpu.memory_space<vmem>>, vector<1x1x128x128xf32>,
    %224 = vector.broadcast %13 : vector<1x128xf32> to vector<128x128xf32>
    %225 = arith.mulf %217, %224 : vector<128x128xf32>
    %226 = arith.addf %125, %225 : vector<128x128xf32>
    %c0_97 = arith.constant 0 : index
    %c1_98 = arith.constant 1 : index
    %c0_99 = arith.constant 0 : index
    %c0_100 = arith.constant 0 : index
    %227 = vector.load %arg19[%c0_97, %c1_98, %c0_99, %c0_100] : memref<1x4x128x128xf32, #tpu.memory_space<vmem>>, vector<1x1x128x128xf32>
    %228 = vector.shape_cast %227 : vector<1x1x128x128xf32> to vector<128x128xf32>
    %229 = vector.shape_cast %226 : vector<128x128xf32> to vector<1x1x128x128xf32>
    tpu.vector_store %arg19[%c0_97, %c1_98, %c0_99, %c0_100], %229 {strides = array<i32>} : memref<1x4x128x128xf32, #tpu.memory_space<vmem>>, vector<1x1x128x128xf32>,
    %c0_101 = arith.constant 0 : index
    %c2 = arith.constant 2 : index
    %c0_102 = arith.constant 0 : index
    %c0_103 = arith.constant 0 : index
    %230 = vector.load %arg2[%c0_101, %c2, %c0_102, %c0_103] : memref<1x4x128x128xf32, #tpu.memory_space<vmem>>, vector<1x1x128x128xf32>
    %231 = vector.shape_cast %230 : vector<1x1x128x128xf32> to vector<128x128xf32>
    %c0_104 = arith.constant 0 : index
    %c2_105 = arith.constant 2 : index
    %c0_106 = arith.constant 0 : index
    %c0_107 = arith.constant 0 : index
    %232 = vector.load %arg3[%c0_104, %c2_105, %c0_106, %c0_107] : memref<1x4x128x128xf32, #tpu.memory_space<vmem>>, vector<1x1x128x128xf32>
    %233 = vector.shape_cast %232 : vector<1x1x128x128xf32> to vector<128x128xf32>
    %cst_108 = arith.constant dense<0.000000e+00> : vector<128xf32>
    %234 = vector.multi_reduction <add>, %231, %cst_108 [0] : vector<128x128xf32> to vector<128xf32>
    %235 = vector.shape_cast %234 : vector<128xf32> to vector<1x128xf32>
    %cst_109 = arith.constant 1.280000e+02 : f32
    %236 = vector.broadcast %cst_109 : f32 to vector<1x128xf32>
    %237 = arith.divf %235, %236 : vector<1x128xf32>
    %238 = arith.mulf %231, %231 : vector<128x128xf32>
    %cst_110 = arith.constant dense<0.000000e+00> : vector<128xf32>
    %239 = vector.multi_reduction <add>, %238, %cst_110 [0] : vector<128x128xf32> to vector<128xf32>
    %240 = vector.shape_cast %239 : vector<128xf32> to vector<1x128xf32>
    %cst_111 = arith.constant 1.280000e+02 : f32
    %241 = vector.broadcast %cst_111 : f32 to vector<1x128xf32>
    %242 = arith.divf %240, %241 : vector<1x128xf32>
    %243 = arith.mulf %237, %237 : vector<1x128xf32>
    %244 = arith.subf %242, %243 : vector<1x128xf32>
    %245 = vector.broadcast %237 : vector<1x128xf32> to vector<128x128xf32>
    %246 = arith.subf %231, %245 : vector<128x128xf32>
    %cst_112 = arith.constant 9.99999974E-6 : f32
    %247 = vector.broadcast %cst_112 : f32 to vector<1x128xf32>
    %248 = arith.addf %244, %247 : vector<1x128xf32>
    %249 = math.rsqrt %248 : vector<1x128xf32>
    %250 = vector.broadcast %249 : vector<1x128xf32> to vector<128x128xf32>
    %251 = arith.mulf %246, %250 : vector<128x128xf32>
    %252 = vector.broadcast %0 : vector<128x1xf32> to vector<128x128xf32>
    %253 = arith.mulf %251, %252 : vector<128x128xf32>
    %254 = vector.broadcast %1 : vector<128x1xf32> to vector<128x128xf32>
    %255 = arith.addf %253, %254 : vector<128x128xf32>
    %cst_113 = arith.constant dense<0.000000e+00> : vector<128xf32>
    %256 = vector.multi_reduction <add>, %233, %cst_113 [0] : vector<128x128xf32> to vector<128xf32>
    %257 = vector.shape_cast %256 : vector<128xf32> to vector<1x128xf32>
    %cst_114 = arith.constant 1.280000e+02 : f32
    %258 = vector.broadcast %cst_114 : f32 to vector<1x128xf32>
    %259 = arith.divf %257, %258 : vector<1x128xf32>
    %260 = arith.mulf %233, %233 : vector<128x128xf32>
    %cst_115 = arith.constant dense<0.000000e+00> : vector<128xf32>
    %261 = vector.multi_reduction <add>, %260, %cst_115 [0] : vector<128x128xf32> to vector<128xf32>
    %262 = vector.shape_cast %261 : vector<128xf32> to vector<1x128xf32>
    %cst_116 = arith.constant 1.280000e+02 : f32
    %263 = vector.broadcast %cst_116 : f32 to vector<1x128xf32>
    %264 = arith.divf %262, %263 : vector<1x128xf32>
    %265 = arith.mulf %259, %259 : vector<1x128xf32>
    %266 = arith.subf %264, %265 : vector<1x128xf32>
    %267 = vector.broadcast %259 : vector<1x128xf32> to vector<128x128xf32>
    %268 = arith.subf %233, %267 : vector<128x128xf32>
    %cst_117 = arith.constant 9.99999974E-6 : f32
    %269 = vector.broadcast %cst_117 : f32 to vector<1x128xf32>
    %270 = arith.addf %266, %269 : vector<1x128xf32>
    %271 = math.rsqrt %270 : vector<1x128xf32>
    %272 = vector.broadcast %271 : vector<1x128xf32> to vector<128x128xf32>
    %273 = arith.mulf %268, %272 : vector<128x128xf32>
    %274 = vector.broadcast %2 : vector<128x1xf32> to vector<128x128xf32>
    %275 = arith.mulf %273, %274 : vector<128x128xf32>
    %276 = vector.broadcast %3 : vector<128x1xf32> to vector<128x128xf32>
    %277 = arith.addf %275, %276 : vector<128x128xf32>
    %278 = arith.truncf %255 : vector<128x128xf32> to vector<128x128xbf16>
    %cst_118 = arith.constant dense<0.000000e+00> : vector<128x128xf32>
    %279 = tpu.matmul %278, %4, %cst_118 {dimension_numbers = #tpu.dot_dimension_numbers<[1], [0], [0], [1], [0, 0, 1, 1], [], []>} : vector<128x128xbf16>, vector<128x128xbf16>, vector<128x128xf32> -> vector<128x128xf32>
    %280 = vector.broadcast %8 : vector<1x128xf32> to vector<128x128xf32>
    %281 = arith.addf %279, %280 : vector<128x128xf32>
    %cst_119 = arith.constant 0.0883883461 : f32
    %282 = vector.broadcast %cst_119 : f32 to vector<128x128xf32>
    %283 = arith.mulf %281, %282 : vector<128x128xf32>
    %284 = arith.truncf %277 : vector<128x128xf32> to vector<128x128xbf16>
    %cst_120 = arith.constant dense<0.000000e+00> : vector<128x128xf32>
    %285 = tpu.matmul %284, %5, %cst_120 {dimension_numbers = #tpu.dot_dimension_numbers<[1], [0], [0], [1], [0, 0, 1, 1], [], []>} : vector<128x128xbf16>, vector<128x128xbf16>, vector<128x128xf32> -> vector<128x128xf32>
    %286 = vector.broadcast %9 : vector<1x128xf32> to vector<128x128xf32>
    %287 = arith.addf %285, %286 : vector<128x128xf32>
    %288 = arith.truncf %231 : vector<128x128xf32> to vector<128x128xbf16>
    %cst_121 = arith.constant dense<0.000000e+00> : vector<128x128xf32>
    %289 = tpu.matmul %288, %6, %cst_121 {dimension_numbers = #tpu.dot_dimension_numbers<[1], [0], [0], [1], [0, 0, 1, 1], [], []>} : vector<128x128xbf16>, vector<128x128xbf16>, vector<128x128xf32> -> vector<128x128xf32>
    %290 = vector.broadcast %10 : vector<1x128xf32> to vector<128x128xf32>
    %291 = arith.addf %289, %290 : vector<128x128xf32>
    %292 = arith.truncf %233 : vector<128x128xf32> to vector<128x128xbf16>
    %cst_122 = arith.constant dense<0.000000e+00> : vector<128x128xf32>
    %293 = tpu.matmul %292, %7, %cst_122 {dimension_numbers = #tpu.dot_dimension_numbers<[1], [0], [0], [1], [0, 0, 1, 1], [], []>} : vector<128x128xbf16>, vector<128x128xbf16>, vector<128x128xf32> -> vector<128x128xf32>
    %294 = vector.broadcast %11 : vector<1x128xf32> to vector<128x128xf32>
    %295 = arith.addf %293, %294 : vector<128x128xf32>
    %296 = arith.truncf %283 : vector<128x128xf32> to vector<128x128xbf16>
    %297 = arith.truncf %287 : vector<128x128xf32> to vector<128x128xbf16>
    %cst_123 = arith.constant dense<0.000000e+00> : vector<128x128xf32>
    %298 = tpu.matmul %296, %297, %cst_123 {dimension_numbers = #tpu.dot_dimension_numbers<[1], [1], [0], [0], [0, 0, 1, 0], [], []>} : vector<128x128xbf16>, vector<128x128xbf16>, vector<128x128xf32> -> vector<128x128xf32>
    %cst_124 = arith.constant dense<0xFF800000> : vector<128xf32>
    %299 = vector.multi_reduction <maximumf>, %298, %cst_124 [1] : vector<128x128xf32> to vector<128xf32>
    %300 = vector.shape_cast %299 : vector<128xf32> to vector<128x1xf32>
    %301 = vector.broadcast %300 : vector<128x1xf32> to vector<128x128xf32>
    %302 = arith.subf %298, %301 : vector<128x128xf32>
    %303 = math.exp %302 : vector<128x128xf32>
    %cst_125 = arith.constant dense<0.000000e+00> : vector<128xf32>
    %304 = vector.multi_reduction <add>, %303, %cst_125 [1] : vector<128x128xf32> to vector<128xf32>
    %305 = vector.shape_cast %304 : vector<128xf32> to vector<128x1xf32>
    %306 = tpu.reciprocal %305 {approx = true} : vector<128x1xf32> -> vector<128x1xf32>
    %307 = vector.broadcast %306 : vector<128x1xf32> to vector<128x128xf32>
    %308 = arith.mulf %303, %307 : vector<128x128xf32>
    %309 = arith.truncf %308 : vector<128x128xf32> to vector<128x128xbf16>
    %310 = arith.truncf %295 : vector<128x128xf32> to vector<128x128xbf16>
    %cst_126 = arith.constant dense<0.000000e+00> : vector<128x128xf32>
    %311 = tpu.matmul %309, %310, %cst_126 {dimension_numbers = #tpu.dot_dimension_numbers<[1], [0], [0], [1], [0, 0, 1, 1], [], []>} : vector<128x128xbf16>, vector<128x128xbf16>, vector<128x128xf32> -> vector<128x128xf32>
    %312 = tpu.transpose %298, [1, 0] : vector<128x128xf32> -> vector<128x128xf32>
    %cst_127 = arith.constant dense<0xFF800000> : vector<128xf32>
    %313 = vector.multi_reduction <maximumf>, %312, %cst_127 [1] : vector<128x128xf32> to vector<128xf32>
    %314 = vector.shape_cast %313 : vector<128xf32> to vector<128x1xf32>
    %315 = vector.broadcast %314 : vector<128x1xf32> to vector<128x128xf32>
    %316 = arith.subf %312, %315 : vector<128x128xf32>
    %317 = math.exp %316 : vector<128x128xf32>
    %cst_128 = arith.constant dense<0.000000e+00> : vector<128xf32>
    %318 = vector.multi_reduction <add>, %317, %cst_128 [1] : vector<128x128xf32> to vector<128xf32>
    %319 = vector.shape_cast %318 : vector<128xf32> to vector<128x1xf32>
    %320 = tpu.reciprocal %319 {approx = true} : vector<128x1xf32> -> vector<128x1xf32>
    %321 = vector.broadcast %320 : vector<128x1xf32> to vector<128x128xf32>
    %322 = arith.mulf %317, %321 : vector<128x128xf32>
    %323 = arith.truncf %322 : vector<128x128xf32> to vector<128x128xbf16>
    %324 = arith.truncf %291 : vector<128x128xf32> to vector<128x128xbf16>
    %cst_129 = arith.constant dense<0.000000e+00> : vector<128x128xf32>
    %325 = tpu.matmul %323, %324, %cst_129 {dimension_numbers = #tpu.dot_dimension_numbers<[1], [0], [0], [1], [0, 0, 1, 1], [], []>} : vector<128x128xbf16>, vector<128x128xbf16>, vector<128x128xf32> -> vector<128x128xf32>
    %326 = vector.broadcast %12 : vector<1x128xf32> to vector<128x128xf32>
    %327 = arith.mulf %311, %326 : vector<128x128xf32>
    %328 = arith.addf %231, %327 : vector<128x128xf32>
    %c0_130 = arith.constant 0 : index
    %c2_131 = arith.constant 2 : index
    %c0_132 = arith.constant 0 : index
    %c0_133 = arith.constant 0 : index
    %329 = vector.load %arg18[%c0_130, %c2_131, %c0_132, %c0_133] : memref<1x4x128x128xf32, #tpu.memory_space<vmem>>, vector<1x1x128x128xf32>
    %330 = vector.shape_cast %329 : vector<1x1x128x128xf32> to vector<128x128xf32>
    %331 = vector.shape_cast %328 : vector<128x128xf32> to vector<1x1x128x128xf32>
    tpu.vector_store %arg18[%c0_130, %c2_131, %c0_132, %c0_133], %331 {strides = array<i32>} : memref<1x4x128x128xf32, #tpu.memory_space<vmem>>, vector<1x1x128x128xf32>,
    %332 = vector.broadcast %13 : vector<1x128xf32> to vector<128x128xf32>
    %333 = arith.mulf %325, %332 : vector<128x128xf32>
    %334 = arith.addf %233, %333 : vector<128x128xf32>
    %c0_134 = arith.constant 0 : index
    %c2_135 = arith.constant 2 : index
    %c0_136 = arith.constant 0 : index
    %c0_137 = arith.constant 0 : index
    %335 = vector.load %arg19[%c0_134, %c2_135, %c0_136, %c0_137] : memref<1x4x128x128xf32, #tpu.memory_space<vmem>>, vector<1x1x128x128xf32>
    %336 = vector.shape_cast %335 : vector<1x1x128x128xf32> to vector<128x128xf32>
    %337 = vector.shape_cast %334 : vector<128x128xf32> to vector<1x1x128x128xf32>
    tpu.vector_store %arg19[%c0_134, %c2_135, %c0_136, %c0_137], %337 {strides = array<i32>} : memref<1x4x128x128xf32, #tpu.memory_space<vmem>>, vector<1x1x128x128xf32>,
    %c0_138 = arith.constant 0 : index
    %c3 = arith.constant 3 : index
    %c0_139 = arith.constant 0 : index
    %c0_140 = arith.constant 0 : index
    %338 = vector.load %arg2[%c0_138, %c3, %c0_139, %c0_140] : memref<1x4x128x128xf32, #tpu.memory_space<vmem>>, vector<1x1x128x128xf32>
    %339 = vector.shape_cast %338 : vector<1x1x128x128xf32> to vector<128x128xf32>
    %c0_141 = arith.constant 0 : index
    %c3_142 = arith.constant 3 : index
    %c0_143 = arith.constant 0 : index
    %c0_144 = arith.constant 0 : index
    %340 = vector.load %arg3[%c0_141, %c3_142, %c0_143, %c0_144] : memref<1x4x128x128xf32, #tpu.memory_space<vmem>>, vector<1x1x128x128xf32>
    %341 = vector.shape_cast %340 : vector<1x1x128x128xf32> to vector<128x128xf32>
    %cst_145 = arith.constant dense<0.000000e+00> : vector<128xf32>
    %342 = vector.multi_reduction <add>, %339, %cst_145 [0] : vector<128x128xf32> to vector<128xf32>
    %343 = vector.shape_cast %342 : vector<128xf32> to vector<1x128xf32>
    %cst_146 = arith.constant 1.280000e+02 : f32
    %344 = vector.broadcast %cst_146 : f32 to vector<1x128xf32>
    %345 = arith.divf %343, %344 : vector<1x128xf32>
    %346 = arith.mulf %339, %339 : vector<128x128xf32>
    %cst_147 = arith.constant dense<0.000000e+00> : vector<128xf32>
    %347 = vector.multi_reduction <add>, %346, %cst_147 [0] : vector<128x128xf32> to vector<128xf32>
    %348 = vector.shape_cast %347 : vector<128xf32> to vector<1x128xf32>
    %cst_148 = arith.constant 1.280000e+02 : f32
    %349 = vector.broadcast %cst_148 : f32 to vector<1x128xf32>
    %350 = arith.divf %348, %349 : vector<1x128xf32>
    %351 = arith.mulf %345, %345 : vector<1x128xf32>
    %352 = arith.subf %350, %351 : vector<1x128xf32>
    %353 = vector.broadcast %345 : vector<1x128xf32> to vector<128x128xf32>
    %354 = arith.subf %339, %353 : vector<128x128xf32>
    %cst_149 = arith.constant 9.99999974E-6 : f32
    %355 = vector.broadcast %cst_149 : f32 to vector<1x128xf32>
    %356 = arith.addf %352, %355 : vector<1x128xf32>
    %357 = math.rsqrt %356 : vector<1x128xf32>
    %358 = vector.broadcast %357 : vector<1x128xf32> to vector<128x128xf32>
    %359 = arith.mulf %354, %358 : vector<128x128xf32>
    %360 = vector.broadcast %0 : vector<128x1xf32> to vector<128x128xf32>
    %361 = arith.mulf %359, %360 : vector<128x128xf32>
    %362 = vector.broadcast %1 : vector<128x1xf32> to vector<128x128xf32>
    %363 = arith.addf %361, %362 : vector<128x128xf32>
    %cst_150 = arith.constant dense<0.000000e+00> : vector<128xf32>
    %364 = vector.multi_reduction <add>, %341, %cst_150 [0] : vector<128x128xf32> to vector<128xf32>
    %365 = vector.shape_cast %364 : vector<128xf32> to vector<1x128xf32>
    %cst_151 = arith.constant 1.280000e+02 : f32
    %366 = vector.broadcast %cst_151 : f32 to vector<1x128xf32>
    %367 = arith.divf %365, %366 : vector<1x128xf32>
    %368 = arith.mulf %341, %341 : vector<128x128xf32>
    %cst_152 = arith.constant dense<0.000000e+00> : vector<128xf32>
    %369 = vector.multi_reduction <add>, %368, %cst_152 [0] : vector<128x128xf32> to vector<128xf32>
    %370 = vector.shape_cast %369 : vector<128xf32> to vector<1x128xf32>
    %cst_153 = arith.constant 1.280000e+02 : f32
    %371 = vector.broadcast %cst_153 : f32 to vector<1x128xf32>
    %372 = arith.divf %370, %371 : vector<1x128xf32>
    %373 = arith.mulf %367, %367 : vector<1x128xf32>
    %374 = arith.subf %372, %373 : vector<1x128xf32>
    %375 = vector.broadcast %367 : vector<1x128xf32> to vector<128x128xf32>
    %376 = arith.subf %341, %375 : vector<128x128xf32>
    %cst_154 = arith.constant 9.99999974E-6 : f32
    %377 = vector.broadcast %cst_154 : f32 to vector<1x128xf32>
    %378 = arith.addf %374, %377 : vector<1x128xf32>
    %379 = math.rsqrt %378 : vector<1x128xf32>
    %380 = vector.broadcast %379 : vector<1x128xf32> to vector<128x128xf32>
    %381 = arith.mulf %376, %380 : vector<128x128xf32>
    %382 = vector.broadcast %2 : vector<128x1xf32> to vector<128x128xf32>
    %383 = arith.mulf %381, %382 : vector<128x128xf32>
    %384 = vector.broadcast %3 : vector<128x1xf32> to vector<128x128xf32>
    %385 = arith.addf %383, %384 : vector<128x128xf32>
    %386 = arith.truncf %363 : vector<128x128xf32> to vector<128x128xbf16>
    %cst_155 = arith.constant dense<0.000000e+00> : vector<128x128xf32>
    %387 = tpu.matmul %386, %4, %cst_155 {dimension_numbers = #tpu.dot_dimension_numbers<[1], [0], [0], [1], [0, 0, 1, 1], [], []>} : vector<128x128xbf16>, vector<128x128xbf16>, vector<128x128xf32> -> vector<128x128xf32>
    %388 = vector.broadcast %8 : vector<1x128xf32> to vector<128x128xf32>
    %389 = arith.addf %387, %388 : vector<128x128xf32>
    %cst_156 = arith.constant 0.0883883461 : f32
    %390 = vector.broadcast %cst_156 : f32 to vector<128x128xf32>
    %391 = arith.mulf %389, %390 : vector<128x128xf32>
    %392 = arith.truncf %385 : vector<128x128xf32> to vector<128x128xbf16>
    %cst_157 = arith.constant dense<0.000000e+00> : vector<128x128xf32>
    %393 = tpu.matmul %392, %5, %cst_157 {dimension_numbers = #tpu.dot_dimension_numbers<[1], [0], [0], [1], [0, 0, 1, 1], [], []>} : vector<128x128xbf16>, vector<128x128xbf16>, vector<128x128xf32> -> vector<128x128xf32>
    %394 = vector.broadcast %9 : vector<1x128xf32> to vector<128x128xf32>
    %395 = arith.addf %393, %394 : vector<128x128xf32>
    %396 = arith.truncf %339 : vector<128x128xf32> to vector<128x128xbf16>
    %cst_158 = arith.constant dense<0.000000e+00> : vector<128x128xf32>
    %397 = tpu.matmul %396, %6, %cst_158 {dimension_numbers = #tpu.dot_dimension_numbers<[1], [0], [0], [1], [0, 0, 1, 1], [], []>} : vector<128x128xbf16>, vector<128x128xbf16>, vector<128x128xf32> -> vector<128x128xf32>
    %398 = vector.broadcast %10 : vector<1x128xf32> to vector<128x128xf32>
    %399 = arith.addf %397, %398 : vector<128x128xf32>
    %400 = arith.truncf %341 : vector<128x128xf32> to vector<128x128xbf16>
    %cst_159 = arith.constant dense<0.000000e+00> : vector<128x128xf32>
    %401 = tpu.matmul %400, %7, %cst_159 {dimension_numbers = #tpu.dot_dimension_numbers<[1], [0], [0], [1], [0, 0, 1, 1], [], []>} : vector<128x128xbf16>, vector<128x128xbf16>, vector<128x128xf32> -> vector<128x128xf32>
    %402 = vector.broadcast %11 : vector<1x128xf32> to vector<128x128xf32>
    %403 = arith.addf %401, %402 : vector<128x128xf32>
    %404 = arith.truncf %391 : vector<128x128xf32> to vector<128x128xbf16>
    %405 = arith.truncf %395 : vector<128x128xf32> to vector<128x128xbf16>
    %cst_160 = arith.constant dense<0.000000e+00> : vector<128x128xf32>
    %406 = tpu.matmul %404, %405, %cst_160 {dimension_numbers = #tpu.dot_dimension_numbers<[1], [1], [0], [0], [0, 0, 1, 0], [], []>} : vector<128x128xbf16>, vector<128x128xbf16>, vector<128x128xf32> -> vector<128x128xf32>
    %cst_161 = arith.constant dense<0xFF800000> : vector<128xf32>
    %407 = vector.multi_reduction <maximumf>, %406, %cst_161 [1] : vector<128x128xf32> to vector<128xf32>
    %408 = vector.shape_cast %407 : vector<128xf32> to vector<128x1xf32>
    %409 = vector.broadcast %408 : vector<128x1xf32> to vector<128x128xf32>
    %410 = arith.subf %406, %409 : vector<128x128xf32>
    %411 = math.exp %410 : vector<128x128xf32>
    %cst_162 = arith.constant dense<0.000000e+00> : vector<128xf32>
    %412 = vector.multi_reduction <add>, %411, %cst_162 [1] : vector<128x128xf32> to vector<128xf32>
    %413 = vector.shape_cast %412 : vector<128xf32> to vector<128x1xf32>
    %414 = tpu.reciprocal %413 {approx = true} : vector<128x1xf32> -> vector<128x1xf32>
    %415 = vector.broadcast %414 : vector<128x1xf32> to vector<128x128xf32>
    %416 = arith.mulf %411, %415 : vector<128x128xf32>
    %417 = arith.truncf %416 : vector<128x128xf32> to vector<128x128xbf16>
    %418 = arith.truncf %403 : vector<128x128xf32> to vector<128x128xbf16>
    %cst_163 = arith.constant dense<0.000000e+00> : vector<128x128xf32>
    %419 = tpu.matmul %417, %418, %cst_163 {dimension_numbers = #tpu.dot_dimension_numbers<[1], [0], [0], [1], [0, 0, 1, 1], [], []>} : vector<128x128xbf16>, vector<128x128xbf16>, vector<128x128xf32> -> vector<128x128xf32>
    %420 = tpu.transpose %406, [1, 0] : vector<128x128xf32> -> vector<128x128xf32>
    %cst_164 = arith.constant dense<0xFF800000> : vector<128xf32>
    %421 = vector.multi_reduction <maximumf>, %420, %cst_164 [1] : vector<128x128xf32> to vector<128xf32>
    %422 = vector.shape_cast %421 : vector<128xf32> to vector<128x1xf32>
    %423 = vector.broadcast %422 : vector<128x1xf32> to vector<128x128xf32>
    %424 = arith.subf %420, %423 : vector<128x128xf32>
    %425 = math.exp %424 : vector<128x128xf32>
    %cst_165 = arith.constant dense<0.000000e+00> : vector<128xf32>
    %426 = vector.multi_reduction <add>, %425, %cst_165 [1] : vector<128x128xf32> to vector<128xf32>
    %427 = vector.shape_cast %426 : vector<128xf32> to vector<128x1xf32>
    %428 = tpu.reciprocal %427 {approx = true} : vector<128x1xf32> -> vector<128x1xf32>
    %429 = vector.broadcast %428 : vector<128x1xf32> to vector<128x128xf32>
    %430 = arith.mulf %425, %429 : vector<128x128xf32>
    %431 = arith.truncf %430 : vector<128x128xf32> to vector<128x128xbf16>
    %432 = arith.truncf %399 : vector<128x128xf32> to vector<128x128xbf16>
    %cst_166 = arith.constant dense<0.000000e+00> : vector<128x128xf32>
    %433 = tpu.matmul %431, %432, %cst_166 {dimension_numbers = #tpu.dot_dimension_numbers<[1], [0], [0], [1], [0, 0, 1, 1], [], []>} : vector<128x128xbf16>, vector<128x128xbf16>, vector<128x128xf32> -> vector<128x128xf32>
    %434 = vector.broadcast %12 : vector<1x128xf32> to vector<128x128xf32>
    %435 = arith.mulf %419, %434 : vector<128x128xf32>
    %436 = arith.addf %339, %435 : vector<128x128xf32>
    %c0_167 = arith.constant 0 : index
    %c3_168 = arith.constant 3 : index
    %c0_169 = arith.constant 0 : index
    %c0_170 = arith.constant 0 : index
    %437 = vector.load %arg18[%c0_167, %c3_168, %c0_169, %c0_170] : memref<1x4x128x128xf32, #tpu.memory_space<vmem>>, vector<1x1x128x128xf32>
    %438 = vector.shape_cast %437 : vector<1x1x128x128xf32> to vector<128x128xf32>
    %439 = vector.shape_cast %436 : vector<128x128xf32> to vector<1x1x128x128xf32>
    tpu.vector_store %arg18[%c0_167, %c3_168, %c0_169, %c0_170], %439 {strides = array<i32>} : memref<1x4x128x128xf32, #tpu.memory_space<vmem>>, vector<1x1x128x128xf32>,
    %440 = vector.broadcast %13 : vector<1x128xf32> to vector<128x128xf32>
    %441 = arith.mulf %433, %440 : vector<128x128xf32>
    %442 = arith.addf %341, %441 : vector<128x128xf32>
    %c0_171 = arith.constant 0 : index
    %c3_172 = arith.constant 3 : index
    %c0_173 = arith.constant 0 : index
    %c0_174 = arith.constant 0 : index
    %443 = vector.load %arg19[%c0_171, %c3_172, %c0_173, %c0_174] : memref<1x4x128x128xf32, #tpu.memory_space<vmem>>, vector<1x1x128x128xf32>
    %444 = vector.shape_cast %443 : vector<1x1x128x128xf32> to vector<128x128xf32>
    %445 = vector.shape_cast %442 : vector<128x128xf32> to vector<1x1x128x128xf32>
    tpu.vector_store %arg19[%c0_171, %c3_172, %c0_173, %c0_174], %445 {strides = array<i32>} : memref<1x4x128x128xf32, #tpu.memory_space<vmem>>, vector<1x1x128x128xf32>,
    return
  }
  func.func @transform_0(%arg0: i32, %arg1: i32) -> (i32, i32, i32, i32) {
    %c0_i32 = arith.constant 0 : i32
    %c0_i32_0 = arith.constant 0 : i32
    %c0_i32_1 = arith.constant 0 : i32
    return %arg0, %arg1, %c0_i32, %c0_i32_0 : i32, i32, i32, i32
  }
  func.func @transform_1(%arg0: i32, %arg1: i32) -> (i32, i32, i32, i32) {
    %c0_i32 = arith.constant 0 : i32
    %c0_i32_0 = arith.constant 0 : i32
    %c0_i32_1 = arith.constant 0 : i32
    return %arg0, %arg1, %c0_i32, %c0_i32_0 : i32, i32, i32, i32
  }
  func.func @transform_2(%arg0: i32, %arg1: i32) -> (i32, i32) {
    %c0_i32 = arith.constant 0 : i32
    %c0_i32_0 = arith.constant 0 : i32
    %c0_i32_1 = arith.constant 0 : i32
    return %c0_i32, %c0_i32_0 : i32, i32
  }
  func.func @transform_3(%arg0: i32, %arg1: i32) -> (i32, i32) {
    %c0_i32 = arith.constant 0 : i32
    %c0_i32_0 = arith.constant 0 : i32
    %c0_i32_1 = arith.constant 0 : i32
    return %c0_i32, %c0_i32_0 : i32, i32
  }
  func.func @transform_4(%arg0: i32, %arg1: i32) -> (i32, i32) {
    %c0_i32 = arith.constant 0 : i32
    %c0_i32_0 = arith.constant 0 : i32
    %c0_i32_1 = arith.constant 0 : i32
    return %c0_i32, %c0_i32_0 : i32, i32
  }
  func.func @transform_5(%arg0: i32, %arg1: i32) -> (i32, i32) {
    %c0_i32 = arith.constant 0 : i32
    %c0_i32_0 = arith.constant 0 : i32
    %c0_i32_1 = arith.constant 0 : i32
    return %c0_i32, %c0_i32_0 : i32, i32
  }
  func.func @transform_6(%arg0: i32, %arg1: i32) -> (i32, i32) {
    %c0_i32 = arith.constant 0 : i32
    %c0_i32_0 = arith.constant 0 : i32
    %c0_i32_1 = arith.constant 0 : i32
    return %c0_i32, %c0_i32_0 : i32, i32
  }
  func.func @transform_7(%arg0: i32, %arg1: i32) -> (i32, i32) {
    %c0_i32 = arith.constant 0 : i32
    %c0_i32_0 = arith.constant 0 : i32
    %c0_i32_1 = arith.constant 0 : i32
    return %c0_i32, %c0_i32_0 : i32, i32
  }
  func.func @transform_8(%arg0: i32, %arg1: i32) -> (i32, i32) {
    %c0_i32 = arith.constant 0 : i32
    %c0_i32_0 = arith.constant 0 : i32
    %c0_i32_1 = arith.constant 0 : i32
    return %c0_i32, %c0_i32_0 : i32, i32
  }
  func.func @transform_9(%arg0: i32, %arg1: i32) -> (i32, i32) {
    %c0_i32 = arith.constant 0 : i32
    %c0_i32_0 = arith.constant 0 : i32
    %c0_i32_1 = arith.constant 0 : i32
    return %c0_i32, %c0_i32_0 : i32, i32
  }
  func.func @transform_10(%arg0: i32, %arg1: i32) -> (i32, i32) {
    %c0_i32 = arith.constant 0 : i32
    %c0_i32_0 = arith.constant 0 : i32
    %c0_i32_1 = arith.constant 0 : i32
    return %c0_i32, %c0_i32_0 : i32, i32
  }
  func.func @transform_11(%arg0: i32, %arg1: i32) -> (i32, i32) {
    %c0_i32 = arith.constant 0 : i32
    %c0_i32_0 = arith.constant 0 : i32
    %c0_i32_1 = arith.constant 0 : i32
    return %c0_i32, %c0_i32_0 : i32, i32
  }
  func.func @transform_12(%arg0: i32, %arg1: i32) -> (i32, i32) {
    %c0_i32 = arith.constant 0 : i32
    %c0_i32_0 = arith.constant 0 : i32
    %c0_i32_1 = arith.constant 0 : i32
    return %c0_i32, %c0_i32_0 : i32, i32
  }
  func.func @transform_13(%arg0: i32, %arg1: i32) -> (i32, i32) {
    %c0_i32 = arith.constant 0 : i32
    %c0_i32_0 = arith.constant 0 : i32
    %c0_i32_1 = arith.constant 0 : i32
    return %c0_i32, %c0_i32_0 : i32, i32
  }
  func.func @transform_14(%arg0: i32, %arg1: i32) -> (i32, i32) {
    %c0_i32 = arith.constant 0 : i32
    %c0_i32_0 = arith.constant 0 : i32
    %c0_i32_1 = arith.constant 0 : i32
    return %c0_i32, %c0_i32_0 : i32, i32
  }
  func.func @transform_15(%arg0: i32, %arg1: i32) -> (i32, i32) {
    %c0_i32 = arith.constant 0 : i32
    %c0_i32_0 = arith.constant 0 : i32
    %c0_i32_1 = arith.constant 0 : i32
    return %c0_i32, %c0_i32_0 : i32, i32
  }
  func.func @transform_16(%arg0: i32, %arg1: i32) -> (i32, i32, i32, i32) {
    %c0_i32 = arith.constant 0 : i32
    %c0_i32_0 = arith.constant 0 : i32
    %c0_i32_1 = arith.constant 0 : i32
    return %arg0, %arg1, %c0_i32, %c0_i32_0 : i32, i32, i32, i32
  }
  func.func @transform_17(%arg0: i32, %arg1: i32) -> (i32, i32, i32, i32) {
    %c0_i32 = arith.constant 0 : i32
    %c0_i32_0 = arith.constant 0 : i32
    %c0_i32_1 = arith.constant 0 : i32
    return %arg0, %arg1, %c0_i32, %c0_i32_0 : i32, i32, i32, i32
  }
}

</mosaic_0001>

<bundles_post_ra>
// kernel: scam_forward.1
= control target key start
LH: loop header
LB: loop body
LE: loop exit
PB: predicated region body
PF: predicated region fallthrough
CT: control target
= control target key end

     0   :  { %s10039_s24 = smov 0   ;;  %s10041_s25 = smov 0   ;;  %s14542_s0 = inlined_call_operand.vmem [shape: f32[2,4,128,128], index: 0, kind: input, shape index: {}]   ;;  %s14543_s1 = inlined_call_operand.vmem [shape: f32[2,4,128,128], index: 1, kind: input, shape index: {}]   ;;  %s14544_s2 = inlined_call_operand.vmem [shape: f32[128,1], index: 2, kind: input, shape index: {}]   ;;  %s14545_s3 = inlined_call_operand.vmem [shape: f32[128,1], index: 3, kind: input, shape index: {}]   ;;  %s14546_s4 = inlined_call_operand.vmem [shape: f32[128,1], index: 4, kind: input, shape index: {}]   ;;  %s14547_s5 = inlined_call_operand.vmem [shape: f32[128,1], index: 5, kind: input, shape index: {}]   ;;  %s14548_s6 = inlined_call_operand.vmem [shape: bf16[128,128], index: 6, kind: input, shape index: {}]   ;;  %s14549_s7 = inlined_call_operand.vmem [shape: f32[1,128], index: 7, kind: input, shape index: {}]   ;;  %s14550_s8 = inlined_call_operand.vmem [shape: bf16[128,128], index: 8, kind: input, shape index: {}]   ;;  %s14551_s9 = inlined_call_operand.vmem [shape: f32[1,128], index: 9, kind: input, shape index: {}]   ;;  %s14552_s10 = inlined_call_operand.vmem [shape: bf16[128,128], index: 10, kind: input, shape index: {}]   ;;  %s14553_s11 = inlined_call_operand.vmem [shape: f32[1,128], index: 11, kind: input, shape index: {}]   ;;  %s14554_s12 = inlined_call_operand.vmem [shape: bf16[128,128], index: 12, kind: input, shape index: {}]   ;;  %s14555_s13 = inlined_call_operand.vmem [shape: f32[1,128], index: 13, kind: input, shape index: {}]   ;;  %s14556_s14 = inlined_call_operand.vmem [shape: f32[1,128], index: 14, kind: input, shape index: {}]   ;;  %s14557_s15 = inlined_call_operand.vmem [shape: f32[1,128], index: 15, kind: input, shape index: {}]   ;;  %s14558_s16 = inlined_call_operand.vmem [shape: f32[2,4,128,128], index: 16, kind: output, shape index: {0}]   ;;  %s14559_s17 = inlined_call_operand.vmem [shape: f32[2,4,128,128], index: 17, kind: output, shape index: {1}]  }
   0x1   :  { %14707 = sst [smem:[#allocation82_spill]] %s14542_s0  ;;  %s10043_s26 = smov 0  }
   0x2   :  { %14708 = sst [smem:[#allocation83_spill]] %s14543_s1 }
   0x3 LB: > { %s40_s27 = sadd.s32 1, %s9942_s25  ;;  %p7447_p0 = scmp.ge.s32.totalorder %s9946_s26, 1  ;;  %s9946_s26 = sphi %s10043_s26, %s28_s26   ;;  %s9942_s25 = sphi %s10041_s25, %s14961_s25   ;;  %s9938_s24 = sphi %s10039_s24, %s14960_s24  }
   0x4   : > { %p42_p1 = scmp.ge.s32.totalorder %s40_s27, 2  ;;  %p532_p2 = scmp.lt.s32.totalorder %s9946_s26, 3 }
   0x6   : > { %s14963_s27 = smov (%p42_p1, %s40_s27), 0  ;;  %p533_p3 = pnand %p7447_p0, %p532_p2 }
   0x8   : > { %536 = sbr.rel (%p533_p3) target bundleno = 4334 (0x10ee), region = 84 }
   0xd   : > { %v693_v0 = vld [vmem:[%s14546_s4 + $0x10] sm:$0xff]  ;;  %v691_v1 = vld [vmem:[%s14546_s4] sm:$0xff]  ;;  %v9948_v2 = vmov 0   ;;  %v694_v3 = vld [vmem:[%s14546_s4 + $0x18] sm:$0xff]  ;;  %p615_p4 = scmp.lt.s32.totalorder %s9938_s24, 1  ;;  %s14709_s23 = sld [smem:[#allocation83_spill]] }
   0xe   : > { %9062 = vset.pattern.permute.xlu1 %v9948_v2  ;;  %9061 = vset.pattern.permute.xlu0 %v9948_v2  ;;  %v692_v4 = vld [vmem:[%s14546_s4 + $0x8] sm:$0xff]  ;;  %v707_v6 = vld [vmem:[%s14547_s5] sm:$0xff]  ;;  %v710_v7 = vld [vmem:[%s14547_s5 + $0x18] sm:$0xff]  ;;  %s14710_s19 = sld [smem:[#allocation82_spill]] }
   0xf   : > { %1222 = vperm.xlu1 %9062, %v693_v0   ;;  %1212 = vperm.xlu0 %9061, %v691_v1   ;;  %v708_v5 = vld [vmem:[%s14547_s5 + $0x8] sm:$0xff]  ;;  %v709_v8 = vld [vmem:[%s14547_s5 + $0x10] sm:$0xff]  ;;  %v695_v10 = vld [vmem:[%s14546_s4 + $0x20] sm:$0xff]  ;;  %s14965_s24 = smov (!%p615_p4, %s9938_s24), 1 }
  0x10   : > { %v696_v9 = vld [vmem:[%s14546_s4 + $0x28] sm:$0xff]  ;;  %v9063_v11 = vld [vmem:[%s14550_s8 + $0x38] sm:$0xff]   ;;  %v697_v13 = vld [vmem:[%s14546_s4 + $0x30] sm:$0xff]  ;;  %s10148_s30 = sshll.u32 %s14965_s24, 9 }
  0x11   : > { %v698_v12 = vld [vmem:[%s14546_s4 + $0x38] sm:$0xff]  ;;  %8172 = vmatprep.subr.bf16.mxu1 %v9063_v11  ;;  %v9064_v14 = vld [vmem:[%s14550_s8 + $0x30] sm:$0xff]   ;;  %v712_v15 = vld [vmem:[%s14547_s5 + $0x28] sm:$0xff]  ;;  %s11836_s22 = scalar_lea.vmem %s14558_s16, %s10148_s30  ;;  %s11911_s18 = scalar_lea.vmem %s14559_s17, %s10148_s30 }
  0x12   : > { %8173 = vmatpush3.bf16.msra.mxu1 %v9063_v11  ;;  %v711_v16 = vld [vmem:[%s14547_s5 + $0x20] sm:$0xff]  ;;  %v9065_v17 = vld [vmem:[%s14550_s8 + $0x28] sm:$0xff]   ;;  %v714_v18 = vld [vmem:[%s14547_s5 + $0x38] sm:$0xff] }
  0x13   : > { %1227 = vperm.xlu1 %9062, %v694_v3   ;;  %1217 = vperm.xlu0 %9061, %v692_v4   ;;  %v713_v19 = vld [vmem:[%s14547_s5 + $0x30] sm:$0xff]  ;;  %v9066_v20 = vld [vmem:[%s14550_s8 + $0x20] sm:$0xff]   ;;  %v700_v21 = vld [vmem:[%s14546_s4 + $0x48] sm:$0xff]  ;;  %s10160_s28 = scalar_lea.vmem %s14709_s23, %s10148_s30 }
  0x14   : > { %8174 = vmatprep.subr.bf16.mxu1 %v9064_v14  ;;  %v699_v22 = vld [vmem:[%s14546_s4 + $0x40] sm:$0xff]  ;;  %v702_v23 = vld [vmem:[%s14546_s4 + $0x58] sm:$0xff]  ;;  %v701_v24 = vld [vmem:[%s14546_s4 + $0x50] sm:$0xff]  ;;  %s10385_s1 = scalar_lea.vmem %s14710_s19, %s10148_s30 }
  0x15   : > { %v716_v25 = vld [vmem:[%s14547_s5 + $0x48] sm:$0xff]  ;;  %v715_v26 = vld [vmem:[%s14547_s5 + $0x40] sm:$0xff]  ;;  %v718_v27 = vld [vmem:[%s14547_s5 + $0x58] sm:$0xff] }
  0x16   : > { %8175 = vmatpush3.bf16.msra.mxu1 %v9064_v14  ;;  %v9067_v28 = vld [vmem:[%s14550_s8 + $0x18] sm:$0xff]   ;;  %v717_v29 = vld [vmem:[%s14547_s5 + $0x50] sm:$0xff]  ;;  %v9069_v31 = vld [vmem:[%s14550_s8 + $0x8] sm:$0xff]  }
  0x17   : > { %1313 = vperm.xlu1 %9062, %v708_v5   ;;  %1308 = vperm.xlu0 %9061, %v707_v6   ;;  %v9068_v30 = vld [vmem:[%s14550_s8 + $0x10] sm:$0xff]   ;;  %v704_v32 = vld [vmem:[%s14546_s4 + $0x68] sm:$0xff]  ;;  %v703_v33 = vld [vmem:[%s14546_s4 + $0x60] sm:$0xff] }
  0x18   : > { %8176 = vmatprep.subr.bf16.mxu1 %v9065_v17  ;;  %v706_v34 = vld [vmem:[%s14546_s4 + $0x78] sm:$0xff]  ;;  %v9070_v35 = vld [vmem:[%s14550_s8] sm:$0xff]   ;;  %v10178_v37 = vld [vmem:[%s10160_s28 + $0x8] sm:$0xff] }
  0x19   : > { %v10175_v36 = vld [vmem:[%s10160_s28] sm:$0xff]  ;;  %v705_v38 = vld [vmem:[%s14546_s4 + $0x70] sm:$0xff]  ;;  %v9071_v40 = vld [vmem:[%s14548_s6 + $0x38] sm:$0xff]  }
  0x1a   : > { %8177 = vmatpush3.bf16.msra.mxu1 %v9065_v17  ;;  %v10184_v39 = vld [vmem:[%s10160_s28 + $0x10] sm:$0xff]  ;;  %v10190_v41 = vld [vmem:[%s10160_s28 + $0x18] sm:$0xff]  ;;  %v1114_v42 = vadd.f32 %v10178_v37, %v10175_v36  ;;  %v720_v44 = vld [vmem:[%s14547_s5 + $0x68] sm:$0xff]  ;;  %8140 = vmatprep.subr.bf16.mxu0 %v9071_v40  ;;  %v1136_v17 = vmul.f32 %v10175_v36, %v10175_v36 }
  0x1b   : > { %1323 = vperm.xlu1 %9062, %v710_v7   ;;  %1318 = vperm.xlu0 %9061, %v709_v8   ;;  %v9072_v43 = vld [vmem:[%s14548_s6 + $0x30] sm:$0xff]   ;;  %v719_v45 = vld [vmem:[%s14547_s5 + $0x60] sm:$0xff]  ;;  %v9073_v49 = vld [vmem:[%s14548_s6 + $0x28] sm:$0xff]  }
  0x1c   : > { %8178 = vmatprep.subr.bf16.mxu1 %v9066_v20  ;;  %v1115_v46 = vadd.f32 %v1114_v42, %v10184_v39  ;;  %v10205_v47 = vld [vmem:[%s10160_s28 + $0x20] sm:$0xff]  ;;  %8141 = vmatpush3.bf16.msra.mxu0 %v9071_v40  ;;  %v10212_v50 = vld [vmem:[%s10160_s28 + $0x28] sm:$0xff]  ;;  %v722_v51 = vld [vmem:[%s14547_s5 + $0x78] sm:$0xff] }
  0x1d   : > { %8142 = vmatprep.subr.bf16.mxu0 %v9072_v43  ;;  %v721_v52 = vld [vmem:[%s14547_s5 + $0x70] sm:$0xff]  ;;  %v9074_v56 = vld [vmem:[%s14548_s6 + $0x20] sm:$0xff]   ;;  %v10229_v57 = vld [vmem:[%s10160_s28 + $0x38] sm:$0xff] }
  0x1e   : > { %8179 = vmatpush3.bf16.msra.mxu1 %v9066_v20  ;;  %v1116_v48 = vadd.f32 %v1115_v46, %v10190_v41  ;;  %v10222_v54 = vld [vmem:[%s10160_s28 + $0x30] sm:$0xff]  ;;  %v660_v58 = vld [vmem:[%s14544_s2 + $0x8] sm:$0xff]  ;;  %v659_v59 = vld [vmem:[%s14544_s2] sm:$0xff] }
  0x1f   : > { %1237 = vperm.xlu1 %9062, %v696_v9   ;;  %1232 = vperm.xlu0 %9061, %v695_v10   ;;  %v10239_v61 = vld [vmem:[%s10160_s28 + $0x40] sm:$0xff]  ;;  %v9075_v63 = vld [vmem:[%s14548_s6 + $0x18] sm:$0xff]   ;;  %v10246_v0 = vld [vmem:[%s10160_s28 + $0x48] sm:$0xff] }
  0x20   : > { %8180 = vmatprep.subr.bf16.mxu1 %v9067_v28  ;;  %v1117_v53 = vadd.f32 %v1116_v48, %v10205_v47  ;;  %8143 = vmatpush3.bf16.msra.mxu0 %v9072_v43  ;;  %v662_v1 = vld [vmem:[%s14544_s2 + $0x18] sm:$0xff]  ;;  %v661_v2 = vld [vmem:[%s14544_s2 + $0x10] sm:$0xff]  ;;  %v676_v6 = vld [vmem:[%s14545_s3 + $0x8] sm:$0xff]  ;;  %v1144_v46 = vmul.f32 %v10239_v61, %v10239_v61 }
  0x21   : > { %8144 = vmatprep.subr.bf16.mxu0 %v9073_v49  ;;  %v10256_v4 = vld [vmem:[%s10160_s28 + $0x50] sm:$0xff]  ;;  %v675_v7 = vld [vmem:[%s14545_s3] sm:$0xff]  ;;  %v10266_v8 = vld [vmem:[%s10160_s28 + $0x58] sm:$0xff] }
  0x22   : > { %8181 = vmatpush3.bf16.msra.mxu1 %v9067_v28  ;;  %v1118_v55 = vadd.f32 %v1117_v53, %v10212_v50  ;;  %v678_v10 = vld [vmem:[%s14545_s3 + $0x18] sm:$0xff]  ;;  %v677_v11 = vld [vmem:[%s14545_s3 + $0x10] sm:$0xff]  ;;  %v664_v14 = vld [vmem:[%s14544_s2 + $0x28] sm:$0xff]  ;;  %v1145_v53 = vmul.f32 %v10246_v0, %v10246_v0 }
  0x23   : > { %1247 = vperm.xlu1 %9062, %v698_v12   ;;  %1242 = vperm.xlu0 %9061, %v697_v13   ;;  %v10277_v13 = vld [vmem:[%s10160_s28 + $0x60] sm:$0xff]  ;;  %v666_v20 = vld [vmem:[%s14544_s2 + $0x38] sm:$0xff]  ;;  %v681_v42 = vld [vmem:[%s14545_s3 + $0x30] sm:$0xff] }
  0x24   : > { %8182 = vmatprep.subr.bf16.mxu1 %v9068_v30  ;;  %v1119_v60 = vadd.f32 %v1118_v55, %v10222_v54  ;;  %8145 = vmatpush3.bf16.msra.mxu0 %v9073_v49  ;;  %v679_v28 = vld [vmem:[%s14545_s3 + $0x20] sm:$0xff]  ;;  %v668_v49 = vld [vmem:[%s14544_s2 + $0x48] sm:$0xff] }
  0x25   : > { %8146 = vmatprep.subr.bf16.mxu0 %v9074_v56 }
  0x26   : > { %8183 = vmatpush3.bf16.msra.mxu1 %v9068_v30  ;;  %v1120_v62 = vadd.f32 %v1119_v60, %v10229_v57 }
  0x27   : > { %1333 = vperm.xlu1 %9062, %v712_v15   ;;  %1328 = vperm.xlu0 %9061, %v711_v16   ;;  %v663_v15 = vld [vmem:[%s14544_s2 + $0x20] sm:$0xff] }
  0x28   : > { %8184 = vmatprep.subr.bf16.mxu1 %v9069_v31  ;;  %v1121_v3 = vadd.f32 %v1120_v62, %v10239_v61  ;;  %8147 = vmatpush3.bf16.msra.mxu0 %v9074_v56  ;;  %v9076_v56 = vld [vmem:[%s14548_s6 + $0x10] sm:$0xff]   ;;  %v670_v62 = vld [vmem:[%s14544_s2 + $0x58] sm:$0xff] }
  0x29   : > { %8148 = vmatprep.subr.bf16.mxu0 %v9075_v63 }
  0x2a   : > { %8185 = vmatpush3.bf16.msra.mxu1 %v9069_v31  ;;  %v1122_v5 = vadd.f32 %v1121_v3, %v10246_v0 }
  0x2b   : > { %1343 = vperm.xlu1 %9062, %v714_v18   ;;  %1338 = vperm.xlu0 %9061, %v713_v19   ;;  %v1137_v18 = vmul.f32 %v10178_v37, %v10178_v37  ;;  %v10291_v19 = vld [vmem:[%s10160_s28 + $0x68] sm:$0xff] }
  0x2c   : > { %8186 = vmatprep.subr.bf16.mxu1 %v9070_v35  ;;  %v1123_v9 = vadd.f32 %v1122_v5, %v10256_v4  ;;  %8149 = vmatpush3.bf16.msra.mxu0 %v9075_v63  ;;  %v669_v63 = vld [vmem:[%s14544_s2 + $0x50] sm:$0xff]  ;;  %v9078_v5 = vld [vmem:[%s14548_s6] sm:$0xff]  }
  0x2d   : > { %8150 = vmatprep.subr.bf16.mxu0 %v9076_v56 }
  0x2e   : > { %8187 = vmatpush3.bf16.msra.mxu1 %v9070_v35  ;;  %v1124_v12 = vadd.f32 %v1123_v9, %v10266_v8  ;;  %v682_v35 = vld [vmem:[%s14545_s3 + $0x38] sm:$0xff]  ;;  %v684_v9 = vld [vmem:[%s14545_s3 + $0x48] sm:$0xff] }
  0x2f   : > { %1257 = vperm.xlu1 %9062, %v700_v21   ;;  %1252 = vperm.xlu0 %9061, %v699_v22   ;;  %v665_v21 = vld [vmem:[%s14544_s2 + $0x30] sm:$0xff]  ;;  %v1138_v22 = vmul.f32 %v10184_v39, %v10184_v39 }
  0x30   : > { %v1125_v16 = vadd.f32 %v1124_v12, %v10277_v13  ;;  %8151 = vmatpush3.bf16.msra.mxu0 %v9076_v56  ;;  %v1149_v12 = vmul.f32 %v10291_v19, %v10291_v19  ;;  %v7558_v56 = vld [vmem:[%s10385_s1 + $0x100] sm:$0xff] }
  0x33   : > { %1267 = vperm.xlu1 %9062, %v702_v23   ;;  %1262 = vperm.xlu0 %9061, %v701_v24   ;;  %v1126_v23 = vadd.f32 %v1125_v16, %v10291_v19  ;;  %v1139_v24 = vmul.f32 %v10190_v41, %v10190_v41 }
  0x37   : > { %1353 = vperm.xlu1 %9062, %v716_v25   ;;  %1348 = vperm.xlu0 %9061, %v715_v26   ;;  %v1152_v25 = vadd.f32 %v1137_v18, %v1136_v17  ;;  %v10305_v26 = vld [vmem:[%s10160_s28 + $0x70] sm:$0xff]  ;;  %v686_v17 = vld [vmem:[%s14545_s3 + $0x58] sm:$0xff] }
  0x38   : > { %v1127_v31 = vadd.f32 %v1126_v23, %v10305_v26  ;;  %v685_v18 = vld [vmem:[%s14545_s3 + $0x50] sm:$0xff] }
  0x39   : > { %v1153_v30 = vadd.f32 %v1152_v25, %v1138_v22  ;;  %v671_v25 = vld [vmem:[%s14544_s2 + $0x60] sm:$0xff] }
  0x3b   : > { %1363 = vperm.xlu1 %9062, %v718_v27   ;;  %1358 = vperm.xlu0 %9061, %v717_v29   ;;  %v680_v27 = vld [vmem:[%s14545_s3 + $0x28] sm:$0xff]  ;;  %v1140_v29 = vmul.f32 %v10205_v47, %v10205_v47 }
  0x3f   : > { %1277 = vperm.xlu1 %9062, %v704_v32   ;;  %1272 = vperm.xlu0 %9061, %v703_v33   ;;  %v1141_v32 = vmul.f32 %v10212_v50, %v10212_v50  ;;  %v1154_v33 = vadd.f32 %v1153_v30, %v1139_v24  ;;  %v672_v24 = vld [vmem:[%s14544_s2 + $0x68] sm:$0xff]  ;;  %v7494_v30 = vld [vmem:[%s10385_s1 + $0x80] sm:$0xff] }
  0x41   : > { %v1155_v40 = vadd.f32 %v1154_v33, %v1140_v29  ;;  %v673_v33 = vld [vmem:[%s14544_s2 + $0x70] sm:$0xff] }
  0x43   : > { %1287 = vperm.xlu1 %9062, %v706_v34   ;;  %1282 = vperm.xlu0 %9061, %v705_v38   ;;  %v10319_v34 = vld [vmem:[%s10160_s28 + $0x78] sm:$0xff]  ;;  %v1142_v38 = vmul.f32 %v10222_v54, %v10222_v54 }
  0x44   : > { %v1128_v43 = vadd.f32 %v1127_v31, %v10319_v34  ;;  %v7495_v31 = vld [vmem:[%s10385_s1 + $0x88] sm:$0xff] }
  0x47   : > { %1373 = vperm.xlu1 %9062, %v720_v44   ;;  %1368 = vperm.xlu0 %9061, %v719_v45   ;;  %v1143_v44 = vmul.f32 %v10229_v57, %v10229_v57  ;;  %v1156_v45 = vadd.f32 %v1155_v40, %v1141_v32  ;;  %v674_v32 = vld [vmem:[%s14544_s2 + $0x78] sm:$0xff]  ;;  %v2855_v40 = vadd.f32 %v7495_v31, %v7494_v30 }
  0x49   : > { %v1157_v48 = vadd.f32 %v1156_v45, %v1142_v38  ;;  %v687_v45 = vld [vmem:[%s14545_s3 + $0x60] sm:$0xff] }
  0x4b   : > { %1383 = vperm.xlu1 %9062, %v722_v51   ;;  %1378 = vperm.xlu0 %9061, %v721_v52   ;;  %v667_v51 = vld [vmem:[%s14544_s2 + $0x40] sm:$0xff]  ;;  %v1129_v52 = vrot.slane %v1128_v43, 4  ;;  %v1158_v55 = vadd.f32 %v1157_v48, %v1143_v44  ;;  %v688_v44 = vld [vmem:[%s14545_s3 + $0x68] sm:$0xff] }
  0x4d   : > { %v1159_v60 = vadd.f32 %v1158_v55, %v1144_v46  ;;  %v7497_v55 = vld [vmem:[%s10385_s1 + $0x98] sm:$0xff] }
  0x4f   : > { %929 = vperm.xlu1 %9062, %v660_v58   ;;  %924 = vperm.xlu0 %9061, %v659_v59   ;;  %v9077_v58 = vld [vmem:[%s14548_s6 + $0x8] sm:$0xff]   ;;  %v1146_v59 = vmul.f32 %v10256_v4, %v10256_v4  ;;  %v1160_v3 = vadd.f32 %v1159_v60, %v1145_v53  ;;  %v689_v60 = vld [vmem:[%s14545_s3 + $0x70] sm:$0xff] }
  0x50   : > { %8152 = vmatprep.subr.bf16.mxu0 %v9077_v58 }
  0x51   : > { %8153 = vmatpush3.bf16.msra.mxu0 %v9077_v58  ;;  %v7559_v58 = vld [vmem:[%s10385_s1 + $0x108] sm:$0xff] }
  0x52   : > { %8154 = vmatprep.subr.bf16.mxu0 %v9078_v5 }
  0x53   : > { %939 = vperm.xlu1 %9062, %v662_v1   ;;  %934 = vperm.xlu0 %9061, %v661_v2   ;;  %v1130_v1 = vadd.f32 %v1129_v52, %v1128_v43  ;;  %v1147_v2 = vmul.f32 %v10266_v8, %v10266_v8  ;;  %v7496_v43 = vld [vmem:[%s10385_s1 + $0x90] sm:$0xff]  ;;  %v2878_v52 = vmul.f32 %v7495_v31, %v7495_v31 }
  0x55   : > { %8155 = vmatpush3.bf16.msra.mxu0 %v9078_v5  ;;  %v4338_v5 = vadd.f32 %v7559_v58, %v7558_v56 }
  0x57   : > { %1025 = vperm.xlu1 %9062, %v676_v6   ;;  %1020 = vperm.xlu0 %9061, %v675_v7   ;;  %v1148_v6 = vmul.f32 %v10277_v13, %v10277_v13  ;;  %v1161_v7 = vadd.f32 %v1160_v3, %v1146_v59  ;;  %v690_v59 = vld [vmem:[%s14545_s3 + $0x78] sm:$0xff] }
  0x5b   : > { %1035 = vperm.xlu1 %9062, %v678_v10   ;;  %1030 = vperm.xlu0 %9061, %v677_v11   ;;  %v683_v10 = vld [vmem:[%s14545_s3 + $0x40] sm:$0xff]  ;;  %v1131_v11 = vrot.slane %v1130_v1, 2 }
  0x5f   : > { %949 = vperm.xlu1 %9062, %v664_v14   ;;  %944 = vperm.xlu0 %9061, %v663_v15   ;;  %v1162_v14 = vadd.f32 %v1161_v7, %v1147_v2  ;;  %v1150_v15 = vmul.f32 %v10305_v26, %v10305_v26  ;;  %v2879_v2 = vmul.f32 %v7496_v43, %v7496_v43 }
  0x61   : > { %v1163_v16 = vadd.f32 %v1162_v14, %v1148_v6  ;;  %v4361_v14 = vmul.f32 %v7559_v58, %v7559_v58 }
  0x63   : > { %959 = vperm.xlu1 %9062, %v666_v20   ;;  %954 = vperm.xlu0 %9061, %v665_v21   ;;  %v1132_v20 = vadd.f32 %v1131_v11, %v1130_v1  ;;  %v1151_v21 = vmul.f32 %v10319_v34, %v10319_v34  ;;  %v1164_v22 = vadd.f32 %v1163_v16, %v1149_v12  ;;  %v7560_v11 = vld [vmem:[%s10385_s1 + $0x110] sm:$0xff] }
  0x64   : > { %v4360_v12 = vmul.f32 %v7558_v56, %v7558_v56 }
  0x65   : > { %v1165_v23 = vadd.f32 %v1164_v22, %v1150_v15 }
  0x67   : > { %1045 = vperm.xlu1 %9062, %v680_v27   ;;  %1040 = vperm.xlu0 %9061, %v679_v28   ;;  %v1133_v27 = vrot.slane %v1132_v20, 1  ;;  %v1166_v28 = vadd.f32 %v1165_v23, %v1151_v21 }
  0x69   : > { %v1167_v29 = vrot.slane %v1166_v28, 4 }
  0x6b   : > { %1055 = vperm.xlu1 %9062, %v682_v35   ;;  %1050 = vperm.xlu0 %9061, %v681_v42   ;;  %v1134_v35 = vadd.f32 %v1133_v27, %v1132_v20  ;;  %v1168_v38 = vadd.f32 %v1167_v29, %v1166_v28  ;;  %v4339_v20 = vadd.f32 %v7560_v11, %v4338_v5  ;;  %v7622_v29 = vld [vmem:[%s10385_s1 + $0x180] sm:$0xff]  ;;  %v7625_v5 = vld [vmem:[%s10385_s1 + $0x198] sm:$0xff] }
  0x6c   : > { %v4362_v27 = vmul.f32 %v7560_v11, %v7560_v11  ;;  %v4376_v28 = vadd.f32 %v4361_v14, %v4360_v12 }
  0x6d   : > { %v1169_v42 = vrot.slane %v1168_v38, 2  ;;  %v10408_v46 = vmul.f32 0.0078125, %v1134_v35 }
  0x6f   : > { %969 = vperm.xlu1 %9062, %v668_v49   ;;  %964 = vperm.xlu0 %9061, %v667_v51   ;;  %v1170_v48 = vadd.f32 %v1169_v42, %v1168_v38  ;;  %v2856_v49 = vadd.f32 %v7496_v43, %v2855_v40  ;;  %v2877_v51 = vmul.f32 %v7494_v30, %v7494_v30  ;;  %v7623_v30 = vld [vmem:[%s10385_s1 + $0x188] sm:$0xff]  ;;  %v7500_v42 = vld [vmem:[%s10385_s1 + $0xb0] sm:$0xff]  ;;  %v7562_v43 = vld [vmem:[%s10385_s1 + $0x120] sm:$0xff] }
  0x70   : > { %v1177_v14 = vsub.f32 %v10178_v37, %v10408_v46  ;;  %v1180_v37 = vsub.f32 %v10205_v47, %v10408_v46 }
  0x71   : > { %v1171_v53 = vrot.slane %v1170_v48, 1  ;;  %v2857_v1 = vadd.f32 %v7497_v55, %v2856_v49  ;;  %v2893_v3 = vadd.f32 %v2878_v52, %v2877_v51  ;;  %v7624_v49 = vld [vmem:[%s10385_s1 + $0x190] sm:$0xff]  ;;  %v7501_v51 = vld [vmem:[%s10385_s1 + $0xb8] sm:$0xff] }
  0x73   : > { %979 = vperm.xlu1 %9062, %v670_v62   ;;  %974 = vperm.xlu0 %9061, %v669_v63   ;;  %v1172_v62 = vadd.f32 %v1171_v53, %v1170_v48  ;;  %v1174_v63 = vmul.f32 %v10408_v46, %v10408_v46  ;;  %v5821_v48 = vadd.f32 %v7623_v30, %v7622_v29 }
  0x77   : > { %1065 = vperm.xlu1 %9062, %v684_v9   ;;  %1060 = vperm.xlu0 %9061, %v683_v10   ;;  %v1173_v9 = vmul.f32 0.0078125, %v1172_v62  ;;  %v7498_v10 = vld [vmem:[%s10385_s1 + $0xa0] sm:$0xff]  ;;  %v4364_v62 = vmul.f32 %v7562_v43, %v7562_v43 }
  0x78   : > { %v2858_v16 = vadd.f32 %v7498_v10, %v2857_v1  ;;  %v5822_v1 = vadd.f32 %v7624_v49, %v5821_v48 }
  0x79   : > { %v1175_v15 = vsub.f32 %v1173_v9, %v1174_v63  ;;  %v1176_v9 = vsub.f32 %v10175_v36, %v10408_v46  ;;  %v7564_v36 = vld [vmem:[%s10385_s1 + $0x130] sm:$0xff] }
  0x7b   : > { %1075 = vperm.xlu1 %9062, %v686_v17   ;;  %1070 = vperm.xlu0 %9061, %v685_v18   ;;  %v2880_v17 = vmul.f32 %v7497_v55, %v7497_v55  ;;  %v2894_v18 = vadd.f32 %v2893_v3, %v2879_v2  ;;  %v1192_v23 = vadd.f32 1e-05, %v1175_v15  ;;  %v2883_v2 = vmul.f32 %v7500_v42, %v7500_v42 }
  0x7c   : > { %v10448_v3 = vmul.f32 %v7501_v51, %v7501_v51 }
  0x7d   : > { %9095 = vrsqrt.f32 %v1192_v23 }
  0x7f   : > { %989 = vperm.xlu1 %9062, %v672_v24   ;;  %984 = vperm.xlu0 %9061, %v671_v25   ;;  %v7499_v24 = vld [vmem:[%s10385_s1 + $0xa8] sm:$0xff]  ;;  %v7561_v25 = vld [vmem:[%s10385_s1 + $0x118] sm:$0xff] }
  0x80   : > { %v2859_v31 = vadd.f32 %v7499_v24, %v2858_v16  ;;  %v4340_v35 = vadd.f32 %v7561_v25, %v4339_v20  ;;  %v2882_v53 = vmul.f32 %v7499_v24, %v7499_v24  ;;  %v10464_v20 = vld [vmem:[%s10385_s1 + $0xc0] sm:$0xff] }
  0x82   : > { %v2860_v52 = vadd.f32 %v7500_v42, %v2859_v31  ;;  %v4341_v56 = vadd.f32 %v7562_v43, %v4340_v35  ;;  %v1181_v31 = vsub.f32 %v10212_v50, %v10408_v46  ;;  %v4366_v42 = vmul.f32 %v7564_v36, %v7564_v36 }
  0x83   : > { %999 = vperm.xlu1 %9062, %v674_v32   ;;  %994 = vperm.xlu0 %9061, %v673_v33   ;;  %v2881_v32 = vmul.f32 %v7498_v10, %v7498_v10  ;;  %v2895_v33 = vadd.f32 %v2894_v18, %v2880_v17  ;;  %v1178_v17 = vsub.f32 %v10184_v39, %v10408_v46 }
  0x84   : > { %v2861_v10 = vadd.f32 %v7501_v51, %v2860_v52  ;;  %v1179_v18 = vsub.f32 %v10190_v41, %v10408_v46  ;;  %v1182_v39 = vsub.f32 %v10222_v54, %v10408_v46  ;;  %v1183_v41 = vsub.f32 %v10229_v57, %v10408_v46 }
  0x85   : > { %v2896_v55 = vadd.f32 %v2895_v33, %v2881_v32  ;;  %v10476_v32 = vld [vmem:[%s10385_s1 + $0x1a0] sm:$0xff]  ;;  %v5845_v51 = vmul.f32 %v7624_v49, %v7624_v49 }
  0x86   : > { %v2862_v35 = vadd.f32 %v10464_v20, %v2861_v10 }
  0x87   : > { %1085 = vperm.xlu1 %9062, %v688_v44   ;;  %1080 = vperm.xlu0 %9061, %v687_v45   ;;  %v4363_v44 = vmul.f32 %v7561_v25, %v7561_v25  ;;  %v4377_v45 = vadd.f32 %v4376_v28, %v4362_v27  ;;  %v2897_v11 = vadd.f32 %v2896_v55, %v2882_v53 }
  0x88   : > { %v5823_v25 = vadd.f32 %v7625_v5, %v5822_v1  ;;  %v5843_v27 = vmul.f32 %v7622_v29, %v7622_v29  ;;  %v5844_v28 = vmul.f32 %v7623_v30, %v7623_v30 }
  0x89   : > { %v4378_v63 = vadd.f32 %v4377_v45, %v4363_v44  ;;  %v2898_v29 = vadd.f32 %v2897_v11, %v2883_v2 }
  0x8a   : > { %v10421_v6 = vpop.permute.xlu1 %1222  ;;  %v10423_v7 = vpop.permute.xlu0 %1212  ;;  %v5824_v48 = vadd.f32 %v10476_v32, %v5823_v25  ;;  %v5859_v52 = vadd.f32 %v5844_v28, %v5843_v27 }
  0x8b   : > { %14711 = vst [vmem:[#allocation2_spill] sm:$0xff] %v10421_v6  ;;  %14712 = vst [vmem:[#allocation3_spill] sm:$0xff] %v10423_v7  ;;  %1095 = vperm.xlu1 %9062, %v690_v59   ;;  %1090 = vperm.xlu0 %9061, %v689_v60   ;;  %v7563_v60 = vld [vmem:[%s10385_s1 + $0x128] sm:$0xff]  ;;  %v4379_v24 = vadd.f32 %v4378_v63, %v4364_v62  ;;  %v10478_v33 = vpop.eup %9095  ;;  %v7565_v62 = vld [vmem:[%s10385_s1 + $0x138] sm:$0xff] }
  0x8c   : > { %v4342_v12 = vadd.f32 %v7563_v60, %v4341_v56  ;;  %v4365_v23 = vmul.f32 %v7563_v60, %v7563_v60  ;;  %v1194_v47 = vmul.f32 %v10478_v33, %v1176_v9  ;;  %v1195_v50 = vmul.f32 %v10478_v33, %v1177_v14  ;;  %v7627_v63 = vld [vmem:[%s10385_s1 + $0x1a8] sm:$0xff] }
  0x8d   : > { %v1196_v54 = vmul.f32 %v10478_v33, %v1178_v17  ;;  %v1197_v43 = vmul.f32 %v10478_v33, %v1179_v18  ;;  %v1198_v1 = vmul.f32 %v10478_v33, %v1180_v37  ;;  %v1199_v2 = vmul.f32 %v10478_v33, %v1181_v31  ;;  %v7503_v37 = vld [vmem:[%s10385_s1 + $0xc8] sm:$0xff]  ;;  %v7566_v31 = vld [vmem:[%s10385_s1 + $0x140] sm:$0xff] }
  0x8e   : > { %v10427_v21 = vpop.permute.xlu1 %1227  ;;  %v10429_v22 = vpop.permute.xlu0 %1217  ;;  %v4343_v30 = vadd.f32 %v7564_v36, %v4342_v12  ;;  %v4380_v45 = vadd.f32 %v4379_v24, %v4365_v23  ;;  %v1290_v53 = vmul.f32 %v10423_v7, %v1194_v47  ;;  %v1200_v9 = vmul.f32 %v10478_v33, %v1182_v39 }
  0x8f   : > { %14713 = vst [vmem:[#allocation4_spill] sm:$0xff] %v10427_v21  ;;  %14714 = vst [vmem:[#allocation5_spill] sm:$0xff] %v10429_v22  ;;  %v1291_v55 = vmul.f32 %v10429_v22, %v1195_v50  ;;  %v1292_v56 = vmul.f32 %v10421_v6, %v1196_v54  ;;  %v1293_v60 = vmul.f32 %v10427_v21, %v1197_v43 }
  0x90   : > { %v1201_v49 = vmul.f32 %v10478_v33, %v1183_v41  ;;  %v4344_v24 = vadd.f32 %v7565_v62, %v4343_v30  ;;  %v5825_v25 = vadd.f32 %v7627_v63, %v5824_v48  ;;  %v4367_v39 = vmul.f32 %v7565_v62, %v7565_v62  ;;  %v7628_v41 = vld [vmem:[%s10385_s1 + $0x1b0] sm:$0xff]  ;;  %v10527_v62 = vld [vmem:[%s10385_s1] sm:$0xff] }
  0x91   : > { %v5846_v47 = vmul.f32 %v7625_v5, %v7625_v5  ;;  %v4381_v43 = vadd.f32 %v4380_v45, %v4366_v42  ;;  %v1184_v5 = vsub.f32 %v10239_v61, %v10408_v46  ;;  %v2863_v42 = vadd.f32 %v7503_v37, %v2862_v35  ;;  %v7504_v35 = vld [vmem:[%s10385_s1 + $0xd0] sm:$0xff] }
  0x92   : > { %v10435_v38 = vpop.permute.xlu1 %1313  ;;  %v10437_v40 = vpop.permute.xlu0 %1308  ;;  %v2899_v45 = vadd.f32 %v2898_v29, %v10448_v3  ;;  %v1185_v3 = vsub.f32 %v10246_v0, %v10408_v46  ;;  %v4368_v29 = vmul.f32 %v7566_v31, %v7566_v31 }
  0x93   : > { %14715 = vst [vmem:[#allocation6_spill] sm:$0xff] %v10435_v38  ;;  %14716 = vst [vmem:[#allocation7_spill] sm:$0xff] %v10437_v40  ;;  %v1386_v10 = vadd.f32 %v10437_v40, %v1290_v53  ;;  %v1387_v11 = vadd.f32 %v10435_v38, %v1291_v55  ;;  %v5860_v53 = vadd.f32 %v5859_v52, %v5845_v51 }
  0x94   : > { %v4345_v51 = vadd.f32 %v7566_v31, %v4344_v24  ;;  %v5826_v52 = vadd.f32 %v7628_v41, %v5825_v25  ;;  %v2886_v24 = vmul.f32 %v7503_v37, %v7503_v37  ;;  %v1202_v37 = vmul.f32 %v10478_v33, %v1184_v5 }
  0x95   : > { %v1577_v27 = vpack.c.bf16 %v1387_v11, %v1386_v10  ;;  %v7629_v10 = vld [vmem:[%s10385_s1 + $0x1b8] sm:$0xff]  ;;  %v4382_v11 = vadd.f32 %v4381_v43, %v4367_v39  ;;  %v7630_v43 = vld [vmem:[%s10385_s1 + $0x1c0] sm:$0xff] }
  0x96   : > { %v10443_v58 = vpop.permute.xlu1 %1323  ;;  %v10445_v59 = vpop.permute.xlu0 %1318  ;;  %v5827_v31 = vadd.f32 %v7629_v10, %v5826_v52  ;;  %v10551_v39 = vld [vmem:[%s10385_s1 + $0x18] sm:$0xff] }
  0x97   : > { %14717 = vst [vmem:[#allocation8_spill] sm:$0xff] %v10443_v58  ;;  %14718 = vst [vmem:[#allocation9_spill] sm:$0xff] %v10445_v59  ;;  %v1388_v12 = vadd.f32 %v10445_v59, %v1292_v56  ;;  %v1389_v14 = vadd.f32 %v10443_v58, %v1293_v60  ;;  %8188 = vmatprep.mubr.bf16.mxu1 %v1577_v27  ;;  %v2885_v60 = vmul.f32 %v10464_v20, %v10464_v20 }
  0x98   : > { %v5847_v20 = vmul.f32 %v10476_v32, %v10476_v32  ;;  %v5848_v32 = vmul.f32 %v7627_v63, %v7627_v63  ;;  %v1203_v63 = vmul.f32 %v10478_v33, %v1185_v3  ;;  %v10569_v3 = vld [vmem:[%s10385_s1 + $0x20] sm:$0xff] }
  0x99   : > { %v1578_v28 = vpack.c.bf16 %v1389_v14, %v1388_v12  ;;  %v5861_v12 = vadd.f32 %v5860_v53, %v5846_v47  ;;  %v10542_v14 = vld [vmem:[%s10385_s1 + $0x10] sm:$0xff]  ;;  %v2900_v27 = vadd.f32 %v2899_v45, %v2885_v60  ;;  %v7505_v47 = vld [vmem:[%s10385_s1 + $0xd8] sm:$0xff]  ;;  %14731 = vst [vmem:[#allocation22_spill] sm:$0xff] %v10569_v3 }
  0x9a   : > { %v10455_v15 = vpop.permute.xlu1 %1237  ;;  %v10457_v16 = vpop.permute.xlu0 %1232 }
  0x9b   : > { %14719 = vst [vmem:[#allocation10_spill] sm:$0xff] %v10455_v15  ;;  %14720 = vst [vmem:[#allocation11_spill] sm:$0xff] %v10457_v16  ;;  %v1294_v36 = vmul.f32 %v10457_v16, %v1198_v1  ;;  %v1295_v23 = vmul.f32 %v10455_v15, %v1199_v2  ;;  %8189 = vmatmul.mubr.bf16.vlgmr.msra.gmra.mxu1 %v1578_v28  ;;  %v10530_v1 = vld [vmem:[%s10385_s1 + $0x8] sm:$0xff]  ;;  %v5862_v53 = vadd.f32 %v5861_v12, %v5847_v20 }
  0x9c   : > { %v825_v0 = vadd.f32 %v10530_v1, %v10527_v62  ;;  %v2901_v20 = vadd.f32 %v2900_v27, %v2886_v24 }
  0x9d   : > { %v5863_v52 = vadd.f32 %v5862_v53, %v5848_v32  ;;  %v7569_v32 = vld [vmem:[%s10385_s1 + $0x158] sm:$0xff] }
  0x9e   : > { %v10485_v57 = vpop.permute.xlu1 %1247  ;;  %v10487_v44 = vpop.permute.xlu0 %1242 }
  0x9f   : > { %14721 = vst [vmem:[#allocation12_spill] sm:$0xff] %v10485_v57  ;;  %14722 = vst [vmem:[#allocation13_spill] sm:$0xff] %v10487_v44  ;;  %v1296_v48 = vmul.f32 %v10487_v44, %v1200_v9  ;;  %v1297_v56 = vmul.f32 %v10485_v57, %v1201_v49  ;;  %v7567_v49 = vld [vmem:[%s10385_s1 + $0x148] sm:$0xff] }
  0xa0   : > { %v4369_v28 = vmul.f32 %v7567_v49, %v7567_v49 }
  0xa2   : > { %v10504_v17 = vpop.permute.xlu1 %1333  ;;  %v10506_v18 = vpop.permute.xlu0 %1328 }
  0xa3   : > { %14723 = vst [vmem:[#allocation14_spill] sm:$0xff] %v10504_v17  ;;  %14724 = vst [vmem:[#allocation15_spill] sm:$0xff] %v10506_v18  ;;  %v1390_v50 = vadd.f32 %v10506_v18, %v1294_v36  ;;  %v1391_v54 = vadd.f32 %v10504_v17, %v1295_v23 }
  0xa5   : > { %v1579_v2 = vpack.c.bf16 %v1391_v54, %v1390_v50  ;;  %v2864_v50 = vadd.f32 %v7504_v35, %v2863_v42  ;;  %v4346_v54 = vadd.f32 %v7567_v49, %v4345_v51  ;;  %v1186_v42 = vsub.f32 %v10256_v4, %v10408_v46 }
  0xa6   : > { %v10515_v55 = vpop.permute.xlu1 %1343  ;;  %v10517_v30 = vpop.permute.xlu0 %1338  ;;  %v1187_v51 = vsub.f32 %v10266_v8, %v10408_v46  ;;  %v2888_v49 = vmul.f32 %v7505_v47, %v7505_v47 }
  0xa7   : > { %14725 = vst [vmem:[#allocation16_spill] sm:$0xff] %v10515_v55  ;;  %14726 = vst [vmem:[#allocation17_spill] sm:$0xff] %v10517_v30  ;;  %v1392_v9 = vadd.f32 %v10517_v30, %v1296_v48  ;;  %v1393_v61 = vadd.f32 %v10515_v55, %v1297_v56  ;;  %8192 = vmatprep.mubr.bf16.mxu1 %v1579_v2  ;;  %v826_v48 = vadd.f32 %v825_v0, %v10542_v14  ;;  %v7568_v56 = vld [vmem:[%s10385_s1 + $0x150] sm:$0xff]  ;;  %v7631_v0 = vld [vmem:[%s10385_s1 + $0x1c8] sm:$0xff] }
  0xa8   : > { %v4383_v2 = vadd.f32 %v4382_v11, %v4368_v29  ;;  %v2865_v29 = vadd.f32 %v7505_v47, %v2864_v50  ;;  %v4347_v11 = vadd.f32 %v7568_v56, %v4346_v54  ;;  %v4370_v12 = vmul.f32 %v7568_v56, %v7568_v56  ;;  %v7506_v56 = vld [vmem:[%s10385_s1 + $0xe0] sm:$0xff] }
  0xa9   : > { %v1580_v25 = vpack.c.bf16 %v1393_v61, %v1392_v9  ;;  %v5849_v9 = vmul.f32 %v7628_v41, %v7628_v41  ;;  %v827_v5 = vadd.f32 %v826_v48, %v10551_v39  ;;  %v2887_v61 = vmul.f32 %v7504_v35, %v7504_v35 }
  0xaa   : > { %v10544_v36 = vpop.permute.xlu1 %1257  ;;  %v10546_v23 = vpop.permute.xlu0 %1252  ;;  %v5828_v41 = vadd.f32 %v7630_v43, %v5827_v31  ;;  %v5850_v55 = vmul.f32 %v7629_v10, %v7629_v10  ;;  %v4384_v53 = vadd.f32 %v4383_v2, %v4369_v28  ;;  %v1204_v27 = vmul.f32 %v10478_v33, %v1186_v42 }
  0xab   : > { %14727 = vst [vmem:[#allocation18_spill] sm:$0xff] %v10544_v36  ;;  %14728 = vst [vmem:[#allocation19_spill] sm:$0xff] %v10546_v23  ;;  %8193 = vmatmul.mubr.bf16.gmra.mxu1 %v1580_v25  ;;  %v1298_v4 = vmul.f32 %v10546_v23, %v1202_v37  ;;  %v1299_v8 = vmul.f32 %v10544_v36, %v1203_v63  ;;  %v5864_v35 = vadd.f32 %v5863_v52, %v5849_v9  ;;  %v10585_v37 = vld [vmem:[%s10385_s1 + $0x28] sm:$0xff]  ;;  %v7632_v9 = vld [vmem:[%s10385_s1 + $0x1d0] sm:$0xff] }
  0xac   : > { %v1205_v31 = vmul.f32 %v10478_v33, %v1187_v51  ;;  %v5851_v10 = vmul.f32 %v7630_v43, %v7630_v43  ;;  %v828_v47 = vadd.f32 %v827_v5, %v10569_v3  ;;  %v2902_v48 = vadd.f32 %v2901_v20, %v2887_v61  ;;  %14734 = vst [vmem:[#allocation25_spill] sm:$0xff] %v10585_v37  ;;  %v7570_v43 = vld [vmem:[%s10385_s1 + $0x160] sm:$0xff] }
  0xad   : > { %v5829_v28 = vadd.f32 %v7631_v0, %v5828_v41  ;;  %v1188_v63 = vsub.f32 %v10277_v13, %v10408_v46  ;;  %v4348_v2 = vadd.f32 %v7569_v32, %v4347_v11  ;;  %v5865_v42 = vadd.f32 %v5864_v35, %v5850_v55  ;;  %v10599_v11 = vld [vmem:[%s10385_s1 + $0x30] sm:$0xff] }
  0xae   : > { %v10559_v60 = vpop.permute.xlu1 %1267  ;;  %v10561_v45 = vpop.permute.xlu0 %1262  ;;  %v4371_v52 = vmul.f32 %v7569_v32, %v7569_v32  ;;  %v4385_v5 = vadd.f32 %v4384_v53, %v4370_v12  ;;  %14737 = vst [vmem:[#allocation28_spill] sm:$0xff] %v10599_v11  ;;  %v829_v55 = vadd.f32 %v828_v47, %v10585_v37  ;;  %v2866_v12 = vadd.f32 %v7506_v56, %v2865_v29  ;;  %v10616_v29 = vld [vmem:[%s10385_s1 + $0x168] sm:$0xff] }
  0xaf   : > { %14729 = vst [vmem:[#allocation20_spill] sm:$0xff] %v10559_v60  ;;  %14730 = vst [vmem:[#allocation21_spill] sm:$0xff] %v10561_v45  ;;  %v1300_v20 = vmul.f32 %v10561_v45, %v1204_v27  ;;  %v1301_v13 = vmul.f32 %v10559_v60, %v1205_v31  ;;  %v5866_v41 = vadd.f32 %v5865_v42, %v5851_v10  ;;  %v10605_v27 = vld [vmem:[%s10385_s1 + $0xe8] sm:$0xff]  ;;  %v7633_v31 = vld [vmem:[%s10385_s1 + $0x1d8] sm:$0xff] }
  0xb0   : > { %v5830_v32 = vadd.f32 %v7632_v9, %v5829_v28  ;;  %v5853_v10 = vmul.f32 %v7632_v9, %v7632_v9  ;;  %v1189_v47 = vsub.f32 %v10291_v19, %v10408_v46  ;;  %v830_v28 = vadd.f32 %v829_v55, %v10599_v11  ;;  %v7508_v19 = vld [vmem:[%s10385_s1 + $0xf0] sm:$0xff] }
  0xb1   : > { %v1191_v42 = vsub.f32 %v10319_v34, %v10408_v46 }
  0xb2   : > { %v10575_v25 = vpop.permute.xlu1 %1353  ;;  %v10577_v24 = vpop.permute.xlu0 %1348 }
  0xb3   : > { %14732 = vst [vmem:[#allocation23_spill] sm:$0xff] %v10575_v25  ;;  %14733 = vst [vmem:[#allocation24_spill] sm:$0xff] %v10577_v24  ;;  %v1394_v50 = vadd.f32 %v10577_v24, %v1298_v4  ;;  %v1395_v54 = vadd.f32 %v10575_v25, %v1299_v8  ;;  %v5852_v4 = vmul.f32 %v7631_v0, %v7631_v0  ;;  %v10654_v25 = vld [vmem:[%s10385_s1 + $0x1e8] sm:$0xff] }
  0xb4   : > { %v2889_v8 = vmul.f32 %v7506_v56, %v7506_v56  ;;  %v2903_v0 = vadd.f32 %v2902_v48, %v2888_v49  ;;  %v1190_v49 = vsub.f32 %v10305_v26, %v10408_v46  ;;  %v10627_v26 = vld [vmem:[%s10385_s1 + $0x40] sm:$0xff] }
  0xb5   : > { %v1581_v51 = vpack.c.bf16 %v1395_v54, %v1394_v50  ;;  %v4349_v50 = vadd.f32 %v7570_v43, %v4348_v2  ;;  %v10609_v54 = vld [vmem:[%s10385_s1 + $0x38] sm:$0xff]  ;;  %v5867_v48 = vadd.f32 %v5866_v41, %v5852_v4  ;;  %14741 = vst [vmem:[#allocation32_spill] sm:$0xff] %v10627_v26  ;;  %v2890_v4 = vmul.f32 %v10605_v27, %v10605_v27  ;;  %v7634_v46 = vld [vmem:[%s10385_s1 + $0x1e0] sm:$0xff] }
  0xb6   : > { %v10592_v24 = vpop.permute.xlu1 %1363  ;;  %v10594_v61 = vpop.permute.xlu0 %1358  ;;  %14738 = vst [vmem:[#allocation29_spill] sm:$0xff] %v10609_v54  ;;  %v5831_v41 = vadd.f32 %v7633_v31, %v5830_v32  ;;  %v831_v55 = vadd.f32 %v830_v28, %v10609_v54  ;;  %v5855_v30 = vmul.f32 %v7634_v46, %v7634_v46  ;;  %v1208_v57 = vmul.f32 %v10478_v33, %v1190_v49 }
  0xb7   : > { %14735 = vst [vmem:[#allocation26_spill] sm:$0xff] %v10592_v24  ;;  %14736 = vst [vmem:[#allocation27_spill] sm:$0xff] %v10594_v61  ;;  %8196 = vmatprep.mubr.bf16.mxu1 %v1581_v51  ;;  %v1396_v53 = vadd.f32 %v10594_v61, %v1300_v20  ;;  %v1397_v35 = vadd.f32 %v10592_v24, %v1301_v13  ;;  %v4372_v51 = vmul.f32 %v7570_v43, %v7570_v43  ;;  %v7509_v24 = vld [vmem:[%s10385_s1 + $0xf8] sm:$0xff] }
  0xb8   : > { %v4386_v20 = vadd.f32 %v4385_v5, %v4371_v52  ;;  %v2867_v13 = vadd.f32 %v10605_v27, %v2866_v12  ;;  %v4350_v34 = vadd.f32 %v10616_v29, %v4349_v50  ;;  %v5854_v43 = vmul.f32 %v7633_v31, %v7633_v31  ;;  %v10647_v50 = vld [vmem:[%s10385_s1 + $0x48] sm:$0xff] }
  0xb9   : > { %v1582_v9 = vpack.c.bf16 %v1397_v35, %v1396_v53  ;;  %v2904_v53 = vadd.f32 %v2903_v0, %v2889_v8  ;;  %v7572_v35 = vld [vmem:[%s10385_s1 + $0x170] sm:$0xff]  ;;  %v5868_v52 = vadd.f32 %v5867_v48, %v5853_v10  ;;  %v1206_v5 = vmul.f32 %v10478_v33, %v1188_v63  ;;  %14744 = vst [vmem:[#allocation35_spill] sm:$0xff] %v10647_v50 }
  0xba   : > { %v10619_v56 = vpop.permute.xlu1 %1277  ;;  %v10621_v2 = vpop.permute.xlu0 %1272  ;;  %v1207_v12 = vmul.f32 %v10478_v33, %v1189_v47  ;;  %v2891_v61 = vmul.f32 %v7508_v19, %v7508_v19  ;;  %v832_v32 = vadd.f32 %v831_v55, %v10627_v26  ;;  %v4373_v8 = vmul.f32 %v10616_v29, %v10616_v29 }
  0xbb   : > { %14739 = vst [vmem:[#allocation30_spill] sm:$0xff] %v10619_v56  ;;  %14740 = vst [vmem:[#allocation31_spill] sm:$0xff] %v10621_v2  ;;  %8197 = vmatmul.mubr.bf16.gmra.mxu1 %v1582_v9  ;;  %v4387_v0 = vadd.f32 %v4386_v20, %v4372_v51  ;;  %v848_v63 = vmul.f32 %v10527_v62, %v10527_v62  ;;  %v849_v31 = vmul.f32 %v10530_v1, %v10530_v1  ;;  %v10657_v20 = vld [vmem:[%s10385_s1 + $0x50] sm:$0xff] }
  0xbc   : > { %v2868_v10 = vadd.f32 %v7508_v19, %v2867_v13  ;;  %v2892_v47 = vmul.f32 %v7509_v24, %v7509_v24  ;;  %v4374_v48 = vmul.f32 %v7572_v35, %v7572_v35  ;;  %v5832_v9 = vadd.f32 %v7634_v46, %v5831_v41  ;;  %v7573_v19 = vld [vmem:[%s10385_s1 + $0x178] sm:$0xff] }
  0xbd   : > { %v2905_v55 = vadd.f32 %v2904_v53, %v2890_v4  ;;  %v4351_v45 = vadd.f32 %v7572_v35, %v4350_v34  ;;  %v5869_v51 = vadd.f32 %v5868_v52, %v5854_v43  ;;  %v1302_v36 = vmul.f32 %v10621_v2, %v1206_v5  ;;  %v7636_v34 = vld [vmem:[%s10385_s1 + $0x1f0] sm:$0xff] }
  0xbe   : > { %v10640_v60 = vpop.permute.xlu1 %1287  ;;  %v10642_v28 = vpop.permute.xlu0 %1282  ;;  %v1303_v23 = vmul.f32 %v10619_v56, %v1207_v12  ;;  %v833_v13 = vadd.f32 %v832_v32, %v10647_v50  ;;  %v1209_v53 = vmul.f32 %v10478_v33, %v1191_v42  ;;  %v4388_v35 = vadd.f32 %v4387_v0, %v4373_v8  ;;  %v10676_v12 = vld [vmem:[%s10385_s1 + $0x58] sm:$0xff] }
  0xbf   : > { %14742 = vst [vmem:[#allocation33_spill] sm:$0xff] %v10640_v60  ;;  %14743 = vst [vmem:[#allocation34_spill] sm:$0xff] %v10642_v28  ;;  %v850_v46 = vmul.f32 %v10542_v14, %v10542_v14  ;;  %v864_v43 = vadd.f32 %v849_v31, %v848_v63  ;;  %v5833_v5 = vadd.f32 %v10654_v25, %v5832_v9  ;;  %v10682_v31 = vld [vmem:[%s10385_s1 + $0x60] sm:$0xff] }
  0xc0   : > { %14747 = vst [vmem:[#allocation38_spill] sm:$0xff] %v10676_v12  ;;  %v834_v32 = vadd.f32 %v833_v13, %v10657_v20  ;;  %v2869_v56 = vadd.f32 %v7509_v24, %v2868_v10  ;;  %v4375_v2 = vmul.f32 %v7573_v19, %v7573_v19  ;;  %v5856_v33 = vmul.f32 %v10654_v25, %v10654_v25 }
  0xc1   : > { %v5870_v42 = vadd.f32 %v5869_v51, %v5855_v30  ;;  %v2906_v0 = vadd.f32 %v2905_v55, %v2891_v61  ;;  %v5857_v63 = vmul.f32 %v7636_v34, %v7636_v34  ;;  %v1304_v24 = vmul.f32 %v10642_v28, %v1208_v57 }
  0xc2   : > { %v10664_v41 = vpop.permute.xlu1 %1373  ;;  %v10666_v4 = vpop.permute.xlu0 %1368  ;;  %v1305_v10 = vmul.f32 %v10640_v60, %v1209_v53  ;;  %v835_v30 = vadd.f32 %v834_v32, %v10676_v12  ;;  %v865_v51 = vadd.f32 %v864_v43, %v850_v46  ;;  %v4352_v61 = vadd.f32 %v7573_v19, %v4351_v45  ;;  %v7637_v60 = vld [vmem:[%s10385_s1 + $0x1f8] sm:$0xff]  ;;  %v10703_v32 = vld [vmem:[%s10385_s1 + $0x70] sm:$0xff] }
  0xc3   : > { %14745 = vst [vmem:[#allocation36_spill] sm:$0xff] %v10664_v41  ;;  %14746 = vst [vmem:[#allocation37_spill] sm:$0xff] %v10666_v4  ;;  %v1398_v52 = vadd.f32 %v10666_v4, %v1302_v36  ;;  %v1399_v49 = vadd.f32 %v10664_v41, %v1303_v23  ;;  %v851_v36 = vmul.f32 %v10551_v39, %v10551_v39  ;;  %v2870_v46 = vrot.slane %v2869_v56, 4 }
  0xc4   : > { %v4389_v55 = vadd.f32 %v4388_v35, %v4374_v48  ;;  %v5834_v13 = vadd.f32 %v7636_v34, %v5833_v5  ;;  %v5871_v57 = vadd.f32 %v5870_v42, %v5856_v33  ;;  %v836_v53 = vadd.f32 %v835_v30, %v10682_v31  ;;  %v10713_v42 = vld [vmem:[%s10385_s1 + $0x78] sm:$0xff] }
  0xc5   : > { %v1583_v8 = vpack.c.bf16 %v1399_v49, %v1398_v52  ;;  %v10694_v52 = vld [vmem:[%s10385_s1 + $0x68] sm:$0xff]  ;;  %v852_v49 = vmul.f32 %v10569_v3, %v10569_v3  ;;  %v853_v45 = vmul.f32 %v10585_v37, %v10585_v37  ;;  %v866_v48 = vadd.f32 %v865_v51, %v851_v36 }
  0xc6   : > { %v10686_v23 = vpop.permute.xlu1 %1383  ;;  %v10688_v9 = vpop.permute.xlu0 %1378  ;;  %14750 = vst [vmem:[#allocation41_spill] sm:$0xff] %v10694_v52  ;;  %v2907_v43 = vadd.f32 %v2906_v0, %v2892_v47  ;;  %v837_v5 = vadd.f32 %v836_v53, %v10694_v52  ;;  %v4390_v33 = vadd.f32 %v4389_v55, %v4375_v2  ;;  %v5835_v30 = vadd.f32 %v7637_v60, %v5834_v13 }
  0xc7   : > { %14748 = vst [vmem:[#allocation39_spill] sm:$0xff] %v10686_v23  ;;  %14749 = vst [vmem:[#allocation40_spill] sm:$0xff] %v10688_v9  ;;  %8200 = vmatprep.mubr.bf16.mxu1 %v1583_v8  ;;  %v1400_v41 = vadd.f32 %v10688_v9, %v1304_v24  ;;  %v1401_v4 = vadd.f32 %v10686_v23, %v1305_v10  ;;  %v4353_v8 = vrot.slane %v4352_v61, 4 }
  0xc8   : > { %v854_v24 = vmul.f32 %v10599_v11, %v10599_v11  ;;  %v867_v10 = vadd.f32 %v866_v48, %v852_v49  ;;  %v5858_v36 = vmul.f32 %v7637_v60, %v7637_v60  ;;  %v5872_v51 = vadd.f32 %v5871_v57, %v5857_v63 }
  0xc9   : > { %v1584_v34 = vpack.c.bf16 %v1401_v4, %v1400_v41  ;;  %v838_v23 = vadd.f32 %v837_v5, %v10703_v32  ;;  %v855_v41 = vmul.f32 %v10609_v54, %v10609_v54  ;;  %v2871_v0 = vadd.f32 %v2870_v46, %v2869_v56 }
  0xca   : > { %v10707_v19 = vpop.permute.xlu1 %929  ;;  %v10709_v35 = vpop.permute.xlu0 %924  ;;  %v868_v47 = vadd.f32 %v867_v10, %v853_v45  ;;  %v2908_v2 = vrot.slane %v2907_v43, 4  ;;  %v4354_v9 = vadd.f32 %v4353_v8, %v4352_v61  ;;  %v4391_v49 = vrot.slane %v4390_v33, 4 }
  0xcb   : > { %14751 = vst [vmem:[#allocation42_spill] sm:$0xff] %v10707_v19  ;;  %14752 = vst [vmem:[#allocation43_spill] sm:$0xff] %v10709_v35  ;;  %8201 = vmatmul.mubr.bf16.gmra.mxu1 %v1584_v34  ;;  %v839_v53 = vadd.f32 %v838_v23, %v10713_v42  ;;  %v856_v60 = vmul.f32 %v10627_v26, %v10627_v26  ;;  %v5836_v13 = vrot.slane %v5835_v30, 4  ;;  %v2872_v5 = vrot.slane %v2871_v0, 2 }
  0xcc   : > { %v869_v63 = vadd.f32 %v868_v47, %v854_v24  ;;  %v5873_v57 = vadd.f32 %v5872_v51, %v5858_v36  ;;  %v857_v45 = vmul.f32 %v10647_v50, %v10647_v50  ;;  %v2909_v56 = vadd.f32 %v2908_v2, %v2907_v43 }
  0xcd   : > { %v840_v48 = vrot.slane %v839_v53, 4  ;;  %v4355_v23 = vrot.slane %v4354_v9, 2  ;;  %v4392_v61 = vadd.f32 %v4391_v49, %v4390_v33  ;;  %v858_v8 = vmul.f32 %v10657_v20, %v10657_v20 }
  0xce   : > { %v10720_v4 = vpop.permute.xlu1 %939  ;;  %v10722_v55 = vpop.permute.xlu0 %934  ;;  %v870_v34 = vadd.f32 %v869_v63, %v855_v41  ;;  %v5837_v24 = vadd.f32 %v5836_v13, %v5835_v30  ;;  %v5874_v47 = vrot.slane %v5873_v57, 4  ;;  %v859_v51 = vmul.f32 %v10676_v12, %v10676_v12 }
  0xcf   : > { %14753 = vst [vmem:[#allocation44_spill] sm:$0xff] %v10720_v4  ;;  %14754 = vst [vmem:[#allocation45_spill] sm:$0xff] %v10722_v55  ;;  %v841_v36 = vadd.f32 %v840_v48, %v839_v53  ;;  %v2873_v41 = vadd.f32 %v2872_v5, %v2871_v0  ;;  %v2910_v63 = vrot.slane %v2909_v56, 2  ;;  %v4356_v17 = vadd.f32 %v4355_v23, %v4354_v9 }
  0xd0   : > { %v871_v28 = vadd.f32 %v870_v34, %v856_v60  ;;  %v4393_v18 = vrot.slane %v4392_v61, 2  ;;  %v860_v33 = vmul.f32 %v10682_v31, %v10682_v31  ;;  %v5838_v60 = vrot.slane %v5837_v24, 2 }
  0xd1   : > { %v5875_v30 = vadd.f32 %v5874_v47, %v5873_v57  ;;  %v842_v13 = vrot.slane %v841_v36, 2  ;;  %v861_v53 = vmul.f32 %v10694_v52, %v10694_v52  ;;  %v2911_v0 = vadd.f32 %v2910_v63, %v2909_v56 }
  0xd2   : > { %v10729_v46 = vpop.permute.xlu1 %1025  ;;  %v10731_v10 = vpop.permute.xlu0 %1020  ;;  %v872_v44 = vadd.f32 %v871_v28, %v857_v45  ;;  %v2874_v28 = vrot.slane %v2873_v41, 1  ;;  %v4357_v5 = vrot.slane %v4356_v17, 1  ;;  %v4394_v9 = vadd.f32 %v4393_v18, %v4392_v61 }
  0xd3   : > { %14755 = vst [vmem:[#allocation46_spill] sm:$0xff] %v10729_v46  ;;  %14756 = vst [vmem:[#allocation47_spill] sm:$0xff] %v10731_v10  ;;  %v862_v23 = vmul.f32 %v10703_v32, %v10703_v32  ;;  %v843_v57 = vadd.f32 %v842_v13, %v841_v36  ;;  %v863_v47 = vmul.f32 %v10713_v42, %v10713_v42 }
  0xd4   : > { %v873_v49 = vadd.f32 %v872_v44, %v858_v8  ;;  %v5839_v44 = vadd.f32 %v5838_v60, %v5837_v24  ;;  %v5876_v8 = vrot.slane %v5875_v30, 2  ;;  %v4358_v15 = vadd.f32 %v4357_v5, %v4356_v17 }
  0xd5   : > { %v4395_v16 = vrot.slane %v4394_v9, 1  ;;  %v844_v6 = vrot.slane %v843_v57, 1 }
  0xd6   : > { %v10737_v43 = vpop.permute.xlu1 %1035  ;;  %v10739_v2 = vpop.permute.xlu0 %1030  ;;  %v874_v48 = vadd.f32 %v873_v49, %v859_v51  ;;  %v2875_v51 = vadd.f32 %v2874_v28, %v2873_v41  ;;  %v2912_v49 = vrot.slane %v2911_v0, 1  ;;  %v5840_v61 = vrot.slane %v5839_v44, 1 }
  0xd7   : > { %14757 = vst [vmem:[#allocation48_spill] sm:$0xff] %v10737_v43  ;;  %14758 = vst [vmem:[#allocation49_spill] sm:$0xff] %v10739_v2  ;;  %v5877_v21 = vadd.f32 %v5876_v8, %v5875_v30  ;;  %v4396_v41 = vadd.f32 %v4395_v16, %v4394_v9  ;;  %v845_v17 = vadd.f32 %v844_v6, %v843_v57 }
  0xd8   : > { %v875_v59 = vadd.f32 %v874_v48, %v860_v33  ;;  %v10757_v24 = vmul.f32 0.0078125, %v2875_v51  ;;  %v2913_v36 = vadd.f32 %v2912_v49, %v2911_v0  ;;  %v5841_v48 = vadd.f32 %v5840_v61, %v5839_v44 }
  0xd9   : > { %v5878_v28 = vrot.slane %v5877_v21, 1  ;;  %v4397_v8 = vmul.f32 0.0078125, %v4396_v41  ;;  %v10775_v9 = vmul.f32 0.0078125, %v845_v17 }
  0xda   : > { %v10745_v45 = vpop.permute.xlu1 %949  ;;  %v10747_v34 = vpop.permute.xlu0 %944  ;;  %v876_v58 = vadd.f32 %v875_v59, %v861_v53  ;;  %14763 = vst [vmem:[#allocation54_spill] sm:$0xff] %v10757_v24  ;;  %v10763_v59 = vmul.f32 0.0078125, %v4358_v15  ;;  %v2915_v30 = vmul.f32 %v10757_v24, %v10757_v24  ;;  %v10771_v51 = vmul.f32 0.0078125, %v5841_v48 }
  0xdb   : > { %14759 = vst [vmem:[#allocation50_spill] sm:$0xff] %v10745_v45  ;;  %14760 = vst [vmem:[#allocation51_spill] sm:$0xff] %v10747_v34  ;;  %v5879_v15 = vadd.f32 %v5878_v28, %v5877_v21  ;;  %v886_v41 = vmul.f32 %v10775_v9, %v10775_v9  ;;  %v895_v7 = vsub.f32 %v10609_v54, %v10775_v9 }
  0xdc   : > { %v877_v18 = vadd.f32 %v876_v58, %v862_v23  ;;  %14766 = vst [vmem:[#allocation57_spill] sm:$0xff] %v10763_v59  ;;  %v2914_v58 = vmul.f32 0.0078125, %v2913_v36  ;;  %v4398_v0 = vmul.f32 %v10763_v59, %v10763_v59  ;;  %14768 = vst [vmem:[#allocation59_spill] sm:$0xff] %v10771_v51  ;;  %v5896_v40 = vsub.f32 %v10654_v25, %v10771_v51 }
  0xdd   : > { %v5880_v61 = vmul.f32 0.0078125, %v5879_v15  ;;  %v10794_v15 = vld [vmem:[%s14552_s10 + $0x38] sm:$0xff]  }
  0xde   : > { %v10753_v56 = vpop.permute.xlu1 %959  ;;  %v10755_v63 = vpop.permute.xlu0 %954  ;;  %v878_v33 = vadd.f32 %v877_v18, %v863_v47  ;;  %v2916_v44 = vsub.f32 %v2914_v58, %v2915_v30  ;;  %v4399_v49 = vsub.f32 %v4397_v8, %v4398_v0  ;;  %8204 = vmatprep.subr.bf16.mxu0 %v10794_v15 }
  0xdf   : > { %14761 = vst [vmem:[#allocation52_spill] sm:$0xff] %v10753_v56  ;;  %14762 = vst [vmem:[#allocation53_spill] sm:$0xff] %v10755_v63 }
  0xe0   : > { %v879_v53 = vrot.slane %v878_v33, 4  ;;  %v4416_v28 = vadd.f32 1e-05, %v4399_v49  ;;  %v9082_v49 = vld [vmem:[%s14554_s12 + $0x30] sm:$0xff]  }
  0xe2   : > { %v10759_v60 = vpop.permute.xlu1 %1045  ;;  %v10761_v13 = vpop.permute.xlu0 %1040  ;;  %v880_v5 = vadd.f32 %v879_v53, %v878_v33  ;;  %v5881_v33 = vmul.f32 %v10771_v51, %v10771_v51  ;;  %v2933_v53 = vadd.f32 1e-05, %v2916_v44  ;;  %v9080_v44 = vld [vmem:[%s14554_s12 + $0x38] sm:$0xff]  }
  0xe3   : > { %14764 = vst [vmem:[#allocation55_spill] sm:$0xff] %v10759_v60  ;;  %14765 = vst [vmem:[#allocation56_spill] sm:$0xff] %v10761_v13  ;;  %8236 = vmatprep.subr.bf16.mxu1 %v9080_v44 }
  0xe4   : > { %v881_v47 = vrot.slane %v880_v5, 2  ;;  %9097 = vrsqrt.f32 %v2933_v53  ;;  %8237 = vmatpush3.bf16.msra.mxu1 %v9080_v44 }
  0xe5   : > { %9099 = vrsqrt.f32 %v4416_v28  ;;  %8238 = vmatprep.subr.bf16.mxu1 %v9082_v49  ;;  %v888_v28 = vsub.f32 %v10527_v62, %v10775_v9 }
  0xe6   : > { %v10767_v23 = vpop.permute.xlu1 %1055  ;;  %v10773_v16 = vpop.permute.xlu0 %1050  ;;  %v882_v6 = vadd.f32 %v881_v47, %v880_v5  ;;  %v5882_v5 = vsub.f32 %v5880_v61, %v5881_v33  ;;  %v9084_v61 = vld [vmem:[%s14554_s12 + $0x28] sm:$0xff]  }
  0xe7   : > { %14767 = vst [vmem:[#allocation58_spill] sm:$0xff] %v10767_v23  ;;  %14769 = vst [vmem:[#allocation60_spill] sm:$0xff] %v10773_v16 }
  0xe8   : > { %v883_v18 = vrot.slane %v882_v6, 1  ;;  %v5899_v0 = vadd.f32 1e-05, %v5882_v5  ;;  %v890_v5 = vsub.f32 %v10542_v14, %v10775_v9  ;;  %8239 = vmatpush3.bf16.msra.mxu1 %v9082_v49 }
  0xe9   : > { %8240 = vmatprep.subr.bf16.mxu1 %v9084_v61 }
  0xea   : > { %v10777_v57 = vpop.permute.xlu1 %969  ;;  %v884_v36 = vadd.f32 %v883_v18, %v882_v6  ;;  %v10783_v21 = vpop.permute.xlu0 %964 }
  0xeb   : > { %14770 = vst [vmem:[#allocation61_spill] sm:$0xff] %v10777_v57  ;;  %14771 = vst [vmem:[#allocation62_spill] sm:$0xff] %v10783_v21 }
  0xec   : > { %v885_v17 = vmul.f32 0.0078125, %v884_v36  ;;  %v2930_v36 = vsub.f32 %v10605_v27, %v10757_v24  ;;  %v892_v27 = vsub.f32 %v10569_v3, %v10775_v9  ;;  %v899_v24 = vsub.f32 %v10676_v12, %v10775_v9  ;;  %8241 = vmatpush3.bf16.msra.mxu1 %v9084_v61 }
  0xee   : > { %v10785_v48 = vpop.permute.xlu1 %979  ;;  %v887_v58 = vsub.f32 %v885_v17, %v886_v41  ;;  %v10789_v47 = vpop.permute.xlu0 %974  ;;  %v4413_v41 = vsub.f32 %v10616_v29, %v10763_v59  ;;  %v889_v17 = vsub.f32 %v10530_v1, %v10775_v9  ;;  %v893_v29 = vsub.f32 %v10585_v37, %v10775_v9  ;;  %v9086_v59 = vld [vmem:[%s14554_s12 + $0x20] sm:$0xff]  }
  0xef   : > { %14772 = vst [vmem:[#allocation63_spill] sm:$0xff] %v10785_v48  ;;  %14774 = vst [vmem:[#allocation65_spill] sm:$0xff] %v10789_v47  ;;  %v897_v37 = vsub.f32 %v10647_v50, %v10775_v9  ;;  %v901_v50 = vsub.f32 %v10694_v52, %v10775_v9  ;;  %8242 = vmatprep.subr.bf16.mxu1 %v9086_v59 }
  0xf0   : > { %v904_v8 = vadd.f32 1e-05, %v887_v58  ;;  %v891_v58 = vsub.f32 %v10551_v39, %v10775_v9  ;;  %8243 = vmatpush3.bf16.msra.mxu1 %v9086_v59 }
  0xf1   : > { %v10816_v53 = vpop.eup %9097 }
  0xf2   : > { %v10787_v30 = vpop.permute.xlu1 %1065  ;;  %9101 = vrsqrt.f32 %v904_v8  ;;  %v10805_v18 = vpop.permute.xlu0 %1060  ;;  %14777 = vst [vmem:[#allocation68_spill] sm:$0xff] %v10816_v53  ;;  %v2948_v49 = vmul.f32 %v10816_v53, %v2930_v36 }
  0xf3   : > { %14773 = vst [vmem:[#allocation64_spill] sm:$0xff] %v10787_v30  ;;  %9103 = vrsqrt.f32 %v5899_v0  ;;  %14776 = vst [vmem:[#allocation67_spill] sm:$0xff] %v10805_v18  ;;  %v10826_v8 = vpop.eup %9099  ;;  %v894_v0 = vsub.f32 %v10599_v11, %v10775_v9  ;;  %v896_v11 = vsub.f32 %v10627_v26, %v10775_v9 }
  0xf4   : > { %14778 = vst [vmem:[#allocation69_spill] sm:$0xff] %v10826_v8  ;;  %v4431_v38 = vmul.f32 %v10826_v8, %v4413_v41 }
  0xf6   : > { %v10796_v6 = vpop.permute.xlu1 %1075  ;;  %v10834_v44 = vpop.permute.xlu0 %1070 }
  0xf7   : > { %14775 = vst [vmem:[#allocation66_spill] sm:$0xff] %v10796_v6  ;;  %14779 = vst [vmem:[#allocation70_spill] sm:$0xff] %v10834_v44 }
  0xfa   : > { %v10810_v33 = vpop.permute.xlu1 %989  ;;  %v10877_v3 = vpop.permute.xlu0 %984 }
  0xfb   : > { %14782 = vst [vmem:[#allocation73_spill] sm:$0xff] %v10877_v3 }
  0xfe   : > { %v10857_v8 = vpop.permute.xlu1 %999 }
  0xff   : > { %v10843_v22 = vpop.eup %9101  ;;  %14780 = vst [vmem:[#allocation71_spill] sm:$0xff] %v10857_v8 }
 0x100   : > { %v906_v36 = vmul.f32 %v10843_v22, %v888_v28  ;;  %v907_v41 = vmul.f32 %v10843_v22, %v889_v17  ;;  %v908_v25 = vmul.f32 %v10843_v22, %v890_v5  ;;  %v909_v51 = vmul.f32 %v10843_v22, %v891_v58  ;;  %v10864_v28 = vpop.eup %9103 }
 0x101   : > { %v910_v53 = vmul.f32 %v10843_v22, %v892_v27  ;;  %v911_v12 = vmul.f32 %v10843_v22, %v893_v29  ;;  %v912_v26 = vmul.f32 %v10843_v22, %v894_v0  ;;  %14781 = vst [vmem:[#allocation72_spill] sm:$0xff] %v10864_v28  ;;  %v9088_v27 = vld [vmem:[%s14554_s12 + $0x18] sm:$0xff]   ;;  %v913_v52 = vmul.f32 %v10843_v22, %v895_v7 }
 0x102   : > { %v1002_v17 = vmul.f32 %v10709_v35, %v906_v36  ;;  %v1003_v5 = vmul.f32 %v10707_v19, %v907_v41  ;;  %v1004_v58 = vmul.f32 %v10722_v55, %v908_v25  ;;  %v1005_v61 = vmul.f32 %v10720_v4, %v909_v51  ;;  %8244 = vmatprep.subr.bf16.mxu1 %v9088_v27 }
 0x103   : > { %v1006_v29 = vmul.f32 %v10747_v34, %v910_v53  ;;  %v1007_v0 = vmul.f32 %v10745_v45, %v911_v12  ;;  %v5914_v54 = vmul.f32 %v10864_v28, %v5896_v40  ;;  %v2964_v12 = vmul.f32 %v2948_v49, %v10810_v33  ;;  %8245 = vmatpush3.bf16.msra.mxu1 %v9088_v27 }
 0x104   : > { %v1098_v36 = vadd.f32 %v10731_v10, %v1002_v17  ;;  %v1099_v41 = vadd.f32 %v10729_v46, %v1003_v5  ;;  %v1100_v51 = vadd.f32 %v10739_v2, %v1004_v58  ;;  %v1101_v25 = vadd.f32 %v10737_v43, %v1005_v61  ;;  %v1086_v58 = vpop.permute.xlu1 %1085 }
 0x105   : > { %v1102_v55 = vadd.f32 %v10761_v13, %v1006_v29  ;;  %v1103_v53 = vadd.f32 %v10759_v60, %v1007_v0  ;;  %v898_v7 = vsub.f32 %v10657_v20, %v10775_v9  ;;  %v1008_v17 = vmul.f32 %v10755_v63, %v912_v26 }
 0x106   : > { %v1402_v40 = vpack.c.bf16 %v1099_v41, %v1098_v36  ;;  %v1403_v28 = vpack.c.bf16 %v1101_v25, %v1100_v51  ;;  %v914_v5 = vmul.f32 %v10843_v22, %v896_v11  ;;  %v1009_v59 = vmul.f32 %v10753_v56, %v913_v52  ;;  %v10901_v11 = vld [vmem:[%s14552_s10 + $0x30] sm:$0xff]   ;;  %v10905_v52 = vpop.permute.xlu0 %994 }
 0x107   : > { %v1404_v2 = vpack.c.bf16 %v1103_v53, %v1102_v55  ;;  %v915_v61 = vmul.f32 %v10843_v22, %v897_v37  ;;  %v4447_v29 = vmul.f32 %v4431_v38, %v10810_v33  ;;  %v1104_v49 = vadd.f32 %v10773_v16, %v1008_v17  ;;  %14783 = vst [vmem:[#allocation74_spill] sm:$0xff] %v10905_v52  ;;  %v9090_v51 = vld [vmem:[%s14554_s12 + $0x10] sm:$0xff]  }
 0x108   : > { %8156 = vmatprep.mubr.bf16.mxu0 %v1402_v40  ;;  %v1010_v0 = vmul.f32 %v10783_v21, %v914_v5  ;;  %v5930_v36 = vmul.f32 %v5914_v54, %v10810_v33  ;;  %v900_v26 = vsub.f32 %v10682_v31, %v10775_v9  ;;  %v1105_v37 = vadd.f32 %v10767_v23, %v1009_v59 }
 0x109   : > { %8157 = vmatmul.mubr.bf16.vlgmr.msra.gmra.mxu0 %v1403_v28  ;;  %v1011_v38 = vmul.f32 %v10777_v57, %v915_v61  ;;  %v10907_v55 = vadd.f32 %v2964_v12, %v1086_v58  ;;  %v10909_v41 = vadd.f32 %v4447_v29, %v1086_v58  ;;  %v917_v25 = vmul.f32 %v10843_v22, %v899_v24 }
 0x10a   : > { %8160 = vmatprep.mubr.bf16.mxu0 %v1404_v2  ;;  %v1106_v54 = vadd.f32 %v10805_v18, %v1010_v0  ;;  %v916_v53 = vmul.f32 %v10843_v22, %v898_v7  ;;  %v10918_v40 = vadd.f32 %v5930_v36, %v1086_v58  ;;  %8205 = vmatpush3.bf16.msra.mxu0 %v10794_v15  ;;  %v10926_v2 = vld [vmem:[%s14552_s10 + $0x28] sm:$0xff]   ;;  %v10936_v29 = vpop.permute.xlu0 %1080  ;;  %v10947_v36 = vld [vmem:[%s14552_s10 + $0x20] sm:$0xff]  }
 0x10b   : > { %14784 = vst [vmem:[#allocation75_spill] sm:$0xff] %v10909_v41  ;;  %v1107_v28 = vadd.f32 %v10787_v30, %v1011_v38  ;;  %v919_v12 = vmul.f32 %v10843_v22, %v901_v50  ;;  %8206 = vmatprep.subr.bf16.mxu0 %v10901_v11  ;;  %v1405_v17 = vpack.c.bf16 %v1105_v37, %v1104_v49  ;;  %v9092_v7 = vld [vmem:[%s14554_s12 + $0x8] sm:$0xff]   ;;  %14786 = vst [vmem:[#allocation77_spill] sm:$0xff] %v10936_v29 }
 0x10c   : > { %14785 = vst [vmem:[#allocation76_spill] sm:$0xff] %v10918_v40  ;;  %v918_v24 = vmul.f32 %v10843_v22, %v900_v26  ;;  %8246 = vmatprep.subr.bf16.mxu1 %v9090_v51  ;;  %v1013_v59 = vmul.f32 %v10785_v48, %v917_v25  ;;  %v1012_v50 = vmul.f32 %v10789_v47, %v916_v53  ;;  %v9624_v25 = vld [vmem:[%s10160_s28 + $0x8] sm:$0xff] }
 0x10d   : > { %v1406_v5 = vpack.c.bf16 %v1107_v28, %v1106_v54  ;;  %v903_v61 = vsub.f32 %v10713_v42, %v10775_v9  ;;  %v902_v49 = vsub.f32 %v10703_v32, %v10775_v9  ;;  %v1015_v27 = vmul.f32 %v10810_v33, %v919_v12  ;;  %8247 = vmatpush3.bf16.msra.mxu1 %v9090_v51  ;;  %v9094_v33 = vld [vmem:[%s14554_s12] sm:$0xff]  }
 0x10e   : > { %8207 = vmatpush3.bf16.msra.mxu0 %v10901_v11  ;;  %v1014_v0 = vmul.f32 %v10877_v3, %v918_v24  ;;  %v1109_v26 = vadd.f32 %v10796_v6, %v1013_v59  ;;  %v1108_v37 = vadd.f32 %v10834_v44, %v1012_v50  ;;  %8248 = vmatprep.subr.bf16.mxu1 %v9092_v7  ;;  %v9623_v54 = vld [vmem:[%s10160_s28] sm:$0xff]  ;;  %v10968_v24 = vpop.permute.xlu0 %1090  ;;  %v9625_v50 = vld [vmem:[%s10160_s28 + $0x10] sm:$0xff] }
 0x10f   : > { %8208 = vmatprep.subr.bf16.mxu0 %v10926_v2  ;;  %v1111_v9 = vadd.f32 %v1086_v58, %v1015_v27  ;;  %v1895_v28 = vpack.c.bf16 %v9624_v25, %v9623_v54  ;;  %v921_v53 = vmul.f32 %v10843_v22, %v903_v61  ;;  %v920_v12 = vmul.f32 %v10843_v22, %v902_v49  ;;  %v10964_v58 = vld [vmem:[%s14552_s10 + $0x18] sm:$0xff]   ;;  %v10999_v25 = vld [vmem:[%s14552_s10] sm:$0xff]  }
 0x110   : > { %v1110_v38 = vadd.f32 %v10936_v29, %v1014_v0  ;;  %v1407_v51 = vpack.c.bf16 %v1109_v26, %v1108_v37  ;;  %14788 = vst [vmem:[#allocation79_spill] sm:$0xff] %v10968_v24  ;;  %v9626_v61 = vld [vmem:[%s10160_s28 + $0x18] sm:$0xff]  ;;  %v9627_v26 = vld [vmem:[%s10160_s28 + $0x20] sm:$0xff]  ;;  %v9628_v37 = vld [vmem:[%s10160_s28 + $0x28] sm:$0xff] }
 0x111   : > { %8161 = vmatmul.mubr.bf16.gmra.mxu0 %v1405_v17  ;;  %8252 = vmatprep.mubr.bf16.mxu1 %v1895_v28  ;;  %v10966_v17 = vpop.permute.xlu1 %1095  ;;  %v1016_v59 = vmul.f32 %v10905_v52, %v920_v12  ;;  %v1896_v49 = vpack.c.bf16 %v9626_v61, %v9625_v50  ;;  %14790 = vst [vmem:[#allocation81_spill] sm:$0xff] %v10999_v25  ;;  %v9629_v28 = vld [vmem:[%s10160_s28 + $0x30] sm:$0xff] }
 0x112   : > { %8164 = vmatprep.mubr.bf16.mxu0 %v1406_v5  ;;  %8209 = vmatpush3.bf16.msra.mxu0 %v10926_v2  ;;  %14787 = vst [vmem:[#allocation78_spill] sm:$0xff] %v10966_v17  ;;  %v1408_v22 = vpack.c.bf16 %v1111_v9, %v1110_v38  ;;  %v1017_v5 = vmul.f32 %v10857_v8, %v921_v53  ;;  %v10990_v38 = vld [vmem:[%s14552_s10 + $0x8] sm:$0xff]   ;;  %v9630_v53 = vld [vmem:[%s10160_s28 + $0x38] sm:$0xff]  ;;  %v14795_v61 = vld [vmem:[#allocation32_spill] sm:$0xff] }
 0x113   : > { %8210 = vmatprep.subr.bf16.mxu0 %v10947_v36  ;;  %8249 = vmatpush3.bf16.msra.mxu1 %v9092_v7  ;;  %v10977_v7 = vld [vmem:[%s14552_s10 + $0x10] sm:$0xff]   ;;  %v1112_v0 = vadd.f32 %v10968_v24, %v1016_v59  ;;  %v1897_v9 = vpack.c.bf16 %v9628_v37, %v9627_v26  ;;  %14789 = vst [vmem:[#allocation80_spill] sm:$0xff] %v10990_v38  ;;  %v14794_v59 = vld [vmem:[#allocation29_spill] sm:$0xff]  ;;  %v9632_v26 = vld [vmem:[%s10160_s28 + $0x48] sm:$0xff] }
 0x114   : > { %8250 = vmatprep.subr.bf16.mxu1 %v9094_v33  ;;  %v1113_v27 = vadd.f32 %v10966_v17, %v1017_v5  ;;  %v1898_v12 = vpack.c.bf16 %v9630_v53, %v9629_v28  ;;  %v14793_v5 = vld [vmem:[#allocation28_spill] sm:$0xff]  ;;  %v14798_v28 = vld [vmem:[#allocation41_spill] sm:$0xff] }
 0x115   : > { %v1739_v50 = vpack.c.bf16 %v14794_v59, %v14793_v5  ;;  %v1742_v53 = vpack.c.bf16 %v14798_v28, %v10682_v31  ;;  %v7465_v31 = vld [vmem:[%s14551_s9] ss:$0 sm:$0xff] }
 0x116   : > { %8211 = vmatpush3.bf16.msra.mxu0 %v10947_v36  ;;  %v1409_v54 = vpack.c.bf16 %v1113_v27, %v1112_v0  ;;  %v14797_v0 = vld [vmem:[#allocation38_spill] sm:$0xff] }
 0x117   : > { %8212 = vmatprep.subr.bf16.mxu0 %v10964_v58  ;;  %8251 = vmatpush3.bf16.msra.mxu1 %v9094_v33  ;;  %v1736_v33 = vpack.c.bf16 %v10530_v1, %v10527_v62  ;;  %v1737_v62 = vpack.c.bf16 %v10551_v39, %v10542_v14  ;;  %v14791_v1 = vld [vmem:[#allocation22_spill] sm:$0xff]  ;;  %v1741_v14 = vpack.c.bf16 %v14797_v0, %v10657_v20 }
 0x118   : > { %v9631_v39 = vld [vmem:[%s10160_s28 + $0x40] sm:$0xff]  ;;  %v1743_v20 = vpack.c.bf16 %v10713_v42, %v10703_v32 }
 0x119   : > { %8165 = vmatmul.mubr.bf16.gmra.mxu0 %v1407_v51  ;;  %v14792_v51 = vld [vmem:[#allocation25_spill] sm:$0xff]  ;;  %v1899_v37 = vpack.c.bf16 %v9632_v26, %v9631_v39 }
 0x11a   : > { %8168 = vmatprep.mubr.bf16.mxu0 %v1408_v22  ;;  %8213 = vmatpush3.bf16.msra.mxu0 %v10964_v58  ;;  %v1738_v22 = vpack.c.bf16 %v14792_v51, %v14791_v1  ;;  %v9637_v51 = vld [vmem:[%s10160_s28 + $0x70] sm:$0xff] }
 0x11b   : > { %8214 = vmatprep.subr.bf16.mxu0 %v10977_v7  ;;  %8253 = vmatmul.mubr.bf16.vlgmr.msra.gmra.mxu1 %v1896_v49  ;;  %v14796_v49 = vld [vmem:[#allocation35_spill] sm:$0xff] }
 0x11c   : > { %8256 = vmatprep.mubr.bf16.mxu1 %v1897_v9  ;;  %v1740_v27 = vpack.c.bf16 %v14796_v49, %v14795_v61  ;;  %v9633_v9 = vld [vmem:[%s10160_s28 + $0x50] sm:$0xff] }
 0x11e   : > { %8215 = vmatpush3.bf16.msra.mxu0 %v10977_v7 }
 0x11f   : > { %8216 = vmatprep.subr.bf16.mxu0 %v10990_v38 }
 0x121   : > { %8169 = vmatmul.mubr.bf16.gmra.mxu0 %v1409_v54  ;;  %v9634_v54 = vld [vmem:[%s10160_s28 + $0x58] sm:$0xff] }
 0x122   : > { %8220 = vmatprep.mubr.bf16.mxu0 %v1736_v33  ;;  %8217 = vmatpush3.bf16.msra.mxu0 %v10990_v38  ;;  %v1900_v33 = vpack.c.bf16 %v9634_v54, %v9633_v9 }
 0x123   : > { %8218 = vmatprep.subr.bf16.mxu0 %v10999_v25  ;;  %8257 = vmatmul.mubr.bf16.gmra.mxu1 %v1898_v12  ;;  %v9635_v12 = vld [vmem:[%s10160_s28 + $0x60] sm:$0xff] }
 0x124   : > { %8260 = vmatprep.mubr.bf16.mxu1 %v1899_v37 }
 0x126   : > { %8219 = vmatpush3.bf16.msra.mxu0 %v10999_v25 }
 0x129   : > { %8221 = vmatmul.mubr.bf16.vlgmr.msra.gmra.mxu0 %v1737_v62  ;;  %v9636_v62 = vld [vmem:[%s10160_s28 + $0x68] sm:$0xff] }
 0x12a   : > { %8224 = vmatprep.mubr.bf16.mxu0 %v1738_v22  ;;  %v1901_v1 = vpack.c.bf16 %v9636_v62, %v9635_v12  ;;  %v9638_v22 = vld [vmem:[%s10160_s28 + $0x78] sm:$0xff] }
 0x12b   : > { %8261 = vmatmul.mubr.bf16.gmra.mxu1 %v1900_v33  ;;  %v1902_v5 = vpack.c.bf16 %v9638_v22, %v9637_v51 }
 0x12c   : > { %8264 = vmatprep.mubr.bf16.mxu1 %v1901_v1 }
 0x131   : > { %8225 = vmatmul.mubr.bf16.gmra.mxu0 %v1739_v50 }
 0x132   : > { %8228 = vmatprep.mubr.bf16.mxu0 %v1740_v27 }
 0x133   : > { %8265 = vmatmul.mubr.bf16.gmra.mxu1 %v1902_v5 }
 0x139   : > { %8229 = vmatmul.mubr.bf16.gmra.mxu0 %v1741_v14 }
 0x13a   : > { %8232 = vmatprep.mubr.bf16.mxu0 %v1742_v53 }
 0x141   : > { %8233 = vmatmul.mubr.bf16.gmra.mxu0 %v1743_v20 }
 0x15b   : > { %v8190_v59 = vpop.f32.mrf.mxu1 }
 0x15c   : > { %v1682_v49 = vadd.f32 %v8190_v59, %v7465_v31 }
 0x15d   : > { %v1673_v50 = vpop.f32.mrf.mxu1 }
 0x15f   : > { %v8191_v61 = vpop.f32.mrf.mxu1 }
 0x160   : > { %v1685_v27 = vadd.f32 %v8191_v61, %v7465_v31 }
 0x161   : > { %v1676_v14 = vpop.f32.mrf.mxu1 }
 0x162   : > { %v2063_v0 = vpack.c.bf16 %v1685_v27, %v1682_v49 }
 0x16b   : > { %v8194_v39 = vpop.f32.mrf.mxu1 }
 0x16d   : > { %v1689_v26 = vpop.f32.mrf.mxu1 }
 0x16f   : > { %v8195_v32 = vpop.f32.mrf.mxu1 }
 0x171   : > { %v1692_v42 = vpop.f32.mrf.mxu1 }
 0x17b   : > { %v8198_v37 = vpop.f32.mrf.mxu1 }
 0x17c   : > { %v1714_v49 = vadd.f32 %v8198_v37, %v7465_v31  ;;  %v1677_v37 = vadd.f32 %v7465_v31, %v1676_v14 }
 0x17d   : > { %v1705_v9 = vpop.f32.mrf.mxu1 }
 0x17e   : > { %v1706_v41 = vadd.f32 %v7465_v31, %v1705_v9 }
 0x17f   : > { %v8199_v54 = vpop.f32.mrf.mxu1 }
 0x180   : > { %v1717_v61 = vadd.f32 %v8199_v54, %v7465_v31  ;;  %v1674_v54 = vadd.f32 %v7465_v31, %v1673_v50 }
 0x181   : > { %v1708_v33 = vpop.f32.mrf.mxu1 }
 0x182   : > { %v2067_v27 = vpack.c.bf16 %v1717_v61, %v1714_v49  ;;  %v1709_v40 = vadd.f32 %v7465_v31, %v1708_v33 }
 0x184   : > { %v2066_v25 = vpack.c.bf16 %v1709_v40, %v1706_v41 }
 0x18b   : > { %v8202_v28 = vpop.f32.mrf.mxu1 }
 0x18c   : > { %v1730_v62 = vadd.f32 %v8202_v28, %v7465_v31  ;;  %v1701_v28 = vadd.f32 %v8195_v32, %v7465_v31 }
 0x18d   : > { %v1721_v53 = vpop.f32.mrf.mxu1 }
 0x18e   : > { %v1722_v51 = vadd.f32 %v7465_v31, %v1721_v53  ;;  %v1693_v53 = vadd.f32 %v7465_v31, %v1692_v42 }
 0x18f   : > { %v8203_v12 = vpop.f32.mrf.mxu1 }
 0x190   : > { %v1733_v1 = vadd.f32 %v8203_v12, %v7465_v31  ;;  %v1698_v12 = vadd.f32 %v8194_v39, %v7465_v31 }
 0x191   : > { %v1724_v20 = vpop.f32.mrf.mxu1 }
 0x192   : > { %v2069_v22 = vpack.c.bf16 %v1733_v1, %v1730_v62  ;;  %v1725_v5 = vadd.f32 %v7465_v31, %v1724_v20  ;;  %v2065_v38 = vpack.c.bf16 %v1701_v28, %v1698_v12  ;;  %v1690_v62 = vadd.f32 %v7465_v31, %v1689_v26 }
 0x193   : > { %v2062_v20 = vpack.c.bf16 %v1677_v37, %v1674_v54  ;;  %v9640_v37 = vld [vmem:[%s14548_s6 + $0x30] sm:$0xff]  }
 0x194   : > { %v2068_v59 = vpack.c.bf16 %v1725_v5, %v1722_v51  ;;  %8268 = vmatprep.subr.bf16.mxu0 %v2069_v22  ;;  %v2064_v1 = vpack.c.bf16 %v1693_v53, %v1690_v62 }
 0x195   : > { %8269 = vmatpush3.bf16.xpose.msra.mxu0 %v2069_v22 }
 0x196   : > { %8270 = vmatprep.subr.bf16.mxu0 %v2068_v59 }
 0x19d   : > { %8271 = vmatpush3.bf16.xpose.msra.mxu0 %v2068_v59 }
 0x19e   : > { %8272 = vmatprep.subr.bf16.mxu0 %v2067_v27 }
 0x1a5   : > { %8273 = vmatpush3.bf16.xpose.msra.mxu0 %v2067_v27 }
 0x1a6   : > { %8274 = vmatprep.subr.bf16.mxu0 %v2066_v25 }
 0x1ad   : > { %8275 = vmatpush3.bf16.xpose.msra.mxu0 %v2066_v25  ;;  %v11034_v25 = vld [vmem:[%s14549_s7] ss:$0 sm:$0xff] }
 0x1ae   : > { %8276 = vmatprep.subr.bf16.mxu0 %v2065_v38 }
 0x1b5   : > { %8277 = vmatpush3.bf16.xpose.msra.mxu0 %v2065_v38  ;;  %v9639_v38 = vld [vmem:[%s14548_s6 + $0x38] sm:$0xff]  }
 0x1b6   : > { %8278 = vmatprep.subr.bf16.mxu0 %v2064_v1 }
 0x1bd   : > { %8279 = vmatpush3.bf16.xpose.msra.mxu0 %v2064_v1 }
 0x1be   : > { %8280 = vmatprep.subr.bf16.mxu0 %v2063_v0 }
 0x1c5   : > { %8281 = vmatpush3.bf16.xpose.msra.mxu0 %v2063_v0 }
 0x1c6   : > { %8282 = vmatprep.subr.bf16.mxu0 %v2062_v20 }
 0x1c9   : > { %v8158_v41 = vpop.f32.mrf.mxu0 }
 0x1ca   : > { %v1507_v50 = vadd.f32 %v8158_v41, %v11034_v25 }
 0x1cb   : > { %v1498_v40 = vpop.f32.mrf.mxu0 }
 0x1cc   : > { %v1499_v14 = vadd.f32 %v11034_v25, %v1498_v40  ;;  %v1563_v51 = vmul.f32 0.088388346, %v1507_v50 }
 0x1cd   : > { %8283 = vmatpush3.bf16.xpose.msra.mxu0 %v2062_v20  ;;  %v8159_v39 = vpop.f32.mrf.mxu0 }
 0x1ce   : > { %8364 = vmatprep.subr.bf16.mxu0 %v9639_v38  ;;  %v1510_v31 = vadd.f32 %v8159_v39, %v11034_v25  ;;  %v1561_v9 = vmul.f32 0.088388346, %v1499_v14 }
 0x1cf   : > { %v1501_v0 = vpop.f32.mrf.mxu0 }
 0x1d0   : > { %v1502_v26 = vadd.f32 %v11034_v25, %v1501_v0  ;;  %v1564_v32 = vmul.f32 0.088388346, %v1510_v31 }
 0x1d1   : > { %v8162_v42 = vpop.f32.mrf.mxu0 }
 0x1d2   : > { %v1562_v33 = vmul.f32 0.088388346, %v1502_v26  ;;  %v2055_v59 = vpack.c.bf16 %v1564_v32, %v1563_v51  ;;  %v1523_v28 = vadd.f32 %v8162_v42, %v11034_v25 }
 0x1d3   : > { %v1514_v22 = vpop.f32.mrf.mxu0 }
 0x1d4   : > { %v2054_v5 = vpack.c.bf16 %v1562_v33, %v1561_v9  ;;  %v1515_v49 = vadd.f32 %v11034_v25, %v1514_v22  ;;  %v1567_v41 = vmul.f32 0.088388346, %v1523_v28  ;;  %v11058_v9 = vld [vmem:[%s10385_s1 + $0x80] sm:$0xff]  ;;  %v11063_v22 = vld [vmem:[%s10385_s1 + $0x88] sm:$0xff] }
 0x1d5   : > { %v8163_v61 = vpop.f32.mrf.mxu0  ;;  %v14799_v33 = vld [vmem:[#allocation54_spill] sm:$0xff] }
 0x1d6   : > { %8284 = vmatprep.mubr.bf16.mxu0 %v2054_v5  ;;  %v1526_v27 = vadd.f32 %v8163_v61, %v11034_v25  ;;  %v1565_v54 = vmul.f32 0.088388346, %v1515_v49  ;;  %v2917_v51 = vsub.f32 %v11058_v9, %v14799_v33  ;;  %v2918_v5 = vsub.f32 %v11063_v22, %v14799_v33  ;;  %v9644_v49 = vld [vmem:[%s14548_s6 + $0x20] sm:$0xff]  }
 0x1d7   : > { %v1517_v12 = vpop.f32.mrf.mxu0  ;;  %8285 = vmatmul.mubr.bf16.vlgmr.msra.gmra.mxu0 %v2055_v59 }
 0x1d8   : > { %v1518_v53 = vadd.f32 %v11034_v25, %v1517_v12  ;;  %8365 = vmatpush3.bf16.msra.mxu0 %v9639_v38  ;;  %v1568_v62 = vmul.f32 0.088388346, %v1526_v27  ;;  %v9641_v38 = vld [vmem:[%s14548_s6 + $0x28] sm:$0xff]  }
 0x1d9   : > { %v8166_v1 = vpop.f32.mrf.mxu0  ;;  %8366 = vmatprep.subr.bf16.mxu0 %v9640_v37 }
 0x1da   : > { %v1566_v20 = vmul.f32 0.088388346, %v1518_v53  ;;  %v2057_v14 = vpack.c.bf16 %v1568_v62, %v1567_v41  ;;  %v1539_v26 = vadd.f32 %v8166_v1, %v11034_v25  ;;  %v14800_v1 = vld [vmem:[#allocation68_spill] sm:$0xff] }
 0x1db   : > { %v1530_v40 = vpop.f32.mrf.mxu0 }
 0x1dc   : > { %v2056_v39 = vpack.c.bf16 %v1566_v20, %v1565_v54  ;;  %8367 = vmatpush3.bf16.msra.mxu0 %v9640_v37  ;;  %v1531_v50 = vadd.f32 %v11034_v25, %v1530_v40  ;;  %v1571_v12 = vmul.f32 0.088388346, %v1539_v26  ;;  %v2935_v37 = vmul.f32 %v14800_v1, %v2917_v51  ;;  %v11073_v20 = vld [vmem:[%s10385_s1 + $0x98] sm:$0xff]  ;;  %v11078_v40 = vld [vmem:[%s10385_s1 + $0x90] sm:$0xff] }
 0x1dd   : > { %v8167_v31 = vpop.f32.mrf.mxu0  ;;  %8368 = vmatprep.subr.bf16.mxu0 %v9641_v38  ;;  %v2936_v54 = vmul.f32 %v14800_v1, %v2918_v5  ;;  %v2920_v41 = vsub.f32 %v11073_v20, %v14799_v33 }
 0x1de   : > { %v1542_v0 = vadd.f32 %v8167_v31, %v11034_v25  ;;  %8288 = vmatprep.mubr.bf16.mxu0 %v2056_v39  ;;  %v1569_v27 = vmul.f32 0.088388346, %v1531_v50  ;;  %v2919_v39 = vsub.f32 %v11078_v40, %v14799_v33 }
 0x1df   : > { %v1533_v32 = vpop.f32.mrf.mxu0  ;;  %8289 = vmatmul.mubr.bf16.gmra.mxu0 %v2057_v14 }
 0x1e0   : > { %v1534_v42 = vadd.f32 %v11034_v25, %v1533_v32  ;;  %8369 = vmatpush3.bf16.msra.mxu0 %v9641_v38  ;;  %v1572_v59 = vmul.f32 0.088388346, %v1542_v0  ;;  %v9647_v38 = vld [vmem:[%s14548_s6 + $0x18] sm:$0xff]  }
 0x1e1   : > { %v8170_v61 = vpop.f32.mrf.mxu0  ;;  %8370 = vmatprep.subr.bf16.mxu0 %v9644_v49 }
 0x1e2   : > { %v1570_v28 = vmul.f32 0.088388346, %v1534_v42  ;;  %v2059_v14 = vpack.c.bf16 %v1572_v59, %v1571_v12  ;;  %v1555_v26 = vadd.f32 %v8170_v61, %v11034_v25  ;;  %v11089_v42 = vld [vmem:[%s10385_s1 + $0xa0] sm:$0xff]  ;;  %v2951_v59 = vmul.f32 %v2935_v37, %v10709_v35 }
 0x1e3   : > { %v1546_v53 = vpop.f32.mrf.mxu0  ;;  %v2921_v51 = vsub.f32 %v11089_v42, %v14799_v33  ;;  %v2938_v61 = vmul.f32 %v14800_v1, %v2920_v41  ;;  %v2937_v12 = vmul.f32 %v14800_v1, %v2919_v39 }
 0x1e4   : > { %v2058_v62 = vpack.c.bf16 %v1570_v28, %v1569_v27  ;;  %8371 = vmatpush3.bf16.msra.mxu0 %v9644_v49  ;;  %v1547_v50 = vadd.f32 %v11034_v25, %v1546_v53  ;;  %v2952_v49 = vmul.f32 %v2936_v54, %v10707_v19  ;;  %v11097_v27 = vld [vmem:[%s10385_s1 + $0xa8] sm:$0xff]  ;;  %v2967_v37 = vadd.f32 %v2951_v59, %v10731_v10 }
 0x1e5   : > { %v8171_v31 = vpop.f32.mrf.mxu0  ;;  %8372 = vmatprep.subr.bf16.mxu0 %v9647_v38  ;;  %v2922_v28 = vsub.f32 %v11097_v27, %v14799_v33  ;;  %v1575_v41 = vmul.f32 0.088388346, %v1555_v26  ;;  %v2939_v39 = vmul.f32 %v14800_v1, %v2921_v51  ;;  %v2954_v26 = vmul.f32 %v2938_v61, %v10720_v4  ;;  %v14801_v51 = vld [vmem:[#allocation45_spill] sm:$0xff] }
 0x1e6   : > { %v1558_v0 = vadd.f32 %v8171_v31, %v11034_v25  ;;  %8292 = vmatprep.mubr.bf16.mxu0 %v2058_v62  ;;  %v9650_v62 = vld [vmem:[%s14548_s6 + $0x10] sm:$0xff]   ;;  %v2968_v54 = vadd.f32 %v2952_v49, %v10729_v46  ;;  %v9651_v49 = vld [vmem:[%s14548_s6 + $0x8] sm:$0xff]   ;;  %v2953_v10 = vmul.f32 %v2937_v12, %v14801_v51  ;;  %v14802_v51 = vld [vmem:[#allocation49_spill] sm:$0xff] }
 0x1e7   : > { %v1549_v32 = vpop.f32.mrf.mxu0  ;;  %8293 = vmatmul.mubr.bf16.gmra.mxu0 %v2059_v14  ;;  %v1573_v14 = vmul.f32 0.088388346, %v1547_v50  ;;  %v2940_v50 = vmul.f32 %v14800_v1, %v2922_v28  ;;  %v2955_v28 = vmul.f32 %v2939_v39, %v10747_v34  ;;  %v11142_v39 = vld [vmem:[%s10385_s1 + $0xc8] sm:$0xff]  ;;  %v2970_v34 = vadd.f32 %v2954_v26, %v10737_v43 }
 0x1e8   : > { %v1550_v5 = vadd.f32 %v11034_v25, %v1549_v32  ;;  %8373 = vmatpush3.bf16.msra.mxu0 %v9647_v38  ;;  %v1576_v53 = vmul.f32 0.088388346, %v1558_v0  ;;  %v11111_v32 = vld [vmem:[%s14553_s11] ss:$0 sm:$0xff] }
 0x1e9   : > { %8374 = vmatprep.subr.bf16.mxu0 %v9650_v62  ;;  %v8222_v38 = vpop.f32.mrf.mxu0  ;;  %v2956_v12 = vmul.f32 %v2940_v50, %v10745_v45  ;;  %v9656_v50 = vld [vmem:[%s14548_s6] sm:$0xff]  }
 0x1ea   : > { %v1574_v31 = vmul.f32 0.088388346, %v1550_v5  ;;  %v2061_v59 = vpack.c.bf16 %v1576_v53, %v1575_v41  ;;  %v1841_v46 = vadd.f32 %v8222_v38, %v11111_v32  ;;  %v11125_v53 = vld [vmem:[%s10385_s1 + $0xb0] sm:$0xff]  ;;  %v11130_v41 = vld [vmem:[%s10385_s1 + $0xb8] sm:$0xff] }
 0x1eb   : > { %v11115_v5 = vpop.f32.mrf.mxu0  ;;  %v2924_v38 = vsub.f32 %v11130_v41, %v14799_v33  ;;  %v2972_v45 = vadd.f32 %v2956_v12, %v10759_v60 }
 0x1ec   : > { %v2060_v0 = vpack.c.bf16 %v1574_v31, %v1573_v14  ;;  %8375 = vmatpush3.bf16.msra.mxu0 %v9650_v62  ;;  %v3111_v62 = vpack.c.bf16 %v2968_v54, %v2967_v37  ;;  %v2923_v31 = vsub.f32 %v11125_v53, %v14799_v33  ;;  %v11137_v37 = vld [vmem:[%s10385_s1 + $0xc0] sm:$0xff] }
 0x1ed   : > { %8376 = vmatprep.subr.bf16.mxu0 %v9651_v49  ;;  %v8223_v14 = vpop.f32.mrf.mxu0  ;;  %v2925_v54 = vsub.f32 %v11137_v37, %v14799_v33  ;;  %v2942_v35 = vmul.f32 %v14800_v1, %v2924_v38 }
 0x1ee   : > { %8296 = vmatprep.mubr.bf16.mxu0 %v2060_v0  ;;  %v1844_v61 = vadd.f32 %v8223_v14, %v11111_v32  ;;  %v2926_v0 = vsub.f32 %v11142_v39, %v14799_v33  ;;  %v2969_v14 = vadd.f32 %v2953_v10, %v14802_v51  ;;  %v2941_v19 = vmul.f32 %v14800_v1, %v2923_v31 }
 0x1ef   : > { %8297 = vmatmul.mubr.bf16.gmra.mxu0 %v2061_v59  ;;  %v11146_v59 = vpop.f32.mrf.mxu0  ;;  %v2943_v10 = vmul.f32 %v14800_v1, %v2925_v54 }
 0x1f0   : > { %8377 = vmatpush3.bf16.msra.mxu0 %v9651_v49  ;;  %8380 = vmatprep.mubr.bf16.mxu0 %v3111_v62  ;;  %v11153_v49 = vpack.c.bf16 %v1844_v61, %v1841_v46  ;;  %v2971_v62 = vadd.f32 %v2955_v28, %v10761_v13  ;;  %v2944_v26 = vmul.f32 %v14800_v1, %v2926_v0  ;;  %v11163_v46 = vpop.f32.mrf.mxu1  ;;  %v11168_v61 = vld [vmem:[%s10385_s1 + $0xd8] sm:$0xff]  ;;  %v11183_v13 = vld [vmem:[%s10385_s1 + $0xe0] sm:$0xff] }
 0x1f1   : > { %8378 = vmatprep.subr.bf16.mxu0 %v9656_v50  ;;  %v8226_v4 = vpop.f32.mrf.mxu0  ;;  %v3112_v43 = vpack.c.bf16 %v2970_v34, %v2969_v14  ;;  %v2928_v31 = vsub.f32 %v11168_v61, %v14799_v33  ;;  %v2957_v54 = vmul.f32 %v2941_v19, %v10755_v63  ;;  %v2958_v0 = vmul.f32 %v2942_v35, %v10753_v56  ;;  %v11175_v34 = vld [vmem:[%s10385_s1 + $0xd0] sm:$0xff] }
 0x1f2   : > { %v1857_v28 = vadd.f32 %v8226_v4, %v11111_v32  ;;  %v3113_v38 = vpack.c.bf16 %v2972_v45, %v2971_v62  ;;  %v2927_v14 = vsub.f32 %v11175_v34, %v14799_v33  ;;  %v2960_v60 = vmul.f32 %v2944_v26, %v10777_v57  ;;  %v11190_v45 = vpop.f32.mrf.mxu1 }
 0x1f3   : > { %v11161_v51 = vpop.f32.mrf.mxu0  ;;  %v2973_v19 = vadd.f32 %v2957_v54, %v10773_v16  ;;  %v2974_v35 = vadd.f32 %v2958_v0, %v10767_v23  ;;  %v11206_v23 = vld [vmem:[%s10385_s1 + $0xf8] sm:$0xff] }
 0x1f4   : > { %8379 = vmatpush3.bf16.msra.mxu0 %v9656_v50  ;;  %v2959_v50 = vmul.f32 %v2943_v10, %v10783_v21  ;;  %v2976_v26 = vadd.f32 %v2960_v60, %v10787_v30  ;;  %v11201_v0 = vpop.f32.mrf.mxu1  ;;  %v2932_v60 = vsub.f32 %v11206_v23, %v14799_v33 }
 0x1f5   : > { %8428 = vmatprep.subr.bf16.mxu0 %v10794_v15  ;;  %v8227_v12 = vpop.f32.mrf.mxu0  ;;  %v3114_v54 = vpack.c.bf16 %v2974_v35, %v2973_v19 }
 0x1f6   : > { %v1860_v4 = vadd.f32 %v8227_v12, %v11111_v32  ;;  %v2975_v10 = vadd.f32 %v2959_v50, %v10805_v18  ;;  %v11220_v35 = vpop.f32.mrf.mxu1 }
 0x1f7   : > { %8381 = vmatmul.mubr.bf16.vlgmr.msra.gmra.mxu0 %v3112_v43  ;;  %v2929_v43 = vsub.f32 %v11183_v13, %v14799_v33 }
 0x1f8   : > { %8384 = vmatprep.mubr.bf16.mxu0 %v3113_v38  ;;  %8429 = vmatpush3.bf16.msra.mxu0 %v10794_v15  ;;  %v11192_v62 = vpack.c.bf16 %v1860_v4, %v1857_v28  ;;  %v2946_v38 = vmul.f32 %v14800_v1, %v2928_v31  ;;  %v2945_v15 = vmul.f32 %v14800_v1, %v2927_v14  ;;  %v11212_v14 = vld [vmem:[%s10385_s1 + $0xf0] sm:$0xff] }
 0x1f9   : > { %8430 = vmatprep.subr.bf16.mxu0 %v10901_v11  ;;  %v2947_v12 = vmul.f32 %v14800_v1, %v2929_v43  ;;  %v3115_v28 = vpack.c.bf16 %v2976_v26, %v2975_v10  ;;  %v2950_v26 = vmul.f32 %v14800_v1, %v2932_v60 }
 0x1fa   : > { %v2962_v4 = vmul.f32 %v2946_v38, %v10785_v48  ;;  %v2961_v31 = vmul.f32 %v2945_v15, %v10789_v47  ;;  %v8258_v15 = vpop.f32.mrf.mxu1 }
 0x1fb   : > { %v2963_v50 = vmul.f32 %v2947_v12, %v10877_v3  ;;  %v2966_v12 = vmul.f32 %v2950_v26, %v10857_v8 }
 0x1fc   : > { %8431 = vmatpush3.bf16.msra.mxu0 %v10901_v11  ;;  %v2931_v11 = vsub.f32 %v11212_v14, %v14799_v33  ;;  %v2978_v43 = vadd.f32 %v2962_v4, %v10796_v6  ;;  %v2977_v19 = vadd.f32 %v2961_v31, %v10834_v44  ;;  %v2007_v4 = vpop.f32.mrf.mxu1  ;;  %v11237_v31 = vpop.f32.mrf.mxu0  ;;  %v3337_v44 = vpack.c.bf16 %v11063_v22, %v11058_v9 }
 0x1fd   : > { %8432 = vmatprep.subr.bf16.mxu0 %v10926_v2  ;;  %v2979_v10 = vadd.f32 %v2963_v50, %v10936_v29 }
 0x1fe   : > { %v2949_v38 = vmul.f32 %v14800_v1, %v2931_v11  ;;  %v3116_v33 = vpack.c.bf16 %v2978_v43, %v2977_v19  ;;  %v8259_v60 = vpop.f32.mrf.mxu1  ;;  %v8230_v50 = vpop.f32.mrf.mxu0 }
 0x1ff   : > { %8385 = vmatmul.mubr.bf16.gmra.mxu0 %v3114_v54 }
 0x200   : > { %8388 = vmatprep.mubr.bf16.mxu0 %v3115_v28  ;;  %8433 = vmatpush3.bf16.msra.mxu0 %v10926_v2  ;;  %v3117_v2 = vpack.c.bf16 %v10907_v55, %v2979_v10  ;;  %v2965_v54 = vmul.f32 %v2949_v38, %v10905_v52  ;;  %v2982_v28 = vadd.f32 %v2966_v12, %v10966_v17  ;;  %v14803_v55 = vld [vmem:[#allocation80_spill] sm:$0xff]  ;;  %v2010_v11 = vpop.f32.mrf.mxu1  ;;  %v11242_v19 = vpop.f32.mrf.mxu0 }
 0x201   : > { %8434 = vmatprep.subr.bf16.mxu0 %v10947_v36 }
 0x202   : > { %v2981_v1 = vadd.f32 %v2965_v54, %v10968_v24  ;;  %v8262_v43 = vpop.f32.mrf.mxu1  ;;  %v8231_v26 = vpop.f32.mrf.mxu0  ;;  %v7483_v54 = vld [vmem:[%s14555_s13] ss:$0 sm:$0xff] }
 0x203   : > { %v2032_v52 = vadd.f32 %v8262_v43, %v7483_v54  ;;  %v2019_v43 = vadd.f32 %v8259_v60, %v7483_v54  ;;  %v2000_v9 = vadd.f32 %v11163_v46, %v7483_v54  ;;  %v2003_v22 = vadd.f32 %v11201_v0, %v7483_v54 }
 0x204   : > { %8435 = vmatpush3.bf16.msra.mxu0 %v10947_v36  ;;  %v3118_v36 = vpack.c.bf16 %v2982_v28, %v2981_v1  ;;  %v2023_v10 = vpop.f32.mrf.mxu1  ;;  %v3341_v0 = vpack.c.bf16 %v11142_v39, %v11137_v37 }
 0x205   : > { %8436 = vmatprep.subr.bf16.mxu0 %v10964_v58 }
 0x206   : > { %v8263_v38 = vpop.f32.mrf.mxu1 }
 0x207   : > { %8389 = vmatmul.mubr.bf16.gmra.mxu0 %v3116_v33  ;;  %v1876_v33 = vadd.f32 %v8231_v26, %v11111_v32 }
 0x208   : > { %8392 = vmatprep.mubr.bf16.mxu0 %v3117_v2  ;;  %8437 = vmatpush3.bf16.msra.mxu0 %v10964_v58  ;;  %v14804_v58 = vld [vmem:[#allocation81_spill] sm:$0xff]  ;;  %v2026_v2 = vpop.f32.mrf.mxu1 }
 0x209   : > { %8438 = vmatprep.subr.bf16.mxu0 %v10977_v7 }
 0x20a   : > { %v8266_v28 = vpop.f32.mrf.mxu1 }
 0x20c   : > { %8439 = vmatpush3.bf16.msra.mxu0 %v10977_v7  ;;  %v1873_v7 = vadd.f32 %v8230_v50, %v11111_v32  ;;  %v2039_v1 = vpop.f32.mrf.mxu1  ;;  %v2035_v50 = vadd.f32 %v8263_v38, %v7483_v54 }
 0x20d   : > { %8440 = vmatprep.subr.bf16.mxu0 %v14803_v55 }
 0x20e   : > { %v11246_v12 = vpack.c.bf16 %v1876_v33, %v1873_v7  ;;  %v2024_v7 = vadd.f32 %v7483_v54, %v2023_v10  ;;  %v2324_v26 = vpack.c.bf16 %v2035_v50, %v2032_v52  ;;  %v2027_v33 = vadd.f32 %v7483_v54, %v2026_v2 }
 0x20f   : > { %8393 = vmatmul.mubr.bf16.gmra.mxu0 %v3118_v36  ;;  %v2048_v36 = vadd.f32 %v8266_v28, %v7483_v54  ;;  %v3338_v28 = vpack.c.bf16 %v11073_v20, %v11078_v40  ;;  %v3344_v10 = vpack.c.bf16 %v11206_v23, %v11212_v14 }
 0x210   : > { %8441 = vmatpush3.bf16.msra.mxu0 %v14803_v55  ;;  %v8267_v55 = vpop.f32.mrf.mxu1  ;;  %8444 = vmatprep.mubr.bf16.mxu0 %v3337_v44  ;;  %v2323_v38 = vpack.c.bf16 %v2027_v33, %v2024_v7  ;;  %v3340_v44 = vpack.c.bf16 %v11130_v41, %v11125_v53 }
 0x211   : > { %8442 = vmatprep.subr.bf16.mxu0 %v14804_v58  ;;  %v2051_v24 = vadd.f32 %v8267_v55, %v7483_v54 }
 0x212   : > { %v2042_v17 = vpop.f32.mrf.mxu1 }
 0x213   : > { %v2326_v8 = vpack.c.bf16 %v2051_v24, %v2048_v36  ;;  %v2043_v29 = vadd.f32 %v7483_v54, %v2042_v17  ;;  %v2011_v17 = vadd.f32 %v7483_v54, %v2010_v11  ;;  %v3339_v24 = vpack.c.bf16 %v11097_v27, %v11089_v42 }
 0x214   : > { %8443 = vmatpush3.bf16.msra.mxu0 %v14804_v58  ;;  %v2040_v58 = vadd.f32 %v7483_v54, %v2039_v1  ;;  %v2016_v1 = vadd.f32 %v8258_v15, %v7483_v54  ;;  %v1992_v15 = vadd.f32 %v7483_v54, %v11190_v45  ;;  %v1995_v42 = vadd.f32 %v7483_v54, %v11220_v35  ;;  %v9662_v35 = vld [vmem:[%s10385_s1 + $0xe8] sm:$0xff] }
 0x215   : > { %8300 = vmatprep.subr.bf16.mxu1 %v2326_v8  ;;  %v3342_v45 = vpack.c.bf16 %v11168_v61, %v11175_v34  ;;  %v3343_v11 = vpack.c.bf16 %v9662_v35, %v11183_v13 }
 0x216   : > { %v2325_v3 = vpack.c.bf16 %v2043_v29, %v2040_v58  ;;  %8301 = vmatpush3.bf16.msra.mxu1 %v2326_v8  ;;  %v11255_v29 = vpop.f32.mrf.mxu0  ;;  %v2008_v8 = vadd.f32 %v7483_v54, %v2007_v4  ;;  %v2322_v52 = vpack.c.bf16 %v2019_v43, %v2016_v1  ;;  %v2320_v4 = vpack.c.bf16 %v2003_v22, %v2000_v9 }
 0x217   : > { %8445 = vmatmul.mubr.bf16.vlgmr.msra.gmra.mxu0 %v3338_v28  ;;  %v2319_v53 = vpack.c.bf16 %v1995_v42, %v1992_v15 }
 0x218   : > { %8302 = vmatprep.subr.bf16.mxu1 %v2325_v3  ;;  %8448 = vmatprep.mubr.bf16.mxu0 %v3339_v24  ;;  %v2321_v20 = vpack.c.bf16 %v2011_v17, %v2008_v8 }
 0x21a   : > { %8303 = vmatpush3.bf16.msra.mxu1 %v2325_v3  ;;  %v8234_v3 = vpop.f32.mrf.mxu0 }
 0x21b   : > { %8304 = vmatprep.subr.bf16.mxu1 %v2324_v26  ;;  %v1889_v41 = vadd.f32 %v8234_v3, %v11111_v32 }
 0x21c   : > { %v11263_v40 = vpop.f32.mrf.mxu0 }
 0x21e   : > { %8305 = vmatpush3.bf16.msra.mxu1 %v2324_v26  ;;  %v8235_v27 = vpop.f32.mrf.mxu0 }
 0x21f   : > { %8306 = vmatprep.subr.bf16.mxu1 %v2323_v38  ;;  %8449 = vmatmul.mubr.bf16.gmra.mxu0 %v3340_v44  ;;  %v1892_v46 = vadd.f32 %v8235_v27, %v11111_v32 }
 0x220   : > { %8452 = vmatprep.mubr.bf16.mxu0 %v3341_v0  ;;  %v11280_v37 = vpop.f32.mrf.mxu0 }
 0x221   : > { %v11271_v60 = vpack.c.bf16 %v1892_v46, %v1889_v41 }
 0x222   : > { %8307 = vmatpush3.bf16.msra.mxu1 %v2323_v38 }
 0x223   : > { %8308 = vmatprep.subr.bf16.mxu1 %v2322_v52 }
 0x226   : > { %8309 = vmatpush3.bf16.msra.mxu1 %v2322_v52 }
 0x227   : > { %8310 = vmatprep.subr.bf16.mxu1 %v2321_v20  ;;  %8453 = vmatmul.mubr.bf16.gmra.mxu0 %v3342_v45 }
 0x228   : > { %8456 = vmatprep.mubr.bf16.mxu0 %v3343_v11 }
 0x22a   : > { %8311 = vmatpush3.bf16.msra.mxu1 %v2321_v20 }
 0x22b   : > { %8312 = vmatprep.subr.bf16.mxu1 %v2320_v4 }
 0x22e   : > { %8313 = vmatpush3.bf16.msra.mxu1 %v2320_v4 }
 0x22f   : > { %8314 = vmatprep.subr.bf16.mxu1 %v2319_v53  ;;  %8457 = vmatmul.mubr.bf16.gmra.mxu0 %v3344_v10 }
 0x232   : > { %8315 = vmatpush3.bf16.msra.mxu1 %v2319_v53 }
 0x233   : > { %8332 = vmatprep.subr.bf16.mxu1 %v11271_v60 }
 0x297   : > { %v11282_v39 = vpop.f32.mrf.mxu0 }
 0x298   : > { %2171 = vmax.xlane.f32.xlu1 %v11282_v39 }
 0x299   : > { %v11285_v2 = vpop.f32.mrf.mxu0 }
 0x29a   : > { %2424 = vxpose.xlu0.b32.start [1/16] %v11285_v2, 128 }
 0x29b   : > { %v11288_v61 = vpop.f32.mrf.mxu0 }
 0x29c   : > { %2167 = vmax.xlane.f32.xlu1 %v11285_v2 }
 0x29d   : > { %v11291_v13 = vpop.f32.mrf.mxu0 }
 0x29e   : > { %2425 = vxpose.xlu0.b32.cont [2/16] %v11291_v13, 128 }
 0x29f   : > { %v11294_v23 = vpop.f32.mrf.mxu0 }
 0x2a0   : > { %2173 = vmax.xlane.f32.xlu1 %v11288_v61 }
 0x2a1   : > { %v11297_v34 = vpop.f32.mrf.mxu0 }
 0x2a2   : > { %2426 = vxpose.xlu0.b32.cont [3/16] %v11282_v39, 128 }
 0x2a3   : > { %v11300_v14 = vpop.f32.mrf.mxu0 }
 0x2a4   : > { %2169 = vmax.xlane.f32.xlu1 %v11291_v13 }
 0x2a5   : > { %v11303_v54 = vpop.f32.mrf.mxu0 }
 0x2a6   : > { %2427 = vxpose.xlu0.b32.cont [4/16] %v11288_v61, 128 }
 0x2a7   : > { %v11306_v36 = vpop.f32.mrf.mxu0 }
 0x2a8   : > { %2179 = vmax.xlane.f32.xlu1 %v11294_v23 }
 0x2a9   : > { %v11309_v55 = vpop.f32.mrf.mxu0 }
 0x2aa   : > { %2428 = vxpose.xlu0.b32.cont [5/16] %v11297_v34, 128 }
 0x2ab   : > { %v11312_v58 = vpop.f32.mrf.mxu0 }
 0x2ac   : > { %2175 = vmax.xlane.f32.xlu1 %v11297_v34 }
 0x2ad   : > { %v11315_v50 = vpop.f32.mrf.mxu0 }
 0x2ae   : > { %2429 = vxpose.xlu0.b32.cont [6/16] %v11303_v54, 128 }
 0x2af   : > { %v11318_v7 = vpop.f32.mrf.mxu0 }
 0x2b0   : > { %2181 = vmax.xlane.f32.xlu1 %v11300_v14 }
 0x2b1   : > { %v11321_v26 = vpop.f32.mrf.mxu0 }
 0x2b2   : > { %2430 = vxpose.xlu0.b32.cont [7/16] %v11294_v23, 128 }
 0x2b3   : > { %v11324_v33 = vpop.f32.mrf.mxu0 }
 0x2b4   : > { %2177 = vmax.xlane.f32.xlu1 %v11303_v54 }
 0x2b5   : > { %v11327_v28 = vpop.f32.mrf.mxu0 }
 0x2b6   : > { %2431 = vxpose.xlu0.b32.cont [8/16] %v11300_v14, 128 }
 0x2b7   : > { %v8382_v1 = vpop.f32.mrf.mxu0 }
 0x2b8   : > { %2187 = vmax.xlane.f32.xlu1 %v11306_v36  ;;  %v3162_v38 = vadd.f32 %v8382_v1, %v11034_v25 }
 0x2b9   : > { %v3153_v43 = vpop.f32.mrf.mxu0 }
 0x2ba   : > { %2432 = vxpose.xlu0.b32.cont [9/16] %v11309_v55, 128  ;;  %v3154_v52 = vadd.f32 %v11034_v25, %v3153_v43  ;;  %v11336_v3 = vmul.f32 0.088388346, %v3162_v38 }
 0x2bb   : > { %v8383_v8 = vpop.f32.mrf.mxu0 }
 0x2bc   : > { %v3165_v17 = vadd.f32 %v8383_v8, %v11034_v25  ;;  %2183 = vmax.xlane.f32.xlu1 %v11309_v55  ;;  %v3216_v22 = vmul.f32 0.088388346, %v3154_v52 }
 0x2bd   : > { %v3156_v24 = vpop.f32.mrf.mxu0 }
 0x2be   : > { %v11338_v44 = vmul.f32 0.088388346, %v3165_v17  ;;  %v3157_v9 = vadd.f32 %v11034_v25, %v3156_v24  ;;  %2433 = vxpose.xlu0.b32.cont [10/16] %v11315_v50, 128 }
 0x2c0   : > { %v3217_v15 = vmul.f32 0.088388346, %v3157_v9  ;;  %2189 = vmax.xlane.f32.xlu1 %v11312_v58 }
 0x2c2   : > { %2434 = vxpose.xlu0.b32.cont [11/16] %v11306_v36, 128  ;;  %v3547_v4 = vpack.c.bf16 %v3217_v15, %v3216_v22 }
 0x2c4   : > { %2185 = vmax.xlane.f32.xlu1 %v11315_v50  ;;  %8508 = vmatprep.mubr.bf16.mxu0 %v3547_v4 }
 0x2c6   : > { %2435 = vxpose.xlu0.b32.cont [12/16] %v11312_v58, 128 }
 0x2c8   : > { %2195 = vmax.xlane.f32.xlu1 %v11318_v7 }
 0x2ca   : > { %2436 = vxpose.xlu0.b32.cont [13/16] %v11321_v26, 128 }
 0x2cc   : > { %2191 = vmax.xlane.f32.xlu1 %v11321_v26 }
 0x2ce   : > { %2437 = vxpose.xlu0.b32.cont [14/16] %v11327_v28, 128 }
 0x2d0   : > { %2193 = vmax.xlane.f32.xlu1 %v11327_v28 }
 0x2d2   : > { %2438 = vxpose.xlu0.b32.cont [15/16] %v11318_v7, 128 }
 0x2d6   : > { %2439 = vxpose.xlu0.b32.end [16/16] %v11324_v33, 128 }
 0x303   : > { %2197 = vmax.xlane.f32.xlu0 %v11324_v33 }
 0x316   : > { %v11356_v25 = vpop.trf.xlu0 }
 0x317   : > { %2456 = vmax.xlane.f32.xlu1 %v11356_v25 }
 0x31a   : > { %v11359_v42 = vpop.trf.xlu0 }
 0x31b   : > { %2458 = vmax.xlane.f32.xlu1 %v11359_v42 }
 0x31e   : > { %v11362_v27 = vpop.trf.xlu0 }
 0x31f   : > { %2460 = vmax.xlane.f32.xlu1 %v11362_v27 }
 0x321   : > { %v2172_v53 = vpop.xlane.xlu1 %2171 }
 0x322   : > { %v11365_v41 = vpop.trf.xlu0  ;;  %v2201_v15 = vsub.f32 %v11282_v39, %v2172_v53 }
 0x323   : > { %2462 = vmax.xlane.f32.xlu1 %v11365_v41 }
 0x324   : > { %v2219_v48 = vmul.f32 1.442695, %v2201_v15 }
 0x325   : > { %v2168_v46 = vpop.xlane.xlu1 %2167 }
 0x326   : > { %v11368_v0 = vpop.trf.xlu0  ;;  %v2199_v24 = vsub.f32 %v11285_v2, %v2168_v46 }
 0x327   : > { %2464 = vmax.xlane.f32.xlu1 %v11368_v0 }
 0x328   : > { %v2215_v4 = vmul.f32 1.442695, %v2199_v24 }
 0x329   : > { %v2174_v45 = vpop.xlane.xlu1 %2173 }
 0x32a   : > { %v11371_v35 = vpop.trf.xlu0  ;;  %v2202_v30 = vsub.f32 %v11288_v61, %v2174_v45  ;;  %9105 = vpow2.f32 %v2215_v4 }
 0x32b   : > { %2466 = vmax.xlane.f32.xlu1 %v11371_v35  ;;  %9107 = vpow2.f32 %v2219_v48 }
 0x32c   : > { %v2221_v39 = vmul.f32 1.442695, %v2202_v30 }
 0x32d   : > { %v2170_v11 = vpop.xlane.xlu1 %2169 }
 0x32e   : > { %v11374_v10 = vpop.trf.xlu0  ;;  %v2200_v20 = vsub.f32 %v11291_v13, %v2170_v11 }
 0x32f   : > { %2468 = vmax.xlane.f32.xlu1 %v11374_v10 }
 0x330   : > { %v2217_v2 = vmul.f32 1.442695, %v2200_v20 }
 0x331   : > { %v2180_v1 = vpop.xlane.xlu1 %2179 }
 0x332   : > { %v11377_v43 = vpop.trf.xlu0  ;;  %v2205_v13 = vsub.f32 %v11294_v23, %v2180_v1  ;;  %9109 = vpow2.f32 %v2217_v2 }
 0x333   : > { %2470 = vmax.xlane.f32.xlu1 %v11377_v43  ;;  %9111 = vpow2.f32 %v2221_v39 }
 0x334   : > { %v2227_v61 = vmul.f32 1.442695, %v2205_v13 }
 0x335   : > { %v2176_v38 = vpop.xlane.xlu1 %2175 }
 0x336   : > { %v11380_v8 = vpop.trf.xlu0  ;;  %v2203_v46 = vsub.f32 %v11297_v34, %v2176_v38 }
 0x337   : > { %2472 = vmax.xlane.f32.xlu1 %v11380_v8  ;;  %v11412_v4 = vpop.eup %9105 }
 0x338   : > { %v2223_v53 = vmul.f32 1.442695, %v2203_v46 }
 0x339   : > { %v2182_v52 = vpop.xlane.xlu1 %2181 }
 0x33a   : > { %v11383_v17 = vpop.trf.xlu0  ;;  %v2206_v34 = vsub.f32 %v11300_v14, %v2182_v52  ;;  %9113 = vpow2.f32 %v2223_v53  ;;  %v11419_v52 = vpop.eup %9107 }
 0x33b   : > { %2474 = vmax.xlane.f32.xlu1 %v11383_v17  ;;  %9115 = vpow2.f32 %v2227_v61 }
 0x33c   : > { %v2229_v23 = vmul.f32 1.442695, %v2206_v34 }
 0x33d   : > { %v2178_v9 = vpop.xlane.xlu1 %2177 }
 0x33e   : > { %v11387_v22 = vpop.trf.xlu0  ;;  %v2204_v11 = vsub.f32 %v11303_v54, %v2178_v9 }
 0x33f   : > { %2476 = vmax.xlane.f32.xlu1 %v11387_v22  ;;  %v11421_v2 = vpop.eup %9109 }
 0x340   : > { %v2225_v20 = vmul.f32 1.442695, %v2204_v11  ;;  %v11427_v13 = vpop.eup %9111 }
 0x341   : > { %v2188_v6 = vpop.xlane.xlu1 %2187 }
 0x342   : > { %v11392_v47 = vpop.trf.xlu0  ;;  %v2209_v54 = vsub.f32 %v11306_v36, %v2188_v6  ;;  %9117 = vpow2.f32 %v2225_v20 }
 0x343   : > { %2478 = vmax.xlane.f32.xlu0 %v11392_v47  ;;  %9119 = vpow2.f32 %v2229_v23 }
 0x345   : > { %v2184_v18 = vpop.xlane.xlu1 %2183 }
 0x346   : > { %v11397_v16 = vpop.trf.xlu0  ;;  %v2207_v48 = vsub.f32 %v11309_v55, %v2184_v18  ;;  %v2235_v18 = vmul.f32 1.442695, %v2209_v54 }
 0x347   : > { %2480 = vmax.xlane.f32.xlu1 %v11397_v16  ;;  %v11429_v11 = vpop.eup %9113 }
 0x348   : > { %v2231_v1 = vmul.f32 1.442695, %v2207_v48  ;;  %v11434_v61 = vpop.eup %9115 }
 0x349   : > { %v2190_v24 = vpop.xlane.xlu1 %2189 }
 0x34a   : > { %v11402_v15 = vpop.trf.xlu0  ;;  %v2210_v55 = vsub.f32 %v11312_v58, %v2190_v24  ;;  %9121 = vpow2.f32 %v2231_v1 }
 0x34b   : > { %2482 = vmax.xlane.f32.xlu0 %v11402_v15  ;;  %9123 = vpow2.f32 %v2235_v18 }
 0x34c   : > { %v2237_v46 = vmul.f32 1.442695, %v2210_v55 }
 0x34d   : > { %v2186_v30 = vpop.xlane.xlu1 %2185 }
 0x34e   : > { %v11407_v45 = vpop.trf.xlu0  ;;  %v2208_v38 = vsub.f32 %v11315_v50, %v2186_v30 }
 0x34f   : > { %2484 = vmax.xlane.f32.xlu1 %v11407_v45 }
 0x350   : > { %v2233_v6 = vmul.f32 1.442695, %v2208_v38 }
 0x351   : > { %v2196_v9 = vpop.xlane.xlu1 %2195 }
 0x352   : > { %v11414_v14 = vpop.trf.xlu0  ;;  %v2213_v39 = vsub.f32 %v11318_v7, %v2196_v9  ;;  %9125 = vpow2.f32 %v2233_v6  ;;  %v11436_v7 = vpop.eup %9117 }
 0x353   : > { %2486 = vmax.xlane.f32.xlu0 %v11414_v14  ;;  %2247 = vadd.xlane.f32.xlu1 %v11412_v4  ;;  %9127 = vpow2.f32 %v2237_v46  ;;  %v11440_v20 = vpop.eup %9119 }
 0x355   : > { %v2192_v36 = vpop.xlane.xlu1 %2191 }
 0x356   : > { %v2211_v50 = vsub.f32 %v11321_v26, %v2192_v36  ;;  %v2243_v26 = vmul.f32 1.442695, %v2213_v39 }
 0x357   : > { %2249 = vadd.xlane.f32.xlu0 %v11421_v2  ;;  %2251 = vadd.xlane.f32.xlu1 %v11419_v52 }
 0x358   : > { %v2239_v58 = vmul.f32 1.442695, %v2211_v50 }
 0x359   : > { %v2194_v53 = vpop.xlane.xlu1 %2193 }
 0x35a   : > { %v2212_v24 = vsub.f32 %v11327_v28, %v2194_v53  ;;  %9129 = vpow2.f32 %v2239_v58  ;;  %v11442_v28 = vpop.eup %9121 }
 0x35b   : > { %2253 = vadd.xlane.f32.xlu0 %v11427_v13  ;;  %2255 = vadd.xlane.f32.xlu1 %v11429_v11  ;;  %9131 = vpow2.f32 %v2243_v26  ;;  %v11446_v48 = vpop.eup %9123 }
 0x35c   : > { %v2241_v34 = vmul.f32 1.442695, %v2212_v24 }
 0x35e   : > { %9133 = vpow2.f32 %v2241_v34 }
 0x35f   : > { %2257 = vadd.xlane.f32.xlu0 %v11436_v7  ;;  %2259 = vadd.xlane.f32.xlu1 %v11434_v61  ;;  %v11448_v30 = vpop.eup %9125 }
 0x360   : > { %v11452_v23 = vpop.eup %9127 }
 0x363   : > { %2261 = vadd.xlane.f32.xlu0 %v11440_v20  ;;  %2263 = vadd.xlane.f32.xlu1 %v11442_v28 }
 0x367   : > { %2265 = vadd.xlane.f32.xlu0 %v11448_v30  ;;  %2267 = vadd.xlane.f32.xlu1 %v11446_v48  ;;  %v11454_v54 = vpop.eup %9129 }
 0x368   : > { %v11458_v1 = vpop.eup %9131 }
 0x36b   : > { %2269 = vadd.xlane.f32.xlu0 %v11452_v23  ;;  %2271 = vadd.xlane.f32.xlu1 %v11454_v54  ;;  %v11460_v38 = vpop.eup %9133 }
 0x36f   : > { %2275 = vadd.xlane.f32.xlu1 %v11458_v1  ;;  %2273 = vadd.xlane.f32.xlu0 %v11460_v38 }
 0x38c   : > { %v2198_v9 = vpop.xlane.xlu0 %2197 }
 0x38d   : > { %v2214_v18 = vsub.f32 %v11324_v33, %v2198_v9 }
 0x38f   : > { %v2245_v55 = vmul.f32 1.442695, %v2214_v18 }
 0x391   : > { %9135 = vpow2.f32 %v2245_v55 }
 0x39e   : > { %v11465_v6 = vpop.eup %9135 }
 0x39f   : > { %2277 = vadd.xlane.f32.xlu0 %v11465_v6 }
 0x3a0   : > { %v2457_v36 = vpop.xlane.xlu1 %2456 }
 0x3a1   : > { %v2488_v50 = vsub.f32 %v11356_v25, %v2457_v36 }
 0x3a3   : > { %v2504_v46 = vmul.f32 1.442695, %v2488_v50 }
 0x3a4   : > { %v2459_v39 = vpop.xlane.xlu1 %2458 }
 0x3a5   : > { %9137 = vpow2.f32 %v2504_v46  ;;  %v2489_v58 = vsub.f32 %v11359_v42, %v2459_v39 }
 0x3a7   : > { %v2506_v53 = vmul.f32 1.442695, %v2489_v58 }
 0x3a8   : > { %v2461_v24 = vpop.xlane.xlu1 %2460 }
 0x3a9   : > { %9139 = vpow2.f32 %v2506_v53  ;;  %v2490_v26 = vsub.f32 %v11362_v27, %v2461_v24 }
 0x3ab   : > { %v2508_v33 = vmul.f32 1.442695, %v2490_v26 }
 0x3ac   : > { %v2463_v34 = vpop.xlane.xlu1 %2462 }
 0x3ad   : > { %9141 = vpow2.f32 %v2508_v33  ;;  %v2491_v9 = vsub.f32 %v11365_v41, %v2463_v34 }
 0x3af   : > { %v2510_v18 = vmul.f32 1.442695, %v2491_v9 }
 0x3b0   : > { %v2465_v55 = vpop.xlane.xlu1 %2464 }
 0x3b1   : > { %9143 = vpow2.f32 %v2510_v18  ;;  %v2492_v25 = vsub.f32 %v11368_v0, %v2465_v55 }
 0x3b2   : > { %v11473_v36 = vpop.eup %9137 }
 0x3b3   : > { %v2512_v50 = vmul.f32 1.442695, %v2492_v25  ;;  %2536 = vadd.xlane.f32.xlu1 %v11473_v36 }
 0x3b4   : > { %v2467_v42 = vpop.xlane.xlu1 %2466 }
 0x3b5   : > { %9145 = vpow2.f32 %v2512_v50  ;;  %v2493_v46 = vsub.f32 %v11371_v35, %v2467_v42 }
 0x3b6   : > { %v11477_v27 = vpop.eup %9139 }
 0x3b7   : > { %v2514_v39 = vmul.f32 1.442695, %v2493_v46  ;;  %2538 = vadd.xlane.f32.xlu0 %v11477_v27 }
 0x3b8   : > { %v2469_v41 = vpop.xlane.xlu1 %2468 }
 0x3b9   : > { %9147 = vpow2.f32 %v2514_v39  ;;  %v2494_v58 = vsub.f32 %v11374_v10, %v2469_v41 }
 0x3ba   : > { %v11481_v53 = vpop.eup %9141 }
 0x3bb   : > { %v2516_v0 = vmul.f32 1.442695, %v2494_v58  ;;  %2540 = vadd.xlane.f32.xlu1 %v11481_v53 }
 0x3bc   : > { %v2471_v24 = vpop.xlane.xlu1 %2470 }
 0x3bd   : > { %9149 = vpow2.f32 %v2516_v0  ;;  %v2495_v26 = vsub.f32 %v11377_v43, %v2471_v24 }
 0x3be   : > { %v11485_v33 = vpop.eup %9143 }
 0x3bf   : > { %v2518_v35 = vmul.f32 1.442695, %v2495_v26  ;;  %2542 = vadd.xlane.f32.xlu0 %v11485_v33 }
 0x3c0   : > { %v2473_v34 = vpop.xlane.xlu1 %2472 }
 0x3c1   : > { %9151 = vpow2.f32 %v2518_v35  ;;  %v2496_v9 = vsub.f32 %v11380_v8, %v2473_v34 }
 0x3c2   : > { %v11489_v18 = vpop.eup %9145 }
 0x3c3   : > { %v2520_v10 = vmul.f32 1.442695, %v2496_v9  ;;  %2544 = vadd.xlane.f32.xlu1 %v11489_v18 }
 0x3c4   : > { %v2475_v55 = vpop.xlane.xlu1 %2474 }
 0x3c5   : > { %9153 = vpow2.f32 %v2520_v10  ;;  %v2497_v25 = vsub.f32 %v11383_v17, %v2475_v55 }
 0x3c6   : > { %v11493_v50 = vpop.eup %9147 }
 0x3c7   : > { %v2522_v43 = vmul.f32 1.442695, %v2497_v25  ;;  %2546 = vadd.xlane.f32.xlu0 %v11493_v50 }
 0x3c8   : > { %v2477_v42 = vpop.xlane.xlu1 %2476 }
 0x3c9   : > { %9155 = vpow2.f32 %v2522_v43  ;;  %v2498_v46 = vsub.f32 %v11387_v22, %v2477_v42 }
 0x3ca   : > { %v11497_v39 = vpop.eup %9149 }
 0x3cb   : > { %v2524_v8 = vmul.f32 1.442695, %v2498_v46  ;;  %2548 = vadd.xlane.f32.xlu1 %v11497_v39 }
 0x3cc   : > { %v2479_v41 = vpop.xlane.xlu0 %2478 }
 0x3cd   : > { %9157 = vpow2.f32 %v2524_v8  ;;  %v2499_v58 = vsub.f32 %v11392_v47, %v2479_v41 }
 0x3ce   : > { %v11501_v0 = vpop.eup %9151 }
 0x3cf   : > { %v2526_v17 = vmul.f32 1.442695, %v2499_v58  ;;  %2550 = vadd.xlane.f32.xlu0 %v11501_v0 }
 0x3d0   : > { %v2481_v24 = vpop.xlane.xlu1 %2480 }
 0x3d1   : > { %9159 = vpow2.f32 %v2526_v17  ;;  %v2500_v26 = vsub.f32 %v11397_v16, %v2481_v24 }
 0x3d2   : > { %v11505_v35 = vpop.eup %9153 }
 0x3d3   : > { %v2528_v22 = vmul.f32 1.442695, %v2500_v26  ;;  %2552 = vadd.xlane.f32.xlu1 %v11505_v35 }
 0x3d4   : > { %v2483_v34 = vpop.xlane.xlu0 %2482 }
 0x3d5   : > { %9161 = vpow2.f32 %v2528_v22  ;;  %v2501_v9 = vsub.f32 %v11402_v15, %v2483_v34 }
 0x3d6   : > { %v11509_v10 = vpop.eup %9155 }
 0x3d7   : > { %v2530_v47 = vmul.f32 1.442695, %v2501_v9  ;;  %2554 = vadd.xlane.f32.xlu0 %v11509_v10 }
 0x3d8   : > { %v2485_v55 = vpop.xlane.xlu1 %2484 }
 0x3d9   : > { %9163 = vpow2.f32 %v2530_v47  ;;  %v2502_v25 = vsub.f32 %v11407_v45, %v2485_v55 }
 0x3da   : > { %v11513_v43 = vpop.eup %9157 }
 0x3db   : > { %v2532_v16 = vmul.f32 1.442695, %v2502_v25  ;;  %2556 = vadd.xlane.f32.xlu1 %v11513_v43 }
 0x3dc   : > { %v2487_v42 = vpop.xlane.xlu0 %2486  ;;  %v2248_v46 = vpop.xlane.xlu1 %2247 }
 0x3dd   : > { %9165 = vpow2.f32 %v2532_v16  ;;  %v2503_v8 = vsub.f32 %v11414_v14, %v2487_v42 }
 0x3de   : > { %v11517_v15 = vpop.eup %9159  ;;  %9167 = vrcp.f32 %v2248_v46 }
 0x3df   : > { %v2534_v41 = vmul.f32 1.442695, %v2503_v8  ;;  %2558 = vadd.xlane.f32.xlu0 %v11517_v15 }
 0x3e0   : > { %v2250_v58 = vpop.xlane.xlu0 %2249  ;;  %v2252_v17 = vpop.xlane.xlu1 %2251 }
 0x3e1   : > { %9169 = vpow2.f32 %v2534_v41 }
 0x3e2   : > { %v11520_v45 = vpop.eup %9161  ;;  %9171 = vrcp.f32 %v2250_v58 }
 0x3e3   : > { %9173 = vrcp.f32 %v2252_v17  ;;  %2560 = vadd.xlane.f32.xlu1 %v11520_v45 }
 0x3e4   : > { %v2254_v24 = vpop.xlane.xlu0 %2253  ;;  %v2256_v26 = vpop.xlane.xlu1 %2255 }
 0x3e5   : > { %9175 = vrcp.f32 %v2254_v24 }
 0x3e6   : > { %v11523_v22 = vpop.eup %9163  ;;  %9177 = vrcp.f32 %v2256_v26  ;;  %v1881_v26 = vadd.f32 %v11111_v32, %v11263_v40 }
 0x3e7   : > { %2562 = vadd.xlane.f32.xlu0 %v11523_v22 }
 0x3e8   : > { %v2258_v14 = vpop.xlane.xlu0 %2257  ;;  %v2260_v34 = vpop.xlane.xlu1 %2259 }
 0x3e9   : > { %9179 = vrcp.f32 %v2258_v14 }
 0x3ea   : > { %v11526_v9 = vpop.eup %9165  ;;  %9181 = vrcp.f32 %v2260_v34  ;;  %v1884_v34 = vadd.f32 %v11111_v32, %v11280_v37 }
 0x3eb   : > { %2564 = vadd.xlane.f32.xlu1 %v11526_v9  ;;  %v9168_v25 = vpop.eup %9167 }
 0x3ec   : > { %v2262_v47 = vpop.xlane.xlu0 %2261  ;;  %v2264_v55 = vpop.xlane.xlu1 %2263  ;;  %v2295_v58 = vmul.f32 %v9168_v25, %v11412_v4 }
 0x3ed   : > { %9183 = vrcp.f32 %v2262_v47 }
 0x3ee   : > { %v11529_v16 = vpop.eup %9169  ;;  %9185 = vrcp.f32 %v2264_v55 }
 0x3ef   : > { %v9172_v42 = vpop.eup %9171  ;;  %2566 = vadd.xlane.f32.xlu0 %v11529_v16 }
 0x3f0   : > { %v9174_v46 = vpop.eup %9173  ;;  %v2266_v8 = vpop.xlane.xlu0 %2265  ;;  %v2296_v17 = vmul.f32 %v9172_v42, %v11421_v2  ;;  %v2614_v42 = vpack.c.bf16 %v1884_v34, %v1881_v26 }
 0x3f1   : > { %v2268_v41 = vpop.xlane.xlu1 %2267  ;;  %9187 = vrcp.f32 %v2266_v8  ;;  %v2297_v47 = vmul.f32 %v9174_v46, %v11419_v52 }
 0x3f2   : > { %v9176_v24 = vpop.eup %9175  ;;  %v2311_v14 = vpack.c.bf16 %v2296_v17, %v2295_v58  ;;  %9189 = vrcp.f32 %v2268_v41 }
 0x3f3   : > { %v2298_v55 = vmul.f32 %v9176_v24, %v11427_v13  ;;  %v9178_v57 = vpop.eup %9177 }
 0x3f4   : > { %8316 = vmatprep.mubr.bf16.mxu1 %v2311_v14  ;;  %v2270_v21 = vpop.xlane.xlu0 %2269  ;;  %v2299_v40 = vmul.f32 %v9178_v57, %v11429_v11 }
 0x3f5   : > { %v2272_v4 = vpop.xlane.xlu1 %2271  ;;  %9191 = vrcp.f32 %v2270_v21  ;;  %v2312_v2 = vpack.c.bf16 %v2298_v55, %v2297_v47  ;;  %v11546_v21 = vld [vmem:[%s14553_s11] ss:$0 sm:$0xff] }
 0x3f6   : > { %v9180_v25 = vpop.eup %9179  ;;  %9193 = vrcp.f32 %v2272_v4  ;;  %v1865_v46 = vadd.f32 %v11546_v21, %v11242_v19  ;;  %v1868_v57 = vadd.f32 %v11546_v21, %v11255_v29  ;;  %v1852_v14 = vadd.f32 %v11546_v21, %v11237_v31  ;;  %v11569_v31 = vld [vmem:[%s10160_s28 + $0x80] sm:$0xff] }
 0x3f7   : > { %8317 = vmatmul.mubr.bf16.vlgmr.msra.gmra.mxu1 %v2312_v2  ;;  %v2300_v8 = vmul.f32 %v9180_v25, %v11436_v7  ;;  %v9182_v32 = vpop.eup %9181  ;;  %v1833_v2 = vadd.f32 %v11546_v21, %v11115_v5  ;;  %v1836_v25 = vadd.f32 %v11546_v21, %v11146_v59 }
 0x3f8   : > { %8333 = vmatpush3.bf16.msra.mxu1 %v11271_v60  ;;  %v2274_v37 = vpop.xlane.xlu0 %2273  ;;  %v2301_v11 = vmul.f32 %v9182_v32, %v11434_v61  ;;  %v2612_v17 = vpack.c.bf16 %v1868_v57, %v1865_v46  ;;  %v11593_v32 = vld [vmem:[%s10160_s28 + $0x98] sm:$0xff]  ;;  %v11599_v46 = vld [vmem:[%s10160_s28 + $0xa0] sm:$0xff] }
 0x3f9   : > { %9195 = vrcp.f32 %v2274_v37  ;;  %8334 = vmatprep.subr.bf16.mxu1 %v2614_v42  ;;  %v2313_v52 = vpack.c.bf16 %v2300_v8, %v2299_v40  ;;  %v2608_v5 = vpack.c.bf16 %v1836_v25, %v1833_v2  ;;  %v11604_v57 = vld [vmem:[%s14550_s8 + $0x38] sm:$0xff]  }
 0x3fa   : > { %v9184_v13 = vpop.eup %9183 }
 0x3fb   : > { %8320 = vmatprep.mubr.bf16.mxu1 %v2313_v52  ;;  %v2302_v60 = vmul.f32 %v9184_v13, %v11440_v20  ;;  %v9186_v7 = vpop.eup %9185  ;;  %v1849_v20 = vadd.f32 %v11546_v21, %v11161_v51  ;;  %v3008_v52 = vmul.f32 %v11593_v32, %v11593_v32 }
 0x3fc   : > { %8335 = vmatpush3.bf16.msra.mxu1 %v2614_v42  ;;  %v2303_v24 = vmul.f32 %v9186_v7, %v11442_v28  ;;  %v11585_v42 = vld [vmem:[%s10160_s28 + $0x90] sm:$0xff]  ;;  %v11611_v7 = vld [vmem:[%s10160_s28 + $0xa8] sm:$0xff] }
 0x3fd   : > { %8336 = vmatprep.subr.bf16.mxu1 %v11246_v12  ;;  %v2314_v41 = vpack.c.bf16 %v2302_v60, %v2301_v11  ;;  %v2610_v55 = vpack.c.bf16 %v1852_v14, %v1849_v20  ;;  %v3007_v59 = vmul.f32 %v11585_v42, %v11585_v42  ;;  %v3009_v11 = vmul.f32 %v11599_v46, %v11599_v46 }
 0x3fe   : > { %v9188_v58 = vpop.eup %9187 }
 0x3ff   : > { %8321 = vmatmul.mubr.bf16.gmra.mxu1 %v2314_v41  ;;  %v2304_v19 = vmul.f32 %v9188_v58, %v11448_v30  ;;  %v9190_v26 = vpop.eup %9189  ;;  %v3010_v58 = vmul.f32 %v11611_v7, %v11611_v7 }
 0x400   : > { %8337 = vmatpush3.bf16.msra.mxu1 %v11246_v12  ;;  %v2305_v34 = vmul.f32 %v9190_v26, %v11446_v48  ;;  %v11572_v48 = vld [vmem:[%s10160_s28 + $0x88] sm:$0xff] }
 0x401   : > { %8338 = vmatprep.subr.bf16.mxu1 %v2612_v17  ;;  %v2315_v29 = vpack.c.bf16 %v2304_v19, %v2303_v24  ;;  %v11617_v24 = vld [vmem:[%s10160_s28 + $0xb0] sm:$0xff] }
 0x402   : > { %v9192_v61 = vpop.eup %9191  ;;  %v3011_v26 = vmul.f32 %v11617_v24, %v11617_v24 }
 0x403   : > { %8324 = vmatprep.mubr.bf16.mxu1 %v2315_v29  ;;  %v2306_v28 = vmul.f32 %v9192_v61, %v11452_v23  ;;  %v9194_v30 = vpop.eup %9193  ;;  %v11623_v61 = vld [vmem:[%s10160_s28 + $0xb8] sm:$0xff] }
 0x404   : > { %8339 = vmatpush3.bf16.msra.mxu1 %v2612_v17  ;;  %v2307_v51 = vmul.f32 %v9194_v30, %v11454_v54  ;;  %v2983_v54 = vadd.f32 %v11572_v48, %v11569_v31  ;;  %v3012_v14 = vmul.f32 %v11623_v61, %v11623_v61  ;;  %v11629_v30 = vld [vmem:[%s10160_s28 + $0xc0] sm:$0xff] }
 0x405   : > { %8340 = vmatprep.subr.bf16.mxu1 %v11192_v62  ;;  %v2316_v12 = vpack.c.bf16 %v2306_v28, %v2305_v34  ;;  %v2276_v28 = vpop.xlane.xlu1 %2275 }
 0x406   : > { %v9196_v47 = vpop.eup %9195  ;;  %v2984_v40 = vadd.f32 %v11585_v42, %v2983_v54  ;;  %9197 = vrcp.f32 %v2276_v28  ;;  %v11641_v54 = vld [vmem:[%s10160_s28 + $0xd0] sm:$0xff] }
 0x407   : > { %8325 = vmatmul.mubr.bf16.gmra.mxu1 %v2316_v12  ;;  %v2308_v4 = vmul.f32 %v9196_v47, %v11460_v38  ;;  %v3006_v38 = vmul.f32 %v11572_v48, %v11572_v48  ;;  %v3013_v47 = vmul.f32 %v11629_v30, %v11629_v30 }
 0x408   : > { %8341 = vmatpush3.bf16.msra.mxu1 %v11192_v62  ;;  %v3005_v62 = vmul.f32 %v11569_v31, %v11569_v31  ;;  %v2985_v37 = vadd.f32 %v11593_v32, %v2984_v40  ;;  %v11647_v40 = vld [vmem:[%s10160_s28 + $0xd8] sm:$0xff] }
 0x409   : > { %8342 = vmatprep.subr.bf16.mxu1 %v2610_v55  ;;  %v2317_v23 = vpack.c.bf16 %v2308_v4, %v2307_v51  ;;  %v11635_v4 = vld [vmem:[%s10160_s28 + $0xc8] sm:$0xff] }
 0x40a   : > { %v3021_v8 = vadd.f32 %v3006_v38, %v3005_v62  ;;  %v3014_v2 = vmul.f32 %v11635_v4, %v11635_v4  ;;  %v3015_v38 = vmul.f32 %v11641_v54, %v11641_v54 }
 0x40b   : > { %8328 = vmatprep.mubr.bf16.mxu1 %v2317_v23 }
 0x40c   : > { %8343 = vmatpush3.bf16.msra.mxu1 %v2610_v55  ;;  %v3022_v13 = vadd.f32 %v3021_v8, %v3007_v59 }
 0x40d   : > { %8344 = vmatprep.subr.bf16.mxu1 %v11153_v49 }
 0x40e   : > { %v3023_v60 = vadd.f32 %v3022_v13, %v3008_v52  ;;  %v11653_v13 = vld [vmem:[%s10160_s28 + $0xe0] sm:$0xff] }
 0x410   : > { %8345 = vmatpush3.bf16.msra.mxu1 %v11153_v49  ;;  %v2986_v49 = vadd.f32 %v11599_v46, %v2985_v37  ;;  %v3024_v17 = vadd.f32 %v3023_v60, %v3009_v11  ;;  %v3016_v37 = vmul.f32 %v11647_v40, %v11647_v40 }
 0x411   : > { %8346 = vmatprep.subr.bf16.mxu1 %v2608_v5 }
 0x412   : > { %v2987_v41 = vadd.f32 %v11611_v7, %v2986_v49  ;;  %v3025_v29 = vadd.f32 %v3024_v17, %v3010_v58  ;;  %v3017_v58 = vmul.f32 %v11653_v13, %v11653_v13 }
 0x413   : > { %v9198_v59 = vpop.eup %9197 }
 0x414   : > { %8347 = vmatpush3.bf16.msra.mxu1 %v2608_v5  ;;  %v2988_v19 = vadd.f32 %v11617_v24, %v2987_v41  ;;  %v3026_v34 = vadd.f32 %v3025_v29, %v3011_v26  ;;  %v2309_v11 = vmul.f32 %v9198_v59, %v11458_v1 }
 0x415   : > { %8396 = vmatprep.subr.bf16.mxu1 %v11604_v57 }
 0x416   : > { %v2989_v20 = vadd.f32 %v11623_v61, %v2988_v19  ;;  %v3027_v55 = vadd.f32 %v3026_v34, %v3012_v14  ;;  %v11661_v19 = vld [vmem:[%s10160_s28 + $0xe8] sm:$0xff]  ;;  %v11667_v34 = vld [vmem:[%s10160_s28 + $0xf0] sm:$0xff] }
 0x417   : > { %v3019_v28 = vmul.f32 %v11667_v34, %v11667_v34 }
 0x418   : > { %v2990_v12 = vadd.f32 %v11629_v30, %v2989_v20  ;;  %v3028_v25 = vadd.f32 %v3027_v55, %v3013_v47  ;;  %v3018_v20 = vmul.f32 %v11661_v19, %v11661_v19  ;;  %v11673_v55 = vld [vmem:[%s10160_s28 + $0xf8] sm:$0xff] }
 0x41a   : > { %v2991_v23 = vadd.f32 %v11635_v4, %v2990_v12  ;;  %v3029_v5 = vadd.f32 %v3028_v25, %v3014_v2 }
 0x41c   : > { %v2992_v62 = vadd.f32 %v11641_v54, %v2991_v23  ;;  %v3030_v52 = vadd.f32 %v3029_v5, %v3015_v38  ;;  %v3020_v23 = vmul.f32 %v11673_v55, %v11673_v55 }
 0x41e   : > { %v2993_v8 = vadd.f32 %v11647_v40, %v2992_v62  ;;  %v3031_v17 = vadd.f32 %v3030_v52, %v3016_v37 }
 0x420   : > { %v2994_v41 = vadd.f32 %v11653_v13, %v2993_v8  ;;  %v3032_v14 = vadd.f32 %v3031_v17, %v3017_v58 }
 0x422   : > { %v2995_v29 = vadd.f32 %v11661_v19, %v2994_v41  ;;  %v3033_v12 = vadd.f32 %v3032_v14, %v3018_v20 }
 0x424   : > { %v3034_v2 = vadd.f32 %v3033_v12, %v3019_v28 }
 0x426   : > { %v3035_v38 = vadd.f32 %v3034_v2, %v3020_v23 }
 0x428   : > { %v2278_v51 = vpop.xlane.xlu0 %2277  ;;  %v3036_v37 = vrot.slane %v3035_v38, 4 }
 0x429   : > { %9199 = vrcp.f32 %v2278_v51 }
 0x42a   : > { %v3037_v58 = vadd.f32 %v3036_v37, %v3035_v38  ;;  %v9665_v38 = vld [vmem:[%s14550_s8 + $0x30] sm:$0xff]  }
 0x42c   : > { %v3038_v14 = vrot.slane %v3037_v58, 2 }
 0x436   : > { %v9200_v49 = vpop.eup %9199 }
 0x437   : > { %v2310_v60 = vmul.f32 %v9200_v49, %v11465_v6  ;;  %v2996_v6 = vadd.f32 %v11667_v34, %v2995_v29 }
 0x439   : > { %v2318_v26 = vpack.c.bf16 %v2310_v60, %v2309_v11  ;;  %v2997_v51 = vadd.f32 %v11673_v55, %v2996_v6 }
 0x43b   : > { %8329 = vmatmul.mubr.bf16.gmra.mxu1 %v2318_v26  ;;  %v2998_v62 = vrot.slane %v2997_v51, 4 }
 0x43c   : > { %v2537_v1 = vpop.xlane.xlu1 %2536 }
 0x43d   : > { %9201 = vrcp.f32 %v2537_v1  ;;  %v2999_v8 = vadd.f32 %v2998_v62, %v2997_v51 }
 0x43f   : > { %v3000_v41 = vrot.slane %v2999_v8, 2 }
 0x440   : > { %v2539_v47 = vpop.xlane.xlu0 %2538 }
 0x441   : > { %9203 = vrcp.f32 %v2539_v47  ;;  %v3001_v20 = vadd.f32 %v3000_v41, %v2999_v8 }
 0x443   : > { %v3002_v47 = vrot.slane %v3001_v20, 1 }
 0x444   : > { %v2541_v25 = vpop.xlane.xlu1 %2540 }
 0x445   : > { %9205 = vrcp.f32 %v2541_v25  ;;  %v3003_v2 = vadd.f32 %v3002_v47, %v3001_v20 }
 0x448   : > { %v2543_v5 = vpop.xlane.xlu0 %2542 }
 0x449   : > { %9207 = vrcp.f32 %v2543_v5 }
 0x44a   : > { %v9202_v59 = vpop.eup %9201 }
 0x44b   : > { %v2584_v11 = vmul.f32 %v9202_v59, %v11473_v36  ;;  %v3039_v36 = vadd.f32 %v3038_v14, %v3037_v58  ;;  %v11688_v59 = vmul.f32 0.0078125, %v3003_v2  ;;  %v9668_v14 = vld [vmem:[%s14550_s8 + $0x18] sm:$0xff]  }
 0x44c   : > { %v2545_v52 = vpop.xlane.xlu1 %2544 }
 0x44d   : > { %9209 = vrcp.f32 %v2545_v52  ;;  %v3040_v25 = vrot.slane %v3039_v36, 1 }
 0x44e   : > { %v9204_v49 = vpop.eup %9203 }
 0x44f   : > { %v2585_v60 = vmul.f32 %v9204_v49, %v11477_v27  ;;  %v3041_v8 = vadd.f32 %v3040_v25, %v3039_v36 }
 0x450   : > { %v2547_v17 = vpop.xlane.xlu0 %2546 }
 0x451   : > { %9211 = vrcp.f32 %v2547_v17  ;;  %v2600_v26 = vpack.c.bf16 %v2585_v60, %v2584_v11  ;;  %v3042_v11 = vmul.f32 0.0078125, %v3041_v8  ;;  %v3045_v8 = vsub.f32 %v11569_v31, %v11688_v59 }
 0x452   : > { %v9206_v29 = vpop.eup %9205 }
 0x453   : > { %8348 = vmatprep.mubr.bf16.mxu1 %v2600_v26  ;;  %v2586_v28 = vmul.f32 %v9206_v29, %v11481_v53 }
 0x454   : > { %v2549_v1 = vpop.xlane.xlu1 %2548 }
 0x455   : > { %9213 = vrcp.f32 %v2549_v1 }
 0x456   : > { %v9208_v6 = vpop.eup %9207 }
 0x457   : > { %v2587_v12 = vmul.f32 %v9208_v6, %v11485_v33 }
 0x458   : > { %v2551_v51 = vpop.xlane.xlu0 %2550 }
 0x459   : > { %9215 = vrcp.f32 %v2551_v51  ;;  %v2601_v27 = vpack.c.bf16 %v2587_v12, %v2586_v28 }
 0x45a   : > { %v9210_v23 = vpop.eup %9209 }
 0x45b   : > { %8349 = vmatmul.mubr.bf16.vlgmr.msra.gmra.mxu1 %v2601_v27  ;;  %v2588_v33 = vmul.f32 %v9210_v23, %v11489_v18  ;;  %v3043_v18 = vmul.f32 %v11688_v59, %v11688_v59  ;;  %v9670_v27 = vld [vmem:[%s14550_s8 + $0x8] sm:$0xff]  }
 0x45c   : > { %v2553_v62 = vpop.xlane.xlu1 %2552  ;;  %8397 = vmatpush3.bf16.msra.mxu1 %v11604_v57  ;;  %v9666_v57 = vld [vmem:[%s14550_s8 + $0x28] sm:$0xff]  }
 0x45d   : > { %8398 = vmatprep.subr.bf16.mxu1 %v9665_v38  ;;  %9217 = vrcp.f32 %v2553_v62  ;;  %v3044_v26 = vsub.f32 %v3042_v11, %v3043_v18 }
 0x45e   : > { %v9212_v53 = vpop.eup %9211 }
 0x45f   : > { %v2589_v5 = vmul.f32 %v9212_v53, %v11493_v50  ;;  %v9667_v50 = vld [vmem:[%s14550_s8 + $0x20] sm:$0xff]   ;;  %v3061_v6 = vadd.f32 1e-05, %v3044_v26  ;;  %v14806_v26 = vld [vmem:[#allocation5_spill] sm:$0xff] }
 0x460   : > { %v2555_v37 = vpop.xlane.xlu0 %2554  ;;  %8399 = vmatpush3.bf16.msra.mxu1 %v9665_v38 }
 0x461   : > { %9219 = vrcp.f32 %v2555_v37  ;;  %v2602_v52 = vpack.c.bf16 %v2589_v5, %v2588_v33  ;;  %8400 = vmatprep.subr.bf16.mxu1 %v9666_v57  ;;  %v9672_v33 = vld [vmem:[%s14554_s12 + $0x38] sm:$0xff]   ;;  %v3046_v37 = vsub.f32 %v11572_v48, %v11688_v59 }
 0x462   : > { %v9214_v49 = vpop.eup %9213 }
 0x463   : > { %8352 = vmatprep.mubr.bf16.mxu1 %v2602_v52  ;;  %v2590_v58 = vmul.f32 %v9214_v49, %v11497_v39  ;;  %v9669_v39 = vld [vmem:[%s14550_s8 + $0x10] sm:$0xff]  }
 0x464   : > { %v2557_v60 = vpop.xlane.xlu1 %2556  ;;  %8401 = vmatpush3.bf16.msra.mxu1 %v9666_v57 }
 0x465   : > { %8402 = vmatprep.subr.bf16.mxu1 %v9667_v50  ;;  %9221 = vrcp.f32 %v2557_v60  ;;  %v3047_v60 = vsub.f32 %v11585_v42, %v11688_v59 }
 0x466   : > { %v9216_v41 = vpop.eup %9215 }
 0x467   : > { %v2591_v17 = vmul.f32 %v9216_v41, %v11501_v0 }
 0x468   : > { %v2559_v29 = vpop.xlane.xlu0 %2558  ;;  %8403 = vmatpush3.bf16.msra.mxu1 %v9667_v50  ;;  %v3048_v50 = vsub.f32 %v11593_v32, %v11688_v59 }
 0x469   : > { %9223 = vrcp.f32 %v2559_v29  ;;  %v2603_v20 = vpack.c.bf16 %v2591_v17, %v2590_v58  ;;  %8404 = vmatprep.subr.bf16.mxu1 %v9668_v14  ;;  %v14805_v58 = vld [vmem:[#allocation3_spill] sm:$0xff] }
 0x46a   : > { %v9218_v1 = vpop.eup %9217 }
 0x46b   : > { %8353 = vmatmul.mubr.bf16.gmra.mxu1 %v2603_v20  ;;  %v2592_v12 = vmul.f32 %v9218_v1, %v11505_v35  ;;  %v9671_v35 = vld [vmem:[%s14550_s8] sm:$0xff]  }
 0x46c   : > { %v2561_v28 = vpop.xlane.xlu1 %2560  ;;  %8405 = vmatpush3.bf16.msra.mxu1 %v9668_v14  ;;  %v14807_v14 = vld [vmem:[#allocation7_spill] sm:$0xff] }
 0x46d   : > { %8406 = vmatprep.subr.bf16.mxu1 %v9669_v39  ;;  %9225 = vrcp.f32 %v2561_v28 }
 0x46e   : > { %v9220_v0 = vpop.eup %9219  ;;  %9227 = vrsqrt.f32 %v3061_v6  ;;  %v14808_v6 = vld [vmem:[#allocation6_spill] sm:$0xff] }
 0x46f   : > { %v2593_v47 = vmul.f32 %v9220_v0, %v11509_v10 }
 0x470   : > { %v2563_v36 = vpop.xlane.xlu0 %2562  ;;  %8407 = vmatpush3.bf16.msra.mxu1 %v9669_v39 }
 0x471   : > { %9229 = vrcp.f32 %v2563_v36  ;;  %v2604_v51 = vpack.c.bf16 %v2593_v47, %v2592_v12  ;;  %8408 = vmatprep.subr.bf16.mxu1 %v9670_v27 }
 0x472   : > { %v9222_v23 = vpop.eup %9221 }
 0x473   : > { %8356 = vmatprep.mubr.bf16.mxu1 %v2604_v51  ;;  %v2594_v25 = vmul.f32 %v9222_v23, %v11513_v43 }
 0x474   : > { %v2565_v2 = vpop.xlane.xlu1 %2564  ;;  %8409 = vmatpush3.bf16.msra.mxu1 %v9670_v27 }
 0x475   : > { %8410 = vmatprep.subr.bf16.mxu1 %v9671_v35  ;;  %9231 = vrcp.f32 %v2565_v2  ;;  %v3051_v2 = vsub.f32 %v11617_v24, %v11688_v59 }
 0x476   : > { %v9224_v10 = vpop.eup %9223 }
 0x477   : > { %v2595_v62 = vmul.f32 %v9224_v10, %v11517_v15 }
 0x478   : > { %v2567_v38 = vpop.xlane.xlu0 %2566  ;;  %8411 = vmatpush3.bf16.msra.mxu1 %v9671_v35  ;;  %v14809_v35 = vld [vmem:[#allocation2_spill] sm:$0xff] }
 0x479   : > { %9233 = vrcp.f32 %v2567_v38  ;;  %v2605_v53 = vpack.c.bf16 %v2595_v62, %v2594_v25  ;;  %8460 = vmatprep.subr.bf16.mxu1 %v9672_v33  ;;  %v14810_v25 = vld [vmem:[#allocation4_spill] sm:$0xff]  ;;  %v3052_v38 = vsub.f32 %v11623_v61, %v11688_v59 }
 0x47a   : > { %v9226_v5 = vpop.eup %9225 }
 0x47b   : > { %8357 = vmatmul.mubr.bf16.gmra.mxu1 %v2605_v53  ;;  %v11723_v43 = vpop.eup %9227  ;;  %v2596_v52 = vmul.f32 %v9226_v5, %v11520_v45  ;;  %v3049_v45 = vsub.f32 %v11599_v46, %v11688_v59  ;;  %v14812_v5 = vld [vmem:[#allocation10_spill] sm:$0xff] }
 0x47c   : > { %v3063_v49 = vmul.f32 %v11723_v43, %v3045_v8  ;;  %v3064_v11 = vmul.f32 %v11723_v43, %v3046_v37  ;;  %v3065_v39 = vmul.f32 %v11723_v43, %v3047_v60  ;;  %v3066_v0 = vmul.f32 %v11723_v43, %v3048_v50  ;;  %v14816_v60 = vld [vmem:[#allocation14_spill] sm:$0xff] }
 0x47d   : > { %v3067_v36 = vmul.f32 %v11723_v43, %v3049_v45  ;;  %v3054_v37 = vsub.f32 %v11635_v4, %v11688_v59 }
 0x47e   : > { %v9230_v15 = vpop.eup %9229  ;;  %v3079_v17 = vmul.f32 %v3063_v49, %v14805_v58  ;;  %v3080_v29 = vmul.f32 %v3064_v11, %v14806_v26  ;;  %v3081_v10 = vmul.f32 %v3065_v39, %v14809_v35  ;;  %v3082_v62 = vmul.f32 %v3066_v0, %v14810_v25  ;;  %v14815_v11 = vld [vmem:[#allocation15_spill] sm:$0xff]  ;;  %v14818_v39 = vld [vmem:[#allocation12_spill] sm:$0xff] }
 0x47f   : > { %v2597_v57 = vmul.f32 %v9230_v15, %v11523_v22  ;;  %v3050_v22 = vsub.f32 %v11611_v7, %v11688_v59  ;;  %v14813_v15 = vld [vmem:[#allocation8_spill] sm:$0xff]  ;;  %v3072_v45 = vmul.f32 %v11723_v43, %v3054_v37 }
 0x480   : > { %v3095_v1 = vadd.f32 %v3079_v17, %v14807_v14  ;;  %v3096_v28 = vadd.f32 %v3080_v29, %v14808_v6  ;;  %v3070_v17 = vmul.f32 %v11723_v43, %v3052_v38  ;;  %v14823_v37 = vld [vmem:[#allocation24_spill] sm:$0xff] }
 0x481   : > { %v2606_v18 = vpack.c.bf16 %v2597_v57, %v2596_v52  ;;  %v3068_v51 = vmul.f32 %v11723_v43, %v3050_v22  ;;  %v3098_v52 = vadd.f32 %v3082_v62, %v14813_v15  ;;  %v14814_v57 = vld [vmem:[#allocation9_spill] sm:$0xff]  ;;  %v14850_v15 = vld [vmem:[#allocation56_spill] sm:$0xff] }
 0x482   : > { %v9232_v41 = vpop.eup %9231  ;;  %v3232_v23 = vpack.c.bf16 %v3096_v28, %v3095_v1  ;;  %v3097_v49 = vadd.f32 %v3081_v10, %v14814_v57  ;;  %v14817_v1 = vld [vmem:[#allocation13_spill] sm:$0xff]  ;;  %v3086_v0 = vmul.f32 %v3070_v17, %v14818_v39  ;;  %v3058_v10 = vsub.f32 %v11661_v19, %v11688_v59  ;;  %v9732_v57 = vld [vmem:[%s14548_s6] sm:$0xff]  }
 0x483   : > { %8360 = vmatprep.mubr.bf16.mxu1 %v2606_v18  ;;  %v2598_v12 = vmul.f32 %v9232_v41, %v11526_v9  ;;  %v3053_v9 = vsub.f32 %v11629_v30, %v11688_v59  ;;  %v3084_v8 = vmul.f32 %v3068_v51, %v14812_v5  ;;  %v3069_v41 = vmul.f32 %v11723_v43, %v3051_v2  ;;  %v14821_v62 = vld [vmem:[#allocation17_spill] sm:$0xff] }
 0x484   : > { %v3233_v22 = vpack.c.bf16 %v3098_v52, %v3097_v49  ;;  %v3056_v51 = vsub.f32 %v11647_v40, %v11688_v59  ;;  %v3057_v2 = vsub.f32 %v11653_v13, %v11688_v59  ;;  %v14824_v49 = vld [vmem:[#allocation23_spill] sm:$0xff] }
 0x485   : > { %v3100_v50 = vadd.f32 %v3084_v8, %v14816_v60  ;;  %v3071_v29 = vmul.f32 %v11723_v43, %v3053_v9  ;;  %v3085_v28 = vmul.f32 %v3069_v41, %v14817_v1  ;;  %v14822_v9 = vld [vmem:[#allocation16_spill] sm:$0xff]  ;;  %v14846_v1 = vld [vmem:[#allocation51_spill] sm:$0xff]  ;;  %v14847_v60 = vld [vmem:[#allocation50_spill] sm:$0xff] }
 0x486   : > { %v9234_v20 = vpop.eup %9233  ;;  %v9673_v8 = vld [vmem:[%s14554_s12 + $0x30] sm:$0xff]   ;;  %v3074_v41 = vmul.f32 %v11723_v43, %v3056_v51  ;;  %v3075_v17 = vmul.f32 %v11723_v43, %v3057_v2  ;;  %v3060_v51 = vsub.f32 %v11673_v55, %v11688_v59 }
 0x487   : > { %v2599_v47 = vmul.f32 %v9234_v20, %v11529_v16  ;;  %v14811_v16 = vld [vmem:[#allocation11_spill] sm:$0xff]  ;;  %v3101_v38 = vadd.f32 %v3085_v28, %v14821_v62 }
 0x488   : > { %v3083_v53 = vmul.f32 %v3067_v36, %v14811_v16  ;;  %v3055_v36 = vsub.f32 %v11641_v54, %v11688_v59  ;;  %v14851_v16 = vld [vmem:[#allocation55_spill] sm:$0xff] }
 0x489   : > { %v2607_v27 = vpack.c.bf16 %v2599_v47, %v2598_v12  ;;  %v14819_v12 = vld [vmem:[#allocation19_spill] sm:$0xff] }
 0x48a   : > { %v3099_v18 = vadd.f32 %v3083_v53, %v14815_v11  ;;  %v3087_v47 = vmul.f32 %v3071_v29, %v14819_v12  ;;  %v3102_v53 = vadd.f32 %v3086_v0, %v14822_v9  ;;  %v14826_v0 = vld [vmem:[#allocation20_spill] sm:$0xff] }
 0x48b   : > { %8361 = vmatmul.mubr.bf16.gmra.mxu1 %v2607_v27  ;;  %v14820_v27 = vld [vmem:[#allocation18_spill] sm:$0xff] }
 0x48c   : > { %8412 = vmatprep.mubr.bf16.mxu1 %v3232_v23  ;;  %v3234_v20 = vpack.c.bf16 %v3100_v50, %v3099_v18  ;;  %v3088_v23 = vmul.f32 %v3072_v45, %v14820_v27  ;;  %v3103_v52 = vadd.f32 %v3087_v47, %v14823_v37  ;;  %v3073_v50 = vmul.f32 %v11723_v43, %v3055_v36  ;;  %v9674_v45 = vld [vmem:[%s14554_s12 + $0x28] sm:$0xff]   ;;  %v12168_v27 = vld [vmem:[%s10385_s1 + $0x140] sm:$0xff] }
 0x48d   : > { %v3235_v29 = vpack.c.bf16 %v3102_v53, %v3101_v38  ;;  %v3090_v47 = vmul.f32 %v3074_v41, %v14826_v0  ;;  %v3059_v36 = vsub.f32 %v11667_v34, %v11688_v59  ;;  %v14829_v53 = vld [vmem:[#allocation27_spill] sm:$0xff]  ;;  %v14831_v41 = vld [vmem:[#allocation37_spill] sm:$0xff] }
 0x48e   : > { %v3104_v18 = vadd.f32 %v3088_v23, %v14824_v49  ;;  %v14827_v23 = vld [vmem:[#allocation31_spill] sm:$0xff] }
 0x48f   : > { %v3091_v2 = vmul.f32 %v3075_v17, %v14827_v23  ;;  %v3077_v59 = vmul.f32 %v11723_v43, %v3059_v36  ;;  %v3078_v17 = vmul.f32 %v11723_v43, %v3060_v51  ;;  %v14836_v36 = vld [vmem:[#allocation39_spill] sm:$0xff]  ;;  %v9677_v51 = vld [vmem:[%s14554_s12 + $0x10] sm:$0xff]  }
 0x493   : > { %8413 = vmatmul.mubr.bf16.vlgmr.msra.gmra.mxu1 %v3233_v22  ;;  %v3236_v22 = vpack.c.bf16 %v3104_v18, %v3103_v52  ;;  %v14830_v52 = vld [vmem:[#allocation26_spill] sm:$0xff] }
 0x494   : > { %8416 = vmatprep.mubr.bf16.mxu1 %v3234_v20  ;;  %8461 = vmatpush3.bf16.msra.mxu1 %v9672_v33  ;;  %v3076_v33 = vmul.f32 %v11723_v43, %v3058_v10  ;;  %v14825_v20 = vld [vmem:[#allocation21_spill] sm:$0xff]  ;;  %v14828_v10 = vld [vmem:[#allocation30_spill] sm:$0xff]  ;;  %v3106_v18 = vadd.f32 %v3090_v47, %v14830_v52 }
 0x495   : > { %8462 = vmatprep.subr.bf16.mxu1 %v9673_v8  ;;  %v3089_v28 = vmul.f32 %v3073_v50, %v14825_v20  ;;  %v9675_v50 = vld [vmem:[%s14554_s12 + $0x20] sm:$0xff]   ;;  %v14832_v20 = vld [vmem:[#allocation36_spill] sm:$0xff] }
 0x496   : > { %v3092_v38 = vmul.f32 %v3076_v33, %v14828_v10 }
 0x498   : > { %8463 = vmatpush3.bf16.msra.mxu1 %v9673_v8  ;;  %v3105_v8 = vadd.f32 %v3089_v28, %v14829_v53  ;;  %v3108_v0 = vadd.f32 %v3092_v38, %v14832_v20  ;;  %v14833_v28 = vld [vmem:[#allocation34_spill] sm:$0xff]  ;;  %v14834_v53 = vld [vmem:[#allocation33_spill] sm:$0xff] }
 0x499   : > { %8464 = vmatprep.subr.bf16.mxu1 %v9674_v45  ;;  %v3093_v47 = vmul.f32 %v3077_v59, %v14833_v28  ;;  %v3094_v52 = vmul.f32 %v3078_v17, %v14834_v53  ;;  %v9680_v17 = vld [vmem:[%s10385_s1 + $0x10] sm:$0xff]  ;;  %v12005_v53 = vld [vmem:[%s14553_s11] ss:$0 sm:$0xff] }
 0x49a   : > { %v3237_v33 = vpack.c.bf16 %v3106_v18, %v3105_v8  ;;  %v9678_v8 = vld [vmem:[%s14554_s12 + $0x8] sm:$0xff]   ;;  %v11829_v18 = vld [vmem:[%s14556_s14] ss:$0 sm:$0xff] }
 0x49b   : > { %8417 = vmatmul.mubr.bf16.gmra.mxu1 %v3235_v29  ;;  %v3107_v29 = vadd.f32 %v3091_v2, %v14831_v41  ;;  %v14835_v2 = vld [vmem:[#allocation40_spill] sm:$0xff]  ;;  %v3110_v43 = vadd.f32 %v3094_v52, %v14836_v36  ;;  %v9679_v52 = vld [vmem:[%s14554_s12] sm:$0xff]  }
 0x49c   : > { %8420 = vmatprep.mubr.bf16.mxu1 %v3236_v22  ;;  %8465 = vmatpush3.bf16.msra.mxu1 %v9674_v45  ;;  %v9676_v45 = vld [vmem:[%s14554_s12 + $0x18] sm:$0xff]   ;;  %v3109_v38 = vadd.f32 %v3093_v47, %v14835_v2  ;;  %v9681_v47 = vld [vmem:[%s10385_s1] sm:$0xff] }
 0x49d   : > { %8466 = vmatprep.subr.bf16.mxu1 %v9675_v50  ;;  %v3238_v22 = vpack.c.bf16 %v3108_v0, %v3107_v29 }
 0x49e   : > { %v3239_v0 = vpack.c.bf16 %v3110_v43, %v3109_v38 }
 0x4a0   : > { %8467 = vmatpush3.bf16.msra.mxu1 %v9675_v50 }
 0x4a1   : > { %8468 = vmatprep.subr.bf16.mxu1 %v9676_v45 }
 0x4a3   : > { %8421 = vmatmul.mubr.bf16.gmra.mxu1 %v3237_v33 }
 0x4a4   : > { %8424 = vmatprep.mubr.bf16.mxu1 %v3238_v22  ;;  %8469 = vmatpush3.bf16.msra.mxu1 %v9676_v45 }
 0x4a5   : > { %8470 = vmatprep.subr.bf16.mxu1 %v9677_v51 }
 0x4a8   : > { %8471 = vmatpush3.bf16.msra.mxu1 %v9677_v51 }
 0x4a9   : > { %8472 = vmatprep.subr.bf16.mxu1 %v9678_v8 }
 0x4ab   : > { %8425 = vmatmul.mubr.bf16.gmra.mxu1 %v3239_v0  ;;  %v9682_v0 = vld [vmem:[%s10385_s1 + $0x18] sm:$0xff] }
 0x4ac   : > { %8473 = vmatpush3.bf16.msra.mxu1 %v9678_v8 }
 0x4ad   : > { %8474 = vmatprep.subr.bf16.mxu1 %v9679_v52 }
 0x4b0   : > { %8475 = vmatpush3.bf16.msra.mxu1 %v9679_v52 }
 0x4b7   : > { %v8318_v50 = vpop.f32.mrf.mxu1 }
 0x4b8   : > { %v2721_v29 = vmul.f32 %v8318_v50, %v11829_v18 }
 0x4b9   : > { %v2361_v59 = vpop.f32.mrf.mxu1 }
 0x4ba   : > { %v2737_v33 = vadd.f32 %v9680_v17, %v2721_v29  ;;  %v2719_v45 = vmul.f32 %v11829_v18, %v2361_v59  ;;  %v9683_v29 = vld [vmem:[%s10385_s1 + $0x8] sm:$0xff] }
 0x4bb   : > { %v8319_v22 = vpop.f32.mrf.mxu1 }
 0x4bc   : > { %2753 = vst [vmem:[%s11836_s22 + $0x10] sm:$0xff] %v2737_v33  ;;  %v2735_v38 = vadd.f32 %v9681_v47, %v2719_v45  ;;  %v2722_v43 = vmul.f32 %v8319_v22, %v11829_v18  ;;  %v9684_v45 = vld [vmem:[%s10385_s1 + $0x30] sm:$0xff] }
 0x4bd   : > { %v2364_v51 = vpop.f32.mrf.mxu1 }
 0x4be   : > { %2751 = vst [vmem:[%s11836_s22] sm:$0xff] %v2735_v38  ;;  %v2738_v8 = vadd.f32 %v9682_v0, %v2722_v43  ;;  %v2720_v52 = vmul.f32 %v11829_v18, %v2364_v51  ;;  %v9685_v43 = vld [vmem:[%s10385_s1 + $0x20] sm:$0xff] }
 0x4bf   : > { %v8322_v50 = vpop.f32.mrf.mxu1 }
 0x4c0   : > { %2754 = vst [vmem:[%s11836_s22 + $0x18] sm:$0xff] %v2738_v8  ;;  %v2736_v59 = vadd.f32 %v9683_v29, %v2720_v52  ;;  %v2725_v17 = vmul.f32 %v8322_v50, %v11829_v18  ;;  %v9686_v52 = vld [vmem:[%s10385_s1 + $0x38] sm:$0xff] }
 0x4c1   : > { %v2377_v33 = vpop.f32.mrf.mxu1 }
 0x4c2   : > { %2752 = vst [vmem:[%s11836_s22 + $0x8] sm:$0xff] %v2736_v59  ;;  %v2741_v22 = vadd.f32 %v9684_v45, %v2725_v17  ;;  %v2723_v47 = vmul.f32 %v11829_v18, %v2377_v33  ;;  %v9687_v17 = vld [vmem:[%s10385_s1 + $0x28] sm:$0xff] }
 0x4c3   : > { %v8323_v38 = vpop.f32.mrf.mxu1 }
 0x4c4   : > { %2757 = vst [vmem:[%s11836_s22 + $0x30] sm:$0xff] %v2741_v22  ;;  %v2739_v51 = vadd.f32 %v9685_v43, %v2723_v47  ;;  %v2726_v0 = vmul.f32 %v8323_v38, %v11829_v18  ;;  %v9688_v47 = vld [vmem:[%s10385_s1 + $0x50] sm:$0xff] }
 0x4c5   : > { %v2380_v8 = vpop.f32.mrf.mxu1 }
 0x4c6   : > { %2755 = vst [vmem:[%s11836_s22 + $0x20] sm:$0xff] %v2739_v51  ;;  %v2742_v50 = vadd.f32 %v9686_v52, %v2726_v0  ;;  %v2724_v29 = vmul.f32 %v11829_v18, %v2380_v8  ;;  %v9689_v0 = vld [vmem:[%s10385_s1 + $0x40] sm:$0xff] }
 0x4c7   : > { %v8326_v59 = vpop.f32.mrf.mxu1 }
 0x4c8   : > { %2758 = vst [vmem:[%s11836_s22 + $0x38] sm:$0xff] %v2742_v50  ;;  %v2740_v33 = vadd.f32 %v9687_v17, %v2724_v29  ;;  %v2729_v45 = vmul.f32 %v8326_v59, %v11829_v18  ;;  %v9690_v29 = vld [vmem:[%s10385_s1 + $0x58] sm:$0xff] }
 0x4c9   : > { %v2393_v22 = vpop.f32.mrf.mxu1 }
 0x4ca   : > { %2756 = vst [vmem:[%s11836_s22 + $0x28] sm:$0xff] %v2740_v33  ;;  %v2745_v38 = vadd.f32 %v9688_v47, %v2729_v45  ;;  %v2727_v43 = vmul.f32 %v11829_v18, %v2393_v22  ;;  %v9691_v33 = vld [vmem:[%s10385_s1 + $0x48] sm:$0xff]  ;;  %v3442_v45 = vpack.c.bf16 %v11572_v48, %v11569_v31  ;;  %v3443_v22 = vpack.c.bf16 %v11593_v32, %v11585_v42  ;;  %v9692_v48 = vld [vmem:[%s10385_s1 + $0x70] sm:$0xff] }
 0x4cb   : > { %v8327_v51 = vpop.f32.mrf.mxu1  ;;  %v3444_v47 = vpack.c.bf16 %v11611_v7, %v11599_v46  ;;  %v3446_v32 = vpack.c.bf16 %v11635_v4, %v11629_v30  ;;  %v9693_v7 = vld [vmem:[%s10385_s1 + $0x60] sm:$0xff]  ;;  %v3447_v30 = vpack.c.bf16 %v11647_v40, %v11641_v54  ;;  %v9695_v4 = vld [vmem:[%s10385_s1 + $0x68] sm:$0xff] }
 0x4cc   : > { %2761 = vst [vmem:[%s11836_s22 + $0x50] sm:$0xff] %v2745_v38  ;;  %v2743_v8 = vadd.f32 %v9689_v0, %v2727_v43  ;;  %v2730_v52 = vmul.f32 %v8327_v51, %v11829_v18  ;;  %8476 = vmatprep.mubr.bf16.mxu1 %v3442_v45  ;;  %v3445_v43 = vpack.c.bf16 %v11623_v61, %v11617_v24  ;;  %v9697_v45 = vld [vmem:[%s10160_s28] sm:$0xff] }
 0x4cd   : > { %v2396_v50 = vpop.f32.mrf.mxu1  ;;  %8477 = vmatmul.mubr.bf16.vlgmr.msra.gmra.mxu1 %v3443_v22 }
 0x4ce   : > { %2759 = vst [vmem:[%s11836_s22 + $0x40] sm:$0xff] %v2743_v8  ;;  %v2746_v17 = vadd.f32 %v9690_v29, %v2730_v52  ;;  %v2728_v59 = vmul.f32 %v11829_v18, %v2396_v50  ;;  %8480 = vmatprep.mubr.bf16.mxu1 %v3444_v47  ;;  %v9694_v8 = vld [vmem:[%s10385_s1 + $0x78] sm:$0xff] }
 0x4d0   : > { %2762 = vst [vmem:[%s11836_s22 + $0x58] sm:$0xff] %v2746_v17  ;;  %v2744_v2 = vadd.f32 %v9691_v33, %v2728_v59  ;;  %v3448_v17 = vpack.c.bf16 %v11661_v19, %v11653_v13  ;;  %v3449_v59 = vpack.c.bf16 %v11673_v55, %v11667_v34  ;;  %v9696_v19 = vld [vmem:[%s10160_s28 + $0x10] sm:$0xff] }
 0x4d2   : > { %2760 = vst [vmem:[%s11836_s22 + $0x48] sm:$0xff] %v2744_v2 }
 0x4d5   : > { %8481 = vmatmul.mubr.bf16.gmra.mxu1 %v3445_v43  ;;  %v9698_v43 = vld [vmem:[%s10160_s28 + $0x18] sm:$0xff] }
 0x4d6   : > { %8484 = vmatprep.mubr.bf16.mxu1 %v3446_v32 }
 0x4dd   : > { %8485 = vmatmul.mubr.bf16.gmra.mxu1 %v3447_v30 }
 0x4de   : > { %8488 = vmatprep.mubr.bf16.mxu1 %v3448_v17 }
 0x4e5   : > { %8489 = vmatmul.mubr.bf16.gmra.mxu1 %v3449_v59  ;;  %v9703_v59 = vld [vmem:[%s10160_s28 + $0x28] sm:$0xff] }
 0x4fb   : > { %v8330_v38 = vpop.f32.mrf.mxu1 }
 0x4fc   : > { %v2733_v2 = vmul.f32 %v8330_v38, %v11829_v18 }
 0x4fd   : > { %v2409_v31 = vpop.f32.mrf.mxu1 }
 0x4fe   : > { %v2749_v51 = vadd.f32 %v9692_v48, %v2733_v2  ;;  %v2731_v42 = vmul.f32 %v11829_v18, %v2409_v31  ;;  %v9699_v48 = vld [vmem:[%s10160_s28 + $0x8] sm:$0xff] }
 0x4ff   : > { %v8331_v46 = vpop.f32.mrf.mxu1 }
 0x500   : > { %2765 = vst [vmem:[%s11836_s22 + $0x70] sm:$0xff] %v2749_v51  ;;  %v2747_v0 = vadd.f32 %v9693_v7, %v2731_v42  ;;  %v2734_v24 = vmul.f32 %v8331_v46, %v11829_v18  ;;  %v9700_v7 = vld [vmem:[%s10160_s28 + $0x30] sm:$0xff] }
 0x501   : > { %v2412_v61 = vpop.f32.mrf.mxu1 }
 0x502   : > { %2763 = vst [vmem:[%s11836_s22 + $0x60] sm:$0xff] %v2747_v0  ;;  %v2750_v52 = vadd.f32 %v9694_v8, %v2734_v24  ;;  %v2732_v50 = vmul.f32 %v11829_v18, %v2412_v61  ;;  %v11904_v18 = vld [vmem:[%s14557_s15] ss:$0 sm:$0xff] }
 0x503   : > { %v9701_v8 = vld [vmem:[%s10160_s28 + $0x20] sm:$0xff] }
 0x504   : > { %2766 = vst [vmem:[%s11836_s22 + $0x78] sm:$0xff] %v2750_v52  ;;  %v2748_v29 = vadd.f32 %v9695_v4, %v2732_v50  ;;  %v9702_v4 = vld [vmem:[%s10160_s28 + $0x38] sm:$0xff] }
 0x506   : > { %2764 = vst [vmem:[%s11836_s22 + $0x68] sm:$0xff] %v2748_v29 }
 0x51b   : > { %v8350_v54 = vpop.f32.mrf.mxu1 }
 0x51c   : > { %v2775_v40 = vmul.f32 %v8350_v54, %v11904_v18 }
 0x51d   : > { %v2650_v13 = vpop.f32.mrf.mxu1 }
 0x51e   : > { %v2791_v34 = vadd.f32 %v9696_v19, %v2775_v40  ;;  %v2773_v55 = vmul.f32 %v11904_v18, %v2650_v13 }
 0x51f   : > { %v8351_v33 = vpop.f32.mrf.mxu1 }
 0x520   : > { %2807 = vst [vmem:[%s11911_s18 + $0x10] sm:$0xff] %v2791_v34  ;;  %v2789_v22 = vadd.f32 %v9697_v45, %v2773_v55  ;;  %v2776_v47 = vmul.f32 %v8351_v33, %v11904_v18  ;;  %v11937_v34 = vpop.f32.mrf.mxu0  ;;  %v9704_v55 = vld [vmem:[%s10160_s28 + $0x50] sm:$0xff] }
 0x521   : > { %v2653_v38 = vpop.f32.mrf.mxu1 }
 0x522   : > { %2805 = vst [vmem:[%s11911_s18] sm:$0xff] %v2789_v22  ;;  %v2792_v2 = vadd.f32 %v9698_v43, %v2776_v47  ;;  %v2774_v31 = vmul.f32 %v11904_v18, %v2653_v38  ;;  %v9705_v47 = vld [vmem:[%s10160_s28 + $0x40] sm:$0xff] }
 0x524   : > { %2808 = vst [vmem:[%s11911_s18 + $0x18] sm:$0xff] %v2792_v2  ;;  %v2790_v51 = vadd.f32 %v9699_v48, %v2774_v31  ;;  %v11944_v31 = vpop.f32.mrf.mxu0  ;;  %v9706_v48 = vld [vmem:[%s10160_s28 + $0x58] sm:$0xff] }
 0x526   : > { %2806 = vst [vmem:[%s11911_s18 + $0x8] sm:$0xff] %v2790_v51 }
 0x52b   : > { %v8354_v42 = vpop.f32.mrf.mxu1 }
 0x52c   : > { %v2779_v32 = vmul.f32 %v8354_v42, %v11904_v18 }
 0x52d   : > { %v2666_v46 = vpop.f32.mrf.mxu1 }
 0x52e   : > { %v2795_v0 = vadd.f32 %v9700_v7, %v2779_v32  ;;  %v2777_v24 = vmul.f32 %v11904_v18, %v2666_v46  ;;  %v9707_v32 = vld [vmem:[%s10160_s28 + $0x48] sm:$0xff]  ;;  %v11951_v7 = vpop.f32.mrf.mxu0 }
 0x52f   : > { %v8355_v61 = vpop.f32.mrf.mxu1 }
 0x530   : > { %2811 = vst [vmem:[%s11911_s18 + $0x30] sm:$0xff] %v2795_v0  ;;  %v2793_v52 = vadd.f32 %v9701_v8, %v2777_v24  ;;  %v2780_v50 = vmul.f32 %v8355_v61, %v11904_v18  ;;  %v11954_v0 = vpop.f32.mrf.mxu0 }
 0x531   : > { %v2669_v30 = vpop.f32.mrf.mxu1 }
 0x532   : > { %2809 = vst [vmem:[%s11911_s18 + $0x20] sm:$0xff] %v2793_v52  ;;  %v2796_v29 = vadd.f32 %v9702_v4, %v2780_v50  ;;  %v2778_v17 = vmul.f32 %v11904_v18, %v2669_v30  ;;  %v11957_v52 = vpop.f32.mrf.mxu0  ;;  %v9708_v50 = vld [vmem:[%s10160_s28 + $0x70] sm:$0xff] }
 0x534   : > { %2812 = vst [vmem:[%s11911_s18 + $0x38] sm:$0xff] %v2796_v29  ;;  %v2794_v54 = vadd.f32 %v9703_v59, %v2778_v17  ;;  %v9709_v17 = vld [vmem:[%s10160_s28 + $0x60] sm:$0xff] }
 0x536   : > { %2810 = vst [vmem:[%s11911_s18 + $0x28] sm:$0xff] %v2794_v54 }
 0x53b   : > { %v8358_v40 = vpop.f32.mrf.mxu1 }
 0x53c   : > { %v2783_v13 = vmul.f32 %v8358_v40, %v11904_v18 }
 0x53d   : > { %v2682_v19 = vpop.f32.mrf.mxu1 }
 0x53e   : > { %v2799_v33 = vadd.f32 %v9704_v55, %v2783_v13  ;;  %v2781_v45 = vmul.f32 %v11904_v18, %v2682_v19  ;;  %v11964_v13 = vpop.f32.mrf.mxu0  ;;  %v9710_v19 = vld [vmem:[%s10160_s28 + $0x78] sm:$0xff] }
 0x53f   : > { %v8359_v22 = vpop.f32.mrf.mxu1 }
 0x540   : > { %2815 = vst [vmem:[%s11911_s18 + $0x50] sm:$0xff] %v2799_v33  ;;  %v2797_v38 = vadd.f32 %v9705_v47, %v2781_v45  ;;  %v2784_v43 = vmul.f32 %v8359_v22, %v11904_v18  ;;  %v9711_v22 = vld [vmem:[%s10160_s28 + $0x68] sm:$0xff] }
 0x541   : > { %v2685_v2 = vpop.f32.mrf.mxu1 }
 0x542   : > { %2813 = vst [vmem:[%s11911_s18 + $0x40] sm:$0xff] %v2797_v38  ;;  %v2800_v51 = vadd.f32 %v9706_v48, %v2784_v43  ;;  %v2782_v42 = vmul.f32 %v11904_v18, %v2685_v2  ;;  %v11973_v43 = vpop.f32.mrf.mxu0  ;;  %v11979_v48 = vld [vmem:[%s14551_s9] ss:$0 sm:$0xff] }
 0x544   : > { %2816 = vst [vmem:[%s11911_s18 + $0x58] sm:$0xff] %v2800_v51  ;;  %v2798_v46 = vadd.f32 %v9707_v32, %v2782_v42  ;;  %v11985_v32 = vpop.f32.mrf.mxu0 }
 0x546   : > { %2814 = vst [vmem:[%s11911_s18 + $0x48] sm:$0xff] %v2798_v46 }
 0x54b   : > { %v8362_v24 = vpop.f32.mrf.mxu1 }
 0x54c   : > { %v2787_v61 = vmul.f32 %v8362_v24, %v11904_v18 }
 0x54d   : > { %v2698_v8 = vpop.f32.mrf.mxu1 }
 0x54e   : > { %v2803_v30 = vadd.f32 %v9708_v50, %v2787_v61  ;;  %v2785_v4 = vmul.f32 %v11904_v18, %v2698_v8  ;;  %v11989_v8 = vpop.f32.mrf.mxu0 }
 0x54f   : > { %v8363_v29 = vpop.f32.mrf.mxu1 }
 0x550   : > { %2819 = vst [vmem:[%s11911_s18 + $0x70] sm:$0xff] %v2803_v30  ;;  %v2801_v59 = vadd.f32 %v9709_v17, %v2785_v4  ;;  %v2788_v54 = vmul.f32 %v8363_v29, %v11904_v18  ;;  %v11991_v4 = vpop.f32.mrf.mxu0 }
 0x551   : > { %v2701_v40 = vpop.f32.mrf.mxu1 }
 0x552   : > { %2817 = vst [vmem:[%s11911_s18 + $0x60] sm:$0xff] %v2801_v59  ;;  %v2804_v55 = vadd.f32 %v9710_v19, %v2788_v54  ;;  %v2786_v33 = vmul.f32 %v11904_v18, %v2701_v40  ;;  %v11993_v59 = vpop.f32.mrf.mxu0 }
 0x553   : > { %v8414_v45 = vpop.f32.mrf.mxu1 }
 0x554   : > { %2820 = vst [vmem:[%s11911_s18 + $0x78] sm:$0xff] %v2804_v55  ;;  %v2802_v47 = vadd.f32 %v9711_v22, %v2786_v33  ;;  %v3283_v51 = vadd.f32 %v11979_v48, %v8414_v45  ;;  %v11995_v19 = vpop.f32.mrf.mxu0 }
 0x555   : > { %v11971_v38 = vpop.f32.mrf.mxu1 }
 0x556   : > { %2818 = vst [vmem:[%s11911_s18 + $0x68] sm:$0xff] %v2802_v47  ;;  %v8446_v33 = vpop.f32.mrf.mxu0 }
 0x557   : > { %v8415_v2 = vpop.f32.mrf.mxu1 }
 0x558   : > { %v3286_v42 = vadd.f32 %v11979_v48, %v8415_v2  ;;  %v11997_v22 = vpop.f32.mrf.mxu0  ;;  %v3388_v2 = vadd.f32 %v11546_v21, %v8446_v33 }
 0x559   : > { %v11983_v18 = vpop.f32.mrf.mxu1 }
 0x55a   : > { %v11987_v46 = vpack.c.bf16 %v3286_v42, %v3283_v51  ;;  %v8447_v36 = vpop.f32.mrf.mxu0 }
 0x55b   : > { %v8418_v24 = vpop.f32.mrf.mxu1  ;;  %v3391_v20 = vadd.f32 %v12005_v53, %v8447_v36 }
 0x55c   : > { %v12010_v49 = vpop.f32.mrf.mxu0 }
 0x55d   : > { %v3290_v61 = vpop.f32.mrf.mxu1  ;;  %v12012_v21 = vpack.c.bf16 %v3391_v20, %v3388_v2 }
 0x55e   : > { %v8450_v33 = vpop.f32.mrf.mxu0 }
 0x55f   : > { %v8419_v50 = vpop.f32.mrf.mxu1  ;;  %v3404_v37 = vadd.f32 %v12005_v53, %v8450_v33 }
 0x561   : > { %v3293_v30 = vpop.f32.mrf.mxu1 }
 0x563   : > { %v8422_v29 = vpop.f32.mrf.mxu1 }
 0x565   : > { %v3306_v17 = vpop.f32.mrf.mxu1 }
 0x567   : > { %v8423_v54 = vpop.f32.mrf.mxu1 }
 0x568   : > { %v3318_v36 = vadd.f32 %v11979_v48, %v8423_v54 }
 0x569   : > { %v3309_v40 = vpop.f32.mrf.mxu1 }
 0x56b   : > { %v8426_v55 = vpop.f32.mrf.mxu1 }
 0x56c   : > { %v3331_v51 = vadd.f32 %v11979_v48, %v8426_v55 }
 0x56d   : > { %v3322_v45 = vpop.f32.mrf.mxu1 }
 0x56e   : > { %v3323_v41 = vadd.f32 %v11979_v48, %v3322_v45 }
 0x56f   : > { %v8427_v47 = vpop.f32.mrf.mxu1 }
 0x570   : > { %v3334_v42 = vadd.f32 %v11979_v48, %v8427_v47  ;;  %v12014_v47 = vpop.f32.mrf.mxu0 }
 0x571   : > { %v3325_v28 = vpop.f32.mrf.mxu1 }
 0x572   : > { %v3562_v10 = vpack.c.bf16 %v3334_v42, %v3331_v51  ;;  %v3326_v23 = vadd.f32 %v11979_v48, %v3325_v28  ;;  %v8451_v62 = vpop.f32.mrf.mxu0  ;;  %v3315_v28 = vadd.f32 %v11979_v48, %v8422_v29  ;;  %v3310_v42 = vadd.f32 %v11979_v48, %v3309_v40 }
 0x573   : > { %v3407_v45 = vadd.f32 %v12005_v53, %v8451_v62  ;;  %v3307_v62 = vadd.f32 %v11979_v48, %v3306_v17  ;;  %v3291_v40 = vadd.f32 %v11979_v48, %v3290_v61  ;;  %v3278_v17 = vadd.f32 %v11979_v48, %v11983_v18 }
 0x574   : > { %v3561_v55 = vpack.c.bf16 %v3326_v23, %v3323_v41  ;;  %8492 = vmatprep.subr.bf16.mxu0 %v3562_v10  ;;  %v12020_v51 = vpop.f32.mrf.mxu0  ;;  %v3560_v23 = vpack.c.bf16 %v3318_v36, %v3315_v28 }
 0x575   : > { %8493 = vmatpush3.bf16.xpose.msra.mxu0 %v3562_v10  ;;  %v12022_v20 = vpack.c.bf16 %v3407_v45, %v3404_v37  ;;  %v3559_v9 = vpack.c.bf16 %v3310_v42, %v3307_v62  ;;  %v3302_v37 = vadd.f32 %v11979_v48, %v8419_v50  ;;  %v3294_v45 = vadd.f32 %v11979_v48, %v3293_v30  ;;  %v9717_v62 = vld [vmem:[%s14548_s6 + $0x28] sm:$0xff]  }
 0x576   : > { %8494 = vmatprep.subr.bf16.mxu0 %v3561_v55  ;;  %v8454_v41 = vpop.f32.mrf.mxu0  ;;  %v3275_v50 = vadd.f32 %v11979_v48, %v11971_v38  ;;  %v9715_v38 = vld [vmem:[%s14548_s6 + $0x38] sm:$0xff]  }
 0x577   : > { %v3420_v2 = vadd.f32 %v12005_v53, %v8454_v41  ;;  %v3557_v28 = vpack.c.bf16 %v3294_v45, %v3291_v40 }
 0x578   : > { %v12024_v10 = vpop.f32.mrf.mxu0 }
 0x57a   : > { %v8455_v54 = vpop.f32.mrf.mxu0 }
 0x57b   : > { %v3423_v33 = vadd.f32 %v12005_v53, %v8455_v54 }
 0x57d   : > { %8495 = vmatpush3.bf16.xpose.msra.mxu0 %v3561_v55  ;;  %v12030_v29 = vpack.c.bf16 %v3423_v33, %v3420_v2  ;;  %v3299_v55 = vadd.f32 %v11979_v48, %v8418_v24  ;;  %v3555_v24 = vpack.c.bf16 %v3278_v17, %v3275_v50  ;;  %v12091_v50 = vld [vmem:[%s10385_s1 + $0x108] sm:$0xff] }
 0x57e   : > { %8496 = vmatprep.subr.bf16.mxu0 %v3560_v23 }
 0x57f   : > { %v3558_v36 = vpack.c.bf16 %v3302_v37, %v3299_v55 }
 0x585   : > { %8497 = vmatpush3.bf16.xpose.msra.mxu0 %v3560_v23 }
 0x586   : > { %8498 = vmatprep.subr.bf16.mxu0 %v3559_v9 }
 0x58d   : > { %8499 = vmatpush3.bf16.xpose.msra.mxu0 %v3559_v9  ;;  %v12045_v9 = vld [vmem:[%s14549_s7] ss:$0 sm:$0xff]  ;;  %v12068_v54 = vpop.f32.mrf.mxu1 }
 0x58e   : > { %8500 = vmatprep.subr.bf16.mxu0 %v3558_v36  ;;  %v3173_v61 = vadd.f32 %v12045_v9, %v11954_v0  ;;  %v3170_v30 = vadd.f32 %v12045_v9, %v11944_v31  ;;  %v3189_v23 = vadd.f32 %v12045_v9, %v11985_v32  ;;  %v3178_v0 = vadd.f32 %v12045_v9, %v11937_v34 }
 0x58f   : > { %v14837_v31 = vpack.c.bf16 %v11338_v44, %v11336_v3  ;;  %v3186_v2 = vadd.f32 %v12045_v9, %v11964_v13  ;;  %v12070_v3 = vpop.f32.mrf.mxu1  ;;  %v3197_v13 = vadd.f32 %v12045_v9, %v11973_v43  ;;  %v3205_v37 = vadd.f32 %v12045_v9, %v11995_v19  ;;  %v12086_v43 = vld [vmem:[%s10385_s1 + $0x100] sm:$0xff] }
 0x590   : > { %v3221_v48 = vmul.f32 0.088388346, %v3173_v61  ;;  %v3220_v18 = vmul.f32 0.088388346, %v3170_v30  ;;  %v3225_v32 = vmul.f32 0.088388346, %v3189_v23  ;;  %v3194_v45 = vadd.f32 %v12045_v9, %v11957_v52 }
 0x591   : > { %v3222_v33 = vmul.f32 0.088388346, %v3178_v0  ;;  %v3224_v34 = vmul.f32 0.088388346, %v3186_v2  ;;  %v3202_v40 = vadd.f32 %v12045_v9, %v11991_v4  ;;  %v3227_v61 = vmul.f32 0.088388346, %v3197_v13 }
 0x592   : > { %v3549_v41 = vpack.c.bf16 %v3221_v48, %v3220_v18  ;;  %v9720_v52 = vld [vmem:[%s14548_s6 + $0x20] sm:$0xff]   ;;  %v3229_v4 = vmul.f32 0.088388346, %v3205_v37  ;;  %v14839_v18 = vld [vmem:[#allocation69_spill] sm:$0xff]  ;;  %v14840_v37 = vld [vmem:[#allocation43_spill] sm:$0xff] }
 0x593   : > { %v3551_v55 = vpack.c.bf16 %v3225_v32, %v3224_v34  ;;  %v3228_v48 = vmul.f32 0.088388346, %v3202_v40  ;;  %v9721_v2 = vld [vmem:[%s14548_s6 + $0x18] sm:$0xff]   ;;  %v12119_v34 = vld [vmem:[%s10385_s1 + $0x110] sm:$0xff]  ;;  %v12126_v13 = vld [vmem:[%s10385_s1 + $0x120] sm:$0xff] }
 0x594   : > { %v12114_v32 = vld [vmem:[%s10385_s1 + $0x118] sm:$0xff] }
 0x595   : > { %8501 = vmatpush3.bf16.xpose.msra.mxu0 %v3558_v36  ;;  %v12079_v36 = vpop.f32.mrf.mxu1 }
 0x596   : > { %8502 = vmatprep.subr.bf16.mxu0 %v3557_v28 }
 0x59d   : > { %8503 = vmatpush3.bf16.xpose.msra.mxu0 %v3557_v28  ;;  %v14838_v28 = vld [vmem:[#allocation57_spill] sm:$0xff] }
 0x59e   : > { %8504 = vmatprep.subr.bf16.mxu0 %v11987_v46  ;;  %v4400_v17 = vsub.f32 %v12086_v43, %v14838_v28  ;;  %v4401_v19 = vsub.f32 %v12091_v50, %v14838_v28 }
 0x5a0   : > { %v4419_v23 = vmul.f32 %v14839_v18, %v4401_v19 }
 0x5a5   : > { %8505 = vmatpush3.bf16.xpose.msra.mxu0 %v11987_v46  ;;  %v3181_v46 = vadd.f32 %v12045_v9, %v11951_v7  ;;  %v9716_v7 = vld [vmem:[%s14548_s6 + $0x30] sm:$0xff]  }
 0x5a6   : > { %8506 = vmatprep.subr.bf16.mxu0 %v3555_v24 }
 0x5a7   : > { %v3223_v42 = vmul.f32 0.088388346, %v3181_v46  ;;  %v4418_v46 = vmul.f32 %v14839_v18, %v4400_v17  ;;  %v12133_v17 = vld [vmem:[%s10385_s1 + $0x128] sm:$0xff] }
 0x5a8   : > { %v4405_v19 = vsub.f32 %v12133_v17, %v14838_v28 }
 0x5a9   : > { %v3550_v44 = vpack.c.bf16 %v3223_v42, %v3222_v33  ;;  %v3553_v42 = vpack.c.bf16 %v3229_v4, %v3228_v48  ;;  %v4403_v33 = vsub.f32 %v12114_v32, %v14838_v28  ;;  %v14842_v4 = vld [vmem:[#allocation47_spill] sm:$0xff]  ;;  %v14843_v48 = vld [vmem:[#allocation46_spill] sm:$0xff] }
 0x5ad   : > { %8507 = vmatpush3.bf16.xpose.msra.mxu0 %v3555_v24  ;;  %v12095_v24 = vpop.f32.mrf.mxu1 }
 0x5ae   : > { %8588 = vmatprep.subr.bf16.mxu0 %v9715_v38 }
 0x5af   : > { %v12100_v30 = vpop.f32.mrf.mxu1 }
 0x5b4   : > { %8509 = vmatmul.mubr.bf16.vlgmr.msra.gmra.mxu0 %v14837_v31  ;;  %v3213_v31 = vadd.f32 %v12045_v9, %v11993_v59  ;;  %v3210_v59 = vadd.f32 %v12045_v9, %v11989_v8 }
 0x5b5   : > { %8512 = vmatprep.mubr.bf16.mxu0 %v3549_v41  ;;  %8589 = vmatpush3.bf16.msra.mxu0 %v9715_v38  ;;  %v3226_v38 = vmul.f32 0.088388346, %v3194_v45  ;;  %v12104_v41 = vpop.f32.mrf.mxu1  ;;  %v14841_v45 = vld [vmem:[#allocation42_spill] sm:$0xff] }
 0x5b6   : > { %8590 = vmatprep.subr.bf16.mxu0 %v9716_v7  ;;  %v4435_v40 = vmul.f32 %v4419_v23, %v14841_v45  ;;  %v3231_v8 = vmul.f32 0.088388346, %v3213_v31  ;;  %v4423_v45 = vmul.f32 %v14839_v18, %v4405_v19 }
 0x5b7   : > { %v3552_v0 = vpack.c.bf16 %v3227_v61, %v3226_v38 }
 0x5b8   : > { %v4439_v11 = vmul.f32 %v4423_v45, %v14847_v60 }
 0x5b9   : > { %8591 = vmatpush3.bf16.msra.mxu0 %v9716_v7  ;;  %v12111_v7 = vpop.f32.mrf.mxu1 }
 0x5ba   : > { %8592 = vmatprep.subr.bf16.mxu0 %v9717_v62 }
 0x5bb   : > { %v12137_v61 = vpop.f32.mrf.mxu1 }
 0x5bc   : > { %8513 = vmatmul.mubr.bf16.gmra.mxu0 %v3550_v44  ;;  %v4402_v44 = vsub.f32 %v12119_v34, %v14838_v28 }
 0x5bd   : > { %8516 = vmatprep.mubr.bf16.mxu0 %v3551_v55  ;;  %8593 = vmatpush3.bf16.msra.mxu0 %v9717_v62  ;;  %v4404_v62 = vsub.f32 %v12126_v13, %v14838_v28  ;;  %v4434_v55 = vmul.f32 %v4418_v46, %v14840_v37  ;;  %v4451_v46 = vadd.f32 %v4435_v40, %v14843_v48  ;;  %v12144_v23 = vpop.f32.mrf.mxu1  ;;  %v9727_v40 = vld [vmem:[%s14548_s6 + $0x8] sm:$0xff]  }
 0x5be   : > { %8594 = vmatprep.subr.bf16.mxu0 %v9720_v52 }
 0x5bf   : > { %v4450_v38 = vadd.f32 %v4434_v55, %v14842_v4  ;;  %v4422_v31 = vmul.f32 %v14839_v18, %v4404_v62  ;;  %v12150_v37 = vpop.f32.mrf.mxu1 }
 0x5c1   : > { %8595 = vmatpush3.bf16.msra.mxu0 %v9720_v52  ;;  %v9726_v52 = vld [vmem:[%s14548_s6 + $0x10] sm:$0xff]   ;;  %v4594_v48 = vpack.c.bf16 %v4451_v46, %v4450_v38  ;;  %v8487_v19 = vpop.f32.mrf.mxu1  ;;  %v4408_v38 = vsub.f32 %v12168_v27, %v14838_v28  ;;  %v12173_v46 = vld [vmem:[%s10385_s1 + $0x148] sm:$0xff]  ;;  %v4438_v39 = vmul.f32 %v4422_v31, %v14846_v1  ;;  %v14853_v1 = vld [vmem:[#allocation61_spill] sm:$0xff] }
 0x5c2   : > { %8596 = vmatprep.subr.bf16.mxu0 %v9721_v2  ;;  %v4409_v12 = vsub.f32 %v12173_v46, %v14838_v28 }
 0x5c3   : > { %v4454_v5 = vadd.f32 %v4438_v39, %v14850_v15  ;;  %v4426_v60 = vmul.f32 %v14839_v18, %v4408_v38  ;;  %v12207_v38 = vld [vmem:[%s10385_s1 + $0x150] sm:$0xff]  ;;  %v14852_v15 = vld [vmem:[#allocation62_spill] sm:$0xff] }
 0x5c4   : > { %8517 = vmatmul.mubr.bf16.gmra.mxu0 %v3552_v0  ;;  %v4421_v0 = vmul.f32 %v14839_v18, %v4403_v33  ;;  %v12156_v33 = vld [vmem:[%s10385_s1 + $0x130] sm:$0xff] }
 0x5c5   : > { %8520 = vmatprep.mubr.bf16.mxu0 %v3553_v42  ;;  %8597 = vmatpush3.bf16.msra.mxu0 %v9721_v2  ;;  %v4420_v2 = vmul.f32 %v14839_v18, %v4402_v44  ;;  %v3230_v42 = vmul.f32 0.088388346, %v3210_v59  ;;  %v4406_v44 = vsub.f32 %v12156_v33, %v14838_v28  ;;  %v12161_v59 = vld [vmem:[%s10385_s1 + $0x138] sm:$0xff] }
 0x5c6   : > { %8598 = vmatprep.subr.bf16.mxu0 %v9726_v52  ;;  %v4407_v62 = vsub.f32 %v12161_v59, %v14838_v28 }
 0x5c7   : > { %v3554_v55 = vpack.c.bf16 %v3231_v8, %v3230_v42  ;;  %v14845_v8 = vld [vmem:[#allocation45_spill] sm:$0xff] }
 0x5c8   : > { %v4436_v42 = vmul.f32 %v4420_v2, %v14845_v8  ;;  %v14848_v2 = vld [vmem:[#allocation48_spill] sm:$0xff]  ;;  %v14849_v8 = vld [vmem:[#allocation49_spill] sm:$0xff]  ;;  %v4425_v31 = vmul.f32 %v14839_v18, %v4407_v62 }
 0x5c9   : > { %8599 = vmatpush3.bf16.msra.mxu0 %v9726_v52  ;;  %v14844_v52 = vld [vmem:[#allocation44_spill] sm:$0xff]  ;;  %v9735_v62 = vld [vmem:[%s14552_s10 + $0x38] sm:$0xff]  }
 0x5ca   : > { %8600 = vmatprep.subr.bf16.mxu0 %v9727_v40  ;;  %v4437_v4 = vmul.f32 %v4421_v0, %v14844_v52  ;;  %v3519_v0 = vpop.f32.mrf.mxu1  ;;  %v4452_v52 = vadd.f32 %v4436_v42, %v14849_v8 }
 0x5cc   : > { %8521 = vmatmul.mubr.bf16.gmra.mxu0 %v3554_v55  ;;  %v4453_v55 = vadd.f32 %v4437_v4, %v14848_v2  ;;  %v8490_v45 = vpop.f32.mrf.mxu1  ;;  %v4427_v4 = vmul.f32 %v14839_v18, %v4409_v12  ;;  %v12191_v2 = vld [vmem:[%s10385_s1 + $0x158] sm:$0xff] }
 0x5cd   : > { %8601 = vmatpush3.bf16.msra.mxu0 %v9727_v40  ;;  %8604 = vmatprep.mubr.bf16.mxu0 %v4594_v48  ;;  %v4455_v40 = vadd.f32 %v4439_v11, %v14851_v16  ;;  %v4424_v48 = vmul.f32 %v14839_v18, %v4406_v44  ;;  %v4411_v39 = vsub.f32 %v12191_v2, %v14838_v28  ;;  %v12198_v11 = vld [vmem:[%s14555_s13] ss:$0 sm:$0xff] }
 0x5ce   : > { %8602 = vmatprep.subr.bf16.mxu0 %v9732_v57  ;;  %v3532_v42 = vpop.f32.mrf.mxu1  ;;  %v4595_v8 = vpack.c.bf16 %v4453_v55, %v4452_v52  ;;  %v3541_v44 = vadd.f32 %v12198_v11, %v8490_v45  ;;  %v4441_v52 = vmul.f32 %v4425_v31, %v10753_v56  ;;  %v4410_v55 = vsub.f32 %v12207_v38, %v14838_v28 }
 0x5cf   : > { %v4440_v12 = vmul.f32 %v4424_v48, %v10755_v63  ;;  %v4442_v45 = vmul.f32 %v4426_v60, %v14852_v15  ;;  %v4443_v25 = vmul.f32 %v4427_v4, %v14853_v1  ;;  %v3533_v35 = vadd.f32 %v12198_v11, %v3532_v42  ;;  %v14855_v48 = vld [vmem:[#allocation58_spill] sm:$0xff]  ;;  %v14857_v15 = vld [vmem:[#allocation64_spill] sm:$0xff] }
 0x5d0   : > { %v8491_v16 = vpop.f32.mrf.mxu1  ;;  %v4457_v31 = vadd.f32 %v4441_v52, %v14855_v48  ;;  %v12218_v63 = vld [vmem:[%s10385_s1 + $0x160] sm:$0xff]  ;;  %v3525_v60 = vadd.f32 %v12198_v11, %v12144_v23  ;;  %v3528_v4 = vadd.f32 %v12198_v11, %v8487_v19  ;;  %v14856_v52 = vld [vmem:[#allocation67_spill] sm:$0xff]  ;;  %v12234_v23 = vld [vmem:[%s10385_s1 + $0x178] sm:$0xff] }
 0x5d1   : > { %8603 = vmatpush3.bf16.msra.mxu0 %v9732_v57  ;;  %v4596_v57 = vpack.c.bf16 %v4455_v40, %v4454_v5  ;;  %v3544_v6 = vadd.f32 %v12198_v11, %v8491_v16  ;;  %v14854_v5 = vld [vmem:[#allocation60_spill] sm:$0xff]  ;;  %v4412_v56 = vsub.f32 %v12218_v63, %v14838_v28  ;;  %v4458_v1 = vadd.f32 %v4442_v45, %v14856_v52 }
 0x5d2   : > { %8652 = vmatprep.subr.bf16.mxu0 %v9735_v62  ;;  %v4456_v40 = vadd.f32 %v4440_v12, %v14854_v5  ;;  %v4429_v12 = vmul.f32 %v14839_v18, %v4411_v39  ;;  %v4459_v5 = vadd.f32 %v4443_v25, %v14857_v15  ;;  %v3517_v39 = vadd.f32 %v12198_v11, %v12150_v37  ;;  %v14860_v37 = vld [vmem:[#allocation66_spill] sm:$0xff] }
 0x5d3   : > { %v3819_v42 = vpack.c.bf16 %v3544_v6, %v3541_v44  ;;  %v4415_v6 = vsub.f32 %v12234_v23, %v14838_v28  ;;  %v4430_v44 = vmul.f32 %v14839_v18, %v4412_v56  ;;  %v3817_v45 = vpack.c.bf16 %v3528_v4, %v3525_v60  ;;  %v12248_v56 = vld [vmem:[%s10385_s1 + $0x170] sm:$0xff] }
 0x5d4   : > { %8605 = vmatmul.mubr.bf16.vlgmr.msra.gmra.mxu0 %v4595_v8  ;;  %v3535_v8 = vpop.f32.mrf.mxu1  ;;  %v4597_v19 = vpack.c.bf16 %v4457_v31, %v4456_v40  ;;  %v3520_v25 = vadd.f32 %v12198_v11, %v3519_v0  ;;  %v14859_v40 = vld [vmem:[#allocation65_spill] sm:$0xff]  ;;  %v14861_v0 = vld [vmem:[#allocation70_spill] sm:$0xff] }
 0x5d5   : > { %8608 = vmatprep.mubr.bf16.mxu0 %v4596_v57  ;;  %8653 = vmatpush3.bf16.msra.mxu0 %v9735_v62  ;;  %v3536_v16 = vadd.f32 %v12198_v11, %v3535_v8  ;;  %v9738_v57 = vld [vmem:[%s14552_s10 + $0x30] sm:$0xff]   ;;  %v4428_v62 = vmul.f32 %v14839_v18, %v4410_v55  ;;  %v14858_v55 = vld [vmem:[#allocation63_spill] sm:$0xff] }
 0x5d6   : > { %8654 = vmatprep.subr.bf16.mxu0 %v9738_v57  ;;  %8524 = vmatprep.subr.bf16.mxu1 %v3819_v42  ;;  %v4445_v8 = vmul.f32 %v4429_v12, %v14858_v55  ;;  %v3509_v12 = vadd.f32 %v12198_v11, %v12100_v30  ;;  %v12265_v30 = vpop.f32.mrf.mxu0 }
 0x5d7   : > { %v3818_v48 = vpack.c.bf16 %v3536_v16, %v3533_v35  ;;  %8525 = vmatpush3.bf16.msra.mxu1 %v3819_v42  ;;  %v9740_v35 = vld [vmem:[%s14552_s10 + $0x28] sm:$0xff]   ;;  %v4598_v16 = vpack.c.bf16 %v4459_v5, %v4458_v1  ;;  %v4444_v31 = vmul.f32 %v4428_v62, %v14859_v40  ;;  %v4414_v42 = vsub.f32 %v12248_v56, %v14838_v28  ;;  %v14863_v62 = vld [vmem:[#allocation77_spill] sm:$0xff] }
 0x5d8   : > { %v4461_v60 = vadd.f32 %v4445_v8, %v14860_v37  ;;  %v3512_v1 = vadd.f32 %v12198_v11, %v12111_v7  ;;  %v3816_v5 = vpack.c.bf16 %v3520_v25, %v3517_v39  ;;  %v4433_v28 = vmul.f32 %v14839_v18, %v4415_v6  ;;  %v14865_v25 = vld [vmem:[#allocation75_spill] sm:$0xff] }
 0x5d9   : > { %8655 = vmatpush3.bf16.msra.mxu0 %v9738_v57  ;;  %8526 = vmatprep.subr.bf16.mxu1 %v3818_v48  ;;  %v4460_v4 = vadd.f32 %v4444_v31, %v14861_v0  ;;  %v14862_v57 = vld [vmem:[#allocation73_spill] sm:$0xff]  ;;  %v4432_v8 = vmul.f32 %v14839_v18, %v4414_v42  ;;  %v3501_v7 = vadd.f32 %v12198_v11, %v12104_v41  ;;  %v14867_v42 = vld [vmem:[#allocation78_spill] sm:$0xff] }
 0x5da   : > { %8656 = vmatprep.subr.bf16.mxu0 %v9740_v35  ;;  %v4446_v15 = vmul.f32 %v4430_v44, %v14862_v57  ;;  %v9742_v44 = vld [vmem:[%s14552_s10 + $0x20] sm:$0xff]   ;;  %v3815_v39 = vpack.c.bf16 %v3512_v1, %v3509_v12  ;;  %v3504_v6 = vadd.f32 %v12198_v11, %v12137_v61  ;;  %v8458_v61 = vpop.f32.mrf.mxu0  ;;  %v3493_v12 = vadd.f32 %v12198_v11, %v12068_v54 }
 0x5db   : > { %8527 = vmatpush3.bf16.msra.mxu1 %v3818_v48  ;;  %v4599_v48 = vpack.c.bf16 %v4461_v60, %v4460_v4  ;;  %v14868_v60 = vld [vmem:[#allocation79_spill] sm:$0xff]  ;;  %v3496_v1 = vadd.f32 %v12198_v11, %v12079_v36  ;;  %v3488_v54 = vadd.f32 %v12198_v11, %v12095_v24 }
 0x5dc   : > { %8609 = vmatmul.mubr.bf16.gmra.mxu0 %v4597_v19  ;;  %8528 = vmatprep.subr.bf16.mxu1 %v3817_v45  ;;  %v4462_v19 = vadd.f32 %v4446_v15, %v14863_v62  ;;  %v14864_v15 = vld [vmem:[#allocation71_spill] sm:$0xff] }
 0x5dd   : > { %8612 = vmatprep.mubr.bf16.mxu0 %v4598_v16  ;;  %8657 = vmatpush3.bf16.msra.mxu0 %v9740_v35  ;;  %v4449_v18 = vmul.f32 %v4433_v28, %v14864_v15  ;;  %v14866_v16 = vld [vmem:[#allocation74_spill] sm:$0xff]  ;;  %v3814_v28 = vpack.c.bf16 %v3504_v6, %v3501_v7  ;;  %v9745_v36 = vld [vmem:[%s14552_s10 + $0x8] sm:$0xff]   ;;  %v3436_v6 = vadd.f32 %v12005_v53, %v8458_v61 }
 0x5de   : > { %8658 = vmatprep.subr.bf16.mxu0 %v9742_v44  ;;  %v4600_v35 = vpack.c.bf16 %v14865_v25, %v4462_v19  ;;  %v4448_v31 = vmul.f32 %v4432_v8, %v14866_v16  ;;  %v9744_v19 = vld [vmem:[%s14552_s10 + $0x10] sm:$0xff]   ;;  %v4822_v25 = vpack.c.bf16 %v12133_v17, %v12126_v13 }
 0x5df   : > { %8529 = vmatpush3.bf16.msra.mxu1 %v3817_v45  ;;  %v9743_v45 = vld [vmem:[%s14552_s10 + $0x18] sm:$0xff]   ;;  %v4465_v41 = vadd.f32 %v4449_v18, %v14867_v42 }
 0x5e0   : > { %8530 = vmatprep.subr.bf16.mxu1 %v3816_v5  ;;  %v4464_v4 = vadd.f32 %v4448_v31, %v14868_v60  ;;  %v4824_v31 = vpack.c.bf16 %v12173_v46, %v12168_v27 }
 0x5e1   : > { %8659 = vmatpush3.bf16.msra.mxu0 %v9742_v44  ;;  %v12286_v44 = vpop.f32.mrf.mxu0 }
 0x5e2   : > { %8660 = vmatprep.subr.bf16.mxu0 %v9743_v45  ;;  %v4601_v8 = vpack.c.bf16 %v4465_v41, %v4464_v4 }
 0x5e3   : > { %8531 = vmatpush3.bf16.msra.mxu1 %v3816_v5  ;;  %v3485_v5 = vadd.f32 %v12198_v11, %v12070_v3  ;;  %v8459_v7 = vpop.f32.mrf.mxu0  ;;  %v9746_v3 = vld [vmem:[%s14552_s10] sm:$0xff]   ;;  %v4820_v11 = vpack.c.bf16 %v12091_v50, %v12086_v43  ;;  %v4825_v43 = vpack.c.bf16 %v12191_v2, %v12207_v38  ;;  %v9747_v50 = vld [vmem:[%s10385_s1 + $0x168] sm:$0xff] }
 0x5e4   : > { %8613 = vmatmul.mubr.bf16.gmra.mxu0 %v4599_v48  ;;  %8532 = vmatprep.subr.bf16.mxu1 %v3815_v39  ;;  %v3813_v48 = vpack.c.bf16 %v3496_v1, %v3493_v12  ;;  %v3439_v18 = vadd.f32 %v12005_v53, %v8459_v7  ;;  %v4821_v53 = vpack.c.bf16 %v12114_v32, %v12119_v34 }
 0x5e5   : > { %8616 = vmatprep.mubr.bf16.mxu0 %v4600_v35  ;;  %8661 = vmatpush3.bf16.msra.mxu0 %v9743_v45  ;;  %v4823_v35 = vpack.c.bf16 %v12161_v59, %v12156_v33  ;;  %v4826_v32 = vpack.c.bf16 %v9747_v50, %v12218_v63  ;;  %v4827_v34 = vpack.c.bf16 %v12234_v23, %v12248_v56  ;;  %v12319_v13 = vpop.f32.mrf.mxu0 }
 0x5e6   : > { %8662 = vmatprep.subr.bf16.mxu0 %v9744_v19  ;;  %v12300_v24 = vpack.c.bf16 %v3439_v18, %v3436_v6 }
 0x5e7   : > { %8533 = vmatpush3.bf16.msra.mxu1 %v3815_v39  ;;  %v3812_v39 = vpack.c.bf16 %v3488_v54, %v3485_v5 }
 0x5e8   : > { %8534 = vmatprep.subr.bf16.mxu1 %v3814_v28 }
 0x5e9   : > { %8663 = vmatpush3.bf16.msra.mxu0 %v9744_v19 }
 0x5ea   : > { %8664 = vmatprep.subr.bf16.mxu0 %v9745_v36 }
 0x5eb   : > { %8535 = vmatpush3.bf16.msra.mxu1 %v3814_v28 }
 0x5ec   : > { %8617 = vmatmul.mubr.bf16.gmra.mxu0 %v4601_v8  ;;  %8536 = vmatprep.subr.bf16.mxu1 %v3813_v48 }
 0x5ed   : > { %8665 = vmatpush3.bf16.msra.mxu0 %v9745_v36  ;;  %8668 = vmatprep.mubr.bf16.mxu0 %v4820_v11 }
 0x5ee   : > { %8666 = vmatprep.subr.bf16.mxu0 %v9746_v3 }
 0x5ef   : > { %8537 = vmatpush3.bf16.msra.mxu1 %v3813_v48 }
 0x5f0   : > { %8538 = vmatprep.subr.bf16.mxu1 %v3812_v39 }
 0x5f1   : > { %8667 = vmatpush3.bf16.msra.mxu0 %v9746_v3 }
 0x5f3   : > { %8539 = vmatpush3.bf16.msra.mxu1 %v3812_v39 }
 0x5f4   : > { %8556 = vmatprep.subr.bf16.mxu1 %v12300_v24  ;;  %8669 = vmatmul.mubr.bf16.vlgmr.msra.gmra.mxu0 %v4821_v53 }
 0x5f5   : > { %8672 = vmatprep.mubr.bf16.mxu0 %v4822_v25 }
 0x5fc   : > { %8673 = vmatmul.mubr.bf16.gmra.mxu0 %v4823_v35 }
 0x5fd   : > { %8676 = vmatprep.mubr.bf16.mxu0 %v4824_v31 }
 0x604   : > { %8677 = vmatmul.mubr.bf16.gmra.mxu0 %v4825_v43 }
 0x605   : > { %8680 = vmatprep.mubr.bf16.mxu0 %v4826_v32 }
 0x60c   : > { %8681 = vmatmul.mubr.bf16.gmra.mxu0 %v4827_v34 }
 0x674   : > { %v12321_v17 = vpop.f32.mrf.mxu0 }
 0x676   : > { %v12323_v33 = vpop.f32.mrf.mxu0 }
 0x677   : > { %3660 = vmax.xlane.f32.xlu0 %v12323_v33  ;;  %3917 = vxpose.xlu1.b32.start [1/16] %v12323_v33, 128 }
 0x678   : > { %v12327_v27 = vpop.f32.mrf.mxu0 }
 0x67a   : > { %v12329_v59 = vpop.f32.mrf.mxu0 }
 0x67b   : > { %3662 = vmax.xlane.f32.xlu0 %v12329_v59  ;;  %3918 = vxpose.xlu1.b32.cont [2/16] %v12329_v59, 128 }
 0x67c   : > { %v12333_v63 = vpop.f32.mrf.mxu0 }
 0x67e   : > { %v12335_v46 = vpop.f32.mrf.mxu0 }
 0x67f   : > { %3664 = vmax.xlane.f32.xlu0 %v12321_v17  ;;  %3919 = vxpose.xlu1.b32.cont [3/16] %v12321_v17, 128 }
 0x680   : > { %v12339_v2 = vpop.f32.mrf.mxu0 }
 0x682   : > { %v12341_v38 = vpop.f32.mrf.mxu0 }
 0x683   : > { %3666 = vmax.xlane.f32.xlu0 %v12327_v27  ;;  %3920 = vxpose.xlu1.b32.cont [4/16] %v12327_v27, 128 }
 0x684   : > { %v12345_v23 = vpop.f32.mrf.mxu0 }
 0x686   : > { %v12347_v56 = vpop.f32.mrf.mxu0 }
 0x687   : > { %3668 = vmax.xlane.f32.xlu0 %v12335_v46  ;;  %3921 = vxpose.xlu1.b32.cont [5/16] %v12335_v46, 128 }
 0x688   : > { %v12351_v45 = vpop.f32.mrf.mxu0 }
 0x68a   : > { %v12353_v41 = vpop.f32.mrf.mxu0 }
 0x68b   : > { %3670 = vmax.xlane.f32.xlu0 %v12341_v38  ;;  %3922 = vxpose.xlu1.b32.cont [6/16] %v12341_v38, 128 }
 0x68c   : > { %v12357_v4 = vpop.f32.mrf.mxu0 }
 0x68e   : > { %v12359_v61 = vpop.f32.mrf.mxu0 }
 0x68f   : > { %3672 = vmax.xlane.f32.xlu0 %v12333_v63  ;;  %3923 = vxpose.xlu1.b32.cont [7/16] %v12333_v63, 128 }
 0x690   : > { %v12363_v12 = vpop.f32.mrf.mxu0 }
 0x692   : > { %v12365_v1 = vpop.f32.mrf.mxu0 }
 0x693   : > { %3674 = vmax.xlane.f32.xlu0 %v12339_v2  ;;  %3924 = vxpose.xlu1.b32.cont [8/16] %v12339_v2, 128 }
 0x694   : > { %v8606_v28 = vpop.f32.mrf.mxu0 }
 0x695   : > { %v4645_v8 = vadd.f32 %v12045_v9, %v8606_v28 }
 0x696   : > { %v4636_v19 = vpop.f32.mrf.mxu0 }
 0x697   : > { %3676 = vmax.xlane.f32.xlu0 %v12347_v56  ;;  %3925 = vxpose.xlu1.b32.cont [9/16] %v12347_v56, 128  ;;  %v4637_v48 = vadd.f32 %v12045_v9, %v4636_v19  ;;  %v12374_v7 = vmul.f32 0.088388346, %v4645_v8 }
 0x698   : > { %v8607_v5 = vpop.f32.mrf.mxu0 }
 0x699   : > { %v4648_v54 = vadd.f32 %v12045_v9, %v8607_v5  ;;  %v4699_v18 = vmul.f32 0.088388346, %v4637_v48 }
 0x69a   : > { %v4639_v36 = vpop.f32.mrf.mxu0 }
 0x69b   : > { %v12376_v39 = vmul.f32 0.088388346, %v4648_v54  ;;  %v4640_v6 = vadd.f32 %v12045_v9, %v4639_v36  ;;  %3678 = vmax.xlane.f32.xlu0 %v12353_v41  ;;  %3926 = vxpose.xlu1.b32.cont [10/16] %v12353_v41, 128 }
 0x69d   : > { %v4700_v11 = vmul.f32 0.088388346, %v4640_v6 }
 0x69f   : > { %v5030_v53 = vpack.c.bf16 %v4700_v11, %v4699_v18  ;;  %3680 = vmax.xlane.f32.xlu0 %v12345_v23  ;;  %3927 = vxpose.xlu1.b32.cont [11/16] %v12345_v23, 128 }
 0x6a1   : > { %8732 = vmatprep.mubr.bf16.mxu0 %v5030_v53 }
 0x6a3   : > { %3682 = vmax.xlane.f32.xlu0 %v12351_v45  ;;  %3928 = vxpose.xlu1.b32.cont [12/16] %v12351_v45, 128 }
 0x6a7   : > { %3684 = vmax.xlane.f32.xlu0 %v12359_v61  ;;  %3929 = vxpose.xlu1.b32.cont [13/16] %v12359_v61, 128 }
 0x6ab   : > { %3686 = vmax.xlane.f32.xlu0 %v12365_v1  ;;  %3930 = vxpose.xlu1.b32.cont [14/16] %v12365_v1, 128 }
 0x6af   : > { %3688 = vmax.xlane.f32.xlu0 %v12357_v4  ;;  %3931 = vxpose.xlu1.b32.cont [15/16] %v12357_v4, 128 }
 0x6b3   : > { %3690 = vmax.xlane.f32.xlu0 %v12363_v12  ;;  %3932 = vxpose.xlu1.b32.end [16/16] %v12363_v12, 128 }
 0x6f3   : > { %v12395_v9 = vpop.trf.xlu1 }
 0x6f4   : > { %3949 = vmax.xlane.f32.xlu0 %v12395_v9 }
 0x6f7   : > { %v12398_v25 = vpop.trf.xlu1 }
 0x6f8   : > { %3951 = vmax.xlane.f32.xlu0 %v12398_v25 }
 0x6fb   : > { %v12401_v35 = vpop.trf.xlu1 }
 0x6fc   : > { %3953 = vmax.xlane.f32.xlu0 %v12401_v35 }
 0x6ff   : > { %v12404_v31 = vpop.trf.xlu1 }
 0x700   : > { %v3661_v43 = vpop.xlane.xlu0 %3660  ;;  %3955 = vmax.xlane.f32.xlu0 %v12404_v31 }
 0x701   : > { %v3692_v42 = vsub.f32 %v12323_v33, %v3661_v43 }
 0x703   : > { %v12407_v50 = vpop.trf.xlu1  ;;  %v3708_v57 = vmul.f32 1.442695, %v3692_v42 }
 0x704   : > { %v3663_v32 = vpop.xlane.xlu0 %3662  ;;  %3957 = vmax.xlane.f32.xlu0 %v12407_v50 }
 0x705   : > { %v3693_v0 = vsub.f32 %v12329_v59, %v3663_v32 }
 0x707   : > { %v12410_v34 = vpop.trf.xlu1 }
 0x708   : > { %v3665_v28 = vpop.xlane.xlu0 %3664  ;;  %3959 = vmax.xlane.f32.xlu0 %v12410_v34 }
 0x709   : > { %v3694_v33 = vsub.f32 %v12321_v17, %v3665_v28 }
 0x70b   : > { %v12413_v19 = vpop.trf.xlu1 }
 0x70c   : > { %v3667_v8 = vpop.xlane.xlu0 %3666  ;;  %3961 = vmax.xlane.f32.xlu0 %v12413_v19 }
 0x70d   : > { %v3695_v59 = vsub.f32 %v12327_v27, %v3667_v8 }
 0x70f   : > { %v12416_v5 = vpop.trf.xlu1  ;;  %v3714_v17 = vmul.f32 1.442695, %v3695_v59 }
 0x710   : > { %v3669_v48 = vpop.xlane.xlu0 %3668  ;;  %3963 = vmax.xlane.f32.xlu0 %v12416_v5 }
 0x711   : > { %v3696_v32 = vsub.f32 %v12335_v46, %v3669_v48 }
 0x713   : > { %v12419_v54 = vpop.trf.xlu1  ;;  %v3716_v8 = vmul.f32 1.442695, %v3696_v32 }
 0x714   : > { %v3671_v36 = vpop.xlane.xlu0 %3670  ;;  %3965 = vmax.xlane.f32.xlu0 %v12419_v54 }
 0x717   : > { %v12422_v6 = vpop.trf.xlu1 }
 0x718   : > { %v3673_v18 = vpop.xlane.xlu0 %3672  ;;  %3967 = vmax.xlane.f32.xlu0 %v12422_v6 }
 0x719   : > { %v3698_v11 = vsub.f32 %v12333_v63, %v3673_v18 }
 0x71b   : > { %v3720_v53 = vmul.f32 1.442695, %v3698_v11  ;;  %v12426_v3 = vpop.trf.xlu1 }
 0x71c   : > { %v3675_v60 = vpop.xlane.xlu0 %3674  ;;  %3969 = vmax.xlane.f32.xlu0 %v12426_v3 }
 0x71d   : > { %9235 = vpow2.f32 %v3720_v53  ;;  %v3710_v53 = vmul.f32 1.442695, %v3693_v0  ;;  %v3699_v48 = vsub.f32 %v12339_v2, %v3675_v60 }
 0x71f   : > { %v12430_v16 = vpop.trf.xlu1  ;;  %v3722_v59 = vmul.f32 1.442695, %v3699_v48 }
 0x720   : > { %v3677_v15 = vpop.xlane.xlu0 %3676  ;;  %3971 = vmax.xlane.f32.xlu0 %v12430_v16 }
 0x721   : > { %v3700_v62 = vsub.f32 %v12347_v56, %v3677_v15 }
 0x723   : > { %v3724_v63 = vmul.f32 1.442695, %v3700_v62  ;;  %v12435_v18 = vpop.trf.xlu1  ;;  %v3712_v62 = vmul.f32 1.442695, %v3694_v33 }
 0x724   : > { %v3679_v11 = vpop.xlane.xlu0 %3678  ;;  %3973 = vmax.xlane.f32.xlu1 %v12435_v18 }
 0x725   : > { %9237 = vpow2.f32 %v3724_v63  ;;  %v3697_v63 = vsub.f32 %v12341_v38, %v3671_v36 }
 0x726   : > { %9239 = vpow2.f32 %v3708_v57 }
 0x727   : > { %v12439_v43 = vpop.trf.xlu1  ;;  %9241 = vpow2.f32 %v3710_v53  ;;  %v3718_v46 = vmul.f32 1.442695, %v3697_v63 }
 0x728   : > { %v3681_v37 = vpop.xlane.xlu0 %3680  ;;  %3975 = vmax.xlane.f32.xlu0 %v12439_v43 }
 0x729   : > { %v3702_v15 = vsub.f32 %v12345_v23, %v3681_v37 }
 0x72a   : > { %v12443_v42 = vpop.eup %9235 }
 0x72b   : > { %v3728_v56 = vmul.f32 1.442695, %v3702_v15  ;;  %3752 = vadd.xlane.f32.xlu1 %v12443_v42  ;;  %v12447_v57 = vpop.trf.xlu1 }
 0x72c   : > { %v3683_v0 = vpop.xlane.xlu0 %3682  ;;  %3977 = vmax.xlane.f32.xlu0 %v12447_v57 }
 0x72d   : > { %9243 = vpow2.f32 %v3728_v56  ;;  %v3701_v56 = vsub.f32 %v12353_v41, %v3679_v11  ;;  %v3703_v2 = vsub.f32 %v12351_v45, %v3683_v0 }
 0x72e   : > { %9245 = vpow2.f32 %v3712_v62 }
 0x72f   : > { %v12451_v37 = vpop.trf.xlu1  ;;  %9247 = vpow2.f32 %v3714_v17  ;;  %v3726_v60 = vmul.f32 1.442695, %v3701_v56  ;;  %v3730_v41 = vmul.f32 1.442695, %v3703_v2 }
 0x730   : > { %v3685_v23 = vpop.xlane.xlu0 %3684  ;;  %3979 = vmax.xlane.f32.xlu0 %v12451_v37 }
 0x731   : > { %v3704_v27 = vsub.f32 %v12359_v61, %v3685_v23 }
 0x732   : > { %v12455_v28 = vpop.eup %9237 }
 0x733   : > { %v12458_v53 = vpop.eup %9239  ;;  %v3732_v33 = vmul.f32 1.442695, %v3704_v27  ;;  %3756 = vadd.xlane.f32.xlu1 %v12455_v28 }
 0x734   : > { %v3687_v15 = vpop.xlane.xlu0 %3686  ;;  %3740 = vadd.xlane.f32.xlu0 %v12458_v53  ;;  %v12463_v61 = vpop.eup %9241 }
 0x735   : > { %9249 = vpow2.f32 %v3732_v33  ;;  %v3705_v11 = vsub.f32 %v12365_v1, %v3687_v15 }
 0x736   : > { %9251 = vpow2.f32 %v3716_v8 }
 0x737   : > { %9253 = vpow2.f32 %v3718_v46  ;;  %v3734_v63 = vmul.f32 1.442695, %v3705_v11 }
 0x738   : > { %v3689_v62 = vpop.xlane.xlu0 %3688  ;;  %3742 = vadd.xlane.f32.xlu0 %v12463_v61 }
 0x739   : > { %v3706_v38 = vsub.f32 %v12357_v4, %v3689_v62 }
 0x73a   : > { %v12467_v36 = vpop.eup %9243 }
 0x73b   : > { %v12470_v17 = vpop.eup %9245  ;;  %v3736_v32 = vmul.f32 1.442695, %v3706_v38  ;;  %3760 = vadd.xlane.f32.xlu1 %v12467_v36 }
 0x73c   : > { %3744 = vadd.xlane.f32.xlu0 %v12470_v17  ;;  %v12475_v23 = vpop.eup %9247  ;;  %v3691_v8 = vpop.xlane.xlu0 %3690 }
 0x73d   : > { %9255 = vpow2.f32 %v3736_v32  ;;  %v3707_v45 = vsub.f32 %v12363_v12, %v3691_v8 }
 0x73e   : > { %9257 = vpow2.f32 %v3722_v59 }
 0x73f   : > { %9259 = vpow2.f32 %v3726_v60  ;;  %v3738_v46 = vmul.f32 1.442695, %v3707_v45 }
 0x740   : > { %3746 = vadd.xlane.f32.xlu0 %v12475_v23  ;;  %9261 = vpow2.f32 %v3730_v41 }
 0x741   : > { %9263 = vpow2.f32 %v3734_v63 }
 0x742   : > { %v12478_v4 = vpop.eup %9249  ;;  %9265 = vpow2.f32 %v3738_v46 }
 0x743   : > { %v12481_v27 = vpop.eup %9251  ;;  %3764 = vadd.xlane.f32.xlu1 %v12478_v4 }
 0x744   : > { %3748 = vadd.xlane.f32.xlu0 %v12481_v27  ;;  %v12486_v0 = vpop.eup %9253 }
 0x748   : > { %3750 = vadd.xlane.f32.xlu0 %v12486_v0 }
 0x74a   : > { %v12489_v33 = vpop.eup %9255 }
 0x74b   : > { %v12491_v1 = vpop.eup %9257  ;;  %3768 = vadd.xlane.f32.xlu1 %v12489_v33 }
 0x74c   : > { %3754 = vadd.xlane.f32.xlu0 %v12491_v1  ;;  %v12495_v15 = vpop.eup %9259 }
 0x74d   : > { %v12498_v12 = vpop.eup %9261 }
 0x74e   : > { %v12501_v48 = vpop.eup %9263 }
 0x74f   : > { %v12504_v62 = vpop.eup %9265 }
 0x750   : > { %3758 = vadd.xlane.f32.xlu0 %v12495_v15 }
 0x754   : > { %3762 = vadd.xlane.f32.xlu0 %v12498_v12 }
 0x758   : > { %3766 = vadd.xlane.f32.xlu0 %v12501_v48 }
 0x75c   : > { %3770 = vadd.xlane.f32.xlu0 %v12504_v62 }
 0x77d   : > { %v3950_v38 = vpop.xlane.xlu0 %3949 }
 0x77e   : > { %v3981_v59 = vsub.f32 %v12395_v9, %v3950_v38 }
 0x780   : > { %v3997_v56 = vmul.f32 1.442695, %v3981_v59 }
 0x781   : > { %v3952_v32 = vpop.xlane.xlu0 %3951 }
 0x782   : > { %9267 = vpow2.f32 %v3997_v56  ;;  %v3982_v60 = vsub.f32 %v12398_v25, %v3952_v32 }
 0x784   : > { %v3999_v2 = vmul.f32 1.442695, %v3982_v60 }
 0x785   : > { %v3954_v41 = vpop.xlane.xlu0 %3953 }
 0x786   : > { %9269 = vpow2.f32 %v3999_v2  ;;  %v3983_v11 = vsub.f32 %v12401_v35, %v3954_v41 }
 0x788   : > { %v4001_v8 = vmul.f32 1.442695, %v3983_v11 }
 0x789   : > { %v3956_v63 = vpop.xlane.xlu0 %3955 }
 0x78a   : > { %9271 = vpow2.f32 %v4001_v8  ;;  %v3984_v45 = vsub.f32 %v12404_v31, %v3956_v63 }
 0x78c   : > { %v4003_v46 = vmul.f32 1.442695, %v3984_v45 }
 0x78d   : > { %v3958_v55 = vpop.xlane.xlu0 %3957 }
 0x78e   : > { %9273 = vpow2.f32 %v4003_v46  ;;  %v3985_v9 = vsub.f32 %v12407_v50, %v3958_v55 }
 0x78f   : > { %v12512_v38 = vpop.eup %9267 }
 0x790   : > { %v4005_v59 = vmul.f32 1.442695, %v3985_v9  ;;  %4029 = vadd.xlane.f32.xlu1 %v12512_v38 }
 0x791   : > { %v3960_v25 = vpop.xlane.xlu0 %3959 }
 0x792   : > { %9275 = vpow2.f32 %v4005_v59  ;;  %v3986_v56 = vsub.f32 %v12410_v34, %v3960_v25 }
 0x793   : > { %v12516_v35 = vpop.eup %9269 }
 0x794   : > { %v4007_v32 = vmul.f32 1.442695, %v3986_v56  ;;  %4031 = vadd.xlane.f32.xlu0 %v12516_v35 }
 0x795   : > { %v3962_v31 = vpop.xlane.xlu0 %3961 }
 0x796   : > { %9277 = vpow2.f32 %v4007_v32  ;;  %v3987_v60 = vsub.f32 %v12413_v19, %v3962_v31 }
 0x797   : > { %v12520_v2 = vpop.eup %9271 }
 0x798   : > { %v4009_v55 = vmul.f32 1.442695, %v3987_v60  ;;  %4033 = vadd.xlane.f32.xlu1 %v12520_v2 }
 0x799   : > { %v3964_v50 = vpop.xlane.xlu0 %3963 }
 0x79a   : > { %9279 = vpow2.f32 %v4009_v55  ;;  %v3988_v41 = vsub.f32 %v12416_v5, %v3964_v50 }
 0x79b   : > { %v12524_v11 = vpop.eup %9273 }
 0x79c   : > { %v4011_v34 = vmul.f32 1.442695, %v3988_v41  ;;  %4035 = vadd.xlane.f32.xlu0 %v12524_v11 }
 0x79d   : > { %v3966_v8 = vpop.xlane.xlu0 %3965 }
 0x79e   : > { %9281 = vpow2.f32 %v4011_v34  ;;  %v3989_v63 = vsub.f32 %v12419_v54, %v3966_v8 }
 0x79f   : > { %v12528_v45 = vpop.eup %9275 }
 0x7a0   : > { %v4013_v19 = vmul.f32 1.442695, %v3989_v63  ;;  %4037 = vadd.xlane.f32.xlu1 %v12528_v45 }
 0x7a1   : > { %v3968_v46 = vpop.xlane.xlu0 %3967 }
 0x7a2   : > { %9283 = vpow2.f32 %v4013_v19  ;;  %v3990_v9 = vsub.f32 %v12422_v6, %v3968_v46 }
 0x7a3   : > { %v12532_v59 = vpop.eup %9277 }
 0x7a4   : > { %v4015_v5 = vmul.f32 1.442695, %v3990_v9  ;;  %4039 = vadd.xlane.f32.xlu0 %v12532_v59 }
 0x7a5   : > { %v3970_v25 = vpop.xlane.xlu0 %3969 }
 0x7a6   : > { %9285 = vpow2.f32 %v4015_v5  ;;  %v3991_v56 = vsub.f32 %v12426_v3, %v3970_v25 }
 0x7a7   : > { %v12536_v32 = vpop.eup %9279 }
 0x7a8   : > { %v4017_v54 = vmul.f32 1.442695, %v3991_v56  ;;  %4041 = vadd.xlane.f32.xlu1 %v12536_v32 }
 0x7a9   : > { %v3972_v31 = vpop.xlane.xlu0 %3971 }
 0x7aa   : > { %9287 = vpow2.f32 %v4017_v54  ;;  %v3992_v60 = vsub.f32 %v12430_v16, %v3972_v31 }
 0x7ab   : > { %v12540_v55 = vpop.eup %9281 }
 0x7ac   : > { %v4019_v6 = vmul.f32 1.442695, %v3992_v60  ;;  %4043 = vadd.xlane.f32.xlu0 %v12540_v55 }
 0x7ad   : > { %v3974_v50 = vpop.xlane.xlu1 %3973 }
 0x7ae   : > { %9289 = vpow2.f32 %v4019_v6  ;;  %v3993_v41 = vsub.f32 %v12435_v18, %v3974_v50 }
 0x7af   : > { %v12544_v34 = vpop.eup %9283 }
 0x7b0   : > { %v4021_v3 = vmul.f32 1.442695, %v3993_v41  ;;  %4045 = vadd.xlane.f32.xlu1 %v12544_v34 }
 0x7b1   : > { %v3976_v8 = vpop.xlane.xlu0 %3975 }
 0x7b2   : > { %9291 = vpow2.f32 %v4021_v3  ;;  %v3994_v63 = vsub.f32 %v12439_v43, %v3976_v8 }
 0x7b3   : > { %v12548_v19 = vpop.eup %9285 }
 0x7b4   : > { %v4023_v16 = vmul.f32 1.442695, %v3994_v63  ;;  %4047 = vadd.xlane.f32.xlu0 %v12548_v19 }
 0x7b5   : > { %v3978_v46 = vpop.xlane.xlu0 %3977 }
 0x7b6   : > { %9293 = vpow2.f32 %v4023_v16  ;;  %v3995_v9 = vsub.f32 %v12447_v57, %v3978_v46 }
 0x7b7   : > { %v12552_v5 = vpop.eup %9287 }
 0x7b8   : > { %v4025_v18 = vmul.f32 1.442695, %v3995_v9  ;;  %4049 = vadd.xlane.f32.xlu1 %v12552_v5 }
 0x7b9   : > { %v3980_v25 = vpop.xlane.xlu0 %3979 }
 0x7ba   : > { %9295 = vpow2.f32 %v4025_v18  ;;  %v3996_v56 = vsub.f32 %v12451_v37, %v3980_v25  ;;  %v3753_v18 = vpop.xlane.xlu1 %3752 }
 0x7bb   : > { %v12556_v54 = vpop.eup %9289 }
 0x7bc   : > { %v4027_v43 = vmul.f32 1.442695, %v3996_v56  ;;  %4051 = vadd.xlane.f32.xlu0 %v12556_v54 }
 0x7bd   : > { %v3741_v31 = vpop.xlane.xlu0 %3740 }
 0x7be   : > { %9297 = vpow2.f32 %v4027_v43 }
 0x7bf   : > { %v12559_v60 = vpop.eup %9291  ;;  %9299 = vrcp.f32 %v3741_v31  ;;  %v3757_v31 = vpop.xlane.xlu1 %3756 }
 0x7c0   : > { %4053 = vadd.xlane.f32.xlu1 %v12559_v60 }
 0x7c1   : > { %v3743_v57 = vpop.xlane.xlu0 %3742 }
 0x7c2   : > { %9301 = vrcp.f32 %v3743_v57 }
 0x7c3   : > { %v12562_v6 = vpop.eup %9293 }
 0x7c4   : > { %4055 = vadd.xlane.f32.xlu0 %v12562_v6 }
 0x7c5   : > { %v3745_v50 = vpop.xlane.xlu0 %3744 }
 0x7c6   : > { %9303 = vrcp.f32 %v3745_v50 }
 0x7c7   : > { %v12565_v37 = vpop.eup %9295 }
 0x7c8   : > { %4057 = vadd.xlane.f32.xlu1 %v12565_v37 }
 0x7c9   : > { %v3747_v41 = vpop.xlane.xlu0 %3746 }
 0x7ca   : > { %9305 = vrcp.f32 %v3747_v41  ;;  %v12576_v41 = vld [vmem:[%s14553_s11] ss:$0 sm:$0xff] }
 0x7cb   : > { %v12568_v3 = vpop.eup %9297 }
 0x7cc   : > { %4059 = vadd.xlane.f32.xlu0 %v12568_v3  ;;  %v9300_v8 = vpop.eup %9299 }
 0x7cd   : > { %v3749_v63 = vpop.xlane.xlu0 %3748  ;;  %v3788_v46 = vmul.f32 %v9300_v8, %v12458_v53  ;;  %v3428_v53 = vadd.f32 %v12576_v41, %v12286_v44 }
 0x7ce   : > { %9307 = vrcp.f32 %v3749_v63 }
 0x7cf   : > { %v9302_v16 = vpop.eup %9301 }
 0x7d0   : > { %v3789_v9 = vmul.f32 %v9302_v16, %v12463_v61  ;;  %v3431_v61 = vadd.f32 %v12576_v41, %v12319_v13  ;;  %v3761_v16 = vpop.xlane.xlu1 %3760 }
 0x7d1   : > { %v3751_v25 = vpop.xlane.xlu0 %3750 }
 0x7d2   : > { %9309 = vrcp.f32 %v3751_v25  ;;  %v3804_v56 = vpack.c.bf16 %v3789_v9, %v3788_v46 }
 0x7d3   : > { %9311 = vrcp.f32 %v3753_v18  ;;  %v9304_v43 = vpop.eup %9303  ;;  %v4107_v18 = vpack.c.bf16 %v3431_v61, %v3428_v53 }
 0x7d4   : > { %8540 = vmatprep.mubr.bf16.mxu1 %v3804_v56  ;;  %v3790_v8 = vmul.f32 %v9304_v43, %v12470_v17  ;;  %v3765_v56 = vpop.xlane.xlu1 %3764  ;;  %v3412_v17 = vadd.f32 %v12576_v41, %v12024_v10 }
 0x7d5   : > { %v3755_v57 = vpop.xlane.xlu0 %3754 }
 0x7d6   : > { %9313 = vrcp.f32 %v3755_v57 }
 0x7d7   : > { %v9306_v50 = vpop.eup %9305  ;;  %9315 = vrcp.f32 %v3757_v31 }
 0x7d8   : > { %v3791_v63 = vmul.f32 %v9306_v50, %v12475_v23  ;;  %v3415_v23 = vadd.f32 %v12576_v41, %v12265_v30  ;;  %v3769_v50 = vpop.xlane.xlu1 %3768 }
 0x7d9   : > { %v3759_v46 = vpop.xlane.xlu0 %3758 }
 0x7da   : > { %9317 = vrcp.f32 %v3759_v46  ;;  %v3805_v9 = vpack.c.bf16 %v3791_v63, %v3790_v8  ;;  %v4105_v10 = vpack.c.bf16 %v3415_v23, %v3412_v17  ;;  %v12596_v63 = vld [vmem:[%s10160_s28 + $0x100] sm:$0xff] }
 0x7db   : > { %9319 = vrcp.f32 %v3761_v16  ;;  %v9308_v25 = vpop.eup %9307  ;;  %v12599_v16 = vld [vmem:[%s10160_s28 + $0x108] sm:$0xff] }
 0x7dc   : > { %8541 = vmatmul.mubr.bf16.vlgmr.msra.gmra.mxu1 %v3805_v9  ;;  %v3792_v43 = vmul.f32 %v9308_v25, %v12481_v27 }
 0x7dd   : > { %8557 = vmatpush3.bf16.msra.mxu1 %v12300_v24  ;;  %v3763_v44 = vpop.xlane.xlu0 %3762 }
 0x7de   : > { %8558 = vmatprep.subr.bf16.mxu1 %v4107_v18  ;;  %9321 = vrcp.f32 %v3763_v44  ;;  %v4488_v44 = vmul.f32 %v12596_v63, %v12596_v63 }
 0x7df   : > { %v9310_v13 = vpop.eup %9309  ;;  %9323 = vrcp.f32 %v3765_v56  ;;  %v4466_v56 = vadd.f32 %v12599_v16, %v12596_v63 }
 0x7e0   : > { %v3793_v31 = vmul.f32 %v9310_v13, %v12486_v0  ;;  %v9312_v57 = vpop.eup %9311  ;;  %v4489_v13 = vmul.f32 %v12599_v16, %v12599_v16 }
 0x7e1   : > { %8559 = vmatpush3.bf16.msra.mxu1 %v4107_v18  ;;  %v3767_v24 = vpop.xlane.xlu0 %3766  ;;  %v3794_v30 = vmul.f32 %v9312_v57, %v12443_v42  ;;  %v3396_v18 = vadd.f32 %v12576_v41, %v12014_v47  ;;  %v3399_v42 = vadd.f32 %v12576_v41, %v12020_v51  ;;  %v12614_v47 = vld [vmem:[%s10160_s28 + $0x110] sm:$0xff] }
 0x7e2   : > { %8560 = vmatprep.subr.bf16.mxu1 %v12030_v29  ;;  %9325 = vrcp.f32 %v3767_v24  ;;  %v3806_v53 = vpack.c.bf16 %v3793_v31, %v3792_v43  ;;  %v4467_v31 = vadd.f32 %v12614_v47, %v4466_v56  ;;  %v4490_v57 = vmul.f32 %v12614_v47, %v12614_v47  ;;  %v12624_v24 = vld [vmem:[%s10160_s28 + $0x118] sm:$0xff]  ;;  %v12652_v56 = vld [vmem:[%s10160_s28 + $0x130] sm:$0xff] }
 0x7e3   : > { %v9314_v61 = vpop.eup %9313  ;;  %9327 = vrcp.f32 %v3769_v50  ;;  %v4103_v17 = vpack.c.bf16 %v3399_v42, %v3396_v18  ;;  %v4504_v50 = vadd.f32 %v4489_v13, %v4488_v44  ;;  %v4494_v13 = vmul.f32 %v12652_v56, %v12652_v56 }
 0x7e4   : > { %8544 = vmatprep.mubr.bf16.mxu1 %v3806_v53  ;;  %v3795_v27 = vmul.f32 %v9314_v61, %v12491_v1  ;;  %v9316_v8 = vpop.eup %9315 }
 0x7e5   : > { %8561 = vmatpush3.bf16.msra.mxu1 %v12030_v29  ;;  %v3771_v0 = vpop.xlane.xlu0 %3770  ;;  %v3796_v1 = vmul.f32 %v9316_v8, %v12455_v28  ;;  %v4468_v8 = vadd.f32 %v12624_v24, %v4467_v31 }
 0x7e6   : > { %8562 = vmatprep.subr.bf16.mxu1 %v4105_v10  ;;  %9329 = vrcp.f32 %v3771_v0  ;;  %v3807_v46 = vpack.c.bf16 %v3795_v27, %v3794_v30  ;;  %v4505_v0 = vadd.f32 %v4504_v50, %v4490_v57 }
 0x7e7   : > { %v9318_v9 = vpop.eup %9317 }
 0x7e8   : > { %8545 = vmatmul.mubr.bf16.gmra.mxu1 %v3807_v46  ;;  %v3797_v29 = vmul.f32 %v9318_v9, %v12495_v15  ;;  %v9320_v25 = vpop.eup %9319  ;;  %v12636_v46 = vld [vmem:[%s10160_s28 + $0x120] sm:$0xff] }
 0x7e9   : > { %8563 = vmatpush3.bf16.msra.mxu1 %v4105_v10  ;;  %v3798_v15 = vmul.f32 %v9320_v25, %v12467_v36  ;;  %v3380_v36 = vadd.f32 %v12576_v41, %v11997_v22  ;;  %v4469_v9 = vadd.f32 %v12636_v46, %v4468_v8  ;;  %v4492_v18 = vmul.f32 %v12636_v46, %v12636_v46 }
 0x7ea   : > { %8564 = vmatprep.subr.bf16.mxu1 %v12022_v20  ;;  %v3808_v51 = vpack.c.bf16 %v3797_v29, %v3796_v1  ;;  %v12646_v1 = vld [vmem:[%s10160_s28 + $0x128] sm:$0xff] }
 0x7eb   : > { %v9322_v28 = vpop.eup %9321  ;;  %v4470_v25 = vadd.f32 %v12646_v1, %v4469_v9 }
 0x7ec   : > { %8548 = vmatprep.mubr.bf16.mxu1 %v3808_v51  ;;  %v3799_v23 = vmul.f32 %v9322_v28, %v12498_v12  ;;  %v9324_v43 = vpop.eup %9323  ;;  %v3383_v12 = vadd.f32 %v12576_v41, %v12010_v49  ;;  %v12664_v28 = vld [vmem:[%s10160_s28 + $0x138] sm:$0xff] }
 0x7ed   : > { %8565 = vmatpush3.bf16.msra.mxu1 %v12022_v20  ;;  %v3800_v10 = vmul.f32 %v9324_v43, %v12478_v4  ;;  %v4491_v20 = vmul.f32 %v12624_v24, %v12624_v24  ;;  %v4471_v44 = vadd.f32 %v12652_v56, %v4470_v25  ;;  %v12670_v43 = vld [vmem:[%s10160_s28 + $0x140] sm:$0xff] }
 0x7ee   : > { %8566 = vmatprep.subr.bf16.mxu1 %v4103_v17  ;;  %v3809_v53 = vpack.c.bf16 %v3799_v23, %v3798_v15  ;;  %v4101_v41 = vpack.c.bf16 %v3383_v12, %v3380_v36  ;;  %v4495_v15 = vmul.f32 %v12664_v28, %v12664_v28  ;;  %v4496_v57 = vmul.f32 %v12670_v43, %v12670_v43 }
 0x7ef   : > { %v9326_v61 = vpop.eup %9325  ;;  %v4506_v42 = vadd.f32 %v4505_v0, %v4491_v20  ;;  %v12688_v20 = vld [vmem:[%s10160_s28 + $0x158] sm:$0xff] }
 0x7f0   : > { %8549 = vmatmul.mubr.bf16.gmra.mxu1 %v3809_v53  ;;  %v3801_v30 = vmul.f32 %v9326_v61, %v12501_v48  ;;  %v9328_v27 = vpop.eup %9327  ;;  %v12676_v53 = vld [vmem:[%s10160_s28 + $0x148] sm:$0xff] }
 0x7f1   : > { %8567 = vmatpush3.bf16.msra.mxu1 %v4103_v17  ;;  %v3802_v4 = vmul.f32 %v9328_v27, %v12489_v33  ;;  %v4493_v33 = vmul.f32 %v12646_v1, %v12646_v1  ;;  %v4472_v17 = vadd.f32 %v12664_v28, %v4471_v44  ;;  %v4497_v36 = vmul.f32 %v12676_v53, %v12676_v53 }
 0x7f2   : > { %8568 = vmatprep.subr.bf16.mxu1 %v12012_v21  ;;  %v3810_v22 = vpack.c.bf16 %v3801_v30, %v3800_v10  ;;  %v12682_v10 = vld [vmem:[%s10160_s28 + $0x150] sm:$0xff] }
 0x7f3   : > { %v9330_v49 = vpop.eup %9329  ;;  %v4473_v31 = vadd.f32 %v12670_v43, %v4472_v17  ;;  %v4498_v27 = vmul.f32 %v12682_v10, %v12682_v10 }
 0x7f4   : > { %8552 = vmatprep.mubr.bf16.mxu1 %v3810_v22  ;;  %v3803_v48 = vmul.f32 %v9330_v49, %v12504_v62  ;;  %v4507_v62 = vadd.f32 %v4506_v42, %v4492_v18  ;;  %v4499_v22 = vmul.f32 %v12688_v20, %v12688_v20  ;;  %v12700_v18 = vld [vmem:[%s10160_s28 + $0x168] sm:$0xff] }
 0x7f5   : > { %8569 = vmatpush3.bf16.msra.mxu1 %v12012_v21  ;;  %v12657_v21 = vld [vmem:[%s14550_s8 + $0x38] sm:$0xff]   ;;  %v4474_v61 = vadd.f32 %v12676_v53, %v4473_v31 }
 0x7f6   : > { %8570 = vmatprep.subr.bf16.mxu1 %v4101_v41  ;;  %v3811_v29 = vpack.c.bf16 %v3803_v48, %v3802_v4  ;;  %v4508_v51 = vadd.f32 %v4507_v62, %v4493_v33  ;;  %v12706_v62 = vld [vmem:[%s10160_s28 + $0x170] sm:$0xff] }
 0x7f7   : > { %v4475_v30 = vadd.f32 %v12682_v10, %v4474_v61 }
 0x7f8   : > { %8553 = vmatmul.mubr.bf16.gmra.mxu1 %v3811_v29  ;;  %v4509_v23 = vadd.f32 %v4508_v51, %v4494_v13  ;;  %v4501_v29 = vmul.f32 %v12700_v18, %v12700_v18  ;;  %v4502_v13 = vmul.f32 %v12706_v62, %v12706_v62 }
 0x7f9   : > { %8571 = vmatpush3.bf16.msra.mxu1 %v4101_v41  ;;  %v4476_v0 = vadd.f32 %v12688_v20, %v4475_v30  ;;  %v12694_v41 = vld [vmem:[%s10160_s28 + $0x160] sm:$0xff] }
 0x7fa   : > { %8620 = vmatprep.subr.bf16.mxu1 %v12657_v21  ;;  %v4510_v50 = vadd.f32 %v4509_v23, %v4495_v15  ;;  %v4500_v48 = vmul.f32 %v12694_v41, %v12694_v41  ;;  %v12712_v15 = vld [vmem:[%s10160_s28 + $0x178] sm:$0xff] }
 0x7fb   : > { %v4477_v4 = vadd.f32 %v12694_v41, %v4476_v0  ;;  %v4503_v31 = vmul.f32 %v12712_v15, %v12712_v15 }
 0x7fc   : > { %v4511_v12 = vadd.f32 %v4510_v50, %v4496_v57 }
 0x7fd   : > { %v4478_v42 = vadd.f32 %v12700_v18, %v4477_v4 }
 0x7fe   : > { %v4512_v8 = vadd.f32 %v4511_v12, %v4497_v36 }
 0x7ff   : > { %v4479_v44 = vadd.f32 %v12706_v62, %v4478_v42 }
 0x800   : > { %v4513_v49 = vadd.f32 %v4512_v8, %v4498_v27 }
 0x801   : > { %v4480_v23 = vadd.f32 %v12712_v15, %v4479_v44 }
 0x802   : > { %v4514_v9 = vadd.f32 %v4513_v49, %v4499_v22 }
 0x803   : > { %v4481_v61 = vrot.slane %v4480_v23, 4 }
 0x804   : > { %v4515_v25 = vadd.f32 %v4514_v9, %v4500_v48 }
 0x805   : > { %v4482_v27 = vadd.f32 %v4481_v61, %v4480_v23 }
 0x806   : > { %v4516_v51 = vadd.f32 %v4515_v25, %v4501_v29 }
 0x807   : > { %v4483_v48 = vrot.slane %v4482_v27, 2 }
 0x808   : > { %v4517_v57 = vadd.f32 %v4516_v51, %v4502_v13 }
 0x80a   : > { %v4518_v36 = vadd.f32 %v4517_v57, %v4503_v31 }
 0x80c   : > { %v4519_v8 = vrot.slane %v4518_v36, 4 }
 0x80e   : > { %v4520_v9 = vadd.f32 %v4519_v8, %v4518_v36 }
 0x810   : > { %v4521_v44 = vrot.slane %v4520_v9, 2 }
 0x819   : > { %v4030_v33 = vpop.xlane.xlu1 %4029 }
 0x81a   : > { %9331 = vrcp.f32 %v4030_v33  ;;  %v4484_v33 = vadd.f32 %v4483_v48, %v4482_v27 }
 0x81c   : > { %v4485_v31 = vrot.slane %v4484_v33, 1 }
 0x81d   : > { %v4032_v17 = vpop.xlane.xlu0 %4031 }
 0x81e   : > { %9333 = vrcp.f32 %v4032_v17  ;;  %v4486_v61 = vadd.f32 %v4485_v31, %v4484_v33 }
 0x820   : > { %v12727_v8 = vmul.f32 0.0078125, %v4486_v61  ;;  %v9755_v61 = vld [vmem:[%s14550_s8 + $0x8] sm:$0xff]  }
 0x821   : > { %v4034_v50 = vpop.xlane.xlu1 %4033 }
 0x822   : > { %9335 = vrcp.f32 %v4034_v50 }
 0x825   : > { %v4036_v12 = vpop.xlane.xlu0 %4035 }
 0x826   : > { %9337 = vrcp.f32 %v4036_v12 }
 0x827   : > { %v9332_v30 = vpop.eup %9331 }
 0x828   : > { %v4077_v49 = vmul.f32 %v9332_v30, %v12512_v38  ;;  %v4522_v38 = vadd.f32 %v4521_v44, %v4520_v9  ;;  %v9750_v30 = vld [vmem:[%s14550_s8 + $0x30] sm:$0xff]  }
 0x829   : > { %v4038_v0 = vpop.xlane.xlu1 %4037 }
 0x82a   : > { %9339 = vrcp.f32 %v4038_v0  ;;  %v4523_v36 = vrot.slane %v4522_v38, 1 }
 0x82b   : > { %v9334_v22 = vpop.eup %9333 }
 0x82c   : > { %v4078_v4 = vmul.f32 %v9334_v22, %v12516_v35  ;;  %v4524_v0 = vadd.f32 %v4523_v36, %v4522_v38 }
 0x82d   : > { %v4040_v42 = vpop.xlane.xlu0 %4039 }
 0x82e   : > { %9341 = vrcp.f32 %v4040_v42  ;;  %v4093_v29 = vpack.c.bf16 %v4078_v4, %v4077_v49  ;;  %v4525_v48 = vmul.f32 0.0078125, %v4524_v0  ;;  %v9757_v0 = vld [vmem:[%s14554_s12 + $0x38] sm:$0xff]  }
 0x82f   : > { %v9336_v25 = vpop.eup %9335 }
 0x830   : > { %8572 = vmatprep.mubr.bf16.mxu1 %v4093_v29  ;;  %v4079_v17 = vmul.f32 %v9336_v25, %v12520_v2 }
 0x831   : > { %v4042_v13 = vpop.xlane.xlu1 %4041 }
 0x832   : > { %9343 = vrcp.f32 %v4042_v13 }
 0x833   : > { %v9338_v51 = vpop.eup %9337 }
 0x834   : > { %v4080_v23 = vmul.f32 %v9338_v51, %v12524_v11  ;;  %v9753_v51 = vld [vmem:[%s14550_s8 + $0x18] sm:$0xff]  }
 0x835   : > { %v4044_v57 = vpop.xlane.xlu0 %4043 }
 0x836   : > { %9345 = vrcp.f32 %v4044_v57  ;;  %v4094_v35 = vpack.c.bf16 %v4080_v23, %v4079_v17 }
 0x837   : > { %v9340_v50 = vpop.eup %9339 }
 0x838   : > { %8573 = vmatmul.mubr.bf16.vlgmr.msra.gmra.mxu1 %v4094_v35  ;;  %v4081_v11 = vmul.f32 %v9340_v50, %v12528_v45  ;;  %v4526_v45 = vmul.f32 %v12727_v8, %v12727_v8 }
 0x839   : > { %v4046_v12 = vpop.xlane.xlu1 %4045  ;;  %8621 = vmatpush3.bf16.msra.mxu1 %v12657_v21  ;;  %v9751_v21 = vld [vmem:[%s14550_s8 + $0x28] sm:$0xff]  }
 0x83a   : > { %8622 = vmatprep.subr.bf16.mxu1 %v9750_v30  ;;  %9347 = vrcp.f32 %v4046_v12  ;;  %v4527_v33 = vsub.f32 %v4525_v48, %v4526_v45 }
 0x83b   : > { %v9342_v2 = vpop.eup %9341 }
 0x83c   : > { %v4082_v27 = vmul.f32 %v9342_v2, %v12532_v59  ;;  %v9752_v59 = vld [vmem:[%s14550_s8 + $0x20] sm:$0xff]   ;;  %v4544_v23 = vadd.f32 1e-05, %v4527_v33 }
 0x83d   : > { %v4048_v22 = vpop.xlane.xlu0 %4047  ;;  %8623 = vmatpush3.bf16.msra.mxu1 %v9750_v30 }
 0x83e   : > { %9349 = vrcp.f32 %v4048_v22  ;;  %v4095_v49 = vpack.c.bf16 %v4082_v27, %v4081_v11  ;;  %8624 = vmatprep.subr.bf16.mxu1 %v9751_v21 }
 0x83f   : > { %v9344_v4 = vpop.eup %9343 }
 0x840   : > { %8576 = vmatprep.mubr.bf16.mxu1 %v4095_v49  ;;  %v4083_v29 = vmul.f32 %v9344_v4, %v12536_v32  ;;  %v9754_v32 = vld [vmem:[%s14550_s8 + $0x10] sm:$0xff]   ;;  %v4528_v49 = vsub.f32 %v12596_v63, %v12727_v8 }
 0x841   : > { %v4050_v9 = vpop.xlane.xlu1 %4049  ;;  %8625 = vmatpush3.bf16.msra.mxu1 %v9751_v21  ;;  %v4529_v21 = vsub.f32 %v12599_v16, %v12727_v8 }
 0x842   : > { %8626 = vmatprep.subr.bf16.mxu1 %v9752_v59  ;;  %9351 = vrcp.f32 %v4050_v9 }
 0x843   : > { %v9346_v42 = vpop.eup %9345 }
 0x844   : > { %v4084_v25 = vmul.f32 %v9346_v42, %v12540_v55  ;;  %v4530_v42 = vsub.f32 %v12614_v47, %v12727_v8 }
 0x845   : > { %v4052_v44 = vpop.xlane.xlu0 %4051  ;;  %8627 = vmatpush3.bf16.msra.mxu1 %v9752_v59 }
 0x846   : > { %9353 = vrcp.f32 %v4052_v44  ;;  %v4096_v13 = vpack.c.bf16 %v4084_v25, %v4083_v29  ;;  %8628 = vmatprep.subr.bf16.mxu1 %v9753_v51  ;;  %v4531_v29 = vsub.f32 %v12624_v24, %v12727_v8 }
 0x847   : > { %v9348_v17 = vpop.eup %9347 }
 0x848   : > { %8577 = vmatmul.mubr.bf16.gmra.mxu1 %v4096_v13  ;;  %v4085_v38 = vmul.f32 %v9348_v17, %v12544_v34  ;;  %v9756_v34 = vld [vmem:[%s14550_s8] sm:$0xff]  }
 0x849   : > { %v4054_v31 = vpop.xlane.xlu1 %4053  ;;  %8629 = vmatpush3.bf16.msra.mxu1 %v9753_v51  ;;  %v14869_v17 = vld [vmem:[#allocation6_spill] sm:$0xff] }
 0x84a   : > { %8630 = vmatprep.subr.bf16.mxu1 %v9754_v32  ;;  %9355 = vrcp.f32 %v4054_v31 }
 0x84b   : > { %v9350_v55 = vpop.eup %9349  ;;  %9357 = vrsqrt.f32 %v4544_v23 }
 0x84c   : > { %v4086_v57 = vmul.f32 %v9350_v55, %v12548_v19 }
 0x84d   : > { %v4056_v35 = vpop.xlane.xlu0 %4055  ;;  %8631 = vmatpush3.bf16.msra.mxu1 %v9754_v32 }
 0x84e   : > { %9359 = vrcp.f32 %v4056_v35  ;;  %v4097_v50 = vpack.c.bf16 %v4086_v57, %v4085_v38  ;;  %8632 = vmatprep.subr.bf16.mxu1 %v9755_v61 }
 0x84f   : > { %v9352_v36 = vpop.eup %9351 }
 0x850   : > { %8580 = vmatprep.mubr.bf16.mxu1 %v4097_v50  ;;  %v4087_v30 = vmul.f32 %v9352_v36, %v12552_v5  ;;  %v14870_v36 = vld [vmem:[#allocation2_spill] sm:$0xff] }
 0x851   : > { %v4058_v12 = vpop.xlane.xlu1 %4057  ;;  %8633 = vmatpush3.bf16.msra.mxu1 %v9755_v61 }
 0x852   : > { %8634 = vmatprep.subr.bf16.mxu1 %v9756_v34  ;;  %9361 = vrcp.f32 %v4058_v12 }
 0x853   : > { %v9354_v19 = vpop.eup %9353 }
 0x854   : > { %v4088_v2 = vmul.f32 %v9354_v19, %v12556_v54 }
 0x855   : > { %v4060_v11 = vpop.xlane.xlu0 %4059  ;;  %8635 = vmatpush3.bf16.msra.mxu1 %v9756_v34  ;;  %v14871_v34 = vld [vmem:[#allocation4_spill] sm:$0xff] }
 0x856   : > { %9363 = vrcp.f32 %v4060_v11  ;;  %v4098_v27 = vpack.c.bf16 %v4088_v2, %v4087_v30  ;;  %8684 = vmatprep.subr.bf16.mxu1 %v9757_v0  ;;  %v4535_v30 = vsub.f32 %v12664_v28, %v12727_v8  ;;  %v4534_v2 = vsub.f32 %v12652_v56, %v12727_v8  ;;  %v14873_v11 = vld [vmem:[#allocation10_spill] sm:$0xff] }
 0x857   : > { %v9356_v22 = vpop.eup %9355 }
 0x858   : > { %8581 = vmatmul.mubr.bf16.gmra.mxu1 %v4098_v27  ;;  %v12762_v5 = vpop.eup %9357  ;;  %v4089_v4 = vmul.f32 %v9356_v22, %v12559_v60  ;;  %v4532_v60 = vsub.f32 %v12636_v46, %v12727_v8  ;;  %v4536_v22 = vsub.f32 %v12670_v43, %v12727_v8 }
 0x859   : > { %v4546_v45 = vmul.f32 %v12762_v5, %v4528_v49  ;;  %v4547_v9 = vmul.f32 %v12762_v5, %v4529_v21  ;;  %v4548_v31 = vmul.f32 %v12762_v5, %v4530_v42  ;;  %v4549_v32 = vmul.f32 %v12762_v5, %v4531_v29  ;;  %v14874_v21 = vld [vmem:[#allocation8_spill] sm:$0xff] }
 0x85a   : > { %v4550_v57 = vmul.f32 %v12762_v5, %v4532_v60  ;;  %v4537_v49 = vsub.f32 %v12676_v53, %v12727_v8  ;;  %v4553_v29 = vmul.f32 %v12762_v5, %v4535_v30 }
 0x85b   : > { %v9360_v54 = vpop.eup %9359  ;;  %v4562_v33 = vmul.f32 %v4546_v45, %v14805_v58  ;;  %v4563_v44 = vmul.f32 %v4547_v9, %v14806_v26  ;;  %v4564_v12 = vmul.f32 %v4548_v31, %v14870_v36  ;;  %v4565_v19 = vmul.f32 %v4549_v32, %v14871_v34  ;;  %v14876_v45 = vld [vmem:[#allocation15_spill] sm:$0xff]  ;;  %v14879_v31 = vld [vmem:[#allocation13_spill] sm:$0xff] }
 0x85c   : > { %v4090_v48 = vmul.f32 %v9360_v54, %v12562_v6  ;;  %v4533_v6 = vsub.f32 %v12646_v1, %v12727_v8  ;;  %v14918_v36 = vld [vmem:[#allocation61_spill] sm:$0xff] }
 0x85d   : > { %v4578_v51 = vadd.f32 %v4562_v33, %v14807_v14  ;;  %v4579_v23 = vadd.f32 %v4563_v44, %v14869_v17  ;;  %v4581_v54 = vadd.f32 %v4565_v19, %v14874_v21  ;;  %v4554_v33 = vmul.f32 %v12762_v5, %v4536_v22  ;;  %v14882_v19 = vld [vmem:[#allocation16_spill] sm:$0xff]  ;;  %v13259_v14 = vld [vmem:[%s10385_s1 + $0x1e0] sm:$0xff] }
 0x85e   : > { %v4099_v59 = vpack.c.bf16 %v4090_v48, %v4089_v4  ;;  %v4551_v35 = vmul.f32 %v12762_v5, %v4533_v6  ;;  %v14875_v4 = vld [vmem:[#allocation9_spill] sm:$0xff]  ;;  %v4555_v44 = vmul.f32 %v12762_v5, %v4537_v49  ;;  %v4539_v6 = vsub.f32 %v12688_v20, %v12727_v8  ;;  %v14884_v22 = vld [vmem:[#allocation24_spill] sm:$0xff] }
 0x85f   : > { %v9362_v25 = vpop.eup %9361  ;;  %v4715_v61 = vpack.c.bf16 %v4579_v23, %v4578_v51  ;;  %v4580_v48 = vadd.f32 %v4564_v12, %v14875_v4  ;;  %v14878_v51 = vld [vmem:[#allocation12_spill] sm:$0xff]  ;;  %v4541_v12 = vsub.f32 %v12700_v18, %v12727_v8  ;;  %v14914_v4 = vld [vmem:[#allocation53_spill] sm:$0xff] }
 0x860   : > { %8584 = vmatprep.mubr.bf16.mxu1 %v4099_v59  ;;  %v4091_v55 = vmul.f32 %v9362_v25, %v12565_v37  ;;  %v14872_v37 = vld [vmem:[#allocation11_spill] sm:$0xff]  ;;  %v4567_v27 = vmul.f32 %v4551_v35, %v14873_v11  ;;  %v14877_v59 = vld [vmem:[#allocation14_spill] sm:$0xff]  ;;  %v4552_v25 = vmul.f32 %v12762_v5, %v4534_v2  ;;  %v4569_v23 = vmul.f32 %v4553_v29, %v14878_v51  ;;  %v14883_v2 = vld [vmem:[#allocation17_spill] sm:$0xff] }
 0x861   : > { %v4716_v60 = vpack.c.bf16 %v4581_v54, %v4580_v48  ;;  %v14885_v54 = vld [vmem:[#allocation23_spill] sm:$0xff]  ;;  %v13236_v11 = vld [vmem:[%s14555_s13] ss:$0 sm:$0xff] }
 0x862   : > { %v4583_v42 = vadd.f32 %v4567_v27, %v14877_v59  ;;  %v4568_v32 = vmul.f32 %v4552_v25, %v14879_v31  ;;  %v4585_v30 = vadd.f32 %v4569_v23, %v14882_v19  ;;  %v9758_v27 = vld [vmem:[%s14554_s12 + $0x30] sm:$0xff]   ;;  %v14887_v23 = vld [vmem:[#allocation21_spill] sm:$0xff]  ;;  %v14908_v31 = vld [vmem:[#allocation50_spill] sm:$0xff] }
 0x863   : > { %v9364_v13 = vpop.eup %9363  ;;  %v13211_v59 = vld [vmem:[%s10385_s1 + $0x1c0] sm:$0xff] }
 0x864   : > { %v4092_v38 = vmul.f32 %v9364_v13, %v12568_v3  ;;  %v4566_v3 = vmul.f32 %v4550_v57, %v14872_v37  ;;  %v14880_v57 = vld [vmem:[#allocation19_spill] sm:$0xff]  ;;  %v14917_v37 = vld [vmem:[#allocation62_spill] sm:$0xff] }
 0x865   : > { %v4570_v35 = vmul.f32 %v4554_v33, %v14880_v57  ;;  %v9759_v33 = vld [vmem:[%s14554_s12 + $0x28] sm:$0xff]  }
 0x866   : > { %v4100_v50 = vpack.c.bf16 %v4092_v38, %v4091_v55  ;;  %v4582_v9 = vadd.f32 %v4566_v3, %v14876_v45  ;;  %v4538_v55 = vsub.f32 %v12682_v10, %v12727_v8  ;;  %v4540_v38 = vsub.f32 %v12694_v41, %v12727_v8 }
 0x867   : > { %v4584_v3 = vadd.f32 %v4568_v32, %v14883_v2  ;;  %v4586_v49 = vadd.f32 %v4570_v35, %v14884_v22 }
 0x868   : > { %8585 = vmatmul.mubr.bf16.gmra.mxu1 %v4100_v50  ;;  %v4717_v13 = vpack.c.bf16 %v4583_v42, %v4582_v9  ;;  %v14881_v50 = vld [vmem:[#allocation18_spill] sm:$0xff]  ;;  %v4557_v9 = vmul.f32 %v12762_v5, %v4539_v6  ;;  %v4556_v42 = vmul.f32 %v12762_v5, %v4538_v55  ;;  %v4558_v29 = vmul.f32 %v12762_v5, %v4540_v38  ;;  %v14888_v38 = vld [vmem:[#allocation31_spill] sm:$0xff] }
 0x869   : > { %8636 = vmatprep.mubr.bf16.mxu1 %v4715_v61  ;;  %v4571_v61 = vmul.f32 %v4555_v44, %v14881_v50  ;;  %v4718_v25 = vpack.c.bf16 %v4585_v30, %v4584_v3  ;;  %v4543_v6 = vsub.f32 %v12712_v15, %v12727_v8  ;;  %v4542_v55 = vsub.f32 %v12706_v62, %v12727_v8  ;;  %v14890_v30 = vld [vmem:[#allocation26_spill] sm:$0xff]  ;;  %v14907_v50 = vld [vmem:[#allocation51_spill] sm:$0xff] }
 0x86a   : > { %v4572_v32 = vmul.f32 %v4556_v42, %v14887_v23  ;;  %v4574_v35 = vmul.f32 %v4558_v29, %v14888_v38  ;;  %v14893_v23 = vld [vmem:[#allocation36_spill] sm:$0xff] }
 0x86b   : > { %v4587_v48 = vadd.f32 %v4571_v61, %v14885_v54  ;;  %v14889_v61 = vld [vmem:[#allocation30_spill] sm:$0xff]  ;;  %v4560_v29 = vmul.f32 %v12762_v5, %v4542_v55 }
 0x86d   : > { %v4719_v44 = vpack.c.bf16 %v4587_v48, %v4586_v49  ;;  %v9760_v48 = vld [vmem:[%s14554_s12 + $0x20] sm:$0xff]  }
 0x870   : > { %8637 = vmatmul.mubr.bf16.vlgmr.msra.gmra.mxu1 %v4716_v60  ;;  %v14886_v60 = vld [vmem:[#allocation20_spill] sm:$0xff] }
 0x871   : > { %8640 = vmatprep.mubr.bf16.mxu1 %v4717_v13  ;;  %8685 = vmatpush3.bf16.msra.mxu1 %v9757_v0  ;;  %v4559_v0 = vmul.f32 %v12762_v5, %v4541_v12  ;;  %v4573_v13 = vmul.f32 %v4557_v9, %v14886_v60  ;;  %v14892_v9 = vld [vmem:[#allocation37_spill] sm:$0xff] }
 0x872   : > { %8686 = vmatprep.subr.bf16.mxu1 %v9758_v27  ;;  %v4590_v42 = vadd.f32 %v4574_v35, %v14892_v9  ;;  %v14896_v35 = vld [vmem:[#allocation39_spill] sm:$0xff] }
 0x873   : > { %v4575_v12 = vmul.f32 %v4559_v0, %v14889_v61  ;;  %v4589_v3 = vadd.f32 %v4573_v13, %v14890_v30  ;;  %v14894_v13 = vld [vmem:[#allocation33_spill] sm:$0xff] }
 0x875   : > { %8687 = vmatpush3.bf16.msra.mxu1 %v9758_v27  ;;  %v14891_v27 = vld [vmem:[#allocation27_spill] sm:$0xff]  ;;  %v4591_v8 = vadd.f32 %v4575_v12, %v14893_v23 }
 0x876   : > { %8688 = vmatprep.subr.bf16.mxu1 %v9759_v33  ;;  %v4588_v49 = vadd.f32 %v4572_v32, %v14891_v27  ;;  %v14895_v27 = vld [vmem:[#allocation34_spill] sm:$0xff] }
 0x877   : > { %v4576_v30 = vmul.f32 %v4560_v29, %v14895_v27 }
 0x878   : > { %8641 = vmatmul.mubr.bf16.gmra.mxu1 %v4718_v25  ;;  %v4561_v25 = vmul.f32 %v12762_v5, %v4543_v6  ;;  %v4720_v0 = vpack.c.bf16 %v4589_v3, %v4588_v49  ;;  %v14897_v6 = vld [vmem:[#allocation40_spill] sm:$0xff]  ;;  %v9763_v3 = vld [vmem:[%s14554_s12 + $0x8] sm:$0xff]  }
 0x879   : > { %8644 = vmatprep.mubr.bf16.mxu1 %v4719_v44  ;;  %8689 = vmatpush3.bf16.msra.mxu1 %v9759_v33  ;;  %v9761_v33 = vld [vmem:[%s14554_s12 + $0x18] sm:$0xff]   ;;  %v4721_v44 = vpack.c.bf16 %v4591_v8, %v4590_v42  ;;  %v4592_v23 = vadd.f32 %v4576_v30, %v14897_v6  ;;  %v9762_v5 = vld [vmem:[%s14554_s12 + $0x10] sm:$0xff]   ;;  %v9764_v30 = vld [vmem:[%s14554_s12] sm:$0xff]  }
 0x87a   : > { %8690 = vmatprep.subr.bf16.mxu1 %v9760_v48  ;;  %v4577_v32 = vmul.f32 %v4561_v25, %v14894_v13  ;;  %v9766_v8 = vld [vmem:[%s10385_s1 + $0x90] sm:$0xff] }
 0x87c   : > { %v4593_v12 = vadd.f32 %v4577_v32, %v14896_v35 }
 0x87d   : > { %8691 = vmatpush3.bf16.msra.mxu1 %v9760_v48 }
 0x87e   : > { %8692 = vmatprep.subr.bf16.mxu1 %v9761_v33  ;;  %v4722_v55 = vpack.c.bf16 %v4593_v12, %v4592_v23  ;;  %v12868_v23 = vld [vmem:[%s14556_s14] ss:$0 sm:$0xff] }
 0x880   : > { %8645 = vmatmul.mubr.bf16.gmra.mxu1 %v4720_v0 }
 0x881   : > { %8648 = vmatprep.mubr.bf16.mxu1 %v4721_v44  ;;  %8693 = vmatpush3.bf16.msra.mxu1 %v9761_v33  ;;  %v9767_v33 = vld [vmem:[%s10385_s1 + $0x80] sm:$0xff] }
 0x882   : > { %8694 = vmatprep.subr.bf16.mxu1 %v9762_v5 }
 0x885   : > { %8695 = vmatpush3.bf16.msra.mxu1 %v9762_v5  ;;  %v9768_v5 = vld [vmem:[%s10385_s1 + $0x98] sm:$0xff] }
 0x886   : > { %8696 = vmatprep.subr.bf16.mxu1 %v9763_v3 }
 0x888   : > { %8649 = vmatmul.mubr.bf16.gmra.mxu1 %v4722_v55 }
 0x889   : > { %8697 = vmatpush3.bf16.msra.mxu1 %v9763_v3 }
 0x88a   : > { %8698 = vmatprep.subr.bf16.mxu1 %v9764_v30 }
 0x88d   : > { %8699 = vmatpush3.bf16.msra.mxu1 %v9764_v30  ;;  %v9769_v30 = vld [vmem:[%s10385_s1 + $0x88] sm:$0xff] }
 0x89c   : > { %v8542_v49 = vpop.f32.mrf.mxu1 }
 0x89d   : > { %v4208_v48 = vmul.f32 %v12868_v23, %v8542_v49 }
 0x89e   : > { %v3854_v42 = vpop.f32.mrf.mxu1 }
 0x89f   : > { %v4224_v25 = vadd.f32 %v9766_v8, %v4208_v48  ;;  %v4206_v29 = vmul.f32 %v12868_v23, %v3854_v42 }
 0x8a0   : > { %v8543_v0 = vpop.f32.mrf.mxu1 }
 0x8a1   : > { %7528 = vst [vmem:[%s11836_s22 + $0x90] sm:$0xff] %v4224_v25  ;;  %v4222_v44 = vadd.f32 %v9767_v33, %v4206_v29  ;;  %v4209_v32 = vmul.f32 %v12868_v23, %v8543_v0  ;;  %v9770_v25 = vld [vmem:[%s10385_s1 + $0xb0] sm:$0xff] }
 0x8a2   : > { %v3857_v12 = vpop.f32.mrf.mxu1 }
 0x8a3   : > { %7526 = vst [vmem:[%s11836_s22 + $0x80] sm:$0xff] %v4222_v44  ;;  %v4225_v55 = vadd.f32 %v9768_v5, %v4209_v32  ;;  %v4207_v3 = vmul.f32 %v12868_v23, %v3857_v12  ;;  %v9771_v44 = vld [vmem:[%s10385_s1 + $0xa0] sm:$0xff] }
 0x8a5   : > { %7529 = vst [vmem:[%s11836_s22 + $0x98] sm:$0xff] %v4225_v55  ;;  %v4223_v49 = vadd.f32 %v9769_v30, %v4207_v3  ;;  %v9772_v55 = vld [vmem:[%s10385_s1 + $0xb8] sm:$0xff] }
 0x8a7   : > { %7527 = vst [vmem:[%s11836_s22 + $0x88] sm:$0xff] %v4223_v49 }
 0x8a8   : > { %v8546_v48 = vpop.f32.mrf.mxu1 }
 0x8a9   : > { %v4212_v42 = vmul.f32 %v12868_v23, %v8546_v48  ;;  %v9773_v48 = vld [vmem:[%s10385_s1 + $0xa8] sm:$0xff] }
 0x8aa   : > { %v3870_v8 = vpop.f32.mrf.mxu1 }
 0x8ab   : > { %v4228_v29 = vadd.f32 %v9770_v25, %v4212_v42  ;;  %v4210_v0 = vmul.f32 %v12868_v23, %v3870_v8 }
 0x8ac   : > { %v8547_v33 = vpop.f32.mrf.mxu1 }
 0x8ad   : > { %7532 = vst [vmem:[%s11836_s22 + $0xb0] sm:$0xff] %v4228_v29  ;;  %v4226_v32 = vadd.f32 %v9771_v44, %v4210_v0  ;;  %v4213_v12 = vmul.f32 %v12868_v23, %v8547_v33  ;;  %v9774_v29 = vld [vmem:[%s10385_s1 + $0xd0] sm:$0xff] }
 0x8ae   : > { %v3873_v5 = vpop.f32.mrf.mxu1 }
 0x8af   : > { %7530 = vst [vmem:[%s11836_s22 + $0xa0] sm:$0xff] %v4226_v32  ;;  %v4229_v3 = vadd.f32 %v9772_v55, %v4213_v12  ;;  %v4211_v30 = vmul.f32 %v12868_v23, %v3873_v5  ;;  %v9775_v32 = vld [vmem:[%s10385_s1 + $0xc0] sm:$0xff] }
 0x8b0   : > { %v8550_v49 = vpop.f32.mrf.mxu1 }
 0x8b1   : > { %7533 = vst [vmem:[%s11836_s22 + $0xb8] sm:$0xff] %v4229_v3  ;;  %v4227_v42 = vadd.f32 %v9773_v48, %v4211_v30  ;;  %v4216_v8 = vmul.f32 %v12868_v23, %v8550_v49  ;;  %v9776_v3 = vld [vmem:[%s10385_s1 + $0xd8] sm:$0xff] }
 0x8b2   : > { %v3886_v25 = vpop.f32.mrf.mxu1 }
 0x8b3   : > { %7531 = vst [vmem:[%s11836_s22 + $0xa8] sm:$0xff] %v4227_v42  ;;  %v4232_v0 = vadd.f32 %v9774_v29, %v4216_v8  ;;  %v4214_v33 = vmul.f32 %v12868_v23, %v3886_v25  ;;  %v9777_v42 = vld [vmem:[%s10385_s1 + $0xc8] sm:$0xff] }
 0x8b4   : > { %v8551_v44 = vpop.f32.mrf.mxu1 }
 0x8b5   : > { %7536 = vst [vmem:[%s11836_s22 + $0xd0] sm:$0xff] %v4232_v0  ;;  %v4230_v12 = vadd.f32 %v9775_v32, %v4214_v33  ;;  %v4217_v5 = vmul.f32 %v12868_v23, %v8551_v44  ;;  %v9778_v0 = vld [vmem:[%s10385_s1 + $0xf0] sm:$0xff] }
 0x8b6   : > { %v3889_v55 = vpop.f32.mrf.mxu1 }
 0x8b7   : > { %7534 = vst [vmem:[%s11836_s22 + $0xc0] sm:$0xff] %v4230_v12  ;;  %v4233_v30 = vadd.f32 %v9776_v3, %v4217_v5  ;;  %v4215_v49 = vmul.f32 %v12868_v23, %v3889_v55  ;;  %v9779_v12 = vld [vmem:[%s10385_s1 + $0xe0] sm:$0xff] }
 0x8b8   : > { %v8554_v48 = vpop.f32.mrf.mxu1 }
 0x8b9   : > { %7537 = vst [vmem:[%s11836_s22 + $0xd8] sm:$0xff] %v4233_v30  ;;  %v4231_v8 = vadd.f32 %v9777_v42, %v4215_v49  ;;  %v4220_v25 = vmul.f32 %v12868_v23, %v8554_v48  ;;  %v9780_v30 = vld [vmem:[%s10385_s1 + $0xf8] sm:$0xff]  ;;  %v9781_v42 = vld [vmem:[%s10385_s1 + $0xe8] sm:$0xff] }
 0x8ba   : > { %v3902_v29 = vpop.f32.mrf.mxu1 }
 0x8bb   : > { %7535 = vst [vmem:[%s11836_s22 + $0xc8] sm:$0xff] %v4231_v8  ;;  %v4236_v33 = vadd.f32 %v9778_v0, %v4220_v25  ;;  %v4218_v44 = vmul.f32 %v12868_v23, %v3902_v29  ;;  %v4925_v25 = vpack.c.bf16 %v12599_v16, %v12596_v63  ;;  %v4926_v29 = vpack.c.bf16 %v12624_v24, %v12614_v47 }
 0x8bc   : > { %v8555_v32 = vpop.f32.mrf.mxu1  ;;  %v4927_v0 = vpack.c.bf16 %v12646_v1, %v12636_v46  ;;  %v4930_v63 = vpack.c.bf16 %v12688_v20, %v12682_v10  ;;  %v4931_v16 = vpack.c.bf16 %v12700_v18, %v12694_v41  ;;  %v4932_v47 = vpack.c.bf16 %v12712_v15, %v12706_v62  ;;  %v12937_v46 = vld [vmem:[%s14557_s15] ss:$0 sm:$0xff]  ;;  %v9785_v15 = vld [vmem:[%s10160_s28 + $0x98] sm:$0xff] }
 0x8bd   : > { %7540 = vst [vmem:[%s11836_s22 + $0xf0] sm:$0xff] %v4236_v33  ;;  %v4234_v5 = vadd.f32 %v9779_v12, %v4218_v44  ;;  %v4221_v55 = vmul.f32 %v12868_v23, %v8555_v32  ;;  %8700 = vmatprep.mubr.bf16.mxu1 %v4925_v25  ;;  %v4929_v33 = vpack.c.bf16 %v12676_v53, %v12670_v43  ;;  %v9784_v20 = vld [vmem:[%s10160_s28 + $0x80] sm:$0xff]  ;;  %v9786_v12 = vld [vmem:[%s10160_s28 + $0x88] sm:$0xff] }
 0x8be   : > { %v3905_v3 = vpop.f32.mrf.mxu1  ;;  %8701 = vmatmul.mubr.bf16.vlgmr.msra.gmra.mxu1 %v4926_v29  ;;  %v9788_v25 = vld [vmem:[%s10160_s28 + $0xa0] sm:$0xff] }
 0x8bf   : > { %7538 = vst [vmem:[%s11836_s22 + $0xe0] sm:$0xff] %v4234_v5  ;;  %v4237_v49 = vadd.f32 %v9780_v30, %v4221_v55  ;;  %v4219_v48 = vmul.f32 %v12868_v23, %v3905_v3  ;;  %8704 = vmatprep.mubr.bf16.mxu1 %v4927_v0  ;;  %v4928_v23 = vpack.c.bf16 %v12664_v28, %v12652_v56  ;;  %v9783_v28 = vld [vmem:[%s10160_s28 + $0x90] sm:$0xff] }
 0x8c1   : > { %7541 = vst [vmem:[%s11836_s22 + $0xf8] sm:$0xff] %v4237_v49  ;;  %v4235_v8 = vadd.f32 %v9781_v42, %v4219_v48  ;;  %v9787_v49 = vld [vmem:[%s10160_s28 + $0xb0] sm:$0xff] }
 0x8c3   : > { %7539 = vst [vmem:[%s11836_s22 + $0xe8] sm:$0xff] %v4235_v8 }
 0x8c6   : > { %8705 = vmatmul.mubr.bf16.gmra.mxu1 %v4928_v23 }
 0x8c7   : > { %8708 = vmatprep.mubr.bf16.mxu1 %v4929_v33  ;;  %v9789_v33 = vld [vmem:[%s10160_s28 + $0xb8] sm:$0xff] }
 0x8ce   : > { %8709 = vmatmul.mubr.bf16.gmra.mxu1 %v4930_v63 }
 0x8cf   : > { %8712 = vmatprep.mubr.bf16.mxu1 %v4931_v16 }
 0x8d6   : > { %8713 = vmatmul.mubr.bf16.gmra.mxu1 %v4932_v47  ;;  %v9790_v47 = vld [vmem:[%s10160_s28 + $0xa8] sm:$0xff] }
 0x8f8   : > { %v8574_v24 = vpop.f32.mrf.mxu1 }
 0x8f9   : > { %v4257_v1 = vmul.f32 %v12937_v46, %v8574_v24 }
 0x8fa   : > { %v4143_v56 = vpop.f32.mrf.mxu1 }
 0x8fb   : > { %v4273_v43 = vadd.f32 %v9783_v28, %v4257_v1  ;;  %v4255_v53 = vmul.f32 %v12937_v46, %v4143_v56 }
 0x8fc   : > { %v8575_v10 = vpop.f32.mrf.mxu1 }
 0x8fd   : > { %7544 = vst [vmem:[%s11911_s18 + $0x90] sm:$0xff] %v4273_v43  ;;  %v4271_v41 = vadd.f32 %v9784_v20, %v4255_v53  ;;  %v4258_v18 = vmul.f32 %v12937_v46, %v8575_v10  ;;  %v12964_v43 = vpop.f32.mrf.mxu0  ;;  %v9791_v53 = vld [vmem:[%s10160_s28 + $0xd0] sm:$0xff] }
 0x8fe   : > { %v4146_v62 = vpop.f32.mrf.mxu1 }
 0x8ff   : > { %7542 = vst [vmem:[%s11911_s18 + $0x80] sm:$0xff] %v4271_v41  ;;  %v4274_v44 = vadd.f32 %v9785_v15, %v4258_v18  ;;  %v4256_v32 = vmul.f32 %v12937_v46, %v4146_v62  ;;  %v9792_v18 = vld [vmem:[%s10160_s28 + $0xc0] sm:$0xff] }
 0x901   : > { %7545 = vst [vmem:[%s11911_s18 + $0x98] sm:$0xff] %v4274_v44  ;;  %v4272_v5 = vadd.f32 %v9786_v12, %v4256_v32  ;;  %v12971_v32 = vpop.f32.mrf.mxu0  ;;  %v9793_v12 = vld [vmem:[%s10160_s28 + $0xd8] sm:$0xff] }
 0x903   : > { %7543 = vst [vmem:[%s11911_s18 + $0x88] sm:$0xff] %v4272_v5 }
 0x908   : > { %v8578_v55 = vpop.f32.mrf.mxu1 }
 0x909   : > { %v4261_v3 = vmul.f32 %v12937_v46, %v8578_v55 }
 0x90a   : > { %v4159_v30 = vpop.f32.mrf.mxu1 }
 0x90b   : > { %v4277_v48 = vadd.f32 %v9787_v49, %v4261_v3  ;;  %v4259_v42 = vmul.f32 %v12937_v46, %v4159_v30  ;;  %v9794_v3 = vld [vmem:[%s10160_s28 + $0xc8] sm:$0xff]  ;;  %v12978_v49 = vpop.f32.mrf.mxu0 }
 0x90c   : > { %v8579_v8 = vpop.f32.mrf.mxu1 }
 0x90d   : > { %7548 = vst [vmem:[%s11911_s18 + $0xb0] sm:$0xff] %v4277_v48  ;;  %v4275_v29 = vadd.f32 %v9788_v25, %v4259_v42  ;;  %v4262_v0 = vmul.f32 %v12937_v46, %v8579_v8  ;;  %v12981_v48 = vpop.f32.mrf.mxu0 }
 0x90e   : > { %v4162_v23 = vpop.f32.mrf.mxu1 }
 0x90f   : > { %7546 = vst [vmem:[%s11911_s18 + $0xa0] sm:$0xff] %v4275_v29  ;;  %v4278_v63 = vadd.f32 %v9789_v33, %v4262_v0  ;;  %v4260_v16 = vmul.f32 %v12937_v46, %v4162_v23  ;;  %v12984_v29 = vpop.f32.mrf.mxu0  ;;  %v9795_v0 = vld [vmem:[%s10160_s28 + $0xf0] sm:$0xff] }
 0x911   : > { %7549 = vst [vmem:[%s11911_s18 + $0xb8] sm:$0xff] %v4278_v63  ;;  %v4276_v24 = vadd.f32 %v9790_v47, %v4260_v16  ;;  %v9796_v16 = vld [vmem:[%s10160_s28 + $0xe0] sm:$0xff] }
 0x913   : > { %7547 = vst [vmem:[%s11911_s18 + $0xa8] sm:$0xff] %v4276_v24 }
 0x918   : > { %v8582_v1 = vpop.f32.mrf.mxu1 }
 0x919   : > { %v4265_v56 = vmul.f32 %v12937_v46, %v8582_v1 }
 0x91a   : > { %v4175_v28 = vpop.f32.mrf.mxu1 }
 0x91b   : > { %v4281_v10 = vadd.f32 %v9791_v53, %v4265_v56  ;;  %v4263_v20 = vmul.f32 %v12937_v46, %v4175_v28  ;;  %v12991_v56 = vpop.f32.mrf.mxu0  ;;  %v9797_v28 = vld [vmem:[%s10160_s28 + $0xf8] sm:$0xff] }
 0x91c   : > { %v8583_v41 = vpop.f32.mrf.mxu1 }
 0x91d   : > { %7552 = vst [vmem:[%s11911_s18 + $0xd0] sm:$0xff] %v4281_v10  ;;  %v4279_v62 = vadd.f32 %v9792_v18, %v4263_v20  ;;  %v4266_v15 = vmul.f32 %v12937_v46, %v8583_v41  ;;  %v9798_v41 = vld [vmem:[%s10160_s28 + $0xe8] sm:$0xff] }
 0x91e   : > { %v4178_v44 = vpop.f32.mrf.mxu1 }
 0x91f   : > { %7550 = vst [vmem:[%s11911_s18 + $0xc0] sm:$0xff] %v4279_v62  ;;  %v4282_v5 = vadd.f32 %v9793_v12, %v4266_v15  ;;  %v4264_v55 = vmul.f32 %v12937_v46, %v4178_v44  ;;  %v13000_v15 = vpop.f32.mrf.mxu0  ;;  %v13006_v12 = vld [vmem:[%s14551_s9] ss:$0 sm:$0xff] }
 0x921   : > { %7553 = vst [vmem:[%s11911_s18 + $0xd8] sm:$0xff] %v4282_v5  ;;  %v4280_v30 = vadd.f32 %v9794_v3, %v4264_v55  ;;  %v13012_v3 = vpop.f32.mrf.mxu0 }
 0x923   : > { %7551 = vst [vmem:[%s11911_s18 + $0xc8] sm:$0xff] %v4280_v30 }
 0x928   : > { %v8586_v42 = vpop.f32.mrf.mxu1 }
 0x929   : > { %v4269_v8 = vmul.f32 %v12937_v46, %v8586_v42 }
 0x92a   : > { %v4191_v25 = vpop.f32.mrf.mxu1 }
 0x92b   : > { %v4285_v23 = vadd.f32 %v9795_v0, %v4269_v8  ;;  %v4267_v33 = vmul.f32 %v12937_v46, %v4191_v25  ;;  %v13020_v25 = vpop.f32.mrf.mxu0 }
 0x92c   : > { %v8587_v63 = vpop.f32.mrf.mxu1 }
 0x92d   : > { %7556 = vst [vmem:[%s11911_s18 + $0xf0] sm:$0xff] %v4285_v23  ;;  %v4283_v47 = vadd.f32 %v9796_v16, %v4267_v33  ;;  %v4270_v24 = vmul.f32 %v12937_v46, %v8587_v63  ;;  %v13026_v33 = vpop.f32.mrf.mxu0 }
 0x92e   : > { %v4194_v1 = vpop.f32.mrf.mxu1 }
 0x92f   : > { %7554 = vst [vmem:[%s11911_s18 + $0xe0] sm:$0xff] %v4283_v47  ;;  %v4286_v53 = vadd.f32 %v9797_v28, %v4270_v24  ;;  %v4268_v10 = vmul.f32 %v12937_v46, %v4194_v1  ;;  %v13028_v47 = vpop.f32.mrf.mxu0 }
 0x930   : > { %v8638_v20 = vpop.f32.mrf.mxu1 }
 0x931   : > { %7557 = vst [vmem:[%s11911_s18 + $0xf8] sm:$0xff] %v4286_v53  ;;  %v4284_v18 = vadd.f32 %v9798_v41, %v4268_v10  ;;  %v4766_v5 = vadd.f32 %v13006_v12, %v8638_v20  ;;  %v13030_v28 = vpop.f32.mrf.mxu0 }
 0x932   : > { %v12998_v62 = vpop.f32.mrf.mxu1 }
 0x933   : > { %7555 = vst [vmem:[%s11911_s18 + $0xe8] sm:$0xff] %v4284_v18  ;;  %v8670_v10 = vpop.f32.mrf.mxu0 }
 0x934   : > { %v8639_v44 = vpop.f32.mrf.mxu1 }
 0x935   : > { %v4769_v55 = vadd.f32 %v13006_v12, %v8639_v44  ;;  %v4862_v41 = vpop.f32.mrf.mxu0  ;;  %v13035_v44 = vld [vmem:[%s14553_s11] ss:$0 sm:$0xff] }
 0x936   : > { %v13010_v46 = vpop.f32.mrf.mxu1  ;;  %v4863_v13 = vadd.f32 %v13035_v44, %v4862_v41 }
 0x937   : > { %v13014_v30 = vpack.c.bf16 %v4769_v55, %v4766_v5  ;;  %v4871_v5 = vadd.f32 %v13035_v44, %v8670_v10  ;;  %v8671_v35 = vpop.f32.mrf.mxu0 }
 0x938   : > { %v13016_v42 = vpop.f32.mrf.mxu1  ;;  %v4874_v9 = vadd.f32 %v13035_v44, %v8671_v35 }
 0x939   : > { %v4865_v54 = vpop.f32.mrf.mxu0 }
 0x93a   : > { %v13018_v8 = vpop.f32.mrf.mxu1  ;;  %v13044_v22 = vpack.c.bf16 %v4874_v9, %v4871_v5  ;;  %v4866_v10 = vadd.f32 %v13035_v44, %v4865_v54 }
 0x93c   : > { %v13022_v0 = vpop.f32.mrf.mxu1 }
 0x93e   : > { %v13024_v23 = vpop.f32.mrf.mxu1 }
 0x940   : > { %v8646_v63 = vpop.f32.mrf.mxu1 }
 0x941   : > { %v4798_v5 = vadd.f32 %v13006_v12, %v8646_v63 }
 0x942   : > { %v4789_v16 = vpop.f32.mrf.mxu1 }
 0x944   : > { %v8647_v24 = vpop.f32.mrf.mxu1 }
 0x946   : > { %v4792_v1 = vpop.f32.mrf.mxu1 }
 0x948   : > { %v8650_v53 = vpop.f32.mrf.mxu1 }
 0x949   : > { %v4814_v55 = vadd.f32 %v13006_v12, %v8650_v53  ;;  %v8674_v53 = vpop.f32.mrf.mxu0 }
 0x94a   : > { %v4805_v20 = vpop.f32.mrf.mxu1  ;;  %v4887_v35 = vadd.f32 %v13035_v44, %v8674_v53  ;;  %v4793_v53 = vadd.f32 %v13006_v12, %v4792_v1  ;;  %v4785_v1 = vadd.f32 %v13006_v12, %v13022_v0  ;;  %v4761_v0 = vadd.f32 %v13006_v12, %v13010_v46 }
 0x94b   : > { %v4806_v61 = vadd.f32 %v13006_v12, %v4805_v20  ;;  %v4878_v41 = vpop.f32.mrf.mxu0  ;;  %v4801_v20 = vadd.f32 %v13006_v12, %v8647_v24 }
 0x94c   : > { %v8651_v18 = vpop.f32.mrf.mxu1 }
 0x94d   : > { %v4817_v6 = vadd.f32 %v13006_v12, %v8651_v18  ;;  %v13047_v18 = vpack.c.bf16 %v4866_v10, %v4863_v13 }
 0x94e   : > { %v4808_v27 = vpop.f32.mrf.mxu1 }
 0x94f   : > { %v5045_v38 = vpack.c.bf16 %v4817_v6, %v4814_v55  ;;  %v4809_v60 = vadd.f32 %v13006_v12, %v4808_v27  ;;  %v8675_v6 = vpop.f32.mrf.mxu0  ;;  %v4879_v27 = vadd.f32 %v13035_v44, %v4878_v41 }
 0x950   : > { %v4890_v9 = vadd.f32 %v13035_v44, %v8675_v6 }
 0x951   : > { %v5044_v2 = vpack.c.bf16 %v4809_v60, %v4806_v61  ;;  %8716 = vmatprep.subr.bf16.mxu0 %v5045_v38  ;;  %v4881_v54 = vpop.f32.mrf.mxu0  ;;  %v5043_v61 = vpack.c.bf16 %v4801_v20, %v4798_v5  ;;  %v4782_v5 = vadd.f32 %v13006_v12, %v13016_v42  ;;  %v4758_v42 = vadd.f32 %v13006_v12, %v12998_v62  ;;  %v9802_v62 = vld [vmem:[%s14548_s6 + $0x38] sm:$0xff]  }
 0x952   : > { %8717 = vmatpush3.bf16.xpose.msra.mxu0 %v5045_v38  ;;  %v13054_v60 = vpack.c.bf16 %v4890_v9, %v4887_v35  ;;  %v4882_v38 = vadd.f32 %v13035_v44, %v4881_v54  ;;  %v4790_v35 = vadd.f32 %v13006_v12, %v4789_v16  ;;  %v4777_v16 = vadd.f32 %v13006_v12, %v13024_v23 }
 0x953   : > { %8718 = vmatprep.subr.bf16.mxu0 %v5044_v2  ;;  %v8678_v13 = vpop.f32.mrf.mxu0 }
 0x954   : > { %v13057_v55 = vpack.c.bf16 %v4882_v38, %v4879_v27  ;;  %v4903_v24 = vadd.f32 %v13035_v44, %v8678_v13  ;;  %v5042_v20 = vpack.c.bf16 %v4793_v53, %v4790_v35  ;;  %v5041_v38 = vpack.c.bf16 %v4785_v1, %v4782_v5 }
 0x955   : > { %v4894_v10 = vpop.f32.mrf.mxu0  ;;  %v4774_v13 = vadd.f32 %v13006_v12, %v13018_v8  ;;  %v13086_v8 = vld [vmem:[%s14549_s7] ss:$0 sm:$0xff] }
 0x956   : > { %v4895_v6 = vadd.f32 %v13035_v44, %v4894_v10  ;;  %v4656_v23 = vadd.f32 %v13086_v8, %v12981_v48  ;;  %v4661_v48 = vadd.f32 %v13086_v8, %v12964_v43  ;;  %v4688_v1 = vadd.f32 %v13086_v8, %v13030_v28 }
 0x957   : > { %v8679_v41 = vpop.f32.mrf.mxu0  ;;  %v5040_v10 = vpack.c.bf16 %v4777_v16, %v4774_v13  ;;  %v4685_v16 = vadd.f32 %v13086_v8, %v13026_v33  ;;  %v14899_v13 = vld [vmem:[#allocation59_spill] sm:$0xff] }
 0x958   : > { %v4906_v63 = vadd.f32 %v13035_v44, %v8679_v41  ;;  %v4704_v12 = vmul.f32 0.088388346, %v4656_v23  ;;  %v4672_v41 = vadd.f32 %v13086_v8, %v13012_v3  ;;  %v4712_v33 = vmul.f32 0.088388346, %v4688_v1  ;;  %v14902_v1 = vld [vmem:[#allocation42_spill] sm:$0xff] }
 0x959   : > { %v4897_v9 = vpop.f32.mrf.mxu0 }
 0x95a   : > { %8719 = vmatpush3.bf16.xpose.msra.mxu0 %v5044_v2  ;;  %v13064_v54 = vpack.c.bf16 %v4906_v63, %v4903_v24  ;;  %v4898_v2 = vadd.f32 %v13035_v44, %v4897_v9  ;;  %v4653_v24 = vadd.f32 %v13086_v8, %v12971_v32  ;;  %v14898_v32 = vpack.c.bf16 %v12376_v39, %v12374_v7 }
 0x95b   : > { %8720 = vmatprep.subr.bf16.mxu0 %v5043_v61  ;;  %v4708_v35 = vmul.f32 0.088388346, %v4672_v41  ;;  %v4705_v9 = vmul.f32 0.088388346, %v4661_v48  ;;  %v4696_v48 = vadd.f32 %v13086_v8, %v13028_v47  ;;  %v4693_v47 = vadd.f32 %v13086_v8, %v13020_v25 }
 0x95c   : > { %v13067_v27 = vpack.c.bf16 %v4898_v2, %v4895_v6  ;;  %v4703_v46 = vmul.f32 0.088388346, %v4653_v24  ;;  %v4669_v6 = vadd.f32 %v13086_v8, %v12991_v56  ;;  %v4680_v56 = vadd.f32 %v13086_v8, %v13000_v15  ;;  %v9804_v2 = vld [vmem:[%s14548_s6 + $0x28] sm:$0xff]   ;;  %v13127_v15 = vld [vmem:[%s10385_s1 + $0x180] sm:$0xff] }
 0x95d   : > { %v4714_v25 = vmul.f32 0.088388346, %v4696_v48 }
 0x95e   : > { %v5032_v53 = vpack.c.bf16 %v4704_v12, %v4703_v46  ;;  %v4707_v43 = vmul.f32 0.088388346, %v4669_v6  ;;  %v14900_v12 = vld [vmem:[#allocation72_spill] sm:$0xff] }
 0x962   : > { %8721 = vmatpush3.bf16.xpose.msra.mxu0 %v5043_v61  ;;  %v5038_v61 = vpack.c.bf16 %v4761_v0, %v4758_v42  ;;  %v13132_v0 = vld [vmem:[%s10385_s1 + $0x188] sm:$0xff] }
 0x963   : > { %8722 = vmatprep.subr.bf16.mxu0 %v5042_v20  ;;  %v5884_v28 = vsub.f32 %v13132_v0, %v14899_v13 }
 0x96a   : > { %8723 = vmatpush3.bf16.xpose.msra.mxu0 %v5042_v20  ;;  %v5034_v20 = vpack.c.bf16 %v4708_v35, %v4707_v43 }
 0x96b   : > { %8724 = vmatprep.subr.bf16.mxu0 %v5041_v38 }
 0x972   : > { %8725 = vmatpush3.bf16.xpose.msra.mxu0 %v5041_v38  ;;  %v4677_v38 = vadd.f32 %v13086_v8, %v12984_v29  ;;  %v9807_v29 = vld [vmem:[%s14548_s6 + $0x20] sm:$0xff]  }
 0x973   : > { %8726 = vmatprep.subr.bf16.mxu0 %v5040_v10 }
 0x974   : > { %v4709_v24 = vmul.f32 0.088388346, %v4677_v38 }
 0x97a   : > { %8727 = vmatpush3.bf16.xpose.msra.mxu0 %v5040_v10  ;;  %v5883_v10 = vsub.f32 %v13127_v15, %v14899_v13 }
 0x97b   : > { %8728 = vmatprep.subr.bf16.mxu0 %v13014_v30 }
 0x97c   : > { %v5901_v46 = vmul.f32 %v14900_v12, %v5883_v10 }
 0x97e   : > { %v13109_v3 = vpop.f32.mrf.mxu1 }
 0x980   : > { %v13111_v7 = vpop.f32.mrf.mxu1 }
 0x982   : > { %8729 = vmatpush3.bf16.xpose.msra.mxu0 %v13014_v30  ;;  %v4664_v30 = vadd.f32 %v13086_v8, %v12978_v49  ;;  %v9803_v49 = vld [vmem:[%s14548_s6 + $0x30] sm:$0xff]   ;;  %v13120_v5 = vpop.f32.mrf.mxu1 }
 0x983   : > { %8730 = vmatprep.subr.bf16.mxu0 %v5038_v61 }
 0x984   : > { %v4706_v63 = vmul.f32 0.088388346, %v4664_v30  ;;  %v13136_v42 = vpop.f32.mrf.mxu1  ;;  %v5902_v30 = vmul.f32 %v14900_v12, %v5884_v28 }
 0x986   : > { %v5033_v39 = vpack.c.bf16 %v4706_v63, %v4705_v9  ;;  %v13141_v23 = vpop.f32.mrf.mxu1  ;;  %v13160_v9 = vld [vmem:[%s10385_s1 + $0x190] sm:$0xff]  ;;  %v5918_v38 = vmul.f32 %v5902_v30, %v14902_v1  ;;  %v13194_v1 = vld [vmem:[%s10385_s1 + $0x1b8] sm:$0xff] }
 0x987   : > { %v5885_v43 = vsub.f32 %v13160_v9, %v14899_v13 }
 0x98a   : > { %8731 = vmatpush3.bf16.xpose.msra.mxu0 %v5038_v61  ;;  %v4710_v61 = vmul.f32 0.088388346, %v4680_v56 }
 0x98b   : > { %8812 = vmatprep.subr.bf16.mxu0 %v9802_v62 }
 0x98c   : > { %v5035_v41 = vpack.c.bf16 %v4710_v61, %v4709_v24  ;;  %v9813_v61 = vld [vmem:[%s14548_s6 + $0x10] sm:$0xff]   ;;  %v14904_v24 = vld [vmem:[#allocation46_spill] sm:$0xff] }
 0x991   : > { %8733 = vmatmul.mubr.bf16.vlgmr.msra.gmra.mxu0 %v14898_v32  ;;  %v9808_v32 = vld [vmem:[%s14548_s6 + $0x18] sm:$0xff]  }
 0x992   : > { %8736 = vmatprep.mubr.bf16.mxu0 %v5032_v53  ;;  %8813 = vmatpush3.bf16.msra.mxu0 %v9802_v62  ;;  %v4711_v62 = vmul.f32 0.088388346, %v4685_v16  ;;  %v13145_v53 = vpop.f32.mrf.mxu1  ;;  %v13174_v16 = vld [vmem:[%s10385_s1 + $0x1a8] sm:$0xff] }
 0x993   : > { %8814 = vmatprep.subr.bf16.mxu0 %v9803_v49  ;;  %v5888_v10 = vsub.f32 %v13174_v16, %v14899_v13 }
 0x994   : > { %v5036_v6 = vpack.c.bf16 %v4712_v33, %v4711_v62  ;;  %v13152_v63 = vpop.f32.mrf.mxu1  ;;  %v5934_v62 = vadd.f32 %v5918_v38, %v14904_v24  ;;  %v13199_v38 = vld [vmem:[%s10385_s1 + $0x1b0] sm:$0xff]  ;;  %v14906_v24 = vld [vmem:[#allocation45_spill] sm:$0xff] }
 0x995   : > { %v5906_v48 = vmul.f32 %v14900_v12, %v5888_v10 }
 0x996   : > { %8815 = vmatpush3.bf16.msra.mxu0 %v9803_v49  ;;  %v13155_v49 = vld [vmem:[%s10385_s1 + $0x198] sm:$0xff]  ;;  %v13178_v28 = vpop.f32.mrf.mxu1 }
 0x997   : > { %8816 = vmatprep.subr.bf16.mxu0 %v9804_v2  ;;  %v5886_v35 = vsub.f32 %v13155_v49, %v14899_v13  ;;  %v5922_v51 = vmul.f32 %v5906_v48, %v14908_v31  ;;  %v9819_v31 = vld [vmem:[%s14548_s6] sm:$0xff]   ;;  %v14911_v48 = vld [vmem:[#allocation56_spill] sm:$0xff] }
 0x999   : > { %8737 = vmatmul.mubr.bf16.gmra.mxu0 %v5033_v39  ;;  %v13167_v39 = vld [vmem:[%s10385_s1 + $0x1a0] sm:$0xff]  ;;  %v5904_v30 = vmul.f32 %v14900_v12, %v5886_v35  ;;  %v5889_v35 = vsub.f32 %v13199_v38, %v14899_v13 }
 0x99a   : > { %8740 = vmatprep.mubr.bf16.mxu0 %v5034_v20  ;;  %8817 = vmatpush3.bf16.msra.mxu0 %v9804_v2  ;;  %v5887_v56 = vsub.f32 %v13167_v39, %v14899_v13  ;;  %v14901_v2 = vld [vmem:[#allocation43_spill] sm:$0xff] }
 0x99b   : > { %8818 = vmatprep.subr.bf16.mxu0 %v9807_v29  ;;  %v5917_v20 = vmul.f32 %v5901_v46, %v14901_v2  ;;  %v13185_v46 = vpop.f32.mrf.mxu1 }
 0x99d   : > { %v13191_v2 = vpop.f32.mrf.mxu1 }
 0x99e   : > { %8819 = vmatpush3.bf16.msra.mxu0 %v9807_v29  ;;  %v14903_v29 = vld [vmem:[#allocation47_spill] sm:$0xff] }
 0x99f   : > { %8820 = vmatprep.subr.bf16.mxu0 %v9808_v32  ;;  %v5933_v33 = vadd.f32 %v5917_v20, %v14903_v29  ;;  %v5890_v20 = vsub.f32 %v13194_v1, %v14899_v13  ;;  %v8711_v10 = vpop.f32.mrf.mxu1 }
 0x9a1   : > { %8741 = vmatmul.mubr.bf16.gmra.mxu0 %v5035_v41  ;;  %v5903_v41 = vmul.f32 %v14900_v12, %v5885_v43 }
 0x9a2   : > { %8744 = vmatprep.mubr.bf16.mxu0 %v5036_v6  ;;  %8821 = vmatpush3.bf16.msra.mxu0 %v9808_v32  ;;  %v4713_v32 = vmul.f32 0.088388346, %v4693_v47  ;;  %v5905_v6 = vmul.f32 %v14900_v12, %v5887_v56  ;;  %v9816_v47 = vld [vmem:[%s14548_s6 + $0x8] sm:$0xff]   ;;  %v6077_v56 = vpack.c.bf16 %v5934_v62, %v5933_v33  ;;  %v5002_v62 = vpop.f32.mrf.mxu1 }
 0x9a3   : > { %8822 = vmatprep.subr.bf16.mxu0 %v9813_v61  ;;  %v5919_v19 = vmul.f32 %v5903_v41, %v14906_v24 }
 0x9a4   : > { %v5037_v43 = vpack.c.bf16 %v4714_v25, %v4713_v32  ;;  %v5921_v57 = vmul.f32 %v5905_v6, %v14907_v50  ;;  %v5891_v25 = vsub.f32 %v13211_v59, %v14899_v13  ;;  %v13216_v32 = vld [vmem:[%s10385_s1 + $0x1c8] sm:$0xff]  ;;  %v5908_v50 = vmul.f32 %v14900_v12, %v5890_v20  ;;  %v8714_v45 = vpop.f32.mrf.mxu1 }
 0x9a5   : > { %v5892_v33 = vsub.f32 %v13216_v32, %v14899_v13  ;;  %v5907_v6 = vmul.f32 %v14900_v12, %v5889_v35  ;;  %v14913_v35 = vld [vmem:[#allocation52_spill] sm:$0xff] }
 0x9a6   : > { %8823 = vmatpush3.bf16.msra.mxu0 %v9813_v61  ;;  %v14905_v61 = vld [vmem:[#allocation44_spill] sm:$0xff]  ;;  %v5015_v20 = vpop.f32.mrf.mxu1 }
 0x9a7   : > { %8824 = vmatprep.subr.bf16.mxu0 %v9816_v47  ;;  %v5920_v29 = vmul.f32 %v5904_v30, %v14905_v61  ;;  %v14909_v30 = vld [vmem:[#allocation48_spill] sm:$0xff]  ;;  %v5923_v21 = vmul.f32 %v5907_v6, %v14914_v4  ;;  %v14915_v6 = vld [vmem:[#allocation58_spill] sm:$0xff] }
 0x9a9   : > { %8745 = vmatmul.mubr.bf16.gmra.mxu0 %v5037_v43  ;;  %v5936_v41 = vadd.f32 %v5920_v29, %v14909_v30  ;;  %v14910_v43 = vld [vmem:[#allocation49_spill] sm:$0xff]  ;;  %v5909_v29 = vmul.f32 %v14900_v12, %v5891_v25  ;;  %v13243_v25 = vld [vmem:[%s10385_s1 + $0x1d0] sm:$0xff] }
 0x9aa   : > { %8825 = vmatpush3.bf16.msra.mxu0 %v9816_v47  ;;  %8828 = vmatprep.mubr.bf16.mxu0 %v6077_v56  ;;  %v5935_v61 = vadd.f32 %v5919_v19, %v14910_v43  ;;  %v5937_v47 = vadd.f32 %v5921_v57, %v14911_v48  ;;  %v14912_v56 = vld [vmem:[#allocation55_spill] sm:$0xff]  ;;  %v5910_v19 = vmul.f32 %v14900_v12, %v5892_v33 }
 0x9ab   : > { %8826 = vmatprep.subr.bf16.mxu0 %v9819_v31  ;;  %v5938_v24 = vadd.f32 %v5922_v51, %v14912_v56  ;;  %v5924_v43 = vmul.f32 %v5908_v50, %v14913_v35  ;;  %v5024_v57 = vadd.f32 %v13236_v11, %v8714_v45  ;;  %v9821_v51 = vld [vmem:[%s14552_s10 + $0x38] sm:$0xff]   ;;  %v5893_v33 = vsub.f32 %v13243_v25, %v14899_v13  ;;  %v8715_v50 = vpop.f32.mrf.mxu1 }
 0x9ac   : > { %v6078_v30 = vpack.c.bf16 %v5936_v41, %v5935_v61  ;;  %v13248_v41 = vld [vmem:[%s10385_s1 + $0x1d8] sm:$0xff]  ;;  %v5016_v56 = vadd.f32 %v13236_v11, %v5015_v20  ;;  %v5027_v35 = vadd.f32 %v13236_v11, %v8715_v50  ;;  %v5925_v34 = vmul.f32 %v5909_v29, %v14917_v37 }
 0x9ad   : > { %v5894_v4 = vsub.f32 %v13248_v41, %v14899_v13  ;;  %v6079_v61 = vpack.c.bf16 %v5938_v24, %v5937_v47  ;;  %v5940_v45 = vadd.f32 %v5924_v43, %v14915_v6  ;;  %v5926_v17 = vmul.f32 %v5910_v19, %v14918_v36  ;;  %v5018_v24 = vpop.f32.mrf.mxu1  ;;  %v9825_v36 = vld [vmem:[%s14552_s10 + $0x30] sm:$0xff]  }
 0x9ae   : > { %8827 = vmatpush3.bf16.msra.mxu0 %v9819_v31  ;;  %v14916_v31 = vld [vmem:[#allocation60_spill] sm:$0xff]  ;;  %v5895_v47 = vsub.f32 %v13259_v14, %v14899_v13  ;;  %v5011_v20 = vadd.f32 %v13236_v11, %v8711_v10  ;;  %v5019_v43 = vadd.f32 %v13236_v11, %v5018_v24  ;;  %v5911_v37 = vmul.f32 %v14900_v12, %v5893_v33 }
 0x9af   : > { %8876 = vmatprep.subr.bf16.mxu0 %v9821_v51  ;;  %v5939_v48 = vadd.f32 %v5923_v21, %v14916_v31  ;;  %v5008_v21 = vadd.f32 %v13236_v11, %v13185_v46  ;;  %v5912_v29 = vmul.f32 %v14900_v12, %v5894_v4  ;;  %v5941_v19 = vadd.f32 %v5925_v34, %v14856_v52  ;;  %v13275_v46 = vld [vmem:[%s10385_s1 + $0x1f8] sm:$0xff]  ;;  %v14920_v31 = vld [vmem:[#allocation63_spill] sm:$0xff] }
 0x9b0   : > { %v5301_v50 = vpack.c.bf16 %v5019_v43, %v5016_v56  ;;  %v5898_v10 = vsub.f32 %v13275_v46, %v14899_v13  ;;  %v5913_v6 = vmul.f32 %v14900_v12, %v5895_v47  ;;  %v5000_v33 = vadd.f32 %v13236_v11, %v13191_v2  ;;  %v14921_v2 = vld [vmem:[#allocation66_spill] sm:$0xff] }
 0x9b1   : > { %8829 = vmatmul.mubr.bf16.vlgmr.msra.gmra.mxu0 %v6078_v30  ;;  %v5302_v30 = vpack.c.bf16 %v5027_v35, %v5024_v57  ;;  %v6080_v57 = vpack.c.bf16 %v5940_v45, %v5939_v48  ;;  %v5300_v4 = vpack.c.bf16 %v5011_v20, %v5008_v21  ;;  %v5003_v52 = vadd.f32 %v13236_v11, %v5002_v62  ;;  %v13289_v48 = vld [vmem:[%s10385_s1 + $0x1f0] sm:$0xff]  ;;  %v14922_v62 = vld [vmem:[#allocation70_spill] sm:$0xff]  ;;  %v14923_v21 = vld [vmem:[#allocation73_spill] sm:$0xff] }
 0x9b2   : > { %8832 = vmatprep.mubr.bf16.mxu0 %v6079_v61  ;;  %8877 = vmatpush3.bf16.msra.mxu0 %v9821_v51  ;;  %v14919_v51 = vld [vmem:[#allocation64_spill] sm:$0xff]  ;;  %v5927_v34 = vmul.f32 %v5911_v37, %v14859_v40  ;;  %v5928_v45 = vmul.f32 %v5912_v29, %v14920_v31  ;;  %v5897_v56 = vsub.f32 %v13289_v48, %v14899_v13  ;;  %v14924_v37 = vld [vmem:[#allocation77_spill] sm:$0xff] }
 0x9b3   : > { %8878 = vmatprep.subr.bf16.mxu0 %v9825_v36  ;;  %v5942_v61 = vadd.f32 %v5926_v17, %v14919_v51  ;;  %8748 = vmatprep.subr.bf16.mxu1 %v5302_v30  ;;  %v9827_v17 = vld [vmem:[%s14552_s10 + $0x28] sm:$0xff]   ;;  %v5929_v20 = vmul.f32 %v5913_v6, %v14923_v21  ;;  %v4992_v40 = vadd.f32 %v13236_v11, %v13141_v23  ;;  %v14927_v6 = vld [vmem:[#allocation76_spill] sm:$0xff] }
 0x9b4   : > { %8749 = vmatpush3.bf16.msra.mxu1 %v5302_v30  ;;  %v5944_v47 = vadd.f32 %v5928_v45, %v14921_v2  ;;  %v5943_v24 = vadd.f32 %v5927_v34, %v14922_v62  ;;  %v4995_v30 = vadd.f32 %v13236_v11, %v13152_v63  ;;  %v5299_v43 = vpack.c.bf16 %v5003_v52, %v5000_v33  ;;  %v9830_v52 = vld [vmem:[%s14552_s10 + $0x18] sm:$0xff]  }
 0x9b5   : > { %8750 = vmatprep.subr.bf16.mxu1 %v5301_v50  ;;  %v6081_v35 = vpack.c.bf16 %v5942_v61, %v5941_v19  ;;  %v5916_v13 = vmul.f32 %v14900_v12, %v5898_v10  ;;  %v5945_v29 = vadd.f32 %v5929_v20, %v14924_v37  ;;  %v9829_v19 = vld [vmem:[%s14552_s10 + $0x20] sm:$0xff]   ;;  %v4984_v23 = vadd.f32 %v13236_v11, %v13145_v53 }
 0x9b6   : > { %8879 = vmatpush3.bf16.msra.mxu0 %v9825_v36  ;;  %v5915_v36 = vmul.f32 %v14900_v12, %v5897_v56  ;;  %v6082_v51 = vpack.c.bf16 %v5944_v47, %v5943_v24  ;;  %v5298_v63 = vpack.c.bf16 %v4995_v30, %v4992_v40  ;;  %v4987_v61 = vadd.f32 %v13236_v11, %v13178_v28  ;;  %v14926_v10 = vld [vmem:[#allocation74_spill] sm:$0xff]  ;;  %v8682_v28 = vpop.f32.mrf.mxu0 }
 0x9b7   : > { %8880 = vmatprep.subr.bf16.mxu0 %v9827_v17  ;;  %v6083_v33 = vpack.c.bf16 %v14927_v6, %v5945_v29  ;;  %v4976_v31 = vadd.f32 %v13236_v11, %v13109_v3  ;;  %v4979_v45 = vadd.f32 %v13236_v11, %v13120_v5  ;;  %v4968_v62 = vadd.f32 %v13236_v11, %v13111_v7  ;;  %v9832_v5 = vld [vmem:[%s14552_s10 + $0x8] sm:$0xff]  }
 0x9b8   : > { %8751 = vmatpush3.bf16.msra.mxu1 %v5301_v50  ;;  %v14925_v50 = vld [vmem:[#allocation71_spill] sm:$0xff]  ;;  %v5297_v56 = vpack.c.bf16 %v4987_v61, %v4984_v23  ;;  %v13325_v47 = vpop.f32.mrf.mxu0  ;;  %v4971_v3 = vadd.f32 %v13236_v11, %v13136_v42  ;;  %v4919_v40 = vadd.f32 %v13035_v44, %v8682_v28  ;;  %v9833_v11 = vld [vmem:[%s14552_s10] sm:$0xff]   ;;  %v6303_v42 = vpack.c.bf16 %v13132_v0, %v13127_v15 }
 0x9b9   : > { %8833 = vmatmul.mubr.bf16.gmra.mxu0 %v6080_v57  ;;  %8752 = vmatprep.subr.bf16.mxu1 %v5300_v4  ;;  %v5932_v12 = vmul.f32 %v5916_v13, %v14925_v50  ;;  %v5931_v57 = vmul.f32 %v5915_v36, %v14926_v10  ;;  %v5296_v24 = vpack.c.bf16 %v4979_v45, %v4976_v31  ;;  %v9834_v0 = vld [vmem:[%s10385_s1 + $0x1e8] sm:$0xff] }
 0x9ba   : > { %8836 = vmatprep.mubr.bf16.mxu0 %v6081_v35  ;;  %8881 = vmatpush3.bf16.msra.mxu0 %v9827_v17  ;;  %v14929_v17 = vld [vmem:[#allocation79_spill] sm:$0xff]  ;;  %v9831_v35 = vld [vmem:[%s14552_s10 + $0x10] sm:$0xff]   ;;  %v8683_v21 = vpop.f32.mrf.mxu0  ;;  %v5295_v20 = vpack.c.bf16 %v4971_v3, %v4968_v62  ;;  %v6306_v13 = vpack.c.bf16 %v13194_v1, %v13199_v38  ;;  %v6307_v36 = vpack.c.bf16 %v13216_v32, %v13211_v59 }
 0x9bb   : > { %8882 = vmatprep.subr.bf16.mxu0 %v9829_v19  ;;  %v5947_v34 = vadd.f32 %v5931_v57, %v14929_v17  ;;  %v4922_v30 = vadd.f32 %v13035_v44, %v8683_v21  ;;  %v6304_v44 = vpack.c.bf16 %v13155_v49, %v13160_v9  ;;  %v6308_v15 = vpack.c.bf16 %v13248_v41, %v13243_v25 }
 0x9bc   : > { %8753 = vmatpush3.bf16.msra.mxu1 %v5300_v4  ;;  %v14928_v4 = vld [vmem:[#allocation78_spill] sm:$0xff]  ;;  %v6309_v49 = vpack.c.bf16 %v9834_v0, %v13259_v14  ;;  %v6310_v9 = vpack.c.bf16 %v13275_v46, %v13289_v48 }
 0x9bd   : > { %8754 = vmatprep.subr.bf16.mxu1 %v5299_v43  ;;  %v5948_v53 = vadd.f32 %v5932_v12, %v14928_v4  ;;  %v13339_v7 = vpack.c.bf16 %v4922_v30, %v4919_v40 }
 0x9be   : > { %8883 = vmatpush3.bf16.msra.mxu0 %v9829_v19 }
 0x9bf   : > { %8884 = vmatprep.subr.bf16.mxu0 %v9830_v52  ;;  %v6084_v2 = vpack.c.bf16 %v5948_v53, %v5947_v34 }
 0x9c0   : > { %8755 = vmatpush3.bf16.msra.mxu1 %v5299_v43  ;;  %v6305_v43 = vpack.c.bf16 %v13174_v16, %v13167_v39  ;;  %v13358_v39 = vpop.f32.mrf.mxu0 }
 0x9c1   : > { %8837 = vmatmul.mubr.bf16.gmra.mxu0 %v6082_v51  ;;  %8756 = vmatprep.subr.bf16.mxu1 %v5298_v63 }
 0x9c2   : > { %8840 = vmatprep.mubr.bf16.mxu0 %v6083_v33  ;;  %8885 = vmatpush3.bf16.msra.mxu0 %v9830_v52 }
 0x9c3   : > { %8886 = vmatprep.subr.bf16.mxu0 %v9831_v35 }
 0x9c4   : > { %8757 = vmatpush3.bf16.msra.mxu1 %v5298_v63 }
 0x9c5   : > { %8758 = vmatprep.subr.bf16.mxu1 %v5297_v56 }
 0x9c6   : > { %8887 = vmatpush3.bf16.msra.mxu0 %v9831_v35 }
 0x9c7   : > { %8888 = vmatprep.subr.bf16.mxu0 %v9832_v5 }
 0x9c8   : > { %8759 = vmatpush3.bf16.msra.mxu1 %v5297_v56 }
 0x9c9   : > { %8841 = vmatmul.mubr.bf16.gmra.mxu0 %v6084_v2  ;;  %8760 = vmatprep.subr.bf16.mxu1 %v5296_v24 }
 0x9ca   : > { %8889 = vmatpush3.bf16.msra.mxu0 %v9832_v5  ;;  %8892 = vmatprep.mubr.bf16.mxu0 %v6303_v42 }
 0x9cb   : > { %8890 = vmatprep.subr.bf16.mxu0 %v9833_v11 }
 0x9cc   : > { %8761 = vmatpush3.bf16.msra.mxu1 %v5296_v24 }
 0x9cd   : > { %8762 = vmatprep.subr.bf16.mxu1 %v5295_v20 }
 0x9ce   : > { %8891 = vmatpush3.bf16.msra.mxu0 %v9833_v11 }
 0x9d0   : > { %8763 = vmatpush3.bf16.msra.mxu1 %v5295_v20 }
 0x9d1   : > { %8780 = vmatprep.subr.bf16.mxu1 %v13339_v7  ;;  %8893 = vmatmul.mubr.bf16.vlgmr.msra.gmra.mxu0 %v6304_v44 }
 0x9d2   : > { %8896 = vmatprep.mubr.bf16.mxu0 %v6305_v43 }
 0x9d9   : > { %8897 = vmatmul.mubr.bf16.gmra.mxu0 %v6306_v13 }
 0x9da   : > { %8900 = vmatprep.mubr.bf16.mxu0 %v6307_v36 }
 0x9e1   : > { %8901 = vmatmul.mubr.bf16.gmra.mxu0 %v6308_v15 }
 0x9e2   : > { %8904 = vmatprep.mubr.bf16.mxu0 %v6309_v49 }
 0x9e9   : > { %8905 = vmatmul.mubr.bf16.gmra.mxu0 %v6310_v9 }
 0xa51   : > { %v13360_v16 = vpop.f32.mrf.mxu0 }
 0xa53   : > { %v13362_v1 = vpop.f32.mrf.mxu0 }
 0xa54   : > { %5143 = vmax.xlane.f32.xlu0 %v13362_v1  ;;  %5400 = vxpose.xlu1.b32.start [1/16] %v13362_v1, 128 }
 0xa55   : > { %v13366_v59 = vpop.f32.mrf.mxu0 }
 0xa57   : > { %v13368_v38 = vpop.f32.mrf.mxu0 }
 0xa58   : > { %5145 = vmax.xlane.f32.xlu0 %v13368_v38  ;;  %5401 = vxpose.xlu1.b32.cont [2/16] %v13368_v38, 128 }
 0xa59   : > { %v13372_v14 = vpop.f32.mrf.mxu0 }
 0xa5b   : > { %v13374_v32 = vpop.f32.mrf.mxu0 }
 0xa5c   : > { %5147 = vmax.xlane.f32.xlu0 %v13360_v16  ;;  %5402 = vxpose.xlu1.b32.cont [3/16] %v13360_v16, 128 }
 0xa5d   : > { %v13378_v25 = vpop.f32.mrf.mxu0 }
 0xa5f   : > { %v13380_v41 = vpop.f32.mrf.mxu0 }
 0xa60   : > { %5149 = vmax.xlane.f32.xlu0 %v13366_v59  ;;  %5403 = vxpose.xlu1.b32.cont [4/16] %v13366_v59, 128 }
 0xa61   : > { %v13384_v46 = vpop.f32.mrf.mxu0 }
 0xa63   : > { %v13386_v48 = vpop.f32.mrf.mxu0 }
 0xa64   : > { %5151 = vmax.xlane.f32.xlu0 %v13374_v32  ;;  %5404 = vxpose.xlu1.b32.cont [5/16] %v13374_v32, 128 }
 0xa65   : > { %v13390_v37 = vpop.f32.mrf.mxu0 }
 0xa67   : > { %v13392_v29 = vpop.f32.mrf.mxu0 }
 0xa68   : > { %5153 = vmax.xlane.f32.xlu0 %v13380_v41  ;;  %5405 = vxpose.xlu1.b32.cont [6/16] %v13380_v41, 128 }
 0xa69   : > { %v13396_v19 = vpop.f32.mrf.mxu0 }
 0xa6b   : > { %v13398_v51 = vpop.f32.mrf.mxu0 }
 0xa6c   : > { %5155 = vmax.xlane.f32.xlu0 %v13372_v14  ;;  %5406 = vxpose.xlu1.b32.cont [7/16] %v13372_v14, 128 }
 0xa6d   : > { %v13402_v23 = vpop.f32.mrf.mxu0 }
 0xa6f   : > { %v13404_v63 = vpop.f32.mrf.mxu0 }
 0xa70   : > { %5157 = vmax.xlane.f32.xlu0 %v13378_v25  ;;  %5407 = vxpose.xlu1.b32.cont [8/16] %v13378_v25, 128 }
 0xa71   : > { %v8830_v61 = vpop.f32.mrf.mxu0 }
 0xa72   : > { %v6128_v12 = vadd.f32 %v13086_v8, %v8830_v61 }
 0xa73   : > { %v6119_v50 = vpop.f32.mrf.mxu0 }
 0xa74   : > { %5159 = vmax.xlane.f32.xlu0 %v13386_v48  ;;  %5408 = vxpose.xlu1.b32.cont [9/16] %v13386_v48, 128  ;;  %v6120_v57 = vadd.f32 %v13086_v8, %v6119_v50  ;;  %v13413_v52 = vmul.f32 0.088388346, %v6128_v12 }
 0xa75   : > { %v8831_v10 = vpop.f32.mrf.mxu0 }
 0xa76   : > { %v6131_v6 = vadd.f32 %v13086_v8, %v8831_v10  ;;  %v6182_v17 = vmul.f32 0.088388346, %v6120_v57 }
 0xa77   : > { %v6122_v33 = vpop.f32.mrf.mxu0 }
 0xa78   : > { %v13415_v4 = vmul.f32 0.088388346, %v6131_v6  ;;  %v6123_v53 = vadd.f32 %v13086_v8, %v6122_v33  ;;  %5161 = vmax.xlane.f32.xlu0 %v13392_v29  ;;  %5409 = vxpose.xlu1.b32.cont [10/16] %v13392_v29, 128 }
 0xa7a   : > { %v6514_v34 = vpack.c.bf16 %v13415_v4, %v13413_v52  ;;  %v6183_v28 = vmul.f32 0.088388346, %v6123_v53 }
 0xa7c   : > { %v6513_v31 = vpack.c.bf16 %v6183_v28, %v6182_v17  ;;  %5163 = vmax.xlane.f32.xlu0 %v13384_v46  ;;  %5410 = vxpose.xlu1.b32.cont [11/16] %v13384_v46, 128 }
 0xa7e   : > { %8956 = vmatprep.mubr.bf16.mxu0 %v6513_v31 }
 0xa80   : > { %5165 = vmax.xlane.f32.xlu0 %v13390_v37  ;;  %5411 = vxpose.xlu1.b32.cont [12/16] %v13390_v37, 128 }
 0xa84   : > { %5167 = vmax.xlane.f32.xlu0 %v13398_v51  ;;  %5412 = vxpose.xlu1.b32.cont [13/16] %v13398_v51, 128 }
 0xa88   : > { %5169 = vmax.xlane.f32.xlu0 %v13404_v63  ;;  %5413 = vxpose.xlu1.b32.cont [14/16] %v13404_v63, 128 }
 0xa8c   : > { %5171 = vmax.xlane.f32.xlu0 %v13396_v19  ;;  %5414 = vxpose.xlu1.b32.cont [15/16] %v13396_v19, 128 }
 0xa90   : > { %5173 = vmax.xlane.f32.xlu0 %v13402_v23  ;;  %5415 = vxpose.xlu1.b32.end [16/16] %v13402_v23, 128 }
 0xad0   : > { %v13434_v8 = vpop.trf.xlu1 }
 0xad1   : > { %5432 = vmax.xlane.f32.xlu0 %v13434_v8 }
 0xad4   : > { %v13437_v45 = vpop.trf.xlu1 }
 0xad5   : > { %5434 = vmax.xlane.f32.xlu0 %v13437_v45 }
 0xad8   : > { %v13440_v56 = vpop.trf.xlu1 }
 0xad9   : > { %5436 = vmax.xlane.f32.xlu0 %v13440_v56 }
 0xadc   : > { %v13443_v35 = vpop.trf.xlu1 }
 0xadd   : > { %v5144_v2 = vpop.xlane.xlu0 %5143  ;;  %5438 = vmax.xlane.f32.xlu0 %v13443_v35 }
 0xade   : > { %v5175_v0 = vsub.f32 %v13362_v1, %v5144_v2 }
 0xae0   : > { %v13446_v62 = vpop.trf.xlu1  ;;  %v5191_v50 = vmul.f32 1.442695, %v5175_v0 }
 0xae1   : > { %v5146_v24 = vpop.xlane.xlu0 %5145  ;;  %5440 = vmax.xlane.f32.xlu0 %v13446_v62 }
 0xae2   : > { %v5176_v12 = vsub.f32 %v13368_v38, %v5146_v24 }
 0xae4   : > { %v13449_v3 = vpop.trf.xlu1 }
 0xae5   : > { %v5148_v5 = vpop.xlane.xlu0 %5147  ;;  %5442 = vmax.xlane.f32.xlu0 %v13449_v3 }
 0xae6   : > { %v5177_v1 = vsub.f32 %v13360_v16, %v5148_v5 }
 0xae8   : > { %v13452_v21 = vpop.trf.xlu1  ;;  %v5195_v38 = vmul.f32 1.442695, %v5177_v1 }
 0xae9   : > { %v5150_v20 = vpop.xlane.xlu0 %5149  ;;  %5444 = vmax.xlane.f32.xlu0 %v13452_v21 }
 0xaea   : > { %v5178_v28 = vsub.f32 %v13366_v59, %v5150_v20 }
 0xaec   : > { %v13455_v40 = vpop.trf.xlu1  ;;  %v5197_v16 = vmul.f32 1.442695, %v5178_v28 }
 0xaed   : > { %v5152_v30 = vpop.xlane.xlu0 %5151  ;;  %5446 = vmax.xlane.f32.xlu0 %v13455_v40 }
 0xaee   : > { %v5179_v5 = vsub.f32 %v13374_v32, %v5152_v30 }
 0xaf0   : > { %v13458_v11 = vpop.trf.xlu1  ;;  %v5199_v59 = vmul.f32 1.442695, %v5179_v5 }
 0xaf1   : > { %v5154_v42 = vpop.xlane.xlu0 %5153  ;;  %5448 = vmax.xlane.f32.xlu0 %v13458_v11 }
 0xaf2   : > { %v5180_v20 = vsub.f32 %v13380_v41, %v5154_v42 }
 0xaf4   : > { %v13461_v44 = vpop.trf.xlu1 }
 0xaf5   : > { %v5156_v43 = vpop.xlane.xlu0 %5155  ;;  %5450 = vmax.xlane.f32.xlu0 %v13461_v44 }
 0xaf8   : > { %v13464_v13 = vpop.trf.xlu1 }
 0xaf9   : > { %v5158_v36 = vpop.xlane.xlu0 %5157  ;;  %5452 = vmax.xlane.f32.xlu0 %v13464_v13 }
 0xafa   : > { %v5182_v15 = vsub.f32 %v13378_v25, %v5158_v36  ;;  %v5193_v25 = vmul.f32 1.442695, %v5176_v12  ;;  %v5181_v12 = vsub.f32 %v13372_v14, %v5156_v43 }
 0xafc   : > { %v5205_v49 = vmul.f32 1.442695, %v5182_v15  ;;  %v13469_v9 = vpop.trf.xlu1  ;;  %v5203_v41 = vmul.f32 1.442695, %v5181_v12 }
 0xafd   : > { %v5160_v61 = vpop.xlane.xlu0 %5159  ;;  %5454 = vmax.xlane.f32.xlu0 %v13469_v9 }
 0xafe   : > { %9365 = vpow2.f32 %v5205_v49  ;;  %v5183_v42 = vsub.f32 %v13386_v48, %v5160_v61 }
 0xaff   : > { %9367 = vpow2.f32 %v5191_v50  ;;  %v5201_v50 = vmul.f32 1.442695, %v5180_v20 }
 0xb00   : > { %v13473_v10 = vpop.trf.xlu1 }
 0xb01   : > { %v5162_v57 = vpop.xlane.xlu0 %5161  ;;  %5456 = vmax.xlane.f32.xlu1 %v13473_v10 }
 0xb02   : > { %v5184_v6 = vsub.f32 %v13392_v29, %v5162_v57 }
 0xb04   : > { %v5209_v33 = vmul.f32 1.442695, %v5184_v6  ;;  %v13478_v53 = vpop.trf.xlu1 }
 0xb05   : > { %v5164_v17 = vpop.xlane.xlu0 %5163  ;;  %5458 = vmax.xlane.f32.xlu0 %v13478_v53 }
 0xb06   : > { %9369 = vpow2.f32 %v5209_v33  ;;  %v5207_v33 = vmul.f32 1.442695, %v5183_v42 }
 0xb07   : > { %9371 = vpow2.f32 %v5193_v25 }
 0xb08   : > { %v13482_v31 = vpop.trf.xlu1  ;;  %9373 = vpow2.f32 %v5195_v38  ;;  %v5185_v38 = vsub.f32 %v13384_v46, %v5164_v17 }
 0xb09   : > { %v5166_v2 = vpop.xlane.xlu0 %5165  ;;  %5460 = vmax.xlane.f32.xlu0 %v13482_v31 }
 0xb0a   : > { %v5186_v29 = vsub.f32 %v13390_v37, %v5166_v2  ;;  %v5211_v48 = vmul.f32 1.442695, %v5185_v38 }
 0xb0b   : > { %v13486_v24 = vpop.eup %9365 }
 0xb0c   : > { %v5213_v36 = vmul.f32 1.442695, %v5186_v29  ;;  %5237 = vadd.xlane.f32.xlu1 %v13486_v24  ;;  %v13490_v15 = vpop.trf.xlu1  ;;  %v13494_v37 = vpop.eup %9367 }
 0xb0d   : > { %v5168_v0 = vpop.xlane.xlu0 %5167  ;;  %5462 = vmax.xlane.f32.xlu0 %v13490_v15 }
 0xb0e   : > { %9375 = vpow2.f32 %v5213_v36  ;;  %v5187_v61 = vsub.f32 %v13398_v51, %v5168_v0 }
 0xb0f   : > { %9377 = vpow2.f32 %v5197_v16 }
 0xb10   : > { %9379 = vpow2.f32 %v5199_v59  ;;  %v5215_v46 = vmul.f32 1.442695, %v5187_v61 }
 0xb11   : > { %v5170_v49 = vpop.xlane.xlu0 %5169  ;;  %5223 = vadd.xlane.f32.xlu0 %v13494_v37 }
 0xb12   : > { %v5188_v32 = vsub.f32 %v13404_v63, %v5170_v49 }
 0xb13   : > { %v13498_v30 = vpop.eup %9369 }
 0xb14   : > { %v13501_v57 = vpop.eup %9371  ;;  %v5217_v6 = vmul.f32 1.442695, %v5188_v32  ;;  %5241 = vadd.xlane.f32.xlu1 %v13498_v30 }
 0xb15   : > { %v5172_v25 = vpop.xlane.xlu0 %5171  ;;  %5225 = vadd.xlane.f32.xlu0 %v13501_v57  ;;  %v13506_v63 = vpop.eup %9373 }
 0xb16   : > { %9381 = vpow2.f32 %v5217_v6  ;;  %v5189_v17 = vsub.f32 %v13396_v19, %v5172_v25 }
 0xb17   : > { %9383 = vpow2.f32 %v5201_v50 }
 0xb18   : > { %9385 = vpow2.f32 %v5203_v41  ;;  %v5219_v5 = vmul.f32 1.442695, %v5189_v17 }
 0xb19   : > { %v5174_v1 = vpop.xlane.xlu0 %5173  ;;  %5227 = vadd.xlane.f32.xlu0 %v13506_v63 }
 0xb1a   : > { %v5190_v14 = vsub.f32 %v13402_v23, %v5174_v1 }
 0xb1b   : > { %v13510_v43 = vpop.eup %9375 }
 0xb1c   : > { %v13513_v28 = vpop.eup %9377  ;;  %v5221_v2 = vmul.f32 1.442695, %v5190_v14  ;;  %5245 = vadd.xlane.f32.xlu1 %v13510_v43 }
 0xb1d   : > { %5229 = vadd.xlane.f32.xlu0 %v13513_v28  ;;  %v13518_v29 = vpop.eup %9379 }
 0xb1e   : > { %9387 = vpow2.f32 %v5221_v2 }
 0xb1f   : > { %9389 = vpow2.f32 %v5207_v33 }
 0xb20   : > { %9391 = vpow2.f32 %v5211_v48 }
 0xb21   : > { %5231 = vadd.xlane.f32.xlu0 %v13518_v29  ;;  %9393 = vpow2.f32 %v5215_v46 }
 0xb22   : > { %9395 = vpow2.f32 %v5219_v5 }
 0xb23   : > { %v13521_v23 = vpop.eup %9381 }
 0xb24   : > { %v13524_v16 = vpop.eup %9383  ;;  %5249 = vadd.xlane.f32.xlu1 %v13521_v23 }
 0xb25   : > { %5233 = vadd.xlane.f32.xlu0 %v13524_v16  ;;  %v13528_v36 = vpop.eup %9385 }
 0xb29   : > { %5235 = vadd.xlane.f32.xlu0 %v13528_v36 }
 0xb2b   : > { %v13531_v51 = vpop.eup %9387 }
 0xb2c   : > { %v13533_v0 = vpop.eup %9389  ;;  %5253 = vadd.xlane.f32.xlu1 %v13531_v51 }
 0xb2d   : > { %5239 = vadd.xlane.f32.xlu0 %v13533_v0  ;;  %v13537_v19 = vpop.eup %9391 }
 0xb2e   : > { %v13540_v59 = vpop.eup %9393 }
 0xb2f   : > { %v13543_v20 = vpop.eup %9395 }
 0xb31   : > { %5243 = vadd.xlane.f32.xlu0 %v13537_v19 }
 0xb35   : > { %5247 = vadd.xlane.f32.xlu0 %v13540_v59 }
 0xb39   : > { %5251 = vadd.xlane.f32.xlu0 %v13543_v20 }
 0xb5a   : > { %v5433_v49 = vpop.xlane.xlu0 %5432 }
 0xb5b   : > { %v5464_v32 = vsub.f32 %v13434_v8, %v5433_v49 }
 0xb5d   : > { %v5480_v50 = vmul.f32 1.442695, %v5464_v32 }
 0xb5e   : > { %v5435_v12 = vpop.xlane.xlu0 %5434 }
 0xb5f   : > { %9397 = vpow2.f32 %v5480_v50  ;;  %v5465_v6 = vsub.f32 %v13437_v45, %v5435_v12 }
 0xb61   : > { %v5482_v25 = vmul.f32 1.442695, %v5465_v6 }
 0xb62   : > { %v5437_v41 = vpop.xlane.xlu0 %5436 }
 0xb63   : > { %9399 = vpow2.f32 %v5482_v25  ;;  %v5466_v42 = vsub.f32 %v13440_v56, %v5437_v41 }
 0xb65   : > { %v5484_v1 = vmul.f32 1.442695, %v5466_v42 }
 0xb66   : > { %v5439_v14 = vpop.xlane.xlu0 %5438 }
 0xb67   : > { %9401 = vpow2.f32 %v5484_v1  ;;  %v5467_v33 = vsub.f32 %v13443_v35, %v5439_v14 }
 0xb69   : > { %v5486_v38 = vmul.f32 1.442695, %v5467_v33 }
 0xb6a   : > { %v5441_v2 = vpop.xlane.xlu0 %5440 }
 0xb6b   : > { %9403 = vpow2.f32 %v5486_v38  ;;  %v5468_v8 = vsub.f32 %v13446_v62, %v5441_v2 }
 0xb6c   : > { %v13551_v48 = vpop.eup %9397 }
 0xb6d   : > { %v5488_v61 = vmul.f32 1.442695, %v5468_v8  ;;  %5512 = vadd.xlane.f32.xlu0 %v13551_v48 }
 0xb6e   : > { %v5443_v45 = vpop.xlane.xlu0 %5442 }
 0xb6f   : > { %9405 = vpow2.f32 %v5488_v61  ;;  %v5469_v46 = vsub.f32 %v13449_v3, %v5443_v45 }
 0xb70   : > { %v13555_v56 = vpop.eup %9399 }
 0xb71   : > { %v5490_v17 = vmul.f32 1.442695, %v5469_v46  ;;  %5514 = vadd.xlane.f32.xlu1 %v13555_v56 }
 0xb72   : > { %v5445_v35 = vpop.xlane.xlu0 %5444 }
 0xb73   : > { %9407 = vpow2.f32 %v5490_v17  ;;  %v5470_v5 = vsub.f32 %v13452_v21, %v5445_v35 }
 0xb74   : > { %v13559_v49 = vpop.eup %9401 }
 0xb75   : > { %v5492_v62 = vmul.f32 1.442695, %v5470_v5  ;;  %5516 = vadd.xlane.f32.xlu0 %v13559_v49 }
 0xb76   : > { %v5447_v32 = vpop.xlane.xlu0 %5446 }
 0xb77   : > { %9409 = vpow2.f32 %v5492_v62  ;;  %v5471_v50 = vsub.f32 %v13455_v40, %v5447_v32 }
 0xb78   : > { %v13563_v12 = vpop.eup %9403 }
 0xb79   : > { %v5494_v3 = vmul.f32 1.442695, %v5471_v50  ;;  %5518 = vadd.xlane.f32.xlu1 %v13563_v12 }
 0xb7a   : > { %v5449_v6 = vpop.xlane.xlu0 %5448 }
 0xb7b   : > { %9411 = vpow2.f32 %v5494_v3  ;;  %v5472_v25 = vsub.f32 %v13458_v11, %v5449_v6 }
 0xb7c   : > { %v13567_v41 = vpop.eup %9405 }
 0xb7d   : > { %v5496_v21 = vmul.f32 1.442695, %v5472_v25  ;;  %5520 = vadd.xlane.f32.xlu0 %v13567_v41 }
 0xb7e   : > { %v5451_v42 = vpop.xlane.xlu0 %5450 }
 0xb7f   : > { %9413 = vpow2.f32 %v5496_v21  ;;  %v5473_v1 = vsub.f32 %v13461_v44, %v5451_v42 }
 0xb80   : > { %v13571_v14 = vpop.eup %9407 }
 0xb81   : > { %v5498_v40 = vmul.f32 1.442695, %v5473_v1  ;;  %5522 = vadd.xlane.f32.xlu1 %v13571_v14 }
 0xb82   : > { %v5453_v33 = vpop.xlane.xlu0 %5452 }
 0xb83   : > { %9415 = vpow2.f32 %v5498_v40  ;;  %v5474_v38 = vsub.f32 %v13464_v13, %v5453_v33 }
 0xb84   : > { %v13575_v2 = vpop.eup %9409 }
 0xb85   : > { %v5500_v11 = vmul.f32 1.442695, %v5474_v38  ;;  %5524 = vadd.xlane.f32.xlu0 %v13575_v2 }
 0xb86   : > { %v5455_v8 = vpop.xlane.xlu0 %5454 }
 0xb87   : > { %9417 = vpow2.f32 %v5500_v11  ;;  %v5475_v61 = vsub.f32 %v13469_v9, %v5455_v8 }
 0xb88   : > { %v13579_v45 = vpop.eup %9411 }
 0xb89   : > { %v5502_v44 = vmul.f32 1.442695, %v5475_v61  ;;  %5526 = vadd.xlane.f32.xlu1 %v13579_v45 }
 0xb8a   : > { %v5457_v46 = vpop.xlane.xlu1 %5456 }
 0xb8b   : > { %9419 = vpow2.f32 %v5502_v44  ;;  %v5476_v17 = vsub.f32 %v13473_v10, %v5457_v46 }
 0xb8c   : > { %v13583_v35 = vpop.eup %9413 }
 0xb8d   : > { %v5504_v13 = vmul.f32 1.442695, %v5476_v17  ;;  %5528 = vadd.xlane.f32.xlu0 %v13583_v35 }
 0xb8e   : > { %v5459_v5 = vpop.xlane.xlu0 %5458 }
 0xb8f   : > { %9421 = vpow2.f32 %v5504_v13  ;;  %v5477_v62 = vsub.f32 %v13478_v53, %v5459_v5 }
 0xb90   : > { %v13587_v32 = vpop.eup %9415 }
 0xb91   : > { %v5506_v9 = vmul.f32 1.442695, %v5477_v62  ;;  %5530 = vadd.xlane.f32.xlu1 %v13587_v32 }
 0xb92   : > { %v5461_v50 = vpop.xlane.xlu0 %5460 }
 0xb93   : > { %9423 = vpow2.f32 %v5506_v9  ;;  %v5478_v3 = vsub.f32 %v13482_v31, %v5461_v50 }
 0xb94   : > { %v13591_v6 = vpop.eup %9417 }
 0xb95   : > { %v5508_v10 = vmul.f32 1.442695, %v5478_v3  ;;  %5532 = vadd.xlane.f32.xlu0 %v13591_v6  ;;  %v5238_v5 = vpop.xlane.xlu1 %5237 }
 0xb96   : > { %v5463_v25 = vpop.xlane.xlu0 %5462 }
 0xb97   : > { %9425 = vpow2.f32 %v5508_v10  ;;  %v5479_v21 = vsub.f32 %v13490_v15, %v5463_v25 }
 0xb98   : > { %v13595_v42 = vpop.eup %9419 }
 0xb99   : > { %v5510_v53 = vmul.f32 1.442695, %v5479_v21  ;;  %5534 = vadd.xlane.f32.xlu1 %v13595_v42  ;;  %v13615_v21 = vld [vmem:[%s14553_s11] ss:$0 sm:$0xff] }
 0xb9a   : > { %v5224_v1 = vpop.xlane.xlu0 %5223 }
 0xb9b   : > { %9427 = vpow2.f32 %v5510_v53 }
 0xb9c   : > { %v13598_v40 = vpop.eup %9421  ;;  %9429 = vrcp.f32 %v5224_v1 }
 0xb9d   : > { %5536 = vadd.xlane.f32.xlu0 %v13598_v40  ;;  %v5242_v3 = vpop.xlane.xlu1 %5241 }
 0xb9e   : > { %v5226_v31 = vpop.xlane.xlu0 %5225 }
 0xb9f   : > { %9431 = vrcp.f32 %v5226_v31 }
 0xba0   : > { %v13601_v33 = vpop.eup %9423 }
 0xba1   : > { %5538 = vadd.xlane.f32.xlu1 %v13601_v33 }
 0xba2   : > { %v5228_v38 = vpop.xlane.xlu0 %5227 }
 0xba3   : > { %9433 = vrcp.f32 %v5228_v38 }
 0xba4   : > { %v13604_v15 = vpop.eup %9425 }
 0xba5   : > { %5540 = vadd.xlane.f32.xlu0 %v13604_v15  ;;  %v5246_v31 = vpop.xlane.xlu1 %5245 }
 0xba6   : > { %v5230_v11 = vpop.xlane.xlu0 %5229 }
 0xba7   : > { %9435 = vrcp.f32 %v5230_v11 }
 0xba8   : > { %v13607_v8 = vpop.eup %9427 }
 0xba9   : > { %5542 = vadd.xlane.f32.xlu1 %v13607_v8  ;;  %v9430_v61 = vpop.eup %9429 }
 0xbaa   : > { %v5232_v44 = vpop.xlane.xlu0 %5231  ;;  %v5271_v17 = vmul.f32 %v9430_v61, %v13494_v37  ;;  %v4911_v37 = vadd.f32 %v13615_v21, %v13325_v47 }
 0xbab   : > { %9437 = vrcp.f32 %v5232_v44 }
 0xbac   : > { %v9432_v46 = vpop.eup %9431 }
 0xbad   : > { %v5272_v13 = vmul.f32 %v9432_v46, %v13501_v57  ;;  %v4914_v57 = vadd.f32 %v13615_v21, %v13358_v39  ;;  %v5250_v46 = vpop.xlane.xlu1 %5249 }
 0xbae   : > { %v5234_v62 = vpop.xlane.xlu0 %5233 }
 0xbaf   : > { %9439 = vrcp.f32 %v5234_v62  ;;  %v5287_v9 = vpack.c.bf16 %v5272_v13, %v5271_v17  ;;  %v5590_v61 = vpack.c.bf16 %v4914_v57, %v4911_v37 }
 0xbb0   : > { %9441 = vrcp.f32 %v5238_v5  ;;  %v9434_v50 = vpop.eup %9433 }
 0xbb1   : > { %8764 = vmatprep.mubr.bf16.mxu1 %v5287_v9  ;;  %v5273_v53 = vmul.f32 %v9434_v50, %v13506_v63 }
 0xbb2   : > { %v5236_v10 = vpop.xlane.xlu0 %5235 }
 0xbb3   : > { %9443 = vrcp.f32 %v5236_v10  ;;  %v13634_v10 = vld [vmem:[%s10160_s28 + $0x188] sm:$0xff] }
 0xbb4   : > { %v9436_v25 = vpop.eup %9435  ;;  %9445 = vrcp.f32 %v5242_v3  ;;  %v13631_v3 = vld [vmem:[%s10160_s28 + $0x180] sm:$0xff] }
 0xbb5   : > { %v5274_v1 = vmul.f32 %v9436_v25, %v13513_v28  ;;  %v5254_v13 = vpop.xlane.xlu1 %5253 }
 0xbb6   : > { %v5240_v38 = vpop.xlane.xlu0 %5239 }
 0xbb7   : > { %v5288_v11 = vpack.c.bf16 %v5274_v1, %v5273_v53  ;;  %9447 = vrcp.f32 %v5240_v38  ;;  %v5971_v53 = vmul.f32 %v13631_v3, %v13631_v3  ;;  %v5972_v1 = vmul.f32 %v13634_v10, %v13634_v10 }
 0xbb8   : > { %9449 = vrcp.f32 %v5246_v31  ;;  %v9438_v44 = vpop.eup %9437  ;;  %v13647_v31 = vld [vmem:[%s10160_s28 + $0x190] sm:$0xff] }
 0xbb9   : > { %8765 = vmatmul.mubr.bf16.vlgmr.msra.gmra.mxu1 %v5288_v11  ;;  %v5275_v63 = vmul.f32 %v9438_v44, %v13518_v29 }
 0xbba   : > { %8781 = vmatpush3.bf16.msra.mxu1 %v13339_v7  ;;  %v5244_v47 = vpop.xlane.xlu0 %5243 }
 0xbbb   : > { %8782 = vmatprep.subr.bf16.mxu1 %v5590_v61  ;;  %9451 = vrcp.f32 %v5244_v47  ;;  %v5987_v47 = vadd.f32 %v5972_v1, %v5971_v53 }
 0xbbc   : > { %v9440_v39 = vpop.eup %9439  ;;  %9453 = vrcp.f32 %v5250_v46  ;;  %v5973_v46 = vmul.f32 %v13647_v31, %v13647_v31 }
 0xbbd   : > { %v5276_v28 = vmul.f32 %v9440_v39, %v13524_v16  ;;  %v9442_v17 = vpop.eup %9441 }
 0xbbe   : > { %8783 = vmatpush3.bf16.msra.mxu1 %v5590_v61  ;;  %v5248_v5 = vpop.xlane.xlu0 %5247  ;;  %v5278_v50 = vmul.f32 %v9442_v17, %v13486_v24 }
 0xbbf   : > { %8784 = vmatprep.subr.bf16.mxu1 %v13064_v54  ;;  %9455 = vrcp.f32 %v5248_v5  ;;  %v5289_v62 = vpack.c.bf16 %v5276_v28, %v5275_v63  ;;  %v5988_v5 = vadd.f32 %v5987_v47, %v5973_v46 }
 0xbc0   : > { %v9444_v7 = vpop.eup %9443  ;;  %9457 = vrcp.f32 %v5254_v13 }
 0xbc1   : > { %8768 = vmatprep.mubr.bf16.mxu1 %v5289_v62  ;;  %v5277_v9 = vmul.f32 %v9444_v7, %v13528_v36  ;;  %v9446_v29 = vpop.eup %9445 }
 0xbc2   : > { %8785 = vmatpush3.bf16.msra.mxu1 %v13064_v54  ;;  %v5252_v16 = vpop.xlane.xlu0 %5251  ;;  %v5280_v36 = vmul.f32 %v9446_v29, %v13498_v30  ;;  %v5949_v54 = vadd.f32 %v13634_v10, %v13631_v3 }
 0xbc3   : > { %8786 = vmatprep.subr.bf16.mxu1 %v13067_v27  ;;  %9459 = vrcp.f32 %v5252_v16  ;;  %v5290_v25 = vpack.c.bf16 %v5278_v50, %v5277_v9 }
 0xbc4   : > { %v9448_v37 = vpop.eup %9447  ;;  %v5950_v44 = vadd.f32 %v13647_v31, %v5949_v54  ;;  %v13697_v54 = vld [vmem:[%s10160_s28 + $0x1b8] sm:$0xff] }
 0xbc5   : > { %8769 = vmatmul.mubr.bf16.gmra.mxu1 %v5290_v25  ;;  %v5279_v57 = vmul.f32 %v9448_v37, %v13533_v0  ;;  %v9450_v24 = vpop.eup %9449  ;;  %v13685_v37 = vld [vmem:[%s10160_s28 + $0x1b0] sm:$0xff]  ;;  %v5978_v53 = vmul.f32 %v13697_v54, %v13697_v54 }
 0xbc6   : > { %8787 = vmatpush3.bf16.msra.mxu1 %v13067_v27  ;;  %v5282_v11 = vmul.f32 %v9450_v24, %v13510_v43  ;;  %v13657_v27 = vld [vmem:[%s10160_s28 + $0x198] sm:$0xff] }
 0xbc7   : > { %8788 = vmatprep.subr.bf16.mxu1 %v13054_v60  ;;  %v5291_v0 = vpack.c.bf16 %v5280_v36, %v5279_v57  ;;  %v5951_v17 = vadd.f32 %v13657_v27, %v5950_v44  ;;  %v5974_v13 = vmul.f32 %v13657_v27, %v13657_v27  ;;  %v5977_v36 = vmul.f32 %v13685_v37, %v13685_v37 }
 0xbc8   : > { %v9452_v38 = vpop.eup %9451 }
 0xbc9   : > { %8772 = vmatprep.mubr.bf16.mxu1 %v5291_v0  ;;  %v5281_v30 = vmul.f32 %v9452_v38, %v13537_v19  ;;  %v9454_v61 = vpop.eup %9453  ;;  %v5989_v29 = vadd.f32 %v5988_v5, %v5974_v13  ;;  %v13703_v0 = vld [vmem:[%s10160_s28 + $0x1c0] sm:$0xff] }
 0xbca   : > { %8789 = vmatpush3.bf16.msra.mxu1 %v13054_v60  ;;  %v5284_v43 = vmul.f32 %v9454_v61, %v13521_v23  ;;  %v13667_v60 = vld [vmem:[%s10160_s28 + $0x1a0] sm:$0xff]  ;;  %v13709_v61 = vld [vmem:[%s10160_s28 + $0x1c8] sm:$0xff] }
 0xbcb   : > { %8790 = vmatprep.subr.bf16.mxu1 %v13057_v55  ;;  %v5292_v39 = vpack.c.bf16 %v5282_v11, %v5281_v30  ;;  %v5952_v9 = vadd.f32 %v13667_v60, %v5951_v17  ;;  %v5975_v50 = vmul.f32 %v13667_v60, %v13667_v60  ;;  %v5979_v30 = vmul.f32 %v13703_v0, %v13703_v0 }
 0xbcc   : > { %v9456_v63 = vpop.eup %9455  ;;  %v5980_v46 = vmul.f32 %v13709_v61, %v13709_v61 }
 0xbcd   : > { %8773 = vmatmul.mubr.bf16.gmra.mxu1 %v5292_v39  ;;  %v5283_v19 = vmul.f32 %v9456_v63, %v13540_v59  ;;  %v9458_v28 = vpop.eup %9457  ;;  %v5990_v25 = vadd.f32 %v5989_v29, %v5975_v50  ;;  %v13715_v39 = vld [vmem:[%s10160_s28 + $0x1d0] sm:$0xff] }
 0xbce   : > { %8791 = vmatpush3.bf16.msra.mxu1 %v13057_v55  ;;  %v5286_v59 = vmul.f32 %v9458_v28, %v13531_v51  ;;  %v13677_v55 = vld [vmem:[%s10160_s28 + $0x1a8] sm:$0xff]  ;;  %v13721_v28 = vld [vmem:[%s10160_s28 + $0x1d8] sm:$0xff] }
 0xbcf   : > { %8792 = vmatprep.subr.bf16.mxu1 %v13044_v22  ;;  %v5293_v62 = vpack.c.bf16 %v5284_v43, %v5283_v19  ;;  %v5976_v51 = vmul.f32 %v13677_v55, %v13677_v55  ;;  %v5981_v19 = vmul.f32 %v13715_v39, %v13715_v39  ;;  %v5982_v13 = vmul.f32 %v13721_v28, %v13721_v28 }
 0xbd0   : > { %v9460_v7 = vpop.eup %9459 }
 0xbd1   : > { %8776 = vmatprep.mubr.bf16.mxu1 %v5293_v62  ;;  %v5285_v23 = vmul.f32 %v9460_v7, %v13543_v20  ;;  %v5953_v20 = vadd.f32 %v13677_v55, %v5952_v9  ;;  %v5991_v24 = vadd.f32 %v5990_v25, %v5976_v51  ;;  %v13727_v62 = vld [vmem:[%s10160_s28 + $0x1e0] sm:$0xff]  ;;  %v13733_v9 = vld [vmem:[%s10160_s28 + $0x1e8] sm:$0xff]  ;;  %v13739_v51 = vld [vmem:[%s10160_s28 + $0x1f0] sm:$0xff] }
 0xbd2   : > { %8793 = vmatpush3.bf16.msra.mxu1 %v13044_v22  ;;  %v13690_v22 = vld [vmem:[%s14550_s8 + $0x38] sm:$0xff]   ;;  %v5984_v29 = vmul.f32 %v13733_v9, %v13733_v9 }
 0xbd3   : > { %8794 = vmatprep.subr.bf16.mxu1 %v13047_v18  ;;  %v5294_v16 = vpack.c.bf16 %v5286_v59, %v5285_v23  ;;  %v5954_v57 = vadd.f32 %v13685_v37, %v5953_v20  ;;  %v5992_v1 = vadd.f32 %v5991_v24, %v5977_v36  ;;  %v5983_v23 = vmul.f32 %v13727_v62, %v13727_v62 }
 0xbd5   : > { %8777 = vmatmul.mubr.bf16.gmra.mxu1 %v5294_v16  ;;  %v5993_v11 = vadd.f32 %v5992_v1, %v5978_v53 }
 0xbd6   : > { %8795 = vmatpush3.bf16.msra.mxu1 %v13047_v18  ;;  %v5955_v18 = vadd.f32 %v13697_v54, %v5954_v57  ;;  %v5985_v57 = vmul.f32 %v13739_v51, %v13739_v51 }
 0xbd7   : > { %8844 = vmatprep.subr.bf16.mxu1 %v13690_v22  ;;  %v5994_v47 = vadd.f32 %v5993_v11, %v5979_v30 }
 0xbd8   : > { %v5956_v38 = vadd.f32 %v13703_v0, %v5955_v18  ;;  %v13745_v18 = vld [vmem:[%s10160_s28 + $0x1f8] sm:$0xff] }
 0xbd9   : > { %v5995_v43 = vadd.f32 %v5994_v47, %v5980_v46  ;;  %v5986_v1 = vmul.f32 %v13745_v18, %v13745_v18 }
 0xbda   : > { %v5957_v44 = vadd.f32 %v13709_v61, %v5956_v38 }
 0xbdb   : > { %v5996_v5 = vadd.f32 %v5995_v43, %v5981_v19 }
 0xbdc   : > { %v5958_v63 = vadd.f32 %v13715_v39, %v5957_v44 }
 0xbdd   : > { %v5997_v59 = vadd.f32 %v5996_v5, %v5982_v13 }
 0xbde   : > { %v5959_v17 = vadd.f32 %v13721_v28, %v5958_v63 }
 0xbdf   : > { %v5998_v16 = vadd.f32 %v5997_v59, %v5983_v23 }
 0xbe0   : > { %v5960_v7 = vadd.f32 %v13727_v62, %v5959_v17 }
 0xbe1   : > { %v5999_v36 = vadd.f32 %v5998_v16, %v5984_v29 }
 0xbe2   : > { %v5961_v50 = vadd.f32 %v13733_v9, %v5960_v7 }
 0xbe3   : > { %v6000_v38 = vadd.f32 %v5999_v36, %v5985_v57 }
 0xbe4   : > { %v5962_v25 = vadd.f32 %v13739_v51, %v5961_v50 }
 0xbe5   : > { %v6001_v44 = vadd.f32 %v6000_v38, %v5986_v1 }
 0xbe6   : > { %v5963_v53 = vadd.f32 %v13745_v18, %v5962_v25 }
 0xbe7   : > { %v6002_v19 = vrot.slane %v6001_v44, 4 }
 0xbe8   : > { %v5964_v11 = vrot.slane %v5963_v53, 4 }
 0xbe9   : > { %v6003_v23 = vadd.f32 %v6002_v19, %v6001_v44 }
 0xbea   : > { %v5965_v63 = vadd.f32 %v5964_v11, %v5963_v53 }
 0xbec   : > { %v5966_v7 = vrot.slane %v5965_v63, 2 }
 0xbee   : > { %v5967_v16 = vadd.f32 %v5966_v7, %v5965_v63 }
 0xbf0   : > { %v5968_v53 = vrot.slane %v5967_v16, 1 }
 0xbf6   : > { %v5513_v20 = vpop.xlane.xlu0 %5512 }
 0xbf7   : > { %9461 = vrcp.f32 %v5513_v20  ;;  %v6004_v20 = vrot.slane %v6003_v23, 2 }
 0xbfa   : > { %v5515_v24 = vpop.xlane.xlu1 %5514 }
 0xbfb   : > { %9463 = vrcp.f32 %v5515_v24 }
 0xbfe   : > { %v5517_v30 = vpop.xlane.xlu0 %5516 }
 0xbff   : > { %9465 = vrcp.f32 %v5517_v30  ;;  %v5969_v30 = vadd.f32 %v5968_v53, %v5967_v16 }
 0xc01   : > { %v13760_v63 = vmul.f32 0.0078125, %v5969_v30 }
 0xc02   : > { %v5519_v46 = vpop.xlane.xlu1 %5518 }
 0xc03   : > { %9467 = vrcp.f32 %v5519_v46  ;;  %v9837_v46 = vld [vmem:[%s14550_s8 + $0x30] sm:$0xff]  }
 0xc04   : > { %v9462_v47 = vpop.eup %9461 }
 0xc05   : > { %v5560_v13 = vmul.f32 %v9462_v47, %v13551_v48  ;;  %v6005_v48 = vadd.f32 %v6004_v20, %v6003_v23 }
 0xc06   : > { %v5521_v43 = vpop.xlane.xlu0 %5520 }
 0xc07   : > { %9469 = vrcp.f32 %v5521_v43  ;;  %v6006_v11 = vrot.slane %v6005_v48, 1 }
 0xc08   : > { %v9464_v17 = vpop.eup %9463 }
 0xc09   : > { %v5561_v5 = vmul.f32 %v9464_v17, %v13555_v56  ;;  %v6007_v19 = vadd.f32 %v6006_v11, %v6005_v48 }
 0xc0a   : > { %v5523_v59 = vpop.xlane.xlu1 %5522 }
 0xc0b   : > { %9471 = vrcp.f32 %v5523_v59  ;;  %v5576_v50 = vpack.c.bf16 %v5561_v5, %v5560_v13  ;;  %v6008_v5 = vmul.f32 0.0078125, %v6007_v19 }
 0xc0c   : > { %v9466_v29 = vpop.eup %9465 }
 0xc0d   : > { %8796 = vmatprep.mubr.bf16.mxu1 %v5576_v50  ;;  %v5562_v36 = vmul.f32 %v9466_v29, %v13559_v49 }
 0xc0e   : > { %v5525_v25 = vpop.xlane.xlu0 %5524 }
 0xc0f   : > { %9473 = vrcp.f32 %v5525_v25  ;;  %v9840_v25 = vld [vmem:[%s14550_s8 + $0x18] sm:$0xff]  }
 0xc10   : > { %v9468_v57 = vpop.eup %9467 }
 0xc11   : > { %v5563_v24 = vmul.f32 %v9468_v57, %v13563_v12 }
 0xc12   : > { %v5527_v1 = vpop.xlane.xlu1 %5526 }
 0xc13   : > { %9475 = vrcp.f32 %v5527_v1  ;;  %v5577_v56 = vpack.c.bf16 %v5563_v24, %v5562_v36 }
 0xc14   : > { %v9470_v38 = vpop.eup %9469 }
 0xc15   : > { %8797 = vmatmul.mubr.bf16.vlgmr.msra.gmra.mxu1 %v5577_v56  ;;  %v5564_v12 = vmul.f32 %v9470_v38, %v13567_v41  ;;  %v6009_v41 = vmul.f32 %v13760_v63, %v13760_v63  ;;  %v9842_v38 = vld [vmem:[%s14550_s8 + $0x8] sm:$0xff]  }
 0xc16   : > { %v5529_v44 = vpop.xlane.xlu0 %5528  ;;  %8845 = vmatpush3.bf16.msra.mxu1 %v13690_v22  ;;  %v9838_v22 = vld [vmem:[%s14550_s8 + $0x28] sm:$0xff]  }
 0xc17   : > { %8846 = vmatprep.subr.bf16.mxu1 %v9837_v46  ;;  %9477 = vrcp.f32 %v5529_v44  ;;  %v6010_v29 = vsub.f32 %v6008_v5, %v6009_v41 }
 0xc18   : > { %v9472_v49 = vpop.eup %9471 }
 0xc19   : > { %v5565_v47 = vmul.f32 %v9472_v49, %v13571_v14  ;;  %v9839_v14 = vld [vmem:[%s14550_s8 + $0x20] sm:$0xff]   ;;  %v6027_v36 = vadd.f32 1e-05, %v6010_v29 }
 0xc1a   : > { %v5531_v43 = vpop.xlane.xlu1 %5530  ;;  %8847 = vmatpush3.bf16.msra.mxu1 %v9837_v46 }
 0xc1b   : > { %9479 = vrcp.f32 %v5531_v43  ;;  %v5578_v17 = vpack.c.bf16 %v5565_v47, %v5564_v12  ;;  %8848 = vmatprep.subr.bf16.mxu1 %v9838_v22  ;;  %v9844_v47 = vld [vmem:[%s14554_s12 + $0x38] sm:$0xff]   ;;  %v6011_v43 = vsub.f32 %v13631_v3, %v13760_v63 }
 0xc1c   : > { %v9474_v13 = vpop.eup %9473 }
 0xc1d   : > { %8800 = vmatprep.mubr.bf16.mxu1 %v5578_v17  ;;  %v5566_v59 = vmul.f32 %v9474_v13, %v13575_v2  ;;  %v9841_v2 = vld [vmem:[%s14550_s8 + $0x10] sm:$0xff]   ;;  %v6012_v17 = vsub.f32 %v13634_v10, %v13760_v63 }
 0xc1e   : > { %v5533_v7 = vpop.xlane.xlu0 %5532  ;;  %8849 = vmatpush3.bf16.msra.mxu1 %v9838_v22 }
 0xc1f   : > { %8850 = vmatprep.subr.bf16.mxu1 %v9839_v14  ;;  %9481 = vrcp.f32 %v5533_v7 }
 0xc20   : > { %v9476_v23 = vpop.eup %9475 }
 0xc21   : > { %v5567_v50 = vmul.f32 %v9476_v23, %v13579_v45  ;;  %v6014_v23 = vsub.f32 %v13657_v27, %v13760_v63 }
 0xc22   : > { %v5535_v16 = vpop.xlane.xlu1 %5534  ;;  %8851 = vmatpush3.bf16.msra.mxu1 %v9839_v14  ;;  %v6013_v14 = vsub.f32 %v13647_v31, %v13760_v63 }
 0xc23   : > { %9483 = vrcp.f32 %v5535_v16  ;;  %v5579_v20 = vpack.c.bf16 %v5567_v50, %v5566_v59  ;;  %8852 = vmatprep.subr.bf16.mxu1 %v9840_v25 }
 0xc24   : > { %v9478_v57 = vpop.eup %9477 }
 0xc25   : > { %8801 = vmatmul.mubr.bf16.gmra.mxu1 %v5579_v20  ;;  %v5568_v53 = vmul.f32 %v9478_v57, %v13583_v35  ;;  %v9843_v35 = vld [vmem:[%s14550_s8] sm:$0xff]   ;;  %v14930_v20 = vld [vmem:[#allocation7_spill] sm:$0xff] }
 0xc26   : > { %v5537_v24 = vpop.xlane.xlu0 %5536  ;;  %8853 = vmatpush3.bf16.msra.mxu1 %v9840_v25  ;;  %v14931_v57 = vld [vmem:[#allocation6_spill] sm:$0xff] }
 0xc27   : > { %8854 = vmatprep.subr.bf16.mxu1 %v9841_v2  ;;  %9485 = vrcp.f32 %v5537_v24 }
 0xc28   : > { %v9480_v45 = vpop.eup %9479  ;;  %9487 = vrsqrt.f32 %v6027_v36 }
 0xc29   : > { %v5569_v48 = vmul.f32 %v9480_v45, %v13587_v32 }
 0xc2a   : > { %v5539_v1 = vpop.xlane.xlu1 %5538  ;;  %8855 = vmatpush3.bf16.msra.mxu1 %v9841_v2 }
 0xc2b   : > { %9489 = vrcp.f32 %v5539_v1  ;;  %v5580_v56 = vpack.c.bf16 %v5569_v48, %v5568_v53  ;;  %8856 = vmatprep.subr.bf16.mxu1 %v9842_v38  ;;  %v6018_v1 = vsub.f32 %v13697_v54, %v13760_v63 }
 0xc2c   : > { %v9482_v30 = vpop.eup %9481 }
 0xc2d   : > { %8804 = vmatprep.mubr.bf16.mxu1 %v5580_v56  ;;  %v5570_v44 = vmul.f32 %v9482_v30, %v13591_v6 }
 0xc2e   : > { %v5541_v11 = vpop.xlane.xlu0 %5540  ;;  %8857 = vmatpush3.bf16.msra.mxu1 %v9842_v38  ;;  %v14932_v38 = vld [vmem:[#allocation2_spill] sm:$0xff] }
 0xc2f   : > { %8858 = vmatprep.subr.bf16.mxu1 %v9843_v35  ;;  %9491 = vrcp.f32 %v5541_v11  ;;  %v14933_v11 = vld [vmem:[#allocation4_spill] sm:$0xff] }
 0xc30   : > { %v9484_v32 = vpop.eup %9483 }
 0xc31   : > { %v5571_v46 = vmul.f32 %v9484_v32, %v13595_v42  ;;  %v6017_v32 = vsub.f32 %v13685_v37, %v13760_v63 }
 0xc32   : > { %v5543_v49 = vpop.xlane.xlu1 %5542  ;;  %8859 = vmatpush3.bf16.msra.mxu1 %v9843_v35 }
 0xc33   : > { %9493 = vrcp.f32 %v5543_v49  ;;  %v5581_v12 = vpack.c.bf16 %v5571_v46, %v5570_v44  ;;  %8908 = vmatprep.subr.bf16.mxu1 %v9844_v47  ;;  %v14935_v46 = vld [vmem:[#allocation10_spill] sm:$0xff] }
 0xc34   : > { %v9486_v19 = vpop.eup %9485 }
 0xc35   : > { %8805 = vmatmul.mubr.bf16.gmra.mxu1 %v5581_v12  ;;  %v13795_v6 = vpop.eup %9487  ;;  %v5572_v22 = vmul.f32 %v9486_v19, %v13598_v40  ;;  %v6015_v40 = vsub.f32 %v13667_v60, %v13760_v63  ;;  %v6020_v12 = vsub.f32 %v13709_v61, %v13760_v63  ;;  %v14936_v19 = vld [vmem:[#allocation8_spill] sm:$0xff] }
 0xc36   : > { %v6029_v5 = vmul.f32 %v13795_v6, %v6011_v43  ;;  %v6030_v41 = vmul.f32 %v13795_v6, %v6012_v17  ;;  %v6031_v24 = vmul.f32 %v13795_v6, %v6013_v14  ;;  %v6032_v2 = vmul.f32 %v13795_v6, %v6014_v23  ;;  %v14937_v17 = vld [vmem:[#allocation9_spill] sm:$0xff] }
 0xc37   : > { %v6035_v14 = vmul.f32 %v13795_v6, %v6017_v32 }
 0xc38   : > { %v9490_v42 = vpop.eup %9489  ;;  %v6045_v50 = vmul.f32 %v6029_v5, %v14805_v58  ;;  %v6046_v29 = vmul.f32 %v6030_v41, %v14806_v26  ;;  %v6033_v26 = vmul.f32 %v13795_v6, %v6015_v40  ;;  %v6047_v30 = vmul.f32 %v6031_v24, %v14932_v38  ;;  %v14939_v5 = vld [vmem:[#allocation14_spill] sm:$0xff]  ;;  %v9845_v38 = vld [vmem:[%s14554_s12 + $0x30] sm:$0xff]  }
 0xc39   : > { %v5573_v13 = vmul.f32 %v9490_v42, %v13601_v33  ;;  %v6016_v33 = vsub.f32 %v13677_v55, %v13760_v63  ;;  %v6048_v35 = vmul.f32 %v6032_v2, %v14933_v11  ;;  %v14943_v2 = vld [vmem:[#allocation18_spill] sm:$0xff] }
 0xc3a   : > { %v6061_v25 = vadd.f32 %v6045_v50, %v14930_v20  ;;  %v6062_v36 = vadd.f32 %v6046_v29, %v14931_v57  ;;  %v6063_v42 = vadd.f32 %v6047_v30, %v14937_v17  ;;  %v6022_v29 = vsub.f32 %v13721_v28, %v13760_v63  ;;  %v14941_v20 = vld [vmem:[#allocation13_spill] sm:$0xff]  ;;  %v14946_v30 = vld [vmem:[#allocation24_spill] sm:$0xff] }
 0xc3b   : > { %v5582_v7 = vpack.c.bf16 %v5573_v13, %v5572_v22  ;;  %v6034_v53 = vmul.f32 %v13795_v6, %v6016_v33  ;;  %v6064_v43 = vadd.f32 %v6048_v35, %v14936_v19  ;;  %v14938_v22 = vld [vmem:[#allocation15_spill] sm:$0xff]  ;;  %v14940_v33 = vld [vmem:[#allocation12_spill] sm:$0xff]  ;;  %v6021_v57 = vsub.f32 %v13715_v39, %v13760_v63  ;;  %v14949_v17 = vld [vmem:[#allocation21_spill] sm:$0xff] }
 0xc3c   : > { %v9492_v59 = vpop.eup %9491  ;;  %v6198_v56 = vpack.c.bf16 %v6062_v36, %v6061_v25  ;;  %v6051_v25 = vmul.f32 %v6035_v14, %v14941_v20  ;;  %v14942_v36 = vld [vmem:[#allocation19_spill] sm:$0xff]  ;;  %v14948_v19 = vld [vmem:[#allocation20_spill] sm:$0xff] }
 0xc3d   : > { %8808 = vmatprep.mubr.bf16.mxu1 %v5582_v7  ;;  %v5574_v45 = vmul.f32 %v9492_v59, %v13604_v15  ;;  %v6019_v15 = vsub.f32 %v13703_v0, %v13760_v63  ;;  %v6050_v49 = vmul.f32 %v6034_v53, %v14935_v46  ;;  %v6036_v7 = vmul.f32 %v13795_v6, %v6018_v1  ;;  %v14944_v53 = vld [vmem:[#allocation16_spill] sm:$0xff]  ;;  %v14945_v1 = vld [vmem:[#allocation17_spill] sm:$0xff]  ;;  %v14947_v35 = vld [vmem:[#allocation23_spill] sm:$0xff] }
 0xc3e   : > { %v6038_v59 = vmul.f32 %v13795_v6, %v6020_v12  ;;  %v6199_v50 = vpack.c.bf16 %v6064_v43, %v6063_v42  ;;  %v14955_v20 = vld [vmem:[#allocation36_spill] sm:$0xff] }
 0xc3f   : > { %v6066_v41 = vadd.f32 %v6050_v49, %v14939_v5  ;;  %v6037_v23 = vmul.f32 %v13795_v6, %v6019_v15  ;;  %v6040_v15 = vmul.f32 %v13795_v6, %v6022_v29  ;;  %v9846_v49 = vld [vmem:[%s14554_s12 + $0x28] sm:$0xff]  }
 0xc40   : > { %v9494_v16 = vpop.eup %9493  ;;  %v14950_v5 = vld [vmem:[#allocation31_spill] sm:$0xff] }
 0xc41   : > { %v5575_v58 = vmul.f32 %v9494_v16, %v13607_v8  ;;  %v14934_v8 = vld [vmem:[#allocation11_spill] sm:$0xff]  ;;  %v6052_v16 = vmul.f32 %v6036_v7, %v14940_v33  ;;  %v6053_v24 = vmul.f32 %v6037_v23, %v14942_v36  ;;  %v6056_v43 = vmul.f32 %v6040_v15, %v14948_v19  ;;  %v14951_v7 = vld [vmem:[#allocation30_spill] sm:$0xff]  ;;  %v14954_v33 = vld [vmem:[#allocation37_spill] sm:$0xff] }
 0xc42   : > { %v6049_v44 = vmul.f32 %v6033_v26, %v14934_v8  ;;  %v6024_v26 = vsub.f32 %v13733_v9, %v13760_v63  ;;  %v6039_v8 = vmul.f32 %v13795_v6, %v6021_v57  ;;  %v14952_v23 = vld [vmem:[#allocation26_spill] sm:$0xff] }
 0xc43   : > { %v5583_v48 = vpack.c.bf16 %v5575_v58, %v5574_v45  ;;  %v6054_v45 = vmul.f32 %v6038_v59, %v14943_v2  ;;  %v6023_v58 = vsub.f32 %v13727_v62, %v13760_v63  ;;  %v6069_v11 = vadd.f32 %v6053_v24, %v14946_v30  ;;  %v9848_v24 = vld [vmem:[%s14554_s12 + $0x18] sm:$0xff]   ;;  %v13901_v15 = vld [vmem:[%s14556_s14] ss:$0 sm:$0xff] }
 0xc44   : > { %v6065_v13 = vadd.f32 %v6049_v44, %v14938_v22  ;;  %v6055_v42 = vmul.f32 %v6039_v8, %v14949_v17  ;;  %v6026_v22 = vsub.f32 %v13745_v18, %v13760_v63  ;;  %v6072_v59 = vadd.f32 %v6056_v43, %v14952_v23  ;;  %v9854_v19 = vld [vmem:[%s10385_s1 + $0x100] sm:$0xff] }
 0xc45   : > { %8809 = vmatmul.mubr.bf16.gmra.mxu1 %v5583_v48  ;;  %v6068_v48 = vadd.f32 %v6052_v16, %v14944_v53  ;;  %v6070_v32 = vadd.f32 %v6054_v45, %v14947_v35  ;;  %v6041_v44 = vmul.f32 %v13795_v6, %v6023_v58  ;;  %v14956_v45 = vld [vmem:[#allocation33_spill] sm:$0xff]  ;;  %v9851_v35 = vld [vmem:[%s14554_s12] sm:$0xff]  }
 0xc46   : > { %8860 = vmatprep.mubr.bf16.mxu1 %v6198_v56  ;;  %v6200_v40 = vpack.c.bf16 %v6066_v41, %v6065_v13  ;;  %v6067_v56 = vadd.f32 %v6051_v25, %v14945_v1  ;;  %v6025_v13 = vsub.f32 %v13739_v51, %v13760_v63  ;;  %v6044_v25 = vmul.f32 %v13795_v6, %v6026_v22  ;;  %v9855_v22 = vld [vmem:[%s10385_s1 + $0x118] sm:$0xff] }
 0xc47   : > { %v6202_v12 = vpack.c.bf16 %v6070_v32, %v6069_v11  ;;  %v6057_v41 = vmul.f32 %v6041_v44, %v14950_v5  ;;  %v9850_v11 = vld [vmem:[%s14554_s12 + $0x8] sm:$0xff]  }
 0xc48   : > { %v6201_v46 = vpack.c.bf16 %v6068_v48, %v6067_v56  ;;  %v6043_v57 = vmul.f32 %v13795_v6, %v6025_v13  ;;  %v6060_v58 = vmul.f32 %v6044_v25, %v14956_v45  ;;  %v14958_v48 = vld [vmem:[#allocation39_spill] sm:$0xff]  ;;  %v14959_v56 = vld [vmem:[#allocation40_spill] sm:$0xff] }
 0xc49   : > { %v6073_v16 = vadd.f32 %v6057_v41, %v14954_v33  ;;  %v9856_v41 = vld [vmem:[%s10385_s1 + $0x108] sm:$0xff] }
 0xc4a   : > { %v6076_v1 = vadd.f32 %v6060_v58, %v14958_v48  ;;  %v9860_v45 = vld [vmem:[%s10385_s1 + $0x128] sm:$0xff]  ;;  %v9861_v48 = vld [vmem:[%s10385_s1 + $0x150] sm:$0xff] }
 0xc4d   : > { %8861 = vmatmul.mubr.bf16.vlgmr.msra.gmra.mxu1 %v6199_v50  ;;  %v14953_v50 = vld [vmem:[#allocation27_spill] sm:$0xff] }
 0xc4e   : > { %8864 = vmatprep.mubr.bf16.mxu1 %v6200_v40  ;;  %8909 = vmatpush3.bf16.msra.mxu1 %v9844_v47  ;;  %v6042_v47 = vmul.f32 %v13795_v6, %v6024_v26  ;;  %v6071_v29 = vadd.f32 %v6055_v42, %v14953_v50  ;;  %v9847_v40 = vld [vmem:[%s14554_s12 + $0x20] sm:$0xff]   ;;  %v9849_v6 = vld [vmem:[%s14554_s12 + $0x10] sm:$0xff]  }
 0xc4f   : > { %8910 = vmatprep.subr.bf16.mxu1 %v9845_v38  ;;  %v14957_v26 = vld [vmem:[#allocation34_spill] sm:$0xff]  ;;  %v9857_v50 = vld [vmem:[%s10385_s1 + $0x130] sm:$0xff] }
 0xc50   : > { %v6058_v14 = vmul.f32 %v6042_v47, %v14951_v7  ;;  %v6203_v36 = vpack.c.bf16 %v6072_v59, %v6071_v29  ;;  %v6059_v53 = vmul.f32 %v6043_v57, %v14957_v26  ;;  %v9853_v47 = vld [vmem:[%s10385_s1 + $0x110] sm:$0xff]  ;;  %v9859_v57 = vld [vmem:[%s10385_s1 + $0x138] sm:$0xff] }
 0xc52   : > { %8911 = vmatpush3.bf16.msra.mxu1 %v9845_v38  ;;  %v6074_v63 = vadd.f32 %v6058_v14, %v14955_v20  ;;  %v6075_v38 = vadd.f32 %v6059_v53, %v14959_v56 }
 0xc53   : > { %8912 = vmatprep.subr.bf16.mxu1 %v9846_v49 }
 0xc54   : > { %v6204_v2 = vpack.c.bf16 %v6074_v63, %v6073_v16  ;;  %v6205_v30 = vpack.c.bf16 %v6076_v1, %v6075_v38  ;;  %v9858_v16 = vld [vmem:[%s10385_s1 + $0x120] sm:$0xff] }
 0xc55   : > { %8865 = vmatmul.mubr.bf16.gmra.mxu1 %v6201_v46 }
 0xc56   : > { %8868 = vmatprep.mubr.bf16.mxu1 %v6202_v12  ;;  %8913 = vmatpush3.bf16.msra.mxu1 %v9846_v49 }
 0xc57   : > { %8914 = vmatprep.subr.bf16.mxu1 %v9847_v40 }
 0xc5a   : > { %8915 = vmatpush3.bf16.msra.mxu1 %v9847_v40 }
 0xc5b   : > { %8916 = vmatprep.subr.bf16.mxu1 %v9848_v24 }
 0xc5d   : > { %8869 = vmatmul.mubr.bf16.gmra.mxu1 %v6203_v36 }
 0xc5e   : > { %8872 = vmatprep.mubr.bf16.mxu1 %v6204_v2  ;;  %8917 = vmatpush3.bf16.msra.mxu1 %v9848_v24 }
 0xc5f   : > { %8918 = vmatprep.subr.bf16.mxu1 %v9849_v6 }
 0xc62   : > { %8919 = vmatpush3.bf16.msra.mxu1 %v9849_v6  ;;  %v9862_v6 = vld [vmem:[%s10385_s1 + $0x140] sm:$0xff] }
 0xc63   : > { %8920 = vmatprep.subr.bf16.mxu1 %v9850_v11 }
 0xc65   : > { %8873 = vmatmul.mubr.bf16.gmra.mxu1 %v6205_v30 }
 0xc66   : > { %8921 = vmatpush3.bf16.msra.mxu1 %v9850_v11 }
 0xc67   : > { %8922 = vmatprep.subr.bf16.mxu1 %v9851_v35 }
 0xc6a   : > { %8923 = vmatpush3.bf16.msra.mxu1 %v9851_v35 }
 0xc79   : > { %v8766_v32 = vpop.f32.mrf.mxu1 }
 0xc7a   : > { %v5691_v8 = vmul.f32 %v13901_v15, %v8766_v32  ;;  %v9863_v32 = vld [vmem:[%s10385_s1 + $0x158] sm:$0xff] }
 0xc7b   : > { %v5337_v44 = vpop.f32.mrf.mxu1 }
 0xc7c   : > { %v5707_v46 = vadd.f32 %v9853_v47, %v5691_v8  ;;  %v5689_v49 = vmul.f32 %v13901_v15, %v5337_v44 }
 0xc7d   : > { %v8767_v12 = vpop.f32.mrf.mxu1 }
 0xc7e   : > { %7592 = vst [vmem:[%s11836_s22 + $0x110] sm:$0xff] %v5707_v46  ;;  %v5705_v43 = vadd.f32 %v9854_v19, %v5689_v49  ;;  %v5692_v17 = vmul.f32 %v13901_v15, %v8767_v12  ;;  %v9864_v46 = vld [vmem:[%s10385_s1 + $0x148] sm:$0xff] }
 0xc7f   : > { %v5340_v42 = vpop.f32.mrf.mxu1 }
 0xc80   : > { %7590 = vst [vmem:[%s11836_s22 + $0x100] sm:$0xff] %v5705_v43  ;;  %v5708_v13 = vadd.f32 %v9855_v22, %v5692_v17  ;;  %v5690_v5 = vmul.f32 %v13901_v15, %v5340_v42  ;;  %v9865_v43 = vld [vmem:[%s10385_s1 + $0x170] sm:$0xff] }
 0xc82   : > { %7593 = vst [vmem:[%s11836_s22 + $0x118] sm:$0xff] %v5708_v13  ;;  %v5706_v7 = vadd.f32 %v9856_v41, %v5690_v5  ;;  %v9866_v13 = vld [vmem:[%s10385_s1 + $0x160] sm:$0xff] }
 0xc84   : > { %7591 = vst [vmem:[%s11836_s22 + $0x108] sm:$0xff] %v5706_v7 }
 0xc85   : > { %v8770_v14 = vpop.f32.mrf.mxu1 }
 0xc86   : > { %v5695_v23 = vmul.f32 %v13901_v15, %v8770_v14  ;;  %v9867_v14 = vld [vmem:[%s10385_s1 + $0x178] sm:$0xff] }
 0xc87   : > { %v5353_v59 = vpop.f32.mrf.mxu1 }
 0xc88   : > { %v5711_v29 = vadd.f32 %v9857_v50, %v5695_v23  ;;  %v5693_v40 = vmul.f32 %v13901_v15, %v5353_v59  ;;  %v9868_v50 = vld [vmem:[%s10385_s1 + $0x168] sm:$0xff] }
 0xc89   : > { %v8771_v33 = vpop.f32.mrf.mxu1 }
 0xc8a   : > { %7596 = vst [vmem:[%s11836_s22 + $0x130] sm:$0xff] %v5711_v29  ;;  %v5709_v20 = vadd.f32 %v9858_v16, %v5693_v40  ;;  %v5696_v63 = vmul.f32 %v13901_v15, %v8771_v33  ;;  %v6408_v40 = vpack.c.bf16 %v13634_v10, %v13631_v3  ;;  %v6409_v33 = vpack.c.bf16 %v13657_v27, %v13647_v31 }
 0xc8b   : > { %v5356_v25 = vpop.f32.mrf.mxu1  ;;  %v6410_v16 = vpack.c.bf16 %v13677_v55, %v13667_v60  ;;  %v6413_v3 = vpack.c.bf16 %v13721_v28, %v13715_v39  ;;  %v6414_v10 = vpack.c.bf16 %v13733_v9, %v13727_v62  ;;  %v6415_v31 = vpack.c.bf16 %v13745_v18, %v13739_v51  ;;  %v13970_v60 = vld [vmem:[%s14557_s15] ss:$0 sm:$0xff] }
 0xc8c   : > { %7594 = vst [vmem:[%s11836_s22 + $0x120] sm:$0xff] %v5709_v20  ;;  %v5712_v36 = vadd.f32 %v9859_v57, %v5696_v63  ;;  %v5694_v24 = vmul.f32 %v13901_v15, %v5356_v25  ;;  %8924 = vmatprep.mubr.bf16.mxu1 %v6408_v40  ;;  %v6412_v20 = vpack.c.bf16 %v13709_v61, %v13703_v0  ;;  %v9870_v0 = vld [vmem:[%s10160_s28 + $0x110] sm:$0xff]  ;;  %v9871_v62 = vld [vmem:[%s10160_s28 + $0x100] sm:$0xff]  ;;  %v9872_v25 = vld [vmem:[%s10160_s28 + $0x118] sm:$0xff] }
 0xc8d   : > { %v8774_v2 = vpop.f32.mrf.mxu1  ;;  %8925 = vmatmul.mubr.bf16.vlgmr.msra.gmra.mxu1 %v6409_v33 }
 0xc8e   : > { %7597 = vst [vmem:[%s11836_s22 + $0x138] sm:$0xff] %v5712_v36  ;;  %v5710_v58 = vadd.f32 %v9860_v45, %v5694_v24  ;;  %v5699_v26 = vmul.f32 %v13901_v15, %v8774_v2  ;;  %8928 = vmatprep.mubr.bf16.mxu1 %v6410_v16  ;;  %v9873_v24 = vld [vmem:[%s10160_s28 + $0x108] sm:$0xff]  ;;  %v9880_v16 = vld [vmem:[%s10160_s28 + $0x158] sm:$0xff] }
 0xc8f   : > { %v5369_v53 = vpop.f32.mrf.mxu1 }
 0xc90   : > { %7595 = vst [vmem:[%s11836_s22 + $0x128] sm:$0xff] %v5710_v58  ;;  %v5715_v1 = vadd.f32 %v9861_v48, %v5699_v26  ;;  %v5697_v56 = vmul.f32 %v13901_v15, %v5369_v53 }
 0xc91   : > { %v8775_v38 = vpop.f32.mrf.mxu1 }
 0xc92   : > { %7600 = vst [vmem:[%s11836_s22 + $0x150] sm:$0xff] %v5715_v1  ;;  %v5713_v30 = vadd.f32 %v9862_v6, %v5697_v56  ;;  %v5700_v11 = vmul.f32 %v13901_v15, %v8775_v38  ;;  %v9874_v56 = vld [vmem:[%s10160_s28 + $0x130] sm:$0xff] }
 0xc93   : > { %v5372_v35 = vpop.f32.mrf.mxu1 }
 0xc94   : > { %7598 = vst [vmem:[%s11836_s22 + $0x140] sm:$0xff] %v5713_v30  ;;  %v5716_v8 = vadd.f32 %v9863_v32, %v5700_v11  ;;  %v5698_v44 = vmul.f32 %v13901_v15, %v5372_v35  ;;  %v9875_v11 = vld [vmem:[%s10160_s28 + $0x120] sm:$0xff] }
 0xc95   : > { %v8778_v47 = vpop.f32.mrf.mxu1 }
 0xc96   : > { %7601 = vst [vmem:[%s11836_s22 + $0x158] sm:$0xff] %v5716_v8  ;;  %v5714_v49 = vadd.f32 %v9864_v46, %v5698_v44  ;;  %v5703_v12 = vmul.f32 %v13901_v15, %v8778_v47  ;;  %v9876_v47 = vld [vmem:[%s10160_s28 + $0x138] sm:$0xff] }
 0xc97   : > { %v5385_v19 = vpop.f32.mrf.mxu1 }
 0xc98   : > { %7599 = vst [vmem:[%s11836_s22 + $0x148] sm:$0xff] %v5714_v49  ;;  %v5719_v17 = vadd.f32 %v9865_v43, %v5703_v12  ;;  %v5701_v42 = vmul.f32 %v13901_v15, %v5385_v19  ;;  %v9877_v12 = vld [vmem:[%s10160_s28 + $0x128] sm:$0xff] }
 0xc99   : > { %v8779_v22 = vpop.f32.mrf.mxu1 }
 0xc9a   : > { %7604 = vst [vmem:[%s11836_s22 + $0x170] sm:$0xff] %v5719_v17  ;;  %v5717_v5 = vadd.f32 %v9866_v13, %v5701_v42  ;;  %v5704_v41 = vmul.f32 %v13901_v15, %v8779_v22 }
 0xc9b   : > { %v5388_v7 = vpop.f32.mrf.mxu1 }
 0xc9c   : > { %7602 = vst [vmem:[%s11836_s22 + $0x160] sm:$0xff] %v5717_v5  ;;  %v5720_v23 = vadd.f32 %v9867_v14, %v5704_v41  ;;  %v5702_v59 = vmul.f32 %v13901_v15, %v5388_v7  ;;  %v6411_v15 = vpack.c.bf16 %v13697_v54, %v13685_v37  ;;  %v13973_v54 = vpop.f32.mrf.mxu0  ;;  %v9878_v41 = vld [vmem:[%s10160_s28 + $0x150] sm:$0xff] }
 0xc9e   : > { %7605 = vst [vmem:[%s11836_s22 + $0x178] sm:$0xff] %v5720_v23  ;;  %v5718_v29 = vadd.f32 %v9868_v50, %v5702_v59  ;;  %8929 = vmatmul.mubr.bf16.gmra.mxu1 %v6411_v15  ;;  %v13980_v63 = vpop.f32.mrf.mxu0  ;;  %v9879_v59 = vld [vmem:[%s10160_s28 + $0x140] sm:$0xff] }
 0xc9f   : > { %8932 = vmatprep.mubr.bf16.mxu1 %v6412_v20 }
 0xca0   : > { %7603 = vst [vmem:[%s11836_s22 + $0x168] sm:$0xff] %v5718_v29  ;;  %v13987_v45 = vpop.f32.mrf.mxu0 }
 0xca2   : > { %v13990_v58 = vpop.f32.mrf.mxu0 }
 0xca4   : > { %v13993_v1 = vpop.f32.mrf.mxu0 }
 0xca6   : > { %8933 = vmatmul.mubr.bf16.gmra.mxu1 %v6413_v3  ;;  %v14000_v44 = vpop.f32.mrf.mxu0  ;;  %v9881_v3 = vld [vmem:[%s10160_s28 + $0x148] sm:$0xff] }
 0xca7   : > { %8936 = vmatprep.mubr.bf16.mxu1 %v6414_v10 }
 0xca8   : > { %v14007_v43 = vpop.f32.mrf.mxu0 }
 0xcaa   : > { %v14010_v17 = vpop.f32.mrf.mxu0 }
 0xcac   : > { %v14013_v5 = vpop.f32.mrf.mxu0 }
 0xcae   : > { %8937 = vmatmul.mubr.bf16.gmra.mxu1 %v6415_v31  ;;  %v14020_v33 = vpop.f32.mrf.mxu0 }
 0xcb0   : > { %v14027_v31 = vpop.f32.mrf.mxu0 }
 0xcd5   : > { %v8798_v27 = vpop.f32.mrf.mxu1 }
 0xcd6   : > { %v5740_v55 = vmul.f32 %v13970_v60, %v8798_v27  ;;  %v14030_v27 = vpop.f32.mrf.mxu0 }
 0xcd7   : > { %v5626_v37 = vpop.f32.mrf.mxu1 }
 0xcd8   : > { %v5756_v61 = vadd.f32 %v9870_v0, %v5740_v55  ;;  %v5738_v39 = vmul.f32 %v13970_v60, %v5626_v37  ;;  %v8894_v0 = vpop.f32.mrf.mxu0 }
 0xcd9   : > { %v8799_v28 = vpop.f32.mrf.mxu1 }
 0xcda   : > { %7608 = vst [vmem:[%s11911_s18 + $0x110] sm:$0xff] %v5756_v61  ;;  %v5754_v9 = vadd.f32 %v9871_v62, %v5738_v39  ;;  %v5741_v51 = vmul.f32 %v13970_v60, %v8799_v28  ;;  %v9882_v39 = vld [vmem:[%s10160_s28 + $0x170] sm:$0xff] }
 0xcdb   : > { %v5629_v18 = vpop.f32.mrf.mxu1 }
 0xcdc   : > { %7606 = vst [vmem:[%s11911_s18 + $0x100] sm:$0xff] %v5754_v9  ;;  %v5757_v57 = vadd.f32 %v9872_v25, %v5741_v51  ;;  %v5739_v36 = vmul.f32 %v13970_v60, %v5629_v18  ;;  %v6345_v9 = vpop.f32.mrf.mxu0  ;;  %v6354_v18 = vadd.f32 %v13615_v21, %v8894_v0  ;;  %v9883_v25 = vld [vmem:[%s10160_s28 + $0x160] sm:$0xff] }
 0xcde   : > { %7609 = vst [vmem:[%s11911_s18 + $0x118] sm:$0xff] %v5757_v57  ;;  %v5755_v2 = vadd.f32 %v9873_v24, %v5739_v36  ;;  %v8895_v24 = vpop.f32.mrf.mxu0 }
 0xce0   : > { %7607 = vst [vmem:[%s11911_s18 + $0x108] sm:$0xff] %v5755_v2 }
 0xce5   : > { %v8802_v26 = vpop.f32.mrf.mxu1 }
 0xce6   : > { %v5744_v53 = vmul.f32 %v13970_v60, %v8802_v26  ;;  %v6346_v26 = vadd.f32 %v13615_v21, %v6345_v9 }
 0xce7   : > { %v5642_v48 = vpop.f32.mrf.mxu1 }
 0xce8   : > { %v5760_v38 = vadd.f32 %v9874_v56, %v5744_v53  ;;  %v5742_v6 = vmul.f32 %v13970_v60, %v5642_v48  ;;  %v6357_v53 = vadd.f32 %v13615_v21, %v8895_v24  ;;  %v9884_v48 = vld [vmem:[%s10160_s28 + $0x178] sm:$0xff] }
 0xce9   : > { %v8803_v30 = vpop.f32.mrf.mxu1 }
 0xcea   : > { %7612 = vst [vmem:[%s11911_s18 + $0x130] sm:$0xff] %v5760_v38  ;;  %v5758_v35 = vadd.f32 %v9875_v11, %v5742_v6  ;;  %v5745_v32 = vmul.f32 %v13970_v60, %v8803_v30  ;;  %v6348_v6 = vpop.f32.mrf.mxu0  ;;  %v14044_v11 = vpack.c.bf16 %v6357_v53, %v6354_v18 }
 0xceb   : > { %v5645_v8 = vpop.f32.mrf.mxu1 }
 0xcec   : > { %7610 = vst [vmem:[%s11911_s18 + $0x120] sm:$0xff] %v5758_v35  ;;  %v5761_v46 = vadd.f32 %v9876_v47, %v5745_v32  ;;  %v5743_v49 = vmul.f32 %v13970_v60, %v5645_v8  ;;  %v6349_v35 = vadd.f32 %v13615_v21, %v6348_v6  ;;  %v9885_v32 = vld [vmem:[%s10160_s28 + $0x168] sm:$0xff] }
 0xcee   : > { %7613 = vst [vmem:[%s11911_s18 + $0x138] sm:$0xff] %v5761_v46  ;;  %v5759_v19 = vadd.f32 %v9877_v12, %v5743_v49  ;;  %v14049_v46 = vpack.c.bf16 %v6349_v35, %v6346_v26  ;;  %v14055_v12 = vld [vmem:[%s14551_s9] ss:$0 sm:$0xff] }
 0xcf0   : > { %7611 = vst [vmem:[%s11911_s18 + $0x128] sm:$0xff] %v5759_v19 }
 0xcf5   : > { %v8806_v42 = vpop.f32.mrf.mxu1 }
 0xcf6   : > { %v5748_v22 = vmul.f32 %v13970_v60, %v8806_v42 }
 0xcf7   : > { %v5658_v13 = vpop.f32.mrf.mxu1 }
 0xcf8   : > { %v5764_v7 = vadd.f32 %v9878_v41, %v5748_v22  ;;  %v5746_v14 = vmul.f32 %v13970_v60, %v5658_v13  ;;  %v8898_v22 = vpop.f32.mrf.mxu0 }
 0xcf9   : > { %v8807_v23 = vpop.f32.mrf.mxu1 }
 0xcfa   : > { %7616 = vst [vmem:[%s11911_s18 + $0x150] sm:$0xff] %v5764_v7  ;;  %v5762_v50 = vadd.f32 %v9879_v59, %v5746_v14  ;;  %v5749_v29 = vmul.f32 %v13970_v60, %v8807_v23  ;;  %v6361_v14 = vpop.f32.mrf.mxu0  ;;  %v14068_v59 = vld [vmem:[%s14553_s11] ss:$0 sm:$0xff] }
 0xcfb   : > { %v5661_v40 = vpop.f32.mrf.mxu1 }
 0xcfc   : > { %7614 = vst [vmem:[%s11911_s18 + $0x140] sm:$0xff] %v5762_v50  ;;  %v5765_v15 = vadd.f32 %v9880_v16, %v5749_v29  ;;  %v5747_v20 = vmul.f32 %v13970_v60, %v5661_v40  ;;  %v6370_v50 = vadd.f32 %v14068_v59, %v8898_v22  ;;  %v8899_v40 = vpop.f32.mrf.mxu0  ;;  %v6362_v16 = vadd.f32 %v14068_v59, %v6361_v14 }
 0xcfe   : > { %7617 = vst [vmem:[%s11911_s18 + $0x158] sm:$0xff] %v5765_v15  ;;  %v5763_v10 = vadd.f32 %v9881_v3, %v5747_v20  ;;  %v6373_v15 = vadd.f32 %v14068_v59, %v8899_v40  ;;  %v6364_v3 = vpop.f32.mrf.mxu0 }
 0xd00   : > { %7615 = vst [vmem:[%s11911_s18 + $0x148] sm:$0xff] %v5763_v10  ;;  %v14073_v10 = vpack.c.bf16 %v6373_v15, %v6370_v50  ;;  %v8902_v0 = vpop.f32.mrf.mxu0 }
 0xd05   : > { %v8810_v55 = vpop.f32.mrf.mxu1 }
 0xd06   : > { %v5752_v37 = vmul.f32 %v13970_v60, %v8810_v55  ;;  %v6365_v55 = vadd.f32 %v14068_v59, %v6364_v3 }
 0xd07   : > { %v5674_v61 = vpop.f32.mrf.mxu1 }
 0xd08   : > { %v5768_v28 = vadd.f32 %v9882_v39, %v5752_v37  ;;  %v5750_v62 = vmul.f32 %v13970_v60, %v5674_v61  ;;  %v14076_v61 = vpack.c.bf16 %v6365_v55, %v6362_v16 }
 0xd09   : > { %v8811_v51 = vpop.f32.mrf.mxu1 }
 0xd0a   : > { %7620 = vst [vmem:[%s11911_s18 + $0x170] sm:$0xff] %v5768_v28  ;;  %v5766_v57 = vadd.f32 %v9883_v25, %v5750_v62  ;;  %v5753_v36 = vmul.f32 %v13970_v60, %v8811_v51  ;;  %v6377_v28 = vpop.f32.mrf.mxu0  ;;  %v6386_v62 = vadd.f32 %v14068_v59, %v8902_v0 }
 0xd0b   : > { %v5677_v2 = vpop.f32.mrf.mxu1  ;;  %v6378_v18 = vadd.f32 %v14068_v59, %v6377_v28 }
 0xd0c   : > { %7618 = vst [vmem:[%s11911_s18 + $0x160] sm:$0xff] %v5766_v57  ;;  %v5769_v56 = vadd.f32 %v9884_v48, %v5753_v36  ;;  %v5751_v38 = vmul.f32 %v13970_v60, %v5677_v2  ;;  %v8903_v51 = vpop.f32.mrf.mxu0 }
 0xd0d   : > { %v8862_v30 = vpop.f32.mrf.mxu1  ;;  %v6389_v25 = vadd.f32 %v14068_v59, %v8903_v51 }
 0xd0e   : > { %7621 = vst [vmem:[%s11911_s18 + $0x178] sm:$0xff] %v5769_v56  ;;  %v5767_v8 = vadd.f32 %v9885_v32, %v5751_v38  ;;  %v6249_v60 = vadd.f32 %v14055_v12, %v8862_v30  ;;  %v6380_v36 = vpop.f32.mrf.mxu0 }
 0xd0f   : > { %v6240_v47 = vpop.f32.mrf.mxu1  ;;  %v14081_v24 = vpack.c.bf16 %v6389_v25, %v6386_v62  ;;  %v6381_v2 = vadd.f32 %v14068_v59, %v6380_v36 }
 0xd10   : > { %7619 = vst [vmem:[%s11911_s18 + $0x168] sm:$0xff] %v5767_v8  ;;  %v6241_v21 = vadd.f32 %v14055_v12, %v6240_v47 }
 0xd11   : > { %v8863_v49 = vpop.f32.mrf.mxu1  ;;  %v14084_v53 = vpack.c.bf16 %v6381_v2, %v6378_v18 }
 0xd12   : > { %v6252_v19 = vadd.f32 %v14055_v12, %v8863_v49 }
 0xd13   : > { %v6243_v42 = vpop.f32.mrf.mxu1 }
 0xd14   : > { %v14060_v13 = vpack.c.bf16 %v6252_v19, %v6249_v60  ;;  %v6244_v41 = vadd.f32 %v14055_v12, %v6243_v42 }
 0xd15   : > { %v8866_v7 = vpop.f32.mrf.mxu1 }
 0xd16   : > { %v14063_v23 = vpack.c.bf16 %v6244_v41, %v6241_v21  ;;  %v6265_v50 = vadd.f32 %v14055_v12, %v8866_v7  ;;  %v9888_v7 = vld [vmem:[%s14549_s7] ss:$0 sm:$0xff] }
 0xd17   : > { %v6256_v29 = vpop.f32.mrf.mxu1  ;;  %v6136_v55 = vadd.f32 %v9888_v7, %v13980_v63  ;;  %v6152_v28 = vadd.f32 %v9888_v7, %v14000_v44  ;;  %v6160_v52 = vadd.f32 %v9888_v7, %v13993_v1  ;;  %v6168_v4 = vadd.f32 %v9888_v7, %v14020_v33 }
 0xd18   : > { %v6257_v15 = vadd.f32 %v14055_v12, %v6256_v29 }
 0xd19   : > { %v8867_v20 = vpop.f32.mrf.mxu1  ;;  %v6186_v29 = vmul.f32 0.088388346, %v6136_v55  ;;  %v6192_v2 = vmul.f32 0.088388346, %v6160_v52 }
 0xd1a   : > { %v6268_v14 = vadd.f32 %v14055_v12, %v8867_v20  ;;  %v6139_v20 = vadd.f32 %v9888_v7, %v13990_v58 }
 0xd1b   : > { %v6259_v37 = vpop.f32.mrf.mxu1 }
 0xd1c   : > { %v6524_v40 = vpack.c.bf16 %v6268_v14, %v6265_v50  ;;  %v6260_v16 = vadd.f32 %v14055_v12, %v6259_v37  ;;  %v6147_v37 = vadd.f32 %v9888_v7, %v13987_v45 }
 0xd1d   : > { %v8870_v39 = vpop.f32.mrf.mxu1 }
 0xd1e   : > { %v6281_v19 = vadd.f32 %v14055_v12, %v8870_v39  ;;  %v6523_v3 = vpack.c.bf16 %v6260_v16, %v6257_v15  ;;  %v6155_v39 = vadd.f32 %v9888_v7, %v14010_v17  ;;  %v6189_v58 = vmul.f32 0.088388346, %v6147_v37 }
 0xd1f   : > { %v6272_v9 = vpop.f32.mrf.mxu1  ;;  %v6163_v17 = vadd.f32 %v9888_v7, %v14007_v43  ;;  %v6179_v43 = vadd.f32 %v9888_v7, %v14027_v31  ;;  %v9889_v31 = vld [vmem:[%s14555_s13] ss:$0 sm:$0xff] }
 0xd20   : > { %v6273_v21 = vadd.f32 %v14055_v12, %v6272_v9  ;;  %v6191_v63 = vmul.f32 0.088388346, %v6155_v39  ;;  %v6190_v9 = vmul.f32 0.088388346, %v6152_v28 }
 0xd21   : > { %v8871_v57 = vpop.f32.mrf.mxu1  ;;  %v6193_v44 = vmul.f32 0.088388346, %v6163_v17 }
 0xd22   : > { %v6284_v60 = vadd.f32 %v14055_v12, %v8871_v57  ;;  %v6517_v18 = vpack.c.bf16 %v6191_v63, %v6190_v9 }
 0xd23   : > { %v6275_v26 = vpop.f32.mrf.mxu1 }
 0xd24   : > { %v6526_v42 = vpack.c.bf16 %v6284_v60, %v6281_v19  ;;  %v6276_v22 = vadd.f32 %v14055_v12, %v6275_v26  ;;  %v6194_v26 = vmul.f32 0.088388346, %v6168_v4 }
 0xd25   : > { %v8874_v48 = vpop.f32.mrf.mxu1 }
 0xd26   : > { %v6297_v6 = vadd.f32 %v14055_v12, %v8874_v48  ;;  %v6525_v41 = vpack.c.bf16 %v6276_v22, %v6273_v21 }
 0xd27   : > { %v6288_v56 = vpop.f32.mrf.mxu1 }
 0xd28   : > { %v6289_v32 = vadd.f32 %v14055_v12, %v6288_v56  ;;  %v6518_v56 = vpack.c.bf16 %v6193_v44, %v6192_v2 }
 0xd29   : > { %v8875_v38 = vpop.f32.mrf.mxu1 }
 0xd2a   : > { %v6300_v30 = vadd.f32 %v14055_v12, %v8875_v38 }
 0xd2b   : > { %v6291_v35 = vpop.f32.mrf.mxu1 }
 0xd2c   : > { %v6528_v8 = vpack.c.bf16 %v6300_v30, %v6297_v6  ;;  %v6292_v47 = vadd.f32 %v14055_v12, %v6291_v35  ;;  %v6187_v12 = vmul.f32 0.088388346, %v6139_v20  ;;  %v6197_v30 = vmul.f32 0.088388346, %v6179_v43 }
 0xd2e   : > { %v6527_v49 = vpack.c.bf16 %v6292_v47, %v6289_v32  ;;  %8940 = vmatprep.subr.bf16.mxu0 %v6528_v8  ;;  %v6515_v0 = vpack.c.bf16 %v6187_v12, %v6186_v29 }
 0xd2f   : > { %8941 = vmatpush3.bf16.xpose.msra.mxu0 %v6528_v8 }
 0xd30   : > { %8942 = vmatprep.subr.bf16.mxu0 %v6527_v49 }
 0xd37   : > { %8943 = vmatpush3.bf16.xpose.msra.mxu0 %v6527_v49 }
 0xd38   : > { %8944 = vmatprep.subr.bf16.mxu0 %v6526_v42 }
 0xd3f   : > { %8945 = vmatpush3.bf16.xpose.msra.mxu0 %v6526_v42 }
 0xd40   : > { %8946 = vmatprep.subr.bf16.mxu0 %v6525_v41 }
 0xd47   : > { %8947 = vmatpush3.bf16.xpose.msra.mxu0 %v6525_v41 }
 0xd48   : > { %8948 = vmatprep.subr.bf16.mxu0 %v6524_v40 }
 0xd4d   : > { %v14114_v62 = vpop.f32.mrf.mxu1 }
 0xd4e   : > { %v6459_v28 = vadd.f32 %v9889_v31, %v14114_v62 }
 0xd4f   : > { %8949 = vmatpush3.bf16.xpose.msra.mxu0 %v6524_v40  ;;  %v14116_v51 = vpop.f32.mrf.mxu1 }
 0xd50   : > { %8950 = vmatprep.subr.bf16.mxu0 %v6523_v3  ;;  %v6451_v9 = vadd.f32 %v9889_v31, %v14116_v51 }
 0xd51   : > { %v8927_v25 = vpop.f32.mrf.mxu1 }
 0xd57   : > { %8951 = vmatpush3.bf16.xpose.msra.mxu0 %v6523_v3 }
 0xd58   : > { %8952 = vmatprep.subr.bf16.mxu0 %v14060_v13 }
 0xd5f   : > { %8953 = vmatpush3.bf16.xpose.msra.mxu0 %v14060_v13  ;;  %v6144_v13 = vadd.f32 %v9888_v7, %v13973_v54  ;;  %v6171_v54 = vadd.f32 %v9888_v7, %v14030_v27  ;;  %v6176_v27 = vadd.f32 %v9888_v7, %v14013_v5 }
 0xd60   : > { %8954 = vmatprep.subr.bf16.mxu0 %v14063_v23 }
 0xd61   : > { %v6195_v57 = vmul.f32 0.088388346, %v6171_v54  ;;  %v6196_v35 = vmul.f32 0.088388346, %v6176_v27 }
 0xd63   : > { %v6519_v38 = vpack.c.bf16 %v6195_v57, %v6194_v26  ;;  %v6520_v8 = vpack.c.bf16 %v6197_v30, %v6196_v35 }
 0xd67   : > { %8955 = vmatpush3.bf16.xpose.msra.mxu0 %v14063_v23  ;;  %v6188_v23 = vmul.f32 0.088388346, %v6144_v13  ;;  %v8906_v13 = vpop.f32.mrf.mxu0 }
 0xd68   : > { %v6402_v52 = vadd.f32 %v14068_v59, %v8906_v13 }
 0xd69   : > { %v6516_v45 = vpack.c.bf16 %v6189_v58, %v6188_v23  ;;  %v6462_v58 = vadd.f32 %v9889_v31, %v8927_v25  ;;  %v14128_v23 = vpop.f32.mrf.mxu0 }
 0xd6e   : > { %8957 = vmatmul.mubr.bf16.vlgmr.msra.gmra.mxu0 %v6514_v34  ;;  %v6453_v34 = vpop.f32.mrf.mxu1 }
 0xd6f   : > { %8960 = vmatprep.mubr.bf16.mxu0 %v6515_v0  ;;  %v6454_v17 = vadd.f32 %v9889_v31, %v6453_v34 }
 0xd70   : > { %v8930_v36 = vpop.f32.mrf.mxu1 }
 0xd71   : > { %v6475_v55 = vadd.f32 %v9889_v31, %v8930_v36  ;;  %v6778_v54 = vpack.c.bf16 %v6454_v17, %v6451_v9 }
 0xd72   : > { %v6466_v48 = vpop.f32.mrf.mxu1 }
 0xd73   : > { %v6467_v37 = vadd.f32 %v9889_v31, %v6466_v48 }
 0xd74   : > { %v8931_v6 = vpop.f32.mrf.mxu1 }
 0xd75   : > { %v6478_v12 = vadd.f32 %v9889_v31, %v8931_v6 }
 0xd76   : > { %8961 = vmatmul.mubr.bf16.gmra.mxu0 %v6516_v45  ;;  %v6469_v1 = vpop.f32.mrf.mxu1  ;;  %v6779_v45 = vpack.c.bf16 %v6462_v58, %v6459_v28 }
 0xd77   : > { %8964 = vmatprep.mubr.bf16.mxu0 %v6517_v18  ;;  %v6781_v0 = vpack.c.bf16 %v6478_v12, %v6475_v55  ;;  %v6470_v39 = vadd.f32 %v9889_v31, %v6469_v1  ;;  %v8907_v18 = vpop.f32.mrf.mxu0 }
 0xd78   : > { %v8934_v33 = vpop.f32.mrf.mxu1  ;;  %v6405_v4 = vadd.f32 %v14068_v59, %v8907_v18 }
 0xd79   : > { %v6491_v14 = vadd.f32 %v9889_v31, %v8934_v33  ;;  %v6780_v63 = vpack.c.bf16 %v6470_v39, %v6467_v37  ;;  %v14136_v25 = vpop.f32.mrf.mxu0 }
 0xd7a   : > { %v6482_v32 = vpop.f32.mrf.mxu1  ;;  %v14133_v62 = vpack.c.bf16 %v6405_v4, %v6402_v52 }
 0xd7b   : > { %v6483_v3 = vadd.f32 %v9889_v31, %v6482_v32 }
 0xd7c   : > { %v8935_v47 = vpop.f32.mrf.mxu1 }
 0xd7d   : > { %v6494_v50 = vadd.f32 %v9889_v31, %v8935_v47 }
 0xd7e   : > { %8965 = vmatmul.mubr.bf16.gmra.mxu0 %v6518_v56  ;;  %v6485_v49 = vpop.f32.mrf.mxu1 }
 0xd7f   : > { %8968 = vmatprep.mubr.bf16.mxu0 %v6519_v38  ;;  %v6783_v7 = vpack.c.bf16 %v6494_v50, %v6491_v14  ;;  %v6486_v20 = vadd.f32 %v9889_v31, %v6485_v49 }
 0xd80   : > { %v8938_v60 = vpop.f32.mrf.mxu1 }
 0xd81   : > { %v6507_v42 = vadd.f32 %v9889_v31, %v8938_v60  ;;  %v6782_v29 = vpack.c.bf16 %v6486_v20, %v6483_v3 }
 0xd82   : > { %v6498_v19 = vpop.f32.mrf.mxu1 }
 0xd83   : > { %v6499_v5 = vadd.f32 %v9889_v31, %v6498_v19 }
 0xd84   : > { %v8939_v22 = vpop.f32.mrf.mxu1 }
 0xd85   : > { %v6510_v21 = vadd.f32 %v9889_v31, %v8939_v22 }
 0xd86   : > { %8969 = vmatmul.mubr.bf16.gmra.mxu0 %v6520_v8  ;;  %v6501_v41 = vpop.f32.mrf.mxu1 }
 0xd87   : > { %v6785_v40 = vpack.c.bf16 %v6510_v21, %v6507_v42  ;;  %v6502_v16 = vadd.f32 %v9889_v31, %v6501_v41 }
 0xd89   : > { %v6784_v15 = vpack.c.bf16 %v6502_v16, %v6499_v5  ;;  %8972 = vmatprep.subr.bf16.mxu1 %v6785_v40 }
 0xd8a   : > { %8973 = vmatpush3.bf16.msra.mxu1 %v6785_v40 }
 0xd8b   : > { %8974 = vmatprep.subr.bf16.mxu1 %v6784_v15 }
 0xd8e   : > { %8975 = vmatpush3.bf16.msra.mxu1 %v6784_v15 }
 0xd8f   : > { %8976 = vmatprep.subr.bf16.mxu1 %v6783_v7 }
 0xd92   : > { %8977 = vmatpush3.bf16.msra.mxu1 %v6783_v7 }
 0xd93   : > { %8978 = vmatprep.subr.bf16.mxu1 %v6782_v29 }
 0xd96   : > { %8979 = vmatpush3.bf16.msra.mxu1 %v6782_v29 }
 0xd97   : > { %8980 = vmatprep.subr.bf16.mxu1 %v6781_v0 }
 0xd9a   : > { %8981 = vmatpush3.bf16.msra.mxu1 %v6781_v0 }
 0xd9b   : > { %8982 = vmatprep.subr.bf16.mxu1 %v6780_v63 }
 0xd9e   : > { %8983 = vmatpush3.bf16.msra.mxu1 %v6780_v63 }
 0xd9f   : > { %8984 = vmatprep.subr.bf16.mxu1 %v6779_v45 }
 0xda2   : > { %8985 = vmatpush3.bf16.msra.mxu1 %v6779_v45 }
 0xda3   : > { %8986 = vmatprep.subr.bf16.mxu1 %v6778_v54 }
 0xda6   : > { %8987 = vmatpush3.bf16.msra.mxu1 %v6778_v54 }
 0xda7   : > { %9004 = vmatprep.subr.bf16.mxu1 %v14133_v62 }
 0xe2e   : > { %v14138_v51 = vpop.f32.mrf.mxu0 }
 0xe30   : > { %v14140_v34 = vpop.f32.mrf.mxu0 }
 0xe31   : > { %6626 = vmax.xlane.f32.xlu1 %v14140_v34  ;;  %6883 = vxpose.xlu0.b32.start [1/16] %v14140_v34, 128 }
 0xe32   : > { %v14144_v44 = vpop.f32.mrf.mxu0 }
 0xe34   : > { %v14146_v57 = vpop.f32.mrf.mxu0 }
 0xe35   : > { %6628 = vmax.xlane.f32.xlu1 %v14146_v57  ;;  %6884 = vxpose.xlu0.b32.cont [2/16] %v14146_v57, 128 }
 0xe36   : > { %v14150_v36 = vpop.f32.mrf.mxu0 }
 0xe38   : > { %v14154_v2 = vpop.f32.mrf.mxu0 }
 0xe39   : > { %6630 = vmax.xlane.f32.xlu1 %v14138_v51  ;;  %6885 = vxpose.xlu0.b32.cont [3/16] %v14138_v51, 128 }
 0xe3a   : > { %v14158_v26 = vpop.f32.mrf.mxu0 }
 0xe3c   : > { %v14162_v48 = vpop.f32.mrf.mxu0 }
 0xe3d   : > { %6632 = vmax.xlane.f32.xlu1 %v14144_v44  ;;  %6886 = vxpose.xlu0.b32.cont [4/16] %v14144_v44, 128 }
 0xe3e   : > { %v14166_v56 = vpop.f32.mrf.mxu0 }
 0xe40   : > { %v14170_v43 = vpop.f32.mrf.mxu0 }
 0xe41   : > { %6634 = vmax.xlane.f32.xlu1 %v14154_v2  ;;  %6887 = vxpose.xlu0.b32.cont [5/16] %v14154_v2, 128 }
 0xe42   : > { %v14174_v38 = vpop.f32.mrf.mxu0 }
 0xe44   : > { %v14178_v6 = vpop.f32.mrf.mxu0 }
 0xe45   : > { %6636 = vmax.xlane.f32.xlu1 %v14162_v48  ;;  %6888 = vxpose.xlu0.b32.cont [6/16] %v14162_v48, 128 }
 0xe46   : > { %v14182_v27 = vpop.f32.mrf.mxu0 }
 0xe48   : > { %v14186_v1 = vpop.f32.mrf.mxu0 }
 0xe49   : > { %6638 = vmax.xlane.f32.xlu1 %v14150_v36  ;;  %6889 = vxpose.xlu0.b32.cont [7/16] %v14150_v36, 128 }
 0xe4a   : > { %v14190_v30 = vpop.f32.mrf.mxu0 }
 0xe4c   : > { %v14194_v33 = vpop.f32.mrf.mxu0 }
 0xe4d   : > { %6640 = vmax.xlane.f32.xlu1 %v14158_v26  ;;  %6890 = vxpose.xlu0.b32.cont [8/16] %v14158_v26, 128 }
 0xe51   : > { %6642 = vmax.xlane.f32.xlu1 %v14170_v43  ;;  %6891 = vxpose.xlu0.b32.cont [9/16] %v14170_v43, 128 }
 0xe55   : > { %6644 = vmax.xlane.f32.xlu1 %v14178_v6  ;;  %6892 = vxpose.xlu0.b32.cont [10/16] %v14178_v6, 128 }
 0xe59   : > { %6646 = vmax.xlane.f32.xlu1 %v14166_v56  ;;  %6893 = vxpose.xlu0.b32.cont [11/16] %v14166_v56, 128 }
 0xe5d   : > { %6648 = vmax.xlane.f32.xlu1 %v14174_v38  ;;  %6894 = vxpose.xlu0.b32.cont [12/16] %v14174_v38, 128 }
 0xe61   : > { %6650 = vmax.xlane.f32.xlu1 %v14186_v1  ;;  %6895 = vxpose.xlu0.b32.cont [13/16] %v14186_v1, 128 }
 0xe65   : > { %6652 = vmax.xlane.f32.xlu1 %v14194_v33  ;;  %6896 = vxpose.xlu0.b32.cont [14/16] %v14194_v33, 128 }
 0xe69   : > { %6654 = vmax.xlane.f32.xlu1 %v14182_v27  ;;  %6897 = vxpose.xlu0.b32.cont [15/16] %v14182_v27, 128 }
 0xe6d   : > { %6656 = vmax.xlane.f32.xlu1 %v14190_v30  ;;  %6898 = vxpose.xlu0.b32.end [16/16] %v14190_v30, 128 }
 0xead   : > { %v14202_v35 = vpop.trf.xlu0 }
 0xeae   : > { %6915 = vmax.xlane.f32.xlu1 %v14202_v35 }
 0xeb1   : > { %v14205_v32 = vpop.trf.xlu0 }
 0xeb2   : > { %6917 = vmax.xlane.f32.xlu1 %v14205_v32 }
 0xeb5   : > { %v14208_v8 = vpop.trf.xlu0 }
 0xeb6   : > { %6919 = vmax.xlane.f32.xlu1 %v14208_v8 }
 0xeb9   : > { %v14211_v47 = vpop.trf.xlu0 }
 0xeba   : > { %v6627_v49 = vpop.xlane.xlu1 %6626  ;;  %6921 = vmax.xlane.f32.xlu1 %v14211_v47 }
 0xebb   : > { %v6658_v20 = vsub.f32 %v14140_v34, %v6627_v49 }
 0xebd   : > { %v14214_v60 = vpop.trf.xlu0  ;;  %v6674_v37 = vmul.f32 1.442695, %v6658_v20 }
 0xebe   : > { %v6629_v19 = vpop.xlane.xlu1 %6628  ;;  %6923 = vmax.xlane.f32.xlu1 %v14214_v60 }
 0xebf   : > { %v6659_v0 = vsub.f32 %v14146_v57, %v6629_v19 }
 0xec1   : > { %v14217_v31 = vpop.trf.xlu0  ;;  %v6676_v58 = vmul.f32 1.442695, %v6659_v0 }
 0xec2   : > { %v6631_v42 = vpop.xlane.xlu1 %6630  ;;  %6925 = vmax.xlane.f32.xlu1 %v14217_v31 }
 0xec3   : > { %v6660_v63 = vsub.f32 %v14138_v51, %v6631_v42 }
 0xec5   : > { %v14220_v22 = vpop.trf.xlu0  ;;  %v6678_v18 = vmul.f32 1.442695, %v6660_v63 }
 0xec6   : > { %v6633_v5 = vpop.xlane.xlu1 %6632  ;;  %6927 = vmax.xlane.f32.xlu1 %v14220_v22 }
 0xec7   : > { %v6661_v54 = vsub.f32 %v14144_v44, %v6633_v5 }
 0xec9   : > { %v14223_v21 = vpop.trf.xlu0  ;;  %v6680_v51 = vmul.f32 1.442695, %v6661_v54 }
 0xeca   : > { %v6635_v41 = vpop.xlane.xlu1 %6634  ;;  %6929 = vmax.xlane.f32.xlu1 %v14223_v21 }
 0xecd   : > { %v14226_v14 = vpop.trf.xlu0 }
 0xece   : > { %v6637_v50 = vpop.xlane.xlu1 %6636  ;;  %6931 = vmax.xlane.f32.xlu1 %v14226_v14 }
 0xecf   : > { %v6663_v42 = vsub.f32 %v14162_v48, %v6637_v50 }
 0xed1   : > { %v14229_v40 = vpop.trf.xlu0 }
 0xed2   : > { %v6639_v16 = vpop.xlane.xlu1 %6638  ;;  %6933 = vmax.xlane.f32.xlu1 %v14229_v40 }
 0xed5   : > { %v14232_v15 = vpop.trf.xlu0 }
 0xed6   : > { %v6641_v3 = vpop.xlane.xlu1 %6640  ;;  %6935 = vmax.xlane.f32.xlu0 %v14232_v15 }
 0xed7   : > { %v6665_v7 = vsub.f32 %v14158_v26, %v6641_v3  ;;  %v6662_v26 = vsub.f32 %v14154_v2, %v6635_v41  ;;  %v6684_v3 = vmul.f32 1.442695, %v6663_v42 }
 0xed9   : > { %v6688_v55 = vmul.f32 1.442695, %v6665_v7  ;;  %v14237_v12 = vpop.trf.xlu0  ;;  %v6682_v44 = vmul.f32 1.442695, %v6662_v26  ;;  %v6664_v7 = vsub.f32 %v14150_v36, %v6639_v16 }
 0xeda   : > { %v6643_v29 = vpop.xlane.xlu1 %6642  ;;  %6937 = vmax.xlane.f32.xlu1 %v14237_v12 }
 0xedb   : > { %9495 = vpow2.f32 %v6688_v55  ;;  %v6686_v48 = vmul.f32 1.442695, %v6664_v7  ;;  %v6666_v50 = vsub.f32 %v14170_v43, %v6643_v29 }
 0xedc   : > { %9497 = vpow2.f32 %v6674_v37 }
 0xedd   : > { %v14241_v39 = vpop.trf.xlu0 }
 0xede   : > { %v6645_v13 = vpop.xlane.xlu1 %6644  ;;  %6939 = vmax.xlane.f32.xlu1 %v14241_v39 }
 0xedf   : > { %v6667_v28 = vsub.f32 %v14178_v6, %v6645_v13  ;;  %v6690_v13 = vmul.f32 1.442695, %v6666_v50 }
 0xee1   : > { %v6692_v9 = vmul.f32 1.442695, %v6667_v28  ;;  %v14246_v45 = vpop.trf.xlu0 }
 0xee2   : > { %v6647_v17 = vpop.xlane.xlu1 %6646  ;;  %6941 = vmax.xlane.f32.xlu1 %v14246_v45 }
 0xee3   : > { %9499 = vpow2.f32 %v6692_v9  ;;  %v6668_v28 = vsub.f32 %v14166_v56, %v6647_v17 }
 0xee4   : > { %9501 = vpow2.f32 %v6676_v58 }
 0xee5   : > { %v14250_v52 = vpop.trf.xlu0  ;;  %9503 = vpow2.f32 %v6678_v18  ;;  %v6694_v43 = vmul.f32 1.442695, %v6668_v28 }
 0xee6   : > { %v6649_v4 = vpop.xlane.xlu1 %6648  ;;  %6943 = vmax.xlane.f32.xlu1 %v14250_v52 }
 0xee7   : > { %v6669_v34 = vsub.f32 %v14174_v38, %v6649_v4 }
 0xee8   : > { %v14254_v57 = vpop.eup %9495 }
 0xee9   : > { %v6696_v6 = vmul.f32 1.442695, %v6669_v34  ;;  %6720 = vadd.xlane.f32.xlu0 %v14254_v57  ;;  %v14258_v49 = vpop.trf.xlu0  ;;  %v14262_v38 = vpop.eup %9497 }
 0xeea   : > { %v6651_v19 = vpop.xlane.xlu1 %6650  ;;  %6945 = vmax.xlane.f32.xlu1 %v14258_v49 }
 0xeeb   : > { %9505 = vpow2.f32 %v6696_v6  ;;  %v6670_v29 = vsub.f32 %v14186_v1, %v6651_v19 }
 0xeec   : > { %9507 = vpow2.f32 %v6680_v51 }
 0xeed   : > { %9509 = vpow2.f32 %v6682_v44  ;;  %v6698_v56 = vmul.f32 1.442695, %v6670_v29 }
 0xeee   : > { %v6653_v5 = vpop.xlane.xlu1 %6652  ;;  %6706 = vadd.xlane.f32.xlu1 %v14262_v38 }
 0xeef   : > { %v6671_v2 = vsub.f32 %v14194_v33, %v6653_v5 }
 0xef0   : > { %v14266_v41 = vpop.eup %9499 }
 0xef1   : > { %v14269_v20 = vpop.eup %9501  ;;  %v6700_v55 = vmul.f32 1.442695, %v6671_v2  ;;  %6724 = vadd.xlane.f32.xlu0 %v14266_v41 }
 0xef2   : > { %v6655_v37 = vpop.xlane.xlu1 %6654  ;;  %6708 = vadd.xlane.f32.xlu1 %v14269_v20  ;;  %v14274_v33 = vpop.eup %9503 }
 0xef3   : > { %9511 = vpow2.f32 %v6700_v55  ;;  %v6672_v17 = vsub.f32 %v14182_v27, %v6655_v37 }
 0xef4   : > { %9513 = vpow2.f32 %v6684_v3 }
 0xef5   : > { %9515 = vpow2.f32 %v6686_v48  ;;  %v6702_v54 = vmul.f32 1.442695, %v6672_v17 }
 0xef6   : > { %v6657_v0 = vpop.xlane.xlu1 %6656  ;;  %6710 = vadd.xlane.f32.xlu1 %v14274_v33 }
 0xef7   : > { %v6673_v36 = vsub.f32 %v14190_v30, %v6657_v0 }
 0xef8   : > { %v14278_v16 = vpop.eup %9505 }
 0xef9   : > { %v14281_v58 = vpop.eup %9507  ;;  %v6704_v63 = vmul.f32 1.442695, %v6673_v36  ;;  %6728 = vadd.xlane.f32.xlu0 %v14278_v16 }
 0xefa   : > { %6712 = vadd.xlane.f32.xlu1 %v14281_v58  ;;  %v14286_v9 = vpop.eup %9509 }
 0xefb   : > { %9517 = vpow2.f32 %v6704_v63 }
 0xefc   : > { %9519 = vpow2.f32 %v6690_v13 }
 0xefd   : > { %9521 = vpow2.f32 %v6694_v43 }
 0xefe   : > { %6714 = vadd.xlane.f32.xlu1 %v14286_v9  ;;  %9523 = vpow2.f32 %v6698_v56 }
 0xeff   : > { %9525 = vpow2.f32 %v6702_v54 }
 0xf00   : > { %v14289_v30 = vpop.eup %9511 }
 0xf01   : > { %v14292_v18 = vpop.eup %9513  ;;  %6732 = vadd.xlane.f32.xlu0 %v14289_v30 }
 0xf02   : > { %6716 = vadd.xlane.f32.xlu1 %v14292_v18  ;;  %v14296_v4 = vpop.eup %9515 }
 0xf06   : > { %6718 = vadd.xlane.f32.xlu1 %v14296_v4 }
 0xf08   : > { %v14299_v1 = vpop.eup %9517 }
 0xf09   : > { %v14301_v34 = vpop.eup %9519  ;;  %6736 = vadd.xlane.f32.xlu0 %v14299_v1 }
 0xf0a   : > { %6722 = vadd.xlane.f32.xlu1 %v14301_v34  ;;  %v14305_v27 = vpop.eup %9521 }
 0xf0b   : > { %v14308_v51 = vpop.eup %9523 }
 0xf0c   : > { %v14311_v26 = vpop.eup %9525 }
 0xf0e   : > { %6726 = vadd.xlane.f32.xlu1 %v14305_v27 }
 0xf12   : > { %6730 = vadd.xlane.f32.xlu1 %v14308_v51 }
 0xf16   : > { %6734 = vadd.xlane.f32.xlu1 %v14311_v26 }
 0xf37   : > { %v6916_v6 = vpop.xlane.xlu1 %6915 }
 0xf38   : > { %v6947_v19 = vsub.f32 %v14202_v35, %v6916_v6 }
 0xf3a   : > { %v6963_v44 = vmul.f32 1.442695, %v6947_v19 }
 0xf3b   : > { %v6918_v42 = vpop.xlane.xlu1 %6917 }
 0xf3c   : > { %9527 = vpow2.f32 %v6963_v44  ;;  %v6948_v5 = vsub.f32 %v14205_v32, %v6918_v42 }
 0xf3e   : > { %v6965_v2 = vmul.f32 1.442695, %v6948_v5 }
 0xf3f   : > { %v6920_v3 = vpop.xlane.xlu1 %6919 }
 0xf40   : > { %9529 = vpow2.f32 %v6965_v2  ;;  %v6949_v7 = vsub.f32 %v14208_v8, %v6920_v3 }
 0xf42   : > { %v6967_v55 = vmul.f32 1.442695, %v6949_v7 }
 0xf43   : > { %v6922_v37 = vpop.xlane.xlu1 %6921 }
 0xf44   : > { %9531 = vpow2.f32 %v6967_v55  ;;  %v6950_v48 = vsub.f32 %v14211_v47, %v6922_v37 }
 0xf46   : > { %v6969_v50 = vmul.f32 1.442695, %v6950_v48 }
 0xf47   : > { %v6924_v0 = vpop.xlane.xlu1 %6923 }
 0xf48   : > { %9533 = vpow2.f32 %v6969_v50  ;;  %v6951_v35 = vsub.f32 %v14214_v60, %v6924_v0 }
 0xf49   : > { %v14319_v36 = vpop.eup %9527 }
 0xf4a   : > { %v6971_v13 = vmul.f32 1.442695, %v6951_v35  ;;  %6995 = vadd.xlane.f32.xlu1 %v14319_v36 }
 0xf4b   : > { %v6926_v32 = vpop.xlane.xlu1 %6925 }
 0xf4c   : > { %9535 = vpow2.f32 %v6971_v13  ;;  %v6952_v28 = vsub.f32 %v14217_v31, %v6926_v32 }
 0xf4d   : > { %v14323_v8 = vpop.eup %9529 }
 0xf4e   : > { %v6973_v63 = vmul.f32 1.442695, %v6952_v28  ;;  %6997 = vadd.xlane.f32.xlu0 %v14323_v8 }
 0xf4f   : > { %v6928_v47 = vpop.xlane.xlu1 %6927 }
 0xf50   : > { %9537 = vpow2.f32 %v6973_v63  ;;  %v6953_v43 = vsub.f32 %v14220_v22, %v6928_v47 }
 0xf51   : > { %v14327_v29 = vpop.eup %9531 }
 0xf52   : > { %v6975_v60 = vmul.f32 1.442695, %v6953_v43  ;;  %6999 = vadd.xlane.f32.xlu1 %v14327_v29 }
 0xf53   : > { %v6930_v56 = vpop.xlane.xlu1 %6929 }
 0xf54   : > { %9539 = vpow2.f32 %v6975_v60  ;;  %v6954_v17 = vsub.f32 %v14223_v21, %v6930_v56 }
 0xf55   : > { %v14331_v54 = vpop.eup %9533 }
 0xf56   : > { %v6977_v31 = vmul.f32 1.442695, %v6954_v17  ;;  %7001 = vadd.xlane.f32.xlu0 %v14331_v54 }
 0xf57   : > { %v6932_v6 = vpop.xlane.xlu1 %6931 }
 0xf58   : > { %9541 = vpow2.f32 %v6977_v31  ;;  %v6955_v19 = vsub.f32 %v14226_v14, %v6932_v6 }
 0xf59   : > { %v14335_v44 = vpop.eup %9535 }
 0xf5a   : > { %v6979_v22 = vmul.f32 1.442695, %v6955_v19  ;;  %7003 = vadd.xlane.f32.xlu1 %v14335_v44 }
 0xf5b   : > { %v6934_v42 = vpop.xlane.xlu1 %6933 }
 0xf5c   : > { %9543 = vpow2.f32 %v6979_v22  ;;  %v6956_v5 = vsub.f32 %v14229_v40, %v6934_v42 }
 0xf5d   : > { %v14339_v2 = vpop.eup %9537 }
 0xf5e   : > { %v6981_v21 = vmul.f32 1.442695, %v6956_v5  ;;  %7005 = vadd.xlane.f32.xlu0 %v14339_v2 }
 0xf5f   : > { %v6936_v3 = vpop.xlane.xlu0 %6935 }
 0xf60   : > { %9545 = vpow2.f32 %v6981_v21  ;;  %v6957_v7 = vsub.f32 %v14232_v15, %v6936_v3 }
 0xf61   : > { %v14343_v55 = vpop.eup %9539 }
 0xf62   : > { %v6983_v14 = vmul.f32 1.442695, %v6957_v7  ;;  %7007 = vadd.xlane.f32.xlu1 %v14343_v55 }
 0xf63   : > { %v6938_v37 = vpop.xlane.xlu1 %6937 }
 0xf64   : > { %9547 = vpow2.f32 %v6983_v14  ;;  %v6958_v48 = vsub.f32 %v14237_v12, %v6938_v37 }
 0xf65   : > { %v14347_v50 = vpop.eup %9541 }
 0xf66   : > { %v6985_v40 = vmul.f32 1.442695, %v6958_v48  ;;  %7009 = vadd.xlane.f32.xlu0 %v14347_v50 }
 0xf67   : > { %v6940_v0 = vpop.xlane.xlu1 %6939 }
 0xf68   : > { %9549 = vpow2.f32 %v6985_v40  ;;  %v6959_v35 = vsub.f32 %v14241_v39, %v6940_v0 }
 0xf69   : > { %v14351_v13 = vpop.eup %9543 }
 0xf6a   : > { %v6987_v15 = vmul.f32 1.442695, %v6959_v35  ;;  %7011 = vadd.xlane.f32.xlu1 %v14351_v13 }
 0xf6b   : > { %v6942_v32 = vpop.xlane.xlu1 %6941 }
 0xf6c   : > { %9551 = vpow2.f32 %v6987_v15  ;;  %v6960_v28 = vsub.f32 %v14246_v45, %v6942_v32 }
 0xf6d   : > { %v14355_v63 = vpop.eup %9545 }
 0xf6e   : > { %v6989_v12 = vmul.f32 1.442695, %v6960_v28  ;;  %7013 = vadd.xlane.f32.xlu0 %v14355_v63 }
 0xf6f   : > { %v6944_v47 = vpop.xlane.xlu1 %6943 }
 0xf70   : > { %9553 = vpow2.f32 %v6989_v12  ;;  %v6961_v43 = vsub.f32 %v14250_v52, %v6944_v47  ;;  %v6394_v47 = vadd.f32 %v14068_v59, %v14128_v23 }
 0xf71   : > { %v14359_v60 = vpop.eup %9547 }
 0xf72   : > { %v6991_v39 = vmul.f32 1.442695, %v6961_v43  ;;  %7015 = vadd.xlane.f32.xlu1 %v14359_v60  ;;  %v6721_v40 = vpop.xlane.xlu0 %6720  ;;  %v6397_v43 = vadd.f32 %v14068_v59, %v14136_v25 }
 0xf73   : > { %v6946_v56 = vpop.xlane.xlu1 %6945 }
 0xf74   : > { %9555 = vpow2.f32 %v6991_v39  ;;  %v6962_v17 = vsub.f32 %v14258_v49, %v6946_v56 }
 0xf75   : > { %v14363_v31 = vpop.eup %9549 }
 0xf76   : > { %v6993_v45 = vmul.f32 1.442695, %v6962_v17  ;;  %7017 = vadd.xlane.f32.xlu0 %v14363_v31 }
 0xf77   : > { %v6707_v6 = vpop.xlane.xlu1 %6706 }
 0xf78   : > { %9557 = vpow2.f32 %v6993_v45  ;;  %v7073_v45 = vpack.c.bf16 %v6397_v43, %v6394_v47 }
 0xf79   : > { %v14366_v19 = vpop.eup %9551  ;;  %9559 = vrcp.f32 %v6707_v6 }
 0xf7a   : > { %7019 = vadd.xlane.f32.xlu1 %v14366_v19  ;;  %v6725_v32 = vpop.xlane.xlu0 %6724 }
 0xf7b   : > { %v6709_v52 = vpop.xlane.xlu1 %6708 }
 0xf7c   : > { %9561 = vrcp.f32 %v6709_v52 }
 0xf7d   : > { %v14369_v22 = vpop.eup %9553 }
 0xf7e   : > { %7021 = vadd.xlane.f32.xlu0 %v14369_v22 }
 0xf7f   : > { %v6711_v42 = vpop.xlane.xlu1 %6710 }
 0xf80   : > { %9563 = vrcp.f32 %v6711_v42 }
 0xf81   : > { %v14372_v49 = vpop.eup %9555 }
 0xf82   : > { %7023 = vadd.xlane.f32.xlu1 %v14372_v49  ;;  %v6729_v39 = vpop.xlane.xlu0 %6728 }
 0xf83   : > { %v6713_v5 = vpop.xlane.xlu1 %6712 }
 0xf84   : > { %9565 = vrcp.f32 %v6713_v5 }
 0xf85   : > { %v14375_v21 = vpop.eup %9557 }
 0xf86   : > { %7025 = vadd.xlane.f32.xlu0 %v14375_v21  ;;  %v9560_v3 = vpop.eup %9559 }
 0xf87   : > { %v6715_v7 = vpop.xlane.xlu1 %6714  ;;  %v6754_v37 = vmul.f32 %v9560_v3, %v14262_v38 }
 0xf88   : > { %9567 = vrcp.f32 %v6715_v7 }
 0xf89   : > { %v9562_v14 = vpop.eup %9561 }
 0xf8a   : > { %v6755_v48 = vmul.f32 %v9562_v14, %v14269_v20  ;;  %v6733_v52 = vpop.xlane.xlu0 %6732 }
 0xf8b   : > { %v6717_v0 = vpop.xlane.xlu1 %6716 }
 0xf8c   : > { %9569 = vrcp.f32 %v6717_v0  ;;  %v6770_v35 = vpack.c.bf16 %v6755_v48, %v6754_v37 }
 0xf8d   : > { %9571 = vrcp.f32 %v6721_v40  ;;  %v9564_v15 = vpop.eup %9563 }
 0xf8e   : > { %8988 = vmatprep.mubr.bf16.mxu1 %v6770_v35  ;;  %v6756_v38 = vmul.f32 %v9564_v15, %v14274_v33 }
 0xf8f   : > { %v6719_v28 = vpop.xlane.xlu1 %6718 }
 0xf90   : > { %9573 = vrcp.f32 %v6719_v28 }
 0xf91   : > { %v9566_v12 = vpop.eup %9565  ;;  %9575 = vrcp.f32 %v6725_v32 }
 0xf92   : > { %v6757_v20 = vmul.f32 %v9566_v12, %v14281_v58  ;;  %v6737_v42 = vpop.xlane.xlu0 %6736 }
 0xf93   : > { %v6723_v56 = vpop.xlane.xlu1 %6722 }
 0xf94   : > { %v6771_v17 = vpack.c.bf16 %v6757_v20, %v6756_v38  ;;  %9577 = vrcp.f32 %v6723_v56 }
 0xf95   : > { %9579 = vrcp.f32 %v6729_v39  ;;  %v9568_v6 = vpop.eup %9567 }
 0xf96   : > { %8989 = vmatmul.mubr.bf16.vlgmr.msra.gmra.mxu1 %v6771_v17  ;;  %v6758_v25 = vmul.f32 %v9568_v6, %v14286_v9 }
 0xf97   : > { %9005 = vmatpush3.bf16.msra.mxu1 %v14133_v62  ;;  %v6727_v23 = vpop.xlane.xlu1 %6726 }
 0xf98   : > { %9006 = vmatprep.subr.bf16.mxu1 %v7073_v45  ;;  %9581 = vrcp.f32 %v6727_v23 }
 0xf99   : > { %v9570_v59 = vpop.eup %9569  ;;  %9583 = vrcp.f32 %v6733_v52 }
 0xf9a   : > { %v6759_v33 = vmul.f32 %v9570_v59, %v14292_v18  ;;  %v9572_v58 = vpop.eup %9571 }
 0xf9b   : > { %9007 = vmatpush3.bf16.msra.mxu1 %v7073_v45  ;;  %v6731_v5 = vpop.xlane.xlu1 %6730  ;;  %v6761_v14 = vmul.f32 %v9572_v58, %v14254_v57 }
 0xf9c   : > { %9008 = vmatprep.subr.bf16.mxu1 %v14081_v24  ;;  %9585 = vrcp.f32 %v6731_v5  ;;  %v6772_v3 = vpack.c.bf16 %v6759_v33, %v6758_v25 }
 0xf9d   : > { %v9574_v7 = vpop.eup %9573  ;;  %9587 = vrcp.f32 %v6737_v42 }
 0xf9e   : > { %8992 = vmatprep.mubr.bf16.mxu1 %v6772_v3  ;;  %v6760_v62 = vmul.f32 %v9574_v7, %v14296_v4  ;;  %v9576_v37 = vpop.eup %9575 }
 0xf9f   : > { %9009 = vmatpush3.bf16.msra.mxu1 %v14081_v24  ;;  %v6735_v9 = vpop.xlane.xlu1 %6734  ;;  %v6763_v0 = vmul.f32 %v9576_v37, %v14266_v41 }
 0xfa0   : > { %9010 = vmatprep.subr.bf16.mxu1 %v14084_v53  ;;  %9589 = vrcp.f32 %v6735_v9  ;;  %v6773_v18 = vpack.c.bf16 %v6761_v14, %v6760_v62 }
 0xfa1   : > { %v9578_v48 = vpop.eup %9577 }
 0xfa2   : > { %8993 = vmatmul.mubr.bf16.gmra.mxu1 %v6773_v18  ;;  %v6762_v40 = vmul.f32 %v9578_v48, %v14301_v34  ;;  %v9580_v35 = vpop.eup %9579 }
 0xfa3   : > { %9011 = vmatpush3.bf16.msra.mxu1 %v14084_v53  ;;  %v6765_v15 = vmul.f32 %v9580_v35, %v14278_v16 }
 0xfa4   : > { %9012 = vmatprep.subr.bf16.mxu1 %v14073_v10  ;;  %v6774_v57 = vpack.c.bf16 %v6763_v0, %v6762_v40 }
 0xfa5   : > { %v9582_v4 = vpop.eup %9581 }
 0xfa6   : > { %8996 = vmatprep.mubr.bf16.mxu1 %v6774_v57  ;;  %v6764_v24 = vmul.f32 %v9582_v4, %v14305_v27  ;;  %v9584_v32 = vpop.eup %9583 }
 0xfa7   : > { %9013 = vmatpush3.bf16.msra.mxu1 %v14073_v10  ;;  %v6767_v53 = vmul.f32 %v9584_v32, %v14289_v30 }
 0xfa8   : > { %9014 = vmatprep.subr.bf16.mxu1 %v14076_v61  ;;  %v6775_v34 = vpack.c.bf16 %v6765_v15, %v6764_v24 }
 0xfa9   : > { %v9586_v28 = vpop.eup %9585 }
 0xfaa   : > { %8997 = vmatmul.mubr.bf16.gmra.mxu1 %v6775_v34  ;;  %v6766_v41 = vmul.f32 %v9586_v28, %v14308_v51  ;;  %v9588_v12 = vpop.eup %9587 }
 0xfab   : > { %9015 = vmatpush3.bf16.msra.mxu1 %v14076_v61  ;;  %v6769_v10 = vmul.f32 %v9588_v12, %v14299_v1 }
 0xfac   : > { %9016 = vmatprep.subr.bf16.mxu1 %v14044_v11  ;;  %v6776_v27 = vpack.c.bf16 %v6767_v53, %v6766_v41 }
 0xfad   : > { %v9590_v47 = vpop.eup %9589 }
 0xfae   : > { %9000 = vmatprep.mubr.bf16.mxu1 %v6776_v27  ;;  %v6768_v16 = vmul.f32 %v9590_v47, %v14311_v26 }
 0xfaf   : > { %9017 = vmatpush3.bf16.msra.mxu1 %v14044_v11 }
 0xfb0   : > { %9018 = vmatprep.subr.bf16.mxu1 %v14049_v46  ;;  %v6777_v43 = vpack.c.bf16 %v6769_v10, %v6768_v16  ;;  %v9891_v10 = vld [vmem:[%s10385_s1 + $0x190] sm:$0xff] }
 0xfb2   : > { %9001 = vmatmul.mubr.bf16.gmra.mxu1 %v6777_v43 }
 0xfb3   : > { %9019 = vmatpush3.bf16.msra.mxu1 %v14049_v46 }
 0xfd3   : > { %v6996_v30 = vpop.xlane.xlu1 %6995 }
 0xfd4   : > { %9591 = vrcp.f32 %v6996_v30  ;;  %v9892_v30 = vld [vmem:[%s10385_s1 + $0x180] sm:$0xff] }
 0xfd7   : > { %v6998_v61 = vpop.xlane.xlu0 %6997 }
 0xfd8   : > { %9593 = vrcp.f32 %v6998_v61 }
 0xfdb   : > { %v7000_v51 = vpop.xlane.xlu1 %6999 }
 0xfdc   : > { %9595 = vrcp.f32 %v7000_v51 }
 0xfdf   : > { %v7002_v38 = vpop.xlane.xlu0 %7001 }
 0xfe0   : > { %9597 = vrcp.f32 %v7002_v38 }
 0xfe1   : > { %v9592_v20 = vpop.eup %9591 }
 0xfe2   : > { %v7043_v11 = vmul.f32 %v9592_v20, %v14319_v36  ;;  %v9893_v20 = vld [vmem:[%s10385_s1 + $0x198] sm:$0xff] }
 0xfe3   : > { %v7004_v26 = vpop.xlane.xlu1 %7003 }
 0xfe4   : > { %9599 = vrcp.f32 %v7004_v26 }
 0xfe5   : > { %v9594_v39 = vpop.eup %9593 }
 0xfe6   : > { %v7044_v1 = vmul.f32 %v9594_v39, %v14323_v8 }
 0xfe7   : > { %v7006_v56 = vpop.xlane.xlu0 %7005 }
 0xfe8   : > { %9601 = vrcp.f32 %v7006_v56  ;;  %v7059_v17 = vpack.c.bf16 %v7044_v1, %v7043_v11  ;;  %v9894_v11 = vld [vmem:[%s10385_s1 + $0x188] sm:$0xff] }
 0xfe9   : > { %v9596_v46 = vpop.eup %9595 }
 0xfea   : > { %9020 = vmatprep.mubr.bf16.mxu1 %v7059_v17  ;;  %v7045_v52 = vmul.f32 %v9596_v46, %v14327_v29 }
 0xfeb   : > { %v7008_v45 = vpop.xlane.xlu1 %7007 }
 0xfec   : > { %9603 = vrcp.f32 %v7008_v45  ;;  %v9895_v45 = vld [vmem:[%s10385_s1 + $0x1b0] sm:$0xff] }
 0xfed   : > { %v9598_v6 = vpop.eup %9597 }
 0xfee   : > { %v7046_v23 = vmul.f32 %v9598_v6, %v14331_v54 }
 0xfef   : > { %v7010_v59 = vpop.xlane.xlu0 %7009 }
 0xff0   : > { %v7060_v25 = vpack.c.bf16 %v7046_v23, %v7045_v52  ;;  %9605 = vrcp.f32 %v7010_v59  ;;  %v9896_v59 = vld [vmem:[%s10385_s1 + $0x1a0] sm:$0xff] }
 0xff1   : > { %v9600_v33 = vpop.eup %9599 }
 0xff2   : > { %9021 = vmatmul.mubr.bf16.vlgmr.msra.gmra.mxu1 %v7060_v25  ;;  %v7047_v8 = vmul.f32 %v9600_v33, %v14335_v44 }
 0xff3   : > { %v7012_v36 = vpop.xlane.xlu1 %7011 }
 0xff4   : > { %9607 = vrcp.f32 %v7012_v36 }
 0xff5   : > { %v9602_v58 = vpop.eup %9601 }
 0xff6   : > { %v7048_v42 = vmul.f32 %v9602_v58, %v14339_v2  ;;  %v9897_v58 = vld [vmem:[%s10385_s1 + $0x1b8] sm:$0xff] }
 0xff7   : > { %v7014_v5 = vpop.xlane.xlu0 %7013 }
 0xff8   : > { %9609 = vrcp.f32 %v7014_v5  ;;  %v7061_v3 = vpack.c.bf16 %v7048_v42, %v7047_v8 }
 0xff9   : > { %v9604_v29 = vpop.eup %9603 }
 0xffa   : > { %9024 = vmatprep.mubr.bf16.mxu1 %v7061_v3  ;;  %v7049_v62 = vmul.f32 %v9604_v29, %v14343_v55  ;;  %v9898_v3 = vld [vmem:[%s10385_s1 + $0x1a8] sm:$0xff] }
 0xffb   : > { %v7016_v7 = vpop.xlane.xlu1 %7015 }
 0xffc   : > { %9611 = vrcp.f32 %v7016_v7 }
 0xffd   : > { %v9606_v54 = vpop.eup %9605 }
 0xffe   : > { %v7050_v14 = vmul.f32 %v9606_v54, %v14347_v50 }
 0xfff   : > { %v7018_v37 = vpop.xlane.xlu0 %7017 }
0x1000   : > { %9613 = vrcp.f32 %v7018_v37  ;;  %v7062_v9 = vpack.c.bf16 %v7050_v14, %v7049_v62  ;;  %v9899_v62 = vld [vmem:[%s10385_s1 + $0x1d0] sm:$0xff] }
0x1001   : > { %v9608_v18 = vpop.eup %9607 }
0x1002   : > { %9025 = vmatmul.mubr.bf16.gmra.mxu1 %v7062_v9  ;;  %v7051_v2 = vmul.f32 %v9608_v18, %v14351_v13  ;;  %v9900_v18 = vld [vmem:[%s10385_s1 + $0x1c0] sm:$0xff] }
0x1003   : > { %v7020_v44 = vpop.xlane.xlu1 %7019 }
0x1004   : > { %9615 = vrcp.f32 %v7020_v44 }
0x1005   : > { %v9610_v48 = vpop.eup %9609 }
0x1006   : > { %v7052_v40 = vmul.f32 %v9610_v48, %v14355_v63 }
0x1007   : > { %v7022_v0 = vpop.xlane.xlu0 %7021 }
0x1008   : > { %9617 = vrcp.f32 %v7022_v0  ;;  %v7063_v35 = vpack.c.bf16 %v7052_v40, %v7051_v2  ;;  %v9901_v40 = vld [vmem:[%s10385_s1 + $0x1d8] sm:$0xff] }
0x1009   : > { %v9612_v57 = vpop.eup %9611 }
0x100a   : > { %9028 = vmatprep.mubr.bf16.mxu1 %v7063_v35  ;;  %v7053_v50 = vmul.f32 %v9612_v57, %v14359_v60 }
0x100b   : > { %v7024_v55 = vpop.xlane.xlu1 %7023 }
0x100c   : > { %9619 = vrcp.f32 %v7024_v55  ;;  %v9902_v55 = vld [vmem:[%s10385_s1 + $0x1c8] sm:$0xff] }
0x100d   : > { %v9614_v4 = vpop.eup %9613 }
0x100e   : > { %v7054_v24 = vmul.f32 %v9614_v4, %v14363_v31 }
0x100f   : > { %v7026_v15 = vpop.xlane.xlu0 %7025 }
0x1010   : > { %9621 = vrcp.f32 %v7026_v15  ;;  %v7064_v32 = vpack.c.bf16 %v7054_v24, %v7053_v50  ;;  %v9903_v15 = vld [vmem:[%s10385_s1 + $0x1f0] sm:$0xff] }
0x1011   : > { %v9616_v34 = vpop.eup %9615 }
0x1012   : > { %9029 = vmatmul.mubr.bf16.gmra.mxu1 %v7064_v32  ;;  %v7055_v63 = vmul.f32 %v9616_v34, %v14366_v19  ;;  %v14430_v19 = vld [vmem:[%s14556_s14] ss:$0 sm:$0xff] }
0x1015   : > { %v9618_v13 = vpop.eup %9617 }
0x1016   : > { %v7056_v28 = vmul.f32 %v9618_v13, %v14369_v22 }
0x1018   : > { %v7065_v41 = vpack.c.bf16 %v7056_v28, %v7055_v63  ;;  %v9904_v63 = vld [vmem:[%s10385_s1 + $0x1e0] sm:$0xff] }
0x1019   : > { %v9620_v53 = vpop.eup %9619 }
0x101a   : > { %9032 = vmatprep.mubr.bf16.mxu1 %v7065_v41  ;;  %v7057_v60 = vmul.f32 %v9620_v53, %v14372_v49 }
0x101d   : > { %v9622_v12 = vpop.eup %9621 }
0x101e   : > { %v7058_v31 = vmul.f32 %v9622_v12, %v14375_v21  ;;  %v9905_v12 = vld [vmem:[%s10385_s1 + $0x1f8] sm:$0xff] }
0x1020   : > { %v7066_v27 = vpack.c.bf16 %v7058_v31, %v7057_v60 }
0x1022   : > { %9033 = vmatmul.mubr.bf16.gmra.mxu1 %v7066_v27  ;;  %v9906_v27 = vld [vmem:[%s10385_s1 + $0x1e8] sm:$0xff] }
0x1056   : > { %v8990_v47 = vpop.f32.mrf.mxu1 }
0x1057   : > { %v7174_v22 = vmul.f32 %v14430_v19, %v8990_v47 }
0x1058   : > { %v6820_v16 = vpop.f32.mrf.mxu1 }
0x1059   : > { %v7190_v49 = vadd.f32 %v9891_v10, %v7174_v22  ;;  %v7172_v21 = vmul.f32 %v14430_v19, %v6820_v16  ;;  %v14483_v16 = vld [vmem:[%s14557_s15] ss:$0 sm:$0xff] }
0x105a   : > { %v8991_v43 = vpop.f32.mrf.mxu1 }
0x105b   : > { %7656 = vst [vmem:[%s11836_s22 + $0x190] sm:$0xff] %v7190_v49  ;;  %v7188_v61 = vadd.f32 %v9892_v30, %v7172_v21  ;;  %v7175_v51 = vmul.f32 %v14430_v19, %v8991_v43  ;;  %v9908_v21 = vld [vmem:[%s10160_s28 + $0x190] sm:$0xff] }
0x105c   : > { %v6823_v38 = vpop.f32.mrf.mxu1 }
0x105d   : > { %7654 = vst [vmem:[%s11836_s22 + $0x180] sm:$0xff] %v7188_v61  ;;  %v7191_v26 = vadd.f32 %v9893_v20, %v7175_v51  ;;  %v7173_v39 = vmul.f32 %v14430_v19, %v6823_v38  ;;  %v9909_v61 = vld [vmem:[%s10160_s28 + $0x180] sm:$0xff] }
0x105f   : > { %7657 = vst [vmem:[%s11836_s22 + $0x198] sm:$0xff] %v7191_v26  ;;  %v7189_v1 = vadd.f32 %v9894_v11, %v7173_v39  ;;  %v9910_v26 = vld [vmem:[%s10160_s28 + $0x198] sm:$0xff] }
0x1061   : > { %7655 = vst [vmem:[%s11836_s22 + $0x188] sm:$0xff] %v7189_v1  ;;  %v9911_v1 = vld [vmem:[%s10160_s28 + $0x188] sm:$0xff] }
0x1062   : > { %v8994_v56 = vpop.f32.mrf.mxu1 }
0x1063   : > { %v7178_v17 = vmul.f32 %v14430_v19, %v8994_v56 }
0x1064   : > { %v6836_v46 = vpop.f32.mrf.mxu1 }
0x1065   : > { %v7194_v6 = vadd.f32 %v9895_v45, %v7178_v17  ;;  %v7176_v52 = vmul.f32 %v14430_v19, %v6836_v46 }
0x1066   : > { %v8995_v23 = vpop.f32.mrf.mxu1 }
0x1067   : > { %7660 = vst [vmem:[%s11836_s22 + $0x1b0] sm:$0xff] %v7194_v6  ;;  %v7192_v25 = vadd.f32 %v9896_v59, %v7176_v52  ;;  %v7179_v33 = vmul.f32 %v14430_v19, %v8995_v23  ;;  %v9912_v6 = vld [vmem:[%s10160_s28 + $0x1b0] sm:$0xff] }
0x1068   : > { %v6839_v36 = vpop.f32.mrf.mxu1 }
0x1069   : > { %7658 = vst [vmem:[%s11836_s22 + $0x1a0] sm:$0xff] %v7192_v25  ;;  %v7195_v8 = vadd.f32 %v9897_v58, %v7179_v33  ;;  %v7177_v42 = vmul.f32 %v14430_v19, %v6839_v36  ;;  %v9913_v25 = vld [vmem:[%s10160_s28 + $0x1a0] sm:$0xff] }
0x106a   : > { %v8998_v5 = vpop.f32.mrf.mxu1 }
0x106b   : > { %7661 = vst [vmem:[%s11836_s22 + $0x1b8] sm:$0xff] %v7195_v8  ;;  %v7193_v29 = vadd.f32 %v9898_v3, %v7177_v42  ;;  %v7182_v7 = vmul.f32 %v14430_v19, %v8998_v5  ;;  %v9914_v8 = vld [vmem:[%s10160_s28 + $0x1b8] sm:$0xff]  ;;  %v9915_v3 = vld [vmem:[%s10160_s28 + $0x1a8] sm:$0xff] }
0x106c   : > { %v6852_v54 = vpop.f32.mrf.mxu1 }
0x106d   : > { %7659 = vst [vmem:[%s11836_s22 + $0x1a8] sm:$0xff] %v7193_v29  ;;  %v7198_v14 = vadd.f32 %v9899_v62, %v7182_v7  ;;  %v7180_v37 = vmul.f32 %v14430_v19, %v6852_v54 }
0x106e   : > { %v8999_v9 = vpop.f32.mrf.mxu1 }
0x106f   : > { %7664 = vst [vmem:[%s11836_s22 + $0x1d0] sm:$0xff] %v7198_v14  ;;  %v7196_v44 = vadd.f32 %v9900_v18, %v7180_v37  ;;  %v7183_v48 = vmul.f32 %v14430_v19, %v8999_v9  ;;  %v9916_v14 = vld [vmem:[%s10160_s28 + $0x1d0] sm:$0xff] }
0x1070   : > { %v6855_v2 = vpop.f32.mrf.mxu1 }
0x1071   : > { %7662 = vst [vmem:[%s11836_s22 + $0x1c0] sm:$0xff] %v7196_v44  ;;  %v7199_v0 = vadd.f32 %v9901_v40, %v7183_v48  ;;  %v7181_v35 = vmul.f32 %v14430_v19, %v6855_v2  ;;  %v9917_v44 = vld [vmem:[%s10160_s28 + $0x1c0] sm:$0xff] }
0x1072   : > { %v9002_v57 = vpop.f32.mrf.mxu1 }
0x1073   : > { %7665 = vst [vmem:[%s11836_s22 + $0x1d8] sm:$0xff] %v7199_v0  ;;  %v7197_v4 = vadd.f32 %v9902_v55, %v7181_v35  ;;  %v7186_v50 = vmul.f32 %v14430_v19, %v9002_v57  ;;  %v9918_v0 = vld [vmem:[%s10160_s28 + $0x1d8] sm:$0xff]  ;;  %v9919_v55 = vld [vmem:[%s10160_s28 + $0x1c8] sm:$0xff] }
0x1074   : > { %v6868_v24 = vpop.f32.mrf.mxu1 }
0x1075   : > { %7663 = vst [vmem:[%s11836_s22 + $0x1c8] sm:$0xff] %v7197_v4  ;;  %v7202_v32 = vadd.f32 %v9903_v15, %v7186_v50  ;;  %v7184_v34 = vmul.f32 %v14430_v19, %v6868_v24 }
0x1076   : > { %v9003_v13 = vpop.f32.mrf.mxu1 }
0x1077   : > { %7668 = vst [vmem:[%s11836_s22 + $0x1f0] sm:$0xff] %v7202_v32  ;;  %v7200_v28 = vadd.f32 %v9904_v63, %v7184_v34  ;;  %v7187_v41 = vmul.f32 %v14430_v19, %v9003_v13  ;;  %v9920_v32 = vld [vmem:[%s10160_s28 + $0x1f0] sm:$0xff] }
0x1078   : > { %v6871_v53 = vpop.f32.mrf.mxu1 }
0x1079   : > { %7666 = vst [vmem:[%s11836_s22 + $0x1e0] sm:$0xff] %v7200_v28  ;;  %v7203_v60 = vadd.f32 %v9905_v12, %v7187_v41  ;;  %v7185_v31 = vmul.f32 %v14430_v19, %v6871_v53  ;;  %v9921_v28 = vld [vmem:[%s10160_s28 + $0x1e0] sm:$0xff] }
0x107b   : > { %7669 = vst [vmem:[%s11836_s22 + $0x1f8] sm:$0xff] %v7203_v60  ;;  %v7201_v47 = vadd.f32 %v9906_v27, %v7185_v31  ;;  %v9922_v60 = vld [vmem:[%s10160_s28 + $0x1f8] sm:$0xff] }
0x107d   : > { %7667 = vst [vmem:[%s11836_s22 + $0x1e8] sm:$0xff] %v7201_v47  ;;  %v9923_v47 = vld [vmem:[%s10160_s28 + $0x1e8] sm:$0xff] }
0x10b2   : > { %v9022_v22 = vpop.f32.mrf.mxu1 }
0x10b3   : > { %v7223_v10 = vmul.f32 %v14483_v16, %v9022_v22 }
0x10b4   : > { %v7109_v49 = vpop.f32.mrf.mxu1 }
0x10b5   : > { %v7239_v19 = vadd.f32 %v9908_v21, %v7223_v10  ;;  %v7221_v43 = vmul.f32 %v14483_v16, %v7109_v49 }
0x10b6   : > { %v9023_v30 = vpop.f32.mrf.mxu1 }
0x10b7   : > { %7672 = vst [vmem:[%s11911_s18 + $0x190] sm:$0xff] %v7239_v19  ;;  %v7237_v51 = vadd.f32 %v9909_v61, %v7221_v43  ;;  %v7224_v38 = vmul.f32 %v14483_v16, %v9023_v30 }
0x10b8   : > { %v7112_v20 = vpop.f32.mrf.mxu1 }
0x10b9   : > { %7670 = vst [vmem:[%s11911_s18 + $0x180] sm:$0xff] %v7237_v51  ;;  %v7240_v39 = vadd.f32 %v9910_v26, %v7224_v38  ;;  %v7222_v11 = vmul.f32 %v14483_v16, %v7112_v20 }
0x10bb   : > { %7673 = vst [vmem:[%s11911_s18 + $0x198] sm:$0xff] %v7240_v39  ;;  %v7238_v56 = vadd.f32 %v9911_v1, %v7222_v11 }
0x10bd   : > { %7671 = vst [vmem:[%s11911_s18 + $0x188] sm:$0xff] %v7238_v56 }
0x10c2   : > { %v9026_v17 = vpop.f32.mrf.mxu1 }
0x10c3   : > { %v7227_v46 = vmul.f32 %v14483_v16, %v9026_v17 }
0x10c4   : > { %v7125_v45 = vpop.f32.mrf.mxu1 }
0x10c5   : > { %v7243_v52 = vadd.f32 %v9912_v6, %v7227_v46  ;;  %v7225_v23 = vmul.f32 %v14483_v16, %v7125_v45 }
0x10c6   : > { %v9027_v59 = vpop.f32.mrf.mxu1 }
0x10c7   : > { %7676 = vst [vmem:[%s11911_s18 + $0x1b0] sm:$0xff] %v7243_v52  ;;  %v7241_v33 = vadd.f32 %v9913_v25, %v7225_v23  ;;  %v7228_v36 = vmul.f32 %v14483_v16, %v9027_v59 }
0x10c8   : > { %v7128_v58 = vpop.f32.mrf.mxu1 }
0x10c9   : > { %7674 = vst [vmem:[%s11911_s18 + $0x1a0] sm:$0xff] %v7241_v33  ;;  %v7244_v42 = vadd.f32 %v9914_v8, %v7228_v36  ;;  %v7226_v5 = vmul.f32 %v14483_v16, %v7128_v58 }
0x10cb   : > { %7677 = vst [vmem:[%s11911_s18 + $0x1b8] sm:$0xff] %v7244_v42  ;;  %v7242_v29 = vadd.f32 %v9915_v3, %v7226_v5 }
0x10cd   : > { %7675 = vst [vmem:[%s11911_s18 + $0x1a8] sm:$0xff] %v7242_v29 }
0x10d2   : > { %v9030_v7 = vpop.f32.mrf.mxu1 }
0x10d3   : > { %v7231_v54 = vmul.f32 %v14483_v16, %v9030_v7 }
0x10d4   : > { %v7141_v62 = vpop.f32.mrf.mxu1 }
0x10d5   : > { %v7247_v37 = vadd.f32 %v9916_v14, %v7231_v54  ;;  %v7229_v9 = vmul.f32 %v14483_v16, %v7141_v62 }
0x10d6   : > { %v9031_v18 = vpop.f32.mrf.mxu1 }
0x10d7   : > { %7680 = vst [vmem:[%s11911_s18 + $0x1d0] sm:$0xff] %v7247_v37  ;;  %v7245_v48 = vadd.f32 %v9917_v44, %v7229_v9  ;;  %v7232_v2 = vmul.f32 %v14483_v16, %v9031_v18 }
0x10d8   : > { %v7144_v40 = vpop.f32.mrf.mxu1 }
0x10d9   : > { %7678 = vst [vmem:[%s11911_s18 + $0x1c0] sm:$0xff] %v7245_v48  ;;  %v7248_v35 = vadd.f32 %v9918_v0, %v7232_v2  ;;  %v7230_v57 = vmul.f32 %v14483_v16, %v7144_v40 }
0x10db   : > { %7681 = vst [vmem:[%s11911_s18 + $0x1d8] sm:$0xff] %v7248_v35  ;;  %v7246_v4 = vadd.f32 %v9919_v55, %v7230_v57 }
0x10dd   : > { %7679 = vst [vmem:[%s11911_s18 + $0x1c8] sm:$0xff] %v7246_v4 }
0x10e2   : > { %v9034_v50 = vpop.f32.mrf.mxu1 }
0x10e3   : > { %v7235_v24 = vmul.f32 %v14483_v16, %v9034_v50 }
0x10e4   : > { %v7157_v15 = vpop.f32.mrf.mxu1 }
0x10e5   : > { %v7251_v34 = vadd.f32 %v9920_v32, %v7235_v24  ;;  %v7233_v13 = vmul.f32 %v14483_v16, %v7157_v15 }
0x10e6   : > { %v9035_v63 = vpop.f32.mrf.mxu1 }
0x10e7   : > { %7684 = vst [vmem:[%s11911_s18 + $0x1f0] sm:$0xff] %v7251_v34  ;;  %v7249_v41 = vadd.f32 %v9921_v28, %v7233_v13  ;;  %v7236_v53 = vmul.f32 %v14483_v16, %v9035_v63 }
0x10e8   : > { %v7160_v12 = vpop.f32.mrf.mxu1 }
0x10e9   : > { %7682 = vst [vmem:[%s11911_s18 + $0x1e0] sm:$0xff] %v7249_v41  ;;  %v7252_v31 = vadd.f32 %v9922_v60, %v7236_v53  ;;  %v7234_v27 = vmul.f32 %v14483_v16, %v7160_v12 }
0x10eb   : > { %7685 = vst [vmem:[%s11911_s18 + $0x1f8] sm:$0xff] %v7252_v31  ;;  %v7250_v22 = vadd.f32 %v9923_v47, %v7234_v27 }
0x10ed   : > { %7683 = vst [vmem:[%s11911_s18 + $0x1e8] sm:$0xff] %v7250_v22 }
0x10ee PF: > { %s28_s26 = sadd.s32 1, %s9946_s26   ;;  %s14960_s24 = smov %s9942_s25 }
0x10ef   : > { %p25_p5 = scmp.ge.s32.totalorder %s28_s26, 4   ;;  %s14961_s25 = smov %s14963_s27 }
0x10f1   :  { %27 = sbr.rel (!%p25_p5) target bundleno = 3 (0x3), region = 141 }

</bundles_post_ra>
